<compile_context>
chip_gen: v7x
topology: tpu7x:2x2x1
jax: 0.10.0
libtpu: 0.0.40
codegen_flags: <defaults>
</compile_context>

<pallas_src>
import functools
import math

import jax
import jax.numpy as jnp
from jax.experimental import pallas as pl
from jax.experimental.pallas import tpu as pltpu


# --------------------------------------------------------------------------- #
# Softplus(beta=100) exactly matching torch.nn.Softplus semantics
# (threshold=20: if beta*x > threshold, return x).
# --------------------------------------------------------------------------- #
def _softplus_beta(x, beta=100.0, threshold=20.0):
    bx = x * beta
    safe = jnp.minimum(bx, threshold)           # avoid overflow in unused branch
    return jnp.where(bx > threshold, x, jnp.log1p(jnp.exp(safe)) / beta)


# --------------------------------------------------------------------------- #
# Pallas kernel: whole SDF MLP forward for one batch tile, feature-major.
#   refs = (x_ref, <per-layer weight/bias refs...>, out_ref)
#   Normal layer contributes (W[out,in], b[out,1]); skip layer contributes
#   (W_h[out,hid], W_xin[out,d_in], b[out,1]).  All folding done host-side.
# --------------------------------------------------------------------------- #
def _sdf_mlp_kernel(layer_is_skip, x_ref, *refs):
    out_ref = refs[-1]
    wb = refs[:-1]
    n_layers = len(layer_is_skip)

    x_in = x_ref[...]            # [d_in, tile] raw xyz (scale folded into weights)
    x = x_in
    idx = 0
    for l in range(n_layers):
        if layer_is_skip[l]:
            w_h = wb[idx][...]
            w_x = wb[idx + 1][...]
            b = wb[idx + 2][...]
            idx += 3
            # skip concat + 1/sqrt(2) replaced by two matmuls (folded host-side)
            x = (jnp.dot(w_h, x.astype(w_h.dtype),
                         preferred_element_type=jnp.float32)
                 + jnp.dot(w_x, x_in.astype(w_x.dtype),
                           preferred_element_type=jnp.float32)
                 + b)
        else:
            w = wb[idx][...]
            b = wb[idx + 1][...]
            idx += 2
            x = jnp.dot(w, x.astype(w.dtype),
                        preferred_element_type=jnp.float32) + b
        if l < n_layers - 1:
            x = _softplus_beta(x)
    out_ref[...] = x.astype(out_ref.dtype)      # [d_out, tile], lane-dense store


# --------------------------------------------------------------------------- #
# Host-side weight preparation: feature-major orientation + constant folding.
# Input params: list of (W[in,out], b[1,out]) as in the reference model.
# --------------------------------------------------------------------------- #
def prepare_kernel_params(params, *, scale, skip_in, d_in, use_bf16=False):
    wdt = jnp.bfloat16 if use_bf16 else jnp.float32
    inv_sqrt2 = 1.0 / math.sqrt(2.0)
    n = len(params)
    kinds = []
    ops = []
    for l, (w, b) in enumerate(params):
        wT = jnp.asarray(w, jnp.float32).T              # [out, in]
        bT = jnp.asarray(b, jnp.float32).reshape(-1, 1)  # [out, 1]
        if l == n - 1:
            # fold the final `x[:, :1] / scale` into output row 0
            wT = wT.at[0, :].multiply(1.0 / scale)
            bT = bT.at[0, :].multiply(1.0 / scale)
        if l in skip_in:
            in_dim = wT.shape[1]
            w_h = wT[:, : in_dim - d_in] * inv_sqrt2         # acts on hidden x
            w_x = wT[:, in_dim - d_in:] * (inv_sqrt2 * scale)  # acts on raw xyz
            if l == 0:
                w_h = w_h * scale                            # x == scaled input
            ops += [w_h.astype(wdt), w_x.astype(wdt), bT]
            kinds.append(True)
        else:
            if l == 0:
                wT = wT * scale                              # fold input scaling
            ops += [wT.astype(wdt), bT]
            kinds.append(False)
    return tuple(kinds), ops


# --------------------------------------------------------------------------- #
# Wrapper: builds BlockSpecs / grid and calls pallas_call.
# --------------------------------------------------------------------------- #
def sdf_forward_pallas(input_xyz, input_bending_latent, params, *, scale,
                       skip_in, d_out, tile=1024, use_bf16=False,
                       vmem_limit_bytes=48 << 20):
    # bending_network is None in the reference module -> identity on input_xyz.
    del input_bending_latent
    N, d_in = input_xyz.shape

    kinds, ops = prepare_kernel_params(params, scale=scale, skip_in=skip_in,
                                       d_in=d_in, use_bf16=use_bf16)

    # Feature-major: batch points on the lane axis (lane-dense loads & stores).
    x_t = jnp.asarray(input_xyz, jnp.float32).T          # [d_in, N]
    n_pad = (-N) % tile                                   # ragged batch support
    if n_pad:
        x_t = jnp.pad(x_t, ((0, 0), (0, n_pad)))
    n_padded = N + n_pad
    grid = (n_padded // tile,)

    in_specs = [pl.BlockSpec((d_in, tile), lambda i: (0, i))]
    for op in ops:
        in_specs.append(pl.BlockSpec(op.shape, lambda i: (0, 0)))  # resident

    # Advisory cost hint for XLA scheduling.
    w_elems = sum(int(w.size) for w, _ in params)
    hid_units = sum(int(b.size) for _, b in params[:-1])
    param_bytes = sum(int(w.size) + int(b.size) for w, b in params) * 4
    cost = pl.CostEstimate(
        flops=2 * n_padded * w_elems,
        transcendentals=2 * n_padded * hid_units,   # exp + log1p per hidden unit
        bytes_accessed=n_padded * (d_in + d_out) * 4 + param_bytes,
    )

    kernel = functools.partial(_sdf_mlp_kernel, kinds)
    out_t = pl.pallas_call(
        kernel,
        out_shape=jax.ShapeDtypeStruct((d_out, n_padded), jnp.float32),
        grid=grid,
        in_specs=in_specs,
        out_specs=pl.BlockSpec((d_out, tile), lambda i: (0, i)),
        compiler_params=pltpu.CompilerParams(
            dimension_semantics=("parallel",),
            vmem_limit_bytes=vmem_limit_bytes),
        cost_estimate=cost,
    )(x_t, *ops)

    return out_t[:, :N].T      # [N, d_out]


# --------------------------------------------------------------------------- #
# Deterministic parameter construction replicating SDFNetwork.__init__
# (geometric_init=True, weight_norm=True -> identity at init, multires=0).
# Returns list of (W[in,out], b[1,out]) in float32.
# --------------------------------------------------------------------------- #
def init_sdf_params(key, d_in, d_out, d_hidden, n_layers, skip_in,
                    bias=0.5, inside_outside=False):
    dims = [d_in] + [d_hidden] * n_layers + [d_out]
    num_layers = len(dims)
    params = []
    for l in range(num_layers - 1):
        key, k = jax.random.split(key)
        if (l + 1) in skip_in:
            out_dim = dims[l + 1] - dims[0]
        else:
            out_dim = dims[l + 1]
        if l == num_layers - 2:
            mean = math.sqrt(math.pi) / math.sqrt(dims[l])
            if inside_outside:
                mean = -mean
            w = mean + 1e-4 * jax.random.normal(k, (out_dim, dims[l]))
            b = jnp.full((out_dim,), bias if inside_outside else -bias)
        else:
            std = math.sqrt(2.0) / math.sqrt(out_dim)
            w = std * jax.random.normal(k, (out_dim, dims[l]))
            b = jnp.zeros((out_dim,))
        params.append((jnp.asarray(w.T, jnp.float32),
                       jnp.asarray(b.reshape(1, -1), jnp.float32)))
    return params


# --------------------------------------------------------------------------- #
# Pure-JAX reference for correctness checking (mirrors the PyTorch forward).
# --------------------------------------------------------------------------- #
def sdf_forward_ref(input_xyz, params, *, scale, skip_in):
    x_in = input_xyz * scale
    x = x_in
    n_lin = len(params)
    for l, (w, b) in enumerate(params):
        if l in skip_in:
            x = jnp.concatenate([x, x_in], axis=1) / math.sqrt(2.0)
        x = x @ w + b
        if l < n_lin - 1:
            x = _softplus_beta(x)
    return jnp.concatenate([x[:, :1] / scale, x[:, 1:]], axis=1)


if __name__ == "__main__":
    # Small SDFNetwork config: d_in=3, d_out=5, d_hidden=32, n_layers=6,
    # skip_in=(4,), multires=0, scale=2.0, geometric_init, weight_norm.
    D_IN, D_OUT, D_HIDDEN, N_LAYERS = 3, 5, 32, 6
    SKIP_IN = (4,)
    SCALE = 2.0
    BEND_LATENT = 32
    N = 2000      # deliberately NOT a multiple of the tile -> exercises padding
    TILE = 1024

    key = jax.random.PRNGKey(0)
    k_param, k_x, k_lat = jax.random.split(key, 3)

    params = init_sdf_params(k_param, D_IN, D_OUT, D_HIDDEN, N_LAYERS, SKIP_IN)
    input_xyz = jax.random.normal(k_x, (N, D_IN), dtype=jnp.float32)
    input_bending_latent = jax.random.normal(k_lat, (BEND_LATENT,),
                                             dtype=jnp.float32)

    out = sdf_forward_pallas(input_xyz, input_bending_latent, params,
                             scale=SCALE, skip_in=SKIP_IN, d_out=D_OUT,
                             tile=TILE)
    out = jax.block_until_ready(out)

    ref = sdf_forward_ref(input_xyz, params, scale=SCALE, skip_in=SKIP_IN)
    assert out.shape == (N, D_OUT)
    assert jnp.allclose(out, ref, atol=1e-4, rtol=1e-4), "mismatch vs reference"

    print("KERNEL_OK")
</pallas_src>

<mosaic_0001>
module attributes {stable_mosaic.version = 11 : i64} {
  func.func @_sdf_mlp_kernel(%arg0: i32, %arg1: memref<3x1024xf32, #tpu.memory_space<vmem>>, %arg2: memref<32x3xf32, #tpu.memory_space<vmem>>, %arg3: memref<32x1xf32, #tpu.memory_space<vmem>>, %arg4: memref<32x32xf32, #tpu.memory_space<vmem>>, %arg5: memref<32x1xf32, #tpu.memory_space<vmem>>, %arg6: memref<32x32xf32, #tpu.memory_space<vmem>>, %arg7: memref<32x1xf32, #tpu.memory_space<vmem>>, %arg8: memref<29x32xf32, #tpu.memory_space<vmem>>, %arg9: memref<29x1xf32, #tpu.memory_space<vmem>>, %arg10: memref<32x29xf32, #tpu.memory_space<vmem>>, %arg11: memref<32x3xf32, #tpu.memory_space<vmem>>, %arg12: memref<32x1xf32, #tpu.memory_space<vmem>>, %arg13: memref<32x32xf32, #tpu.memory_space<vmem>>, %arg14: memref<32x1xf32, #tpu.memory_space<vmem>>, %arg15: memref<5x32xf32, #tpu.memory_space<vmem>>, %arg16: memref<5x1xf32, #tpu.memory_space<vmem>>, %arg17: memref<5x1024xf32, #tpu.memory_space<vmem>>) attributes {dimension_semantics = [#tpu.dimension_semantics<parallel>], iteration_bounds = array<i64: 2>, scalar_prefetch = 0 : i64, scratch_operands = 0 : i64, tpu.core_type = #tpu.core_type<tc>, window_params = [{transform_indices = @transform_0, window_bounds = array<i64: 3, 1024>}, {pipeline_mode = #tpu.pipeline_mode<synchronous>, transform_indices = @transform_1, window_bounds = array<i64: 32, 3>}, {pipeline_mode = #tpu.pipeline_mode<synchronous>, transform_indices = @transform_2, window_bounds = array<i64: 32, 1>}, {pipeline_mode = #tpu.pipeline_mode<synchronous>, transform_indices = @transform_3, window_bounds = array<i64: 32, 32>}, {pipeline_mode = #tpu.pipeline_mode<synchronous>, transform_indices = @transform_4, window_bounds = array<i64: 32, 1>}, {pipeline_mode = #tpu.pipeline_mode<synchronous>, transform_indices = @transform_5, window_bounds = array<i64: 32, 32>}, {pipeline_mode = #tpu.pipeline_mode<synchronous>, transform_indices = @transform_6, window_bounds = array<i64: 32, 1>}, {pipeline_mode = #tpu.pipeline_mode<synchronous>, transform_indices = @transform_7, window_bounds = array<i64: 29, 32>}, {pipeline_mode = #tpu.pipeline_mode<synchronous>, transform_indices = @transform_8, window_bounds = array<i64: 29, 1>}, {pipeline_mode = #tpu.pipeline_mode<synchronous>, transform_indices = @transform_9, window_bounds = array<i64: 32, 29>}, {pipeline_mode = #tpu.pipeline_mode<synchronous>, transform_indices = @transform_10, window_bounds = array<i64: 32, 3>}, {pipeline_mode = #tpu.pipeline_mode<synchronous>, transform_indices = @transform_11, window_bounds = array<i64: 32, 1>}, {pipeline_mode = #tpu.pipeline_mode<synchronous>, transform_indices = @transform_12, window_bounds = array<i64: 32, 32>}, {pipeline_mode = #tpu.pipeline_mode<synchronous>, transform_indices = @transform_13, window_bounds = array<i64: 32, 1>}, {pipeline_mode = #tpu.pipeline_mode<synchronous>, transform_indices = @transform_14, window_bounds = array<i64: 5, 32>}, {pipeline_mode = #tpu.pipeline_mode<synchronous>, transform_indices = @transform_15, window_bounds = array<i64: 5, 1>}, {transform_indices = @transform_16, window_bounds = array<i64: 5, 1024>}]} {
    %c0 = arith.constant 0 : index
    %c0_0 = arith.constant 0 : index
    %0 = vector.load %arg1[%c0, %c0_0] : memref<3x1024xf32, #tpu.memory_space<vmem>>, vector<3x1024xf32>
    %c0_1 = arith.constant 0 : index
    %c0_2 = arith.constant 0 : index
    %1 = vector.load %arg2[%c0_1, %c0_2] : memref<32x3xf32, #tpu.memory_space<vmem>>, vector<32x3xf32>
    %c0_3 = arith.constant 0 : index
    %c0_4 = arith.constant 0 : index
    %2 = vector.load %arg3[%c0_3, %c0_4] : memref<32x1xf32, #tpu.memory_space<vmem>>, vector<32x1xf32>
    %cst = arith.constant dense<0.000000e+00> : vector<32x1024xf32>
    %3 = tpu.matmul %1, %0, %cst {dimension_numbers = #tpu.dot_dimension_numbers<[1], [0], [0], [1], [0, 0, 1, 1], [], []>} : vector<32x3xf32>, vector<3x1024xf32>, vector<32x1024xf32> -> vector<32x1024xf32>
    %4 = vector.broadcast %2 : vector<32x1xf32> to vector<32x1024xf32>
    %5 = arith.addf %3, %4 : vector<32x1024xf32>
    %cst_5 = arith.constant 1.000000e+02 : f32
    %6 = vector.broadcast %cst_5 : f32 to vector<32x1024xf32>
    %7 = arith.mulf %5, %6 : vector<32x1024xf32>
    %cst_6 = arith.constant 2.000000e+01 : f32
    %8 = vector.broadcast %cst_6 : f32 to vector<32x1024xf32>
    %9 = arith.minimumf %7, %8 : vector<32x1024xf32>
    %cst_7 = arith.constant 2.000000e+01 : f32
    %10 = vector.broadcast %cst_7 : f32 to vector<32x1024xf32>
    %11 = arith.cmpf ogt, %7, %10 : vector<32x1024xf32>
    %12 = math.exp %9 : vector<32x1024xf32>
    %13 = math.log1p %12 : vector<32x1024xf32>
    %cst_8 = arith.constant 1.000000e+02 : f32
    %14 = vector.broadcast %cst_8 : f32 to vector<32x1024xf32>
    %15 = arith.divf %13, %14 : vector<32x1024xf32>
    %16 = arith.select %11, %5, %15 : vector<32x1024xi1>, vector<32x1024xf32>
    %c0_9 = arith.constant 0 : index
    %c0_10 = arith.constant 0 : index
    %17 = vector.load %arg4[%c0_9, %c0_10] : memref<32x32xf32, #tpu.memory_space<vmem>>, vector<32x32xf32>
    %c0_11 = arith.constant 0 : index
    %c0_12 = arith.constant 0 : index
    %18 = vector.load %arg5[%c0_11, %c0_12] : memref<32x1xf32, #tpu.memory_space<vmem>>, vector<32x1xf32>
    %cst_13 = arith.constant dense<0.000000e+00> : vector<32x1024xf32>
    %19 = tpu.matmul %17, %16, %cst_13 {dimension_numbers = #tpu.dot_dimension_numbers<[1], [0], [0], [1], [0, 0, 1, 1], [], []>} : vector<32x32xf32>, vector<32x1024xf32>, vector<32x1024xf32> -> vector<32x1024xf32>
    %20 = vector.broadcast %18 : vector<32x1xf32> to vector<32x1024xf32>
    %21 = arith.addf %19, %20 : vector<32x1024xf32>
    %cst_14 = arith.constant 1.000000e+02 : f32
    %22 = vector.broadcast %cst_14 : f32 to vector<32x1024xf32>
    %23 = arith.mulf %21, %22 : vector<32x1024xf32>
    %cst_15 = arith.constant 2.000000e+01 : f32
    %24 = vector.broadcast %cst_15 : f32 to vector<32x1024xf32>
    %25 = arith.minimumf %23, %24 : vector<32x1024xf32>
    %cst_16 = arith.constant 2.000000e+01 : f32
    %26 = vector.broadcast %cst_16 : f32 to vector<32x1024xf32>
    %27 = arith.cmpf ogt, %23, %26 : vector<32x1024xf32>
    %28 = math.exp %25 : vector<32x1024xf32>
    %29 = math.log1p %28 : vector<32x1024xf32>
    %cst_17 = arith.constant 1.000000e+02 : f32
    %30 = vector.broadcast %cst_17 : f32 to vector<32x1024xf32>
    %31 = arith.divf %29, %30 : vector<32x1024xf32>
    %32 = arith.select %27, %21, %31 : vector<32x1024xi1>, vector<32x1024xf32>
    %c0_18 = arith.constant 0 : index
    %c0_19 = arith.constant 0 : index
    %33 = vector.load %arg6[%c0_18, %c0_19] : memref<32x32xf32, #tpu.memory_space<vmem>>, vector<32x32xf32>
    %c0_20 = arith.constant 0 : index
    %c0_21 = arith.constant 0 : index
    %34 = vector.load %arg7[%c0_20, %c0_21] : memref<32x1xf32, #tpu.memory_space<vmem>>, vector<32x1xf32>
    %cst_22 = arith.constant dense<0.000000e+00> : vector<32x1024xf32>
    %35 = tpu.matmul %33, %32, %cst_22 {dimension_numbers = #tpu.dot_dimension_numbers<[1], [0], [0], [1], [0, 0, 1, 1], [], []>} : vector<32x32xf32>, vector<32x1024xf32>, vector<32x1024xf32> -> vector<32x1024xf32>
    %36 = vector.broadcast %34 : vector<32x1xf32> to vector<32x1024xf32>
    %37 = arith.addf %35, %36 : vector<32x1024xf32>
    %cst_23 = arith.constant 1.000000e+02 : f32
    %38 = vector.broadcast %cst_23 : f32 to vector<32x1024xf32>
    %39 = arith.mulf %37, %38 : vector<32x1024xf32>
    %cst_24 = arith.constant 2.000000e+01 : f32
    %40 = vector.broadcast %cst_24 : f32 to vector<32x1024xf32>
    %41 = arith.minimumf %39, %40 : vector<32x1024xf32>
    %cst_25 = arith.constant 2.000000e+01 : f32
    %42 = vector.broadcast %cst_25 : f32 to vector<32x1024xf32>
    %43 = arith.cmpf ogt, %39, %42 : vector<32x1024xf32>
    %44 = math.exp %41 : vector<32x1024xf32>
    %45 = math.log1p %44 : vector<32x1024xf32>
    %cst_26 = arith.constant 1.000000e+02 : f32
    %46 = vector.broadcast %cst_26 : f32 to vector<32x1024xf32>
    %47 = arith.divf %45, %46 : vector<32x1024xf32>
    %48 = arith.select %43, %37, %47 : vector<32x1024xi1>, vector<32x1024xf32>
    %c0_27 = arith.constant 0 : index
    %c0_28 = arith.constant 0 : index
    %49 = vector.load %arg8[%c0_27, %c0_28] : memref<29x32xf32, #tpu.memory_space<vmem>>, vector<29x32xf32>
    %c0_29 = arith.constant 0 : index
    %c0_30 = arith.constant 0 : index
    %50 = vector.load %arg9[%c0_29, %c0_30] : memref<29x1xf32, #tpu.memory_space<vmem>>, vector<29x1xf32>
    %cst_31 = arith.constant dense<0.000000e+00> : vector<29x1024xf32>
    %51 = tpu.matmul %49, %48, %cst_31 {dimension_numbers = #tpu.dot_dimension_numbers<[1], [0], [0], [1], [0, 0, 1, 1], [], []>} : vector<29x32xf32>, vector<32x1024xf32>, vector<29x1024xf32> -> vector<29x1024xf32>
    %52 = vector.broadcast %50 : vector<29x1xf32> to vector<29x1024xf32>
    %53 = arith.addf %51, %52 : vector<29x1024xf32>
    %cst_32 = arith.constant 1.000000e+02 : f32
    %54 = vector.broadcast %cst_32 : f32 to vector<29x1024xf32>
    %55 = arith.mulf %53, %54 : vector<29x1024xf32>
    %cst_33 = arith.constant 2.000000e+01 : f32
    %56 = vector.broadcast %cst_33 : f32 to vector<29x1024xf32>
    %57 = arith.minimumf %55, %56 : vector<29x1024xf32>
    %cst_34 = arith.constant 2.000000e+01 : f32
    %58 = vector.broadcast %cst_34 : f32 to vector<29x1024xf32>
    %59 = arith.cmpf ogt, %55, %58 : vector<29x1024xf32>
    %60 = math.exp %57 : vector<29x1024xf32>
    %61 = math.log1p %60 : vector<29x1024xf32>
    %cst_35 = arith.constant 1.000000e+02 : f32
    %62 = vector.broadcast %cst_35 : f32 to vector<29x1024xf32>
    %63 = arith.divf %61, %62 : vector<29x1024xf32>
    %64 = arith.select %59, %53, %63 : vector<29x1024xi1>, vector<29x1024xf32>
    %c0_36 = arith.constant 0 : index
    %c0_37 = arith.constant 0 : index
    %65 = vector.load %arg10[%c0_36, %c0_37] : memref<32x29xf32, #tpu.memory_space<vmem>>, vector<32x29xf32>
    %c0_38 = arith.constant 0 : index
    %c0_39 = arith.constant 0 : index
    %66 = vector.load %arg11[%c0_38, %c0_39] : memref<32x3xf32, #tpu.memory_space<vmem>>, vector<32x3xf32>
    %c0_40 = arith.constant 0 : index
    %c0_41 = arith.constant 0 : index
    %67 = vector.load %arg12[%c0_40, %c0_41] : memref<32x1xf32, #tpu.memory_space<vmem>>, vector<32x1xf32>
    %cst_42 = arith.constant dense<0.000000e+00> : vector<32x1024xf32>
    %68 = tpu.matmul %65, %64, %cst_42 {dimension_numbers = #tpu.dot_dimension_numbers<[1], [0], [0], [1], [0, 0, 1, 1], [], []>} : vector<32x29xf32>, vector<29x1024xf32>, vector<32x1024xf32> -> vector<32x1024xf32>
    %cst_43 = arith.constant dense<0.000000e+00> : vector<32x1024xf32>
    %69 = tpu.matmul %66, %0, %cst_43 {dimension_numbers = #tpu.dot_dimension_numbers<[1], [0], [0], [1], [0, 0, 1, 1], [], []>} : vector<32x3xf32>, vector<3x1024xf32>, vector<32x1024xf32> -> vector<32x1024xf32>
    %70 = arith.addf %68, %69 : vector<32x1024xf32>
    %71 = vector.broadcast %67 : vector<32x1xf32> to vector<32x1024xf32>
    %72 = arith.addf %70, %71 : vector<32x1024xf32>
    %cst_44 = arith.constant 1.000000e+02 : f32
    %73 = vector.broadcast %cst_44 : f32 to vector<32x1024xf32>
    %74 = arith.mulf %72, %73 : vector<32x1024xf32>
    %cst_45 = arith.constant 2.000000e+01 : f32
    %75 = vector.broadcast %cst_45 : f32 to vector<32x1024xf32>
    %76 = arith.minimumf %74, %75 : vector<32x1024xf32>
    %cst_46 = arith.constant 2.000000e+01 : f32
    %77 = vector.broadcast %cst_46 : f32 to vector<32x1024xf32>
    %78 = arith.cmpf ogt, %74, %77 : vector<32x1024xf32>
    %79 = math.exp %76 : vector<32x1024xf32>
    %80 = math.log1p %79 : vector<32x1024xf32>
    %cst_47 = arith.constant 1.000000e+02 : f32
    %81 = vector.broadcast %cst_47 : f32 to vector<32x1024xf32>
    %82 = arith.divf %80, %81 : vector<32x1024xf32>
    %83 = arith.select %78, %72, %82 : vector<32x1024xi1>, vector<32x1024xf32>
    %c0_48 = arith.constant 0 : index
    %c0_49 = arith.constant 0 : index
    %84 = vector.load %arg13[%c0_48, %c0_49] : memref<32x32xf32, #tpu.memory_space<vmem>>, vector<32x32xf32>
    %c0_50 = arith.constant 0 : index
    %c0_51 = arith.constant 0 : index
    %85 = vector.load %arg14[%c0_50, %c0_51] : memref<32x1xf32, #tpu.memory_space<vmem>>, vector<32x1xf32>
    %cst_52 = arith.constant dense<0.000000e+00> : vector<32x1024xf32>
    %86 = tpu.matmul %84, %83, %cst_52 {dimension_numbers = #tpu.dot_dimension_numbers<[1], [0], [0], [1], [0, 0, 1, 1], [], []>} : vector<32x32xf32>, vector<32x1024xf32>, vector<32x1024xf32> -> vector<32x1024xf32>
    %87 = vector.broadcast %85 : vector<32x1xf32> to vector<32x1024xf32>
    %88 = arith.addf %86, %87 : vector<32x1024xf32>
    %cst_53 = arith.constant 1.000000e+02 : f32
    %89 = vector.broadcast %cst_53 : f32 to vector<32x1024xf32>
    %90 = arith.mulf %88, %89 : vector<32x1024xf32>
    %cst_54 = arith.constant 2.000000e+01 : f32
    %91 = vector.broadcast %cst_54 : f32 to vector<32x1024xf32>
    %92 = arith.minimumf %90, %91 : vector<32x1024xf32>
    %cst_55 = arith.constant 2.000000e+01 : f32
    %93 = vector.broadcast %cst_55 : f32 to vector<32x1024xf32>
    %94 = arith.cmpf ogt, %90, %93 : vector<32x1024xf32>
    %95 = math.exp %92 : vector<32x1024xf32>
    %96 = math.log1p %95 : vector<32x1024xf32>
    %cst_56 = arith.constant 1.000000e+02 : f32
    %97 = vector.broadcast %cst_56 : f32 to vector<32x1024xf32>
    %98 = arith.divf %96, %97 : vector<32x1024xf32>
    %99 = arith.select %94, %88, %98 : vector<32x1024xi1>, vector<32x1024xf32>
    %c0_57 = arith.constant 0 : index
    %c0_58 = arith.constant 0 : index
    %100 = vector.load %arg15[%c0_57, %c0_58] : memref<5x32xf32, #tpu.memory_space<vmem>>, vector<5x32xf32>
    %c0_59 = arith.constant 0 : index
    %c0_60 = arith.constant 0 : index
    %101 = vector.load %arg16[%c0_59, %c0_60] : memref<5x1xf32, #tpu.memory_space<vmem>>, vector<5x1xf32>
    %cst_61 = arith.constant dense<0.000000e+00> : vector<5x1024xf32>
    %102 = tpu.matmul %100, %99, %cst_61 {dimension_numbers = #tpu.dot_dimension_numbers<[1], [0], [0], [1], [0, 0, 1, 1], [], []>} : vector<5x32xf32>, vector<32x1024xf32>, vector<5x1024xf32> -> vector<5x1024xf32>
    %103 = vector.broadcast %101 : vector<5x1xf32> to vector<5x1024xf32>
    %104 = arith.addf %102, %103 : vector<5x1024xf32>
    %c0_62 = arith.constant 0 : index
    %c0_63 = arith.constant 0 : index
    %105 = vector.load %arg17[%c0_62, %c0_63] : memref<5x1024xf32, #tpu.memory_space<vmem>>, vector<5x1024xf32>
    tpu.vector_store %arg17[%c0_62, %c0_63], %104 {strides = array<i32>} : memref<5x1024xf32, #tpu.memory_space<vmem>>, vector<5x1024xf32>,
    return
  }
  func.func @transform_0(%arg0: i32) -> (i32, i32) {
    %c0_i32 = arith.constant 0 : i32
    %c0_i32_0 = arith.constant 0 : i32
    return %c0_i32, %arg0 : i32, i32
  }
  func.func @transform_1(%arg0: i32) -> (i32, i32) {
    %c0_i32 = arith.constant 0 : i32
    %c0_i32_0 = arith.constant 0 : i32
    %c0_i32_1 = arith.constant 0 : i32
    return %c0_i32, %c0_i32_0 : i32, i32
  }
  func.func @transform_2(%arg0: i32) -> (i32, i32) {
    %c0_i32 = arith.constant 0 : i32
    %c0_i32_0 = arith.constant 0 : i32
    %c0_i32_1 = arith.constant 0 : i32
    return %c0_i32, %c0_i32_0 : i32, i32
  }
  func.func @transform_3(%arg0: i32) -> (i32, i32) {
    %c0_i32 = arith.constant 0 : i32
    %c0_i32_0 = arith.constant 0 : i32
    %c0_i32_1 = arith.constant 0 : i32
    return %c0_i32, %c0_i32_0 : i32, i32
  }
  func.func @transform_4(%arg0: i32) -> (i32, i32) {
    %c0_i32 = arith.constant 0 : i32
    %c0_i32_0 = arith.constant 0 : i32
    %c0_i32_1 = arith.constant 0 : i32
    return %c0_i32, %c0_i32_0 : i32, i32
  }
  func.func @transform_5(%arg0: i32) -> (i32, i32) {
    %c0_i32 = arith.constant 0 : i32
    %c0_i32_0 = arith.constant 0 : i32
    %c0_i32_1 = arith.constant 0 : i32
    return %c0_i32, %c0_i32_0 : i32, i32
  }
  func.func @transform_6(%arg0: i32) -> (i32, i32) {
    %c0_i32 = arith.constant 0 : i32
    %c0_i32_0 = arith.constant 0 : i32
    %c0_i32_1 = arith.constant 0 : i32
    return %c0_i32, %c0_i32_0 : i32, i32
  }
  func.func @transform_7(%arg0: i32) -> (i32, i32) {
    %c0_i32 = arith.constant 0 : i32
    %c0_i32_0 = arith.constant 0 : i32
    %c0_i32_1 = arith.constant 0 : i32
    return %c0_i32, %c0_i32_0 : i32, i32
  }
  func.func @transform_8(%arg0: i32) -> (i32, i32) {
    %c0_i32 = arith.constant 0 : i32
    %c0_i32_0 = arith.constant 0 : i32
    %c0_i32_1 = arith.constant 0 : i32
    return %c0_i32, %c0_i32_0 : i32, i32
  }
  func.func @transform_9(%arg0: i32) -> (i32, i32) {
    %c0_i32 = arith.constant 0 : i32
    %c0_i32_0 = arith.constant 0 : i32
    %c0_i32_1 = arith.constant 0 : i32
    return %c0_i32, %c0_i32_0 : i32, i32
  }
  func.func @transform_10(%arg0: i32) -> (i32, i32) {
    %c0_i32 = arith.constant 0 : i32
    %c0_i32_0 = arith.constant 0 : i32
    %c0_i32_1 = arith.constant 0 : i32
    return %c0_i32, %c0_i32_0 : i32, i32
  }
  func.func @transform_11(%arg0: i32) -> (i32, i32) {
    %c0_i32 = arith.constant 0 : i32
    %c0_i32_0 = arith.constant 0 : i32
    %c0_i32_1 = arith.constant 0 : i32
    return %c0_i32, %c0_i32_0 : i32, i32
  }
  func.func @transform_12(%arg0: i32) -> (i32, i32) {
    %c0_i32 = arith.constant 0 : i32
    %c0_i32_0 = arith.constant 0 : i32
    %c0_i32_1 = arith.constant 0 : i32
    return %c0_i32, %c0_i32_0 : i32, i32
  }
  func.func @transform_13(%arg0: i32) -> (i32, i32) {
    %c0_i32 = arith.constant 0 : i32
    %c0_i32_0 = arith.constant 0 : i32
    %c0_i32_1 = arith.constant 0 : i32
    return %c0_i32, %c0_i32_0 : i32, i32
  }
  func.func @transform_14(%arg0: i32) -> (i32, i32) {
    %c0_i32 = arith.constant 0 : i32
    %c0_i32_0 = arith.constant 0 : i32
    %c0_i32_1 = arith.constant 0 : i32
    return %c0_i32, %c0_i32_0 : i32, i32
  }
  func.func @transform_15(%arg0: i32) -> (i32, i32) {
    %c0_i32 = arith.constant 0 : i32
    %c0_i32_0 = arith.constant 0 : i32
    %c0_i32_1 = arith.constant 0 : i32
    return %c0_i32, %c0_i32_0 : i32, i32
  }
  func.func @transform_16(%arg0: i32) -> (i32, i32) {
    %c0_i32 = arith.constant 0 : i32
    %c0_i32_0 = arith.constant 0 : i32
    return %c0_i32, %arg0 : i32, i32
  }
}

</mosaic_0001>

<bundles_post_ra>
// kernel: tpu_custom_call.1
= control target key start
LH: loop header
LB: loop body
LE: loop exit
PB: predicated region body
PF: predicated region fallthrough
CT: control target
= control target key end

     0   :  { %s13624_s0 = inlined_call_operand.vmem [shape: f32[3,2048], index: 0, kind: input, shape index: {}]   ;;  %s13625_s1 = inlined_call_operand.vmem [shape: f32[32,3], index: 1, kind: input, shape index: {}]   ;;  %s13626_s2 = inlined_call_operand.vmem [shape: f32[32,1], index: 2, kind: input, shape index: {}]   ;;  %s13627_s3 = inlined_call_operand.vmem [shape: f32[32,32], index: 3, kind: input, shape index: {}]   ;;  %s13628_s4 = inlined_call_operand.vmem [shape: f32[32,1], index: 4, kind: input, shape index: {}]   ;;  %s13629_s5 = inlined_call_operand.vmem [shape: f32[32,32], index: 5, kind: input, shape index: {}]   ;;  %s13630_s6 = inlined_call_operand.vmem [shape: f32[32,1], index: 6, kind: input, shape index: {}]   ;;  %s13631_s7 = inlined_call_operand.vmem [shape: f32[29,32], index: 7, kind: input, shape index: {}]   ;;  %s13632_s8 = inlined_call_operand.vmem [shape: f32[29,1], index: 8, kind: input, shape index: {}]   ;;  %s13633_s9 = inlined_call_operand.vmem [shape: f32[32,29], index: 9, kind: input, shape index: {}]   ;;  %s13634_s10 = inlined_call_operand.vmem [shape: f32[32,3], index: 10, kind: input, shape index: {}]   ;;  %s13635_s11 = inlined_call_operand.vmem [shape: f32[32,1], index: 11, kind: input, shape index: {}]   ;;  %s13636_s12 = inlined_call_operand.vmem [shape: f32[32,32], index: 12, kind: input, shape index: {}]   ;;  %s13637_s13 = inlined_call_operand.vmem [shape: f32[32,1], index: 13, kind: input, shape index: {}]   ;;  %s13638_s14 = inlined_call_operand.vmem [shape: f32[5,32], index: 14, kind: input, shape index: {}]   ;;  %s13639_s15 = inlined_call_operand.vmem [shape: f32[5,1], index: 15, kind: input, shape index: {}]   ;;  %s13640_s16 = inlined_call_operand.hbm [shape: f32[5,2048], index: 16, kind: output, shape index: {}]  }
   0x1   :  { %13863 = sst [smem:[#allocation46_spill]] %s13624_s0 }
   0x2   :  { %21 = vsyncpa [#allocation3], 0 }
   0x3   :  { %23 = vsyncpa [#allocation3 + $0x1], 0  ;;  %s8167_s21 = smov 0   ;;  %s8169_s22 = smov 0  }
   0x4   :  { %s8171_s23 = smov 0   ;;  %s8173_s24 = smov 0  }
   0x5 LB: > { %13864 = sst [smem:[#allocation5_spill]] %s8064_s21  ;;  %s8188_s25 = sadd.s32 4294967295, %s8076_s24   ;;  %s8076_s24 = sphi %s8173_s24, %s14586_s24   ;;  %s8072_s23 = sphi %s8171_s23, %s14588_s23   ;;  %s8068_s22 = sphi %s8169_s22, %s14590_s22   ;;  %s8064_s21 = sphi %s8167_s21, %s14589_s21  }
   0x6   : > { %13865 = sst [smem:[#allocation6_spill]] %s8072_s23  ;;  %s6809_s26 = sadd.s32 4294967294, %s8076_s24  }
   0x7   : > { %13866 = sst [smem:[#allocation7_spill]] %s8076_s24  ;;  %s8192_s27 = sadd.s32 1, %s8076_s24  }
   0x8   : > { %13867 = sst [smem:[#allocation8_spill]] %s8192_s27  ;;  %s377_s28 = sadd.s32 1, %s8072_s23 }
   0x9   : > { %s374_s29 = ssub.s32 %s8076_s24, %s8192_s27  ;;  %p387_p0 = scmp.ne.s32.totalorder %s8072_s23, %s8068_s22 }
   0xa   : > { %p375_p1 = scmp.eq.s32.totalorder %s374_s29, 0  ;;  %p388_p2 = scmp.eq.s32.totalorder %s8188_s25, 1 }
   0xb   : > { %p393_p3 = scmp.ne.s32.totalorder %s8068_s22, %s8064_s21  ;;  %p394_p4 = scmp.eq.s32.totalorder %s6809_s26, 1 }
   0xc   : > { %s8203_s30 = scalar_select %p375_p1, %s8072_s23, %s377_s28  }
   0xd   : > { %p8205_p5 = por %p388_p2, %p387_p0  ;;  %p8209_p6 = por %p394_p4, %p393_p3 }
   0xe   : > { %13868 = sst [smem:[#allocation9_spill]] %s8203_s30  ;;  %p6812_p7 = scmp.ge.s32.totalorder %s8076_s24, 1 }
   0xf   : > { %s13870_s17 = scalar_select %p8209_p6, 1, 0 }
  0x10   : > { %p466_p8 = scmp.lt.s32.totalorder %s8076_s24, 3 }
  0x11   : > { %13871 = sst [smem:[#allocation10_spill]] %s13870_s17 }
  0x12   : > { %p467_p9 = pnand %p6812_p7, %p466_p8 }
  0x14   : > { %470 = sbr.rel (%p467_p9) target bundleno = 2369 (0x941), region = 84 }
  0x1b   : > { %s6814_s18 = sshll.u32 %s8188_s25, 3  ;;  %v13647_v0 = vmov 0.0   ;;  %v531_v1 = vld [vmem:[%s13626_s2] sm:$0xff]  ;;  %v8079_v2 = vmov 0   ;;  %v533_v3 = vld [vmem:[%s13626_s2 + $0x10] sm:$0xff]  ;;  %v532_v4 = vld [vmem:[%s13626_s2 + $0x8] sm:$0xff] }
  0x1c   : > { %p517_p10 = scmp.lt.s32.totalorder %s6814_s18, 15  ;;  %657 = vmatprep.mubr.f32.mxu0 %v13647_v0  ;;  %746 = vmatprep.mubr.f32.mxu1 %v13647_v0  ;;  %v534_v5 = vld [vmem:[%s13626_s2 + $0x18] sm:$0xff]  ;;  %s13872_s21 = sld [smem:[#allocation46_spill]]  ;;  %vm576_vm0 = vcmask 1042432   ;;  %v527_v12 = vld [vmem:[%s13625_s1] sm:$0xff]  ;;  %vm563_vm1 = vcmask 23552  }
  0x1d   : > { %7236 = vset.pattern.permute.xlu0 %v8079_v2  ;;  %7237 = vset.pattern.permute.xlu1 %v8079_v2  ;;  %v528_v15 = vld [vmem:[%s13625_s1 + $0x8] sm:$0xff]  ;;  %v1466_v16 = vld [vmem:[%s13628_s4] sm:$0xff]  ;;  %v529_v18 = vld [vmem:[%s13625_s1 + $0x10] sm:$0xff]  ;;  %s513_s20 = sand.u32 1, %s8068_s22   ;;  %s8081_s28 = smov [#allocation2]  }
  0x1e   : > { %s14592_s18 = smov (!%p517_p10, %s6814_s18), 15  ;;  %537 = vperm.xlu0 %7236, %v531_v1   ;;  %547 = vperm.xlu1 %7237, %v533_v3   ;;  %v1467_v17 = vld [vmem:[%s13628_s4 + $0x8] sm:$0xff]  ;;  %v1468_v19 = vld [vmem:[%s13628_s4 + $0x10] sm:$0xff]  ;;  %v1469_v20 = vld [vmem:[%s13628_s4 + $0x18] sm:$0xff]  ;;  %s6813_s23 = sshll.u32 %s513_s20, 6 }
  0x1f   : > { %s6815_s19 = sshll.u32 %s14592_s18, 2  ;;  %v530_v21 = vld [vmem:[%s13625_s1 + $0x18] sm:$0xff]  ;;  %v2375_v22 = vld [vmem:[%s13630_s6] sm:$0xff]  ;;  %v2376_v23 = vld [vmem:[%s13630_s6 + $0x8] sm:$0xff]  ;;  %s515_s27 = scalar_lea.vmem [#allocation2], %s6813_s23 }
  0x20   : > { %v2377_v24 = vld [vmem:[%s13630_s6 + $0x10] sm:$0xff]  ;;  %v2378_v25 = vld [vmem:[%s13630_s6 + $0x18] sm:$0xff]  ;;  %v3283_v26 = vld [vmem:[%s13632_s8] sm:$0xff]  ;;  %s6736_s26 = scalar_lea.sflag [#allocation3], %s513_s20  ;;  %s8018_s29 = sshll.u32 %s8081_s28, 4  ;;  %s8019_s29 = int_to_ptr.vmem [resolvable:$false] %s8018_s29 }
  0x21   : > { %v3284_v27 = vld [vmem:[%s13632_s8 + $0x8] sm:$0xff]  ;;  %v3285_v28 = vld [vmem:[%s13632_s8 + $0x10] sm:$0xff]  ;;  %v3286_v29 = vld [vmem:[%s13632_s8 + $0x18] sm:$0x1f] }
  0x22   : > { %s8233_s24 = scalar_lea.vmem %s13872_s21, %s6815_s19  ;;  %542 = vperm.xlu0 %7236, %v532_v4   ;;  %552 = vperm.xlu1 %7237, %v534_v5   ;;  %v4195_v30 = vld [vmem:[%s13635_s11] sm:$0xff]  ;;  %v4196_v31 = vld [vmem:[%s13635_s11 + $0x8] sm:$0xff]  ;;  %v4197_v32 = vld [vmem:[%s13635_s11 + $0x10] sm:$0xff]  ;;  %s6961_s21 = sshll.u32 %s8188_s25, 10 }
  0x23   : > { %v523_v6 = vld [vmem:[%s8233_s24] sm:$0x77]  ;;  %v524_v7 = vld [vmem:[%s8233_s24 + $0x8] sm:$0x77]  ;;  %v525_v8 = vld [vmem:[%s8233_s24 + $0x10] sm:$0x77]  ;;  %s13580_s18 = scalar_lea.hbm %s13640_s16, %s6961_s21 }
  0x24   : > { %v8238_v9 = vcombine.high %v523_v6, %v523_v6  ;;  %v8240_v10 = vcombine.high %v524_v7, %v524_v7  ;;  %v526_v11 = vld [vmem:[%s8233_s24 + $0x18] sm:$0x77]  ;;  %v8250_v13 = vcombine.high %v525_v8, %v525_v8  ;;  %v5529_v34 = vld [vmem:[%s13637_s13] sm:$0xff]  ;;  %v5530_v35 = vld [vmem:[%s13637_s13 + $0x8] sm:$0xff]  ;;  %s8020_s19 = scalar_lea.vmem %s8019_s29, 2048 }
  0x25   : > { %v8252_v14 = vcombine.high %v526_v11, %v526_v11  ;;  %v4198_v33 = vld [vmem:[%s13635_s11 + $0x18] sm:$0xff]  ;;  %v5531_v36 = vld [vmem:[%s13637_s13 + $0x10] sm:$0xff]  ;;  %v6434_v38 = vld [vmem:[%s13639_s15] sm:$0x1f] }
  0x26   : > { %13873 = vst [vmem:[#allocation11_spill] sm:$0xff] %v8238_v9  ;;  %13874 = vst [vmem:[#allocation12_spill] sm:$0xff] %v8240_v10  ;;  %6816 = vmatprep.subr.msk.mxu0 %vm576_vm0, %v8238_v9  ;;  %6822 = vmatprep.subr.msk.mxu1 %vm576_vm0, %v8240_v10  ;;  %v5532_v37 = vld [vmem:[%s13637_s13 + $0x18] sm:$0xff] }
  0x27   : > { %13875 = vst [vmem:[#allocation13_spill] sm:$0xff] %v8250_v13  ;;  %13876 = vst [vmem:[#allocation14_spill] sm:$0xff] %v8252_v14  ;;  %6817 = vmatpush1.msk.msra.mxu0 %vm576_vm0, %v523_v6  ;;  %6823 = vmatpush1.msk.msra.mxu1 %vm576_vm0, %v524_v7 }
  0x28   : > { %6818 = vmatmul.mubr.msk.f32.vlgmr.msra.gmra.mrb[0].mxu0 %vm563_vm1, %v527_v12  ;;  %6824 = vmatmul.mubr.msk.f32.vlgmr.msra.gmra.mrb[0].mxu1 %vm563_vm1, %v527_v12 }
  0x29   : > { %663 = vmatprep.mubr.f32.mxu0 %v13647_v0  ;;  %752 = vmatprep.mubr.f32.mxu1 %v13647_v0 }
  0x2a   : > { %6828 = vmatprep.subr.msk.mxu0 %vm576_vm0, %v8250_v13  ;;  %6834 = vmatprep.subr.msk.mxu1 %vm576_vm0, %v8252_v14 }
  0x2b   : > { %6829 = vmatpush1.msk.msra.mxu0 %vm576_vm0, %v525_v8  ;;  %6835 = vmatpush1.msk.msra.mxu1 %vm576_vm0, %v526_v11 }
  0x2c   : > { %6819 = vmatmul.mubr.msk.f32.gmra.mrb[2].mxu0 %vm563_vm1, %v528_v15  ;;  %6825 = vmatmul.mubr.msk.f32.gmra.mrb[2].mxu1 %vm563_vm1, %v528_v15 }
  0x2d   : > { %669 = vmatprep.mubr.f32.mxu0 %v13647_v0  ;;  %758 = vmatprep.mubr.f32.mxu1 %v13647_v0 }
  0x2e   : > { %1472 = vperm.xlu0 %7236, %v1466_v16   ;;  %1477 = vperm.xlu1 %7237, %v1467_v17  }
  0x30   : > { %6820 = vmatmul.mubr.msk.f32.gmra.mrb[4].mxu0 %vm563_vm1, %v529_v18  ;;  %6826 = vmatmul.mubr.msk.f32.gmra.mrb[4].mxu1 %vm563_vm1, %v529_v18 }
  0x31   : > { %675 = vmatprep.mubr.f32.mxu0 %v13647_v0  ;;  %764 = vmatprep.mubr.f32.mxu1 %v13647_v0 }
  0x32   : > { %1482 = vperm.xlu0 %7236, %v1468_v19   ;;  %1487 = vperm.xlu1 %7237, %v1469_v20  }
  0x34   : > { %6821 = vmatmul.mubr.msk.f32.gmra.mrb[6].mxu0 %vm563_vm1, %v530_v21  ;;  %6827 = vmatmul.mubr.msk.f32.gmra.mrb[6].mxu1 %vm563_vm1, %v530_v21 }
  0x35   : > { %835 = vmatprep.mubr.f32.mxu0 %v13647_v0  ;;  %924 = vmatprep.mubr.f32.mxu1 %v13647_v0 }
  0x36   : > { %2381 = vperm.xlu0 %7236, %v2375_v22   ;;  %2386 = vperm.xlu1 %7237, %v2376_v23  }
  0x38   : > { %6830 = vmatmul.mubr.msk.f32.vlgmr.msra.gmra.mrb[8].mxu0 %vm563_vm1, %v527_v12  ;;  %6836 = vmatmul.mubr.msk.f32.vlgmr.msra.gmra.mrb[8].mxu1 %vm563_vm1, %v527_v12 }
  0x39   : > { %841 = vmatprep.mubr.f32.mxu0 %v13647_v0  ;;  %930 = vmatprep.mubr.f32.mxu1 %v13647_v0 }
  0x3a   : > { %2391 = vperm.xlu0 %7236, %v2377_v24   ;;  %2396 = vperm.xlu1 %7237, %v2378_v25  }
  0x3c   : > { %6831 = vmatmul.mubr.msk.f32.gmra.mrb[10].mxu0 %vm563_vm1, %v528_v15  ;;  %6837 = vmatmul.mubr.msk.f32.gmra.mrb[10].mxu1 %vm563_vm1, %v528_v15 }
  0x3d   : > { %847 = vmatprep.mubr.f32.mxu0 %v13647_v0  ;;  %936 = vmatprep.mubr.f32.mxu1 %v13647_v0 }
  0x3e   : > { %3289 = vperm.xlu0 %7236, %v3283_v26   ;;  %3294 = vperm.xlu1 %7237, %v3284_v27  }
  0x40   : > { %6832 = vmatmul.mubr.msk.f32.gmra.mrb[12].mxu0 %vm563_vm1, %v529_v18  ;;  %6838 = vmatmul.mubr.msk.f32.gmra.mrb[12].mxu1 %vm563_vm1, %v529_v18 }
  0x41   : > { %853 = vmatprep.mubr.f32.mxu0 %v13647_v0  ;;  %942 = vmatprep.mubr.f32.mxu1 %v13647_v0 }
  0x42   : > { %3299 = vperm.xlu0 %7236, %v3285_v28   ;;  %3304 = vperm.xlu1 %7237, %v3286_v29  }
  0x44   : > { %6833 = vmatmul.mubr.msk.f32.gmra.mrb[14].mxu0 %vm563_vm1, %v530_v21  ;;  %6839 = vmatmul.mubr.msk.f32.gmra.mrb[14].mxu1 %vm563_vm1, %v530_v21 }
  0x45   : > { %1567 = vmatprep.mubr.f32.mxu0 %v13647_v0  ;;  %1656 = vmatprep.mubr.f32.mxu1 %v13647_v0 }
  0x46   : > { %4963 = vperm.xlu0 %7236, %v4195_v30   ;;  %4968 = vperm.xlu1 %7237, %v4196_v31  }
  0x4a   : > { %4973 = vperm.xlu0 %7236, %v4197_v32   ;;  %4978 = vperm.xlu1 %7237, %v4198_v33  }
  0x4e   : > { %5535 = vperm.xlu0 %7236, %v5529_v34   ;;  %5540 = vperm.xlu1 %7237, %v5530_v35  }
  0x52   : > { %5545 = vperm.xlu0 %7236, %v5531_v36   ;;  %5550 = vperm.xlu1 %7237, %v5532_v37  }
  0x56   : > { %6437 = vperm.xlu0 %7236, %v6434_v38  }
  0x9d   : > { %v8366_v39 = vpop.permute.xlu0 %537  ;;  %v8387_v56 = vpop.permute.xlu1 %547 }
  0xa1   : > { %v8382_v54 = vpop.permute.xlu0 %542  ;;  %v8437_v26 = vpop.permute.xlu1 %552 }
  0xfb   : > { %v659_v40 = vpop.f32.mrb[0].mxu0  ;;  %v748_v41 = vpop.f32.mrb[0].mxu1 }
  0xfc   : > { %v8369_v42 = vadd.f32 %v659_v40, %v8366_v39  ;;  %v8372_v43 = vadd.f32 %v748_v41, %v8366_v39  ;;  %v661_v44 = vpop.f32.mrb[1].mxu0  ;;  %v750_v45 = vpop.f32.mrb[1].mxu1 }
  0xfd   : > { %v8385_v55 = vadd.f32 %v661_v44, %v8366_v39  ;;  %v8396_v63 = vadd.f32 %v750_v45, %v8366_v39 }
  0xfe   : > { %v8375_v46 = vmul.f32 100.0, %v8369_v42  ;;  %v8378_v47 = vmul.f32 100.0, %v8372_v43 }
  0xff   : > { %v665_v48 = vpop.f32.mrb[2].mxu0  ;;  %v754_v49 = vpop.f32.mrb[2].mxu1  ;;  %13877 = vst [vmem:[#allocation15_spill] sm:$0xff] %v8385_v55  ;;  %13878 = vst [vmem:[#allocation16_spill] sm:$0xff] %v8396_v63  ;;  %v8414_v8 = vmul.f32 100.0, %v8385_v55  ;;  %v8422_v18 = vmul.f32 100.0, %v8396_v63 }
 0x100   : > { %v981_v50 = vmin.f32 %v8375_v46, 20.0  ;;  %v983_v51 = vmin.f32 %v8378_v47, 20.0  ;;  %v667_v52 = vpop.f32.mrb[3].mxu0  ;;  %v756_v53 = vpop.f32.mrb[3].mxu1  ;;  %v8390_v59 = vadd.f32 %v665_v48, %v8382_v54  ;;  %v8393_v60 = vadd.f32 %v754_v49, %v8382_v54 }
 0x101   : > { %v8405_v5 = vadd.f32 %v667_v52, %v8382_v54  ;;  %13880 = vst [vmem:[#allocation18_spill] sm:$0xff] %v8414_v8  ;;  %v8419_v15 = vadd.f32 %v756_v53, %v8382_v54  ;;  %13882 = vst [vmem:[#allocation20_spill] sm:$0xff] %v8422_v18  ;;  %v982_v27 = vmin.f32 %v8414_v8, 20.0  ;;  %v984_v34 = vmin.f32 %v8422_v18, 20.0 }
 0x102   : > { %v1045_v57 = vmul.f32 1.442695, %v981_v50  ;;  %v1049_v58 = vmul.f32 1.442695, %v983_v51  ;;  %v8399_v1 = vmul.f32 100.0, %v8390_v59  ;;  %v8402_v2 = vmul.f32 100.0, %v8393_v60 }
 0x103   : > { %v671_v61 = vpop.f32.mrb[4].mxu0  ;;  %v760_v62 = vpop.f32.mrb[4].mxu1  ;;  %13879 = vst [vmem:[#allocation17_spill] sm:$0xff] %v8405_v5  ;;  %13881 = vst [vmem:[#allocation19_spill] sm:$0xff] %v8419_v15  ;;  %v8425_v21 = vmul.f32 100.0, %v8405_v5  ;;  %v8441_v28 = vmul.f32 100.0, %v8419_v15 }
 0x104   : > { %7242 = vpow2.f32 %v1045_v57  ;;  %v673_v3 = vpop.f32.mrb[5].mxu0  ;;  %v762_v4 = vpop.f32.mrb[5].mxu1  ;;  %v8408_v6 = vadd.f32 %v671_v61, %v8387_v56  ;;  %v8411_v7 = vadd.f32 %v760_v62, %v8387_v56  ;;  %v989_v11 = vmin.f32 %v8399_v1, 20.0 }
 0x105   : > { %7244 = vpow2.f32 %v1049_v58  ;;  %v991_v12 = vmin.f32 %v8402_v2, 20.0  ;;  %13883 = vst [vmem:[#allocation21_spill] sm:$0xff] %v8425_v21  ;;  %13884 = vst [vmem:[#allocation22_spill] sm:$0xff] %v8441_v28  ;;  %v990_v37 = vmin.f32 %v8425_v21, 20.0  ;;  %v992_v44 = vmin.f32 %v8441_v28, 20.0 }
 0x106   : > { %v1061_v19 = vmul.f32 1.442695, %v989_v11  ;;  %v8428_v22 = vmul.f32 100.0, %v8408_v6  ;;  %v8431_v23 = vmul.f32 100.0, %v8411_v7  ;;  %v1047_v49 = vmul.f32 1.442695, %v982_v27 }
 0x107   : > { %v677_v16 = vpop.f32.mrb[6].mxu0  ;;  %v766_v17 = vpop.f32.mrb[6].mxu1  ;;  %v1065_v20 = vmul.f32 1.442695, %v991_v12  ;;  %v1051_v57 = vmul.f32 1.442695, %v984_v34  ;;  %v8473_v58 = vadd.f32 %v673_v3, %v8387_v56 }
 0x108   : > { %v8433_v24 = vpop.f32.mrb[7].mxu0  ;;  %v8435_v25 = vpop.f32.mrb[7].mxu1  ;;  %7246 = vpow2.f32 %v1061_v19  ;;  %v997_v29 = vmin.f32 %v8428_v22, 20.0  ;;  %v999_v30 = vmin.f32 %v8431_v23, 20.0  ;;  %v8446_v31 = vadd.f32 %v677_v16, %v8437_v26 }
 0x109   : > { %7248 = vpow2.f32 %v1065_v20  ;;  %13885 = vst [vmem:[#allocation23_spill] sm:$0xff] %v8473_v58  ;;  %v1063_v11 = vmul.f32 1.442695, %v990_v37  ;;  %v1067_v12 = vmul.f32 1.442695, %v992_v44  ;;  %v8480_v16 = vadd.f32 %v762_v4, %v8387_v56 }
 0x10a   : > { %v1077_v38 = vmul.f32 1.442695, %v997_v29  ;;  %v1081_v40 = vmul.f32 1.442695, %v999_v30  ;;  %v8465_v50 = vmul.f32 100.0, %v8446_v31  ;;  %v8490_v29 = vmul.f32 100.0, %v8473_v58 }
 0x10b   : > { %v8448_v32 = vpop.f32.mrb[8].mxu0  ;;  %v8450_v33 = vpop.f32.mrb[8].mxu1  ;;  %13886 = vst [vmem:[#allocation24_spill] sm:$0xff] %v8480_v16  ;;  %v8493_v30 = vadd.f32 %v766_v17, %v8437_v26  ;;  %v8531_v63 = vadd.f32 %v8433_v24, %v8437_v26  ;;  %vm1013_vm2 = vcmp.gt.f32.partialorder %v8375_v46, 20.0  ;;  %vm1015_vm3 = vcmp.gt.f32.partialorder %v8378_v47, 20.0 }
 0x10c   : > { %v8453_v35 = vpop.f32.mrb[9].mxu0  ;;  %v8455_v36 = vpop.f32.mrb[9].mxu1  ;;  %7250 = vpow2.f32 %v1077_v38  ;;  %v1005_v19 = vmin.f32 %v8465_v50, 20.0  ;;  %13887 = vst [vmem:[#allocation25_spill] sm:$0xff] %v8490_v29  ;;  %vm1021_vm4 = vcmp.gt.f32.partialorder %v8399_v1, 20.0  ;;  %vm1023_vm7 = vcmp.gt.f32.partialorder %v8402_v2, 20.0 }
 0x10d   : > { %7252 = vpow2.f32 %v1081_v40  ;;  %v8506_v17 = vmul.f32 100.0, %v8493_v30  ;;  %13893 = vst [vmem:[#allocation31_spill] sm:$0xff] %v8531_v63  ;;  %vm1029_vm12 = vcmp.gt.f32.partialorder %v8428_v22, 20.0  ;;  %vm1037_vm13 = vcmp.gt.f32.partialorder %v8465_v50, 20.0 }
 0x10e   : > { %v8458_v41 = vpop.eup %7242  ;;  %v1093_v44 = vmul.f32 1.442695, %v1005_v19  ;;  %vm1031_vm14 = vcmp.gt.f32.partialorder %v8431_v23, 20.0 }
 0x10f   : > { %v8461_v45 = vpop.eup %7244  ;;  %v1109_v48 = vadd.f32 1.0, %v8458_v41  ;;  %v8467_v51 = vpop.f32.mrb[10].mxu0  ;;  %v1112_v38 = vmul.f32 -0.5, %v8458_v41  ;;  %v1007_v19 = vmin.f32 %v8506_v17, 20.0 }
 0x110   : > { %v8469_v52 = vpop.f32.mrb[10].mxu1  ;;  %v1127_v53 = vadd.f32 1.0, %v8461_v45  ;;  %v8475_v61 = vpop.f32.mrb[11].mxu0  ;;  %v1133_v5 = vand.u32 2147483647, %v8461_v45 }
 0x111   : > { %v8477_v62 = vpop.f32.mrb[11].mxu1  ;;  %7254 = vlog2.f32 %v1109_v48  ;;  %v1130_v48 = vmul.f32 -0.5, %v8461_v45  ;;  %v1113_v13 = vadd.f32 1.0, %v1112_v38  ;;  %v1097_v28 = vmul.f32 1.442695, %v1007_v19 }
 0x112   : > { %7256 = vlog2.f32 %v1127_v53  ;;  %v8487_v3 = vpop.eup %7246  ;;  %v8509_v53 = vmul.f32 100.0, %v8480_v16  ;;  %vm8556_vm6 = vcmp.lt.f32.partialorder %v1133_v5, 0.0004427343 }
 0x113   : > { %7258 = vpow2.f32 %v1047_v49  ;;  %v8483_v20 = vpop.f32.mrb[12].mxu0  ;;  %v8485_v27 = vpop.f32.mrb[12].mxu1  ;;  %v1181_v40 = vadd.f32 1.0, %v8487_v3  ;;  %v1184_v9 = vmul.f32 -0.5, %v8487_v3  ;;  %v1131_v58 = vadd.f32 1.0, %v1130_v48 }
 0x114   : > { %7260 = vpow2.f32 %v1051_v57  ;;  %v8495_v34 = vpop.f32.mrb[13].mxu0  ;;  %v8497_v37 = vpop.f32.mrb[13].mxu1  ;;  %13888 = vst [vmem:[#allocation26_spill] sm:$0xff] %v8509_v53  ;;  %v1000_v55 = vmin.f32 %v8509_v53, 20.0  ;;  %v1187_v48 = vand.u32 2147483647, %v8487_v3 }
 0x115   : > { %v8499_v4 = vpop.eup %7248  ;;  %7262 = vpow2.f32 %v1063_v11  ;;  %v998_v11 = vmin.f32 %v8490_v29, 20.0 }
 0x116   : > { %v1199_v49 = vadd.f32 1.0, %v8499_v4  ;;  %7264 = vpow2.f32 %v1067_v12  ;;  %v8521_v12 = vpop.eup %7250  ;;  %vm8572_vm8 = vcmp.lt.f32.partialorder %v1187_v48, 0.0004427343 }
 0x117   : > { %7266 = vlog2.f32 %v1181_v40  ;;  %v8511_v57 = vpop.f32.mrb[14].mxu0  ;;  %v8513_v0 = vpop.f32.mrb[14].mxu1  ;;  %v1115_v40 = vand.u32 2147483647, %v8458_v41  ;;  %v1253_v15 = vadd.f32 1.0, %v8521_v12 }
 0x118   : > { %13889 = vst [vmem:[#allocation27_spill] sm:$0xff] %v8511_v57  ;;  %13890 = vst [vmem:[#allocation28_spill] sm:$0xff] %v8513_v0  ;;  %7268 = vlog2.f32 %v1199_v49  ;;  %v8517_v14 = vpop.f32.mrb[15].mxu0  ;;  %v8519_v10 = vpop.f32.mrb[15].mxu1  ;;  %v1202_v49 = vmul.f32 -0.5, %v8499_v4 }
 0x119   : > { %13891 = vst [vmem:[#allocation29_spill] sm:$0xff] %v8517_v14  ;;  %13892 = vst [vmem:[#allocation30_spill] sm:$0xff] %v8519_v10  ;;  %7270 = vpow2.f32 %v1093_v44  ;;  %v8525_v16 = vpop.eup %7252  ;;  %v1079_v21 = vmul.f32 1.442695, %v998_v11  ;;  %v1114_v10 = vmul.f32 %v8458_v41, %v1113_v13  ;;  %v1185_v14 = vadd.f32 1.0, %v1184_v9 }
 0x11a   : > { %v1271_v38 = vadd.f32 1.0, %v8525_v16  ;;  %7272 = vlog2.f32 %v1253_v15  ;;  %v1205_v0 = vand.u32 2147483647, %v8499_v4  ;;  %v1203_v15 = vadd.f32 1.0, %v1202_v49 }
 0x11b   : > { %v7255_v29 = vpop.eup %7254  ;;  %7274 = vpow2.f32 %v1097_v28  ;;  %v8548_v11 = vmul.f32 100.0, %v8531_v63  ;;  %vm8552_vm5 = vcmp.lt.f32.partialorder %v1115_v40, 0.0004427343  ;;  %v8569_v40 = vadd.f32 %v8448_v32, %v8366_v39 }
 0x11c   : > { %v7257_v44 = vpop.eup %7256  ;;  %v1111_v18 = vmul.f32 0.6931472, %v7255_v29  ;;  %v1132_v29 = vmul.f32 %v8461_v45, %v1131_v58  ;;  %7276 = vlog2.f32 %v1271_v38  ;;  %v1083_v45 = vmul.f32 1.442695, %v1000_v55 }
 0x11d   : > { %v8537_v8 = vpop.eup %7258  ;;  %v1129_v24 = vmul.f32 0.6931472, %v7257_v44  ;;  %7278 = vpow2.f32 %v1079_v21  ;;  %v1186_v49 = vmul.f32 %v8487_v3, %v1185_v14  ;;  %vm8576_vm9 = vcmp.lt.f32.partialorder %v1205_v0, 0.0004427343 }
 0x11e   : > { %v8541_v57 = vpop.eup %7260  ;;  %v1117_v28 = vsel %vm8552_vm5, %v1114_v10, %v1111_v18  ;;  %v1256_v10 = vmul.f32 -0.5, %v8521_v12  ;;  %v1204_v21 = vmul.f32 %v8499_v4, %v1203_v15  ;;  %v1274_v32 = vmul.f32 -0.5, %v8525_v16 }
 0x11f   : > { %v8550_v13 = vpop.eup %7262  ;;  %v1135_v19 = vsel %vm8556_vm6, %v1132_v29, %v1129_v24  ;;  %v1006_v24 = vmin.f32 %v8548_v11, 20.0  ;;  %v1398_v14 = vmul.f32 0.01, %v1117_v28  ;;  %v8588_v0 = vadd.f32 %v8450_v33, %v8366_v39 }
 0x120   : > { %v8561_v58 = vpop.eup %7264  ;;  %v1400_v3 = vmul.f32 0.01, %v1135_v19  ;;  %v1259_v41 = vand.u32 2147483647, %v8521_v12  ;;  %v8595_v15 = vmul.f32 100.0, %v8569_v40  ;;  %v1257_v19 = vadd.f32 1.0, %v1256_v10 }
 0x121   : > { %v7267_v5 = vpop.eup %7266  ;;  %v1275_v53 = vadd.f32 1.0, %v1274_v32  ;;  %v8607_v44 = vsel %vm1013_vm2, %v8369_v42, %v1398_v14  ;;  %v1095_v14 = vmul.f32 1.442695, %v1006_v24  ;;  %v8653_v24 = vadd.f32 %v8453_v35, %v8366_v39 }
 0x122   : > { %v7269_v18 = vpop.eup %7268  ;;  %v1183_v38 = vmul.f32 0.6931472, %v7267_v5  ;;  %v8612_v55 = vsel %vm1015_vm3, %v8372_v43, %v1400_v3  ;;  %v985_v47 = vmin.f32 %v8595_v15, 20.0  ;;  %vm8638_vm10 = vcmp.lt.f32.partialorder %v1259_v41, 0.0004427343 }
 0x123   : > { %v8584_v29 = vpop.eup %7270  ;;  %v1201_v48 = vmul.f32 0.6931472, %v7269_v18  ;;  %v1277_v18 = vand.u32 2147483647, %v8525_v16  ;;  %v1258_v2 = vmul.f32 %v8521_v12, %v1257_v19  ;;  %13907 = vst [vmem:[#allocation33_spill] sm:$0xff] %v8653_v24  ;;  %vm1039_vm3 = vcmp.gt.f32.partialorder %v8506_v17, 20.0 }
 0x124   : > { %v1189_v9 = vsel %vm8572_vm8, %v1186_v49, %v1183_v38  ;;  %v1325_v4 = vadd.f32 1.0, %v8584_v29  ;;  %v7273_v63 = vpop.eup %7272  ;;  %v8602_v49 = vadd.f32 %v8435_v25, %v8437_v26  ;;  %v8620_v38 = vmul.f32 100.0, %v8588_v0 }
 0x125   : > { %v1406_v5 = vmul.f32 0.01, %v1189_v9  ;;  %v1207_v28 = vsel %vm8576_vm9, %v1204_v21, %v1201_v48  ;;  %v8622_v25 = vpop.eup %7274  ;;  %v1328_v43 = vmul.f32 -0.5, %v8584_v29  ;;  %v1255_v21 = vmul.f32 0.6931472, %v7273_v63 }
 0x126   : > { %v1408_v33 = vmul.f32 0.01, %v1207_v28  ;;  %7280 = vlog2.f32 %v1325_v4  ;;  %13902 = vst [vmem:[#allocation32_spill] sm:$0xff] %v8602_v49  ;;  %v7277_v1 = vpop.eup %7276  ;;  %v1343_v32 = vadd.f32 1.0, %v8622_v25  ;;  %vm8642_vm11 = vcmp.lt.f32.partialorder %v1277_v18, 0.0004427343 }
 0x127   : > { %v8617_v10 = vsel %vm1021_vm4, %v8390_v59, %v1406_v5  ;;  %v8636_v3 = vpop.eup %7278  ;;  %7282 = vpow2.f32 %v1083_v45  ;;  %v8649_v63 = vmul.f32 100.0, %v8602_v49  ;;  %v1273_v9 = vmul.f32 0.6931472, %v7277_v1 }
 0x128   : > { %v8629_v42 = vsel %vm1023_vm7, %v8393_v60, %v1408_v33  ;;  %7284 = vlog2.f32 %v1343_v32  ;;  %v1329_v41 = vadd.f32 1.0, %v1328_v43  ;;  %v1053_v4 = vmul.f32 1.442695, %v985_v47 }
 0x129   : > { %v987_v5 = vmin.f32 %v8620_v38, 20.0  ;;  %v1261_v45 = vsel %vm8638_vm10, %v1258_v2, %v1255_v21  ;;  %v1276_v28 = vmul.f32 %v8525_v16, %v1275_v53  ;;  %v1346_v12 = vmul.f32 -0.5, %v8622_v25 }
 0x12a   : > { %7286 = vpow2.f32 %v1095_v14  ;;  %v1331_v19 = vand.u32 2147483647, %v8584_v29  ;;  %v8664_v18 = vadd.f32 %v8455_v36, %v8366_v39  ;;  %v1008_v33 = vmin.f32 %v8649_v63, 20.0 }
 0x12b   : > { %7288 = vpow2.f32 %v1053_v4  ;;  %v1057_v35 = vmul.f32 1.442695, %v987_v5  ;;  %v8668_v43 = vmul.f32 100.0, %v8653_v24  ;;  %v8672_v16 = vadd.f32 %v8467_v51, %v8382_v54 }
 0x12c   : > { %13908 = vst [vmem:[#allocation34_spill] sm:$0xff] %v8664_v18  ;;  %v8676_v53 = vadd.f32 %v8469_v52, %v8382_v54  ;;  %v1414_v1 = vmul.f32 0.01, %v1261_v45  ;;  %v1279_v21 = vsel %vm8642_vm11, %v1276_v28, %v1273_v9  ;;  %v1330_v39 = vmul.f32 %v8584_v29, %v1329_v41 }
 0x12d   : > { %13909 = vst [vmem:[#allocation35_spill] sm:$0xff] %v8668_v43  ;;  %7290 = vpow2.f32 %v1057_v35  ;;  %v1347_v32 = vadd.f32 1.0, %v1346_v12  ;;  %v8682_v14 = vmul.f32 100.0, %v8672_v16  ;;  %vm1332_vm15 = vcmp.lt.f32.partialorder %v1331_v19, 0.0004427343 }
 0x12e   : > { %v8685_v51 = vmul.f32 100.0, %v8676_v53  ;;  %v8689_v52 = vmul.f32 100.0, %v8664_v18  ;;  %v8693_v48 = vadd.f32 %v8475_v61, %v8382_v54  ;;  %v8697_v29 = vadd.f32 %v8483_v20, %v8387_v56 }
 0x12f   : > { %v1349_v2 = vand.u32 2147483647, %v8622_v25  ;;  %v993_v9 = vmin.f32 %v8682_v14, 20.0  ;;  %v8707_v5 = vsel %vm1029_vm12, %v8408_v6, %v1414_v1  ;;  %v1416_v61 = vmul.f32 0.01, %v1279_v21 }
 0x130   : > { %v7281_v47 = vpop.eup %7280  ;;  %13910 = vst [vmem:[#allocation36_spill] sm:$0xff] %v8689_v52  ;;  %13911 = vst [vmem:[#allocation37_spill] sm:$0xff] %v8693_v48  ;;  %v995_v41 = vmin.f32 %v8685_v51, 20.0  ;;  %v1099_v28 = vmul.f32 1.442695, %v1008_v33  ;;  %v1348_v20 = vmul.f32 %v8622_v25, %v1347_v32  ;;  %v986_v19 = vmin.f32 %v8668_v43, 20.0 }
 0x131   : > { %v1327_v36 = vmul.f32 0.6931472, %v7281_v47  ;;  %v8702_v4 = vpop.eup %7282  ;;  %v1069_v35 = vmul.f32 1.442695, %v993_v9  ;;  %v8717_v22 = vmul.f32 100.0, %v8693_v48  ;;  %v8720_v6 = vmul.f32 100.0, %v8697_v29 }
 0x132   : > { %v7285_v12 = vpop.eup %7284  ;;  %v1073_v47 = vmul.f32 1.442695, %v995_v41  ;;  %vm1350_vm2 = vcmp.lt.f32.partialorder %v1349_v2, 0.0004427343  ;;  %v8728_v1 = vadd.f32 %v8485_v27, %v8387_v56  ;;  %v988_v21 = vmin.f32 %v8689_v52, 20.0 }
 0x133   : > { %v1333_v60 = vsel %vm1332_vm15, %v1330_v39, %v1327_v36  ;;  %v1345_v36 = vmul.f32 0.6931472, %v7285_v12  ;;  %13912 = vst [vmem:[#allocation38_spill] sm:$0xff] %v8717_v22  ;;  %7292 = vpow2.f32 %v1069_v35  ;;  %v1001_v32 = vmin.f32 %v8720_v6, 20.0 }
 0x134   : > { %v1422_v45 = vmul.f32 0.01, %v1333_v60  ;;  %v8722_v33 = vpop.eup %7286  ;;  %7294 = vpow2.f32 %v1073_v47  ;;  %v1055_v41 = vmul.f32 1.442695, %v986_v19  ;;  %v994_v27 = vmin.f32 %v8717_v22, 20.0 }
 0x135   : > { %v1351_v50 = vsel %vm1350_vm2, %v1348_v20, %v1345_v36  ;;  %7296 = vpow2.f32 %v1099_v28  ;;  %v8739_v12 = vmul.f32 100.0, %v8728_v1  ;;  %v8744_v20 = vsel %vm1031_vm14, %v8411_v7, %v1416_v61 }
 0x136   : > { %v8714_v39 = vsel %vm1037_vm13, %v8446_v31, %v1422_v45  ;;  %v7289_v31 = vpop.eup %7288  ;;  %v1424_v60 = vmul.f32 0.01, %v1351_v50  ;;  %v8734_v45 = vadd.f32 %v8477_v62, %v8382_v54  ;;  %13914 = vst [vmem:[#allocation40_spill] sm:$0xff] %v8744_v20  ;;  %v1085_v54 = vmul.f32 1.442695, %v1001_v32  ;;  %v13919_v50 = vld [vmem:[#allocation27_spill] sm:$0xff] }
 0x137   : > { %v1145_v9 = vadd.f32 1.0, %v7289_v31  ;;  %v7291_v2 = vpop.eup %7290  ;;  %v1059_v28 = vmul.f32 1.442695, %v988_v21  ;;  %v8753_v35 = vadd.f32 %v8495_v34, %v8387_v56  ;;  %v1003_v7 = vmin.f32 %v8739_v12, 20.0 }
 0x138   : > { %13913 = vst [vmem:[#allocation39_spill] sm:$0xff] %v8734_v45  ;;  %v8747_v19 = vsel %vm1039_vm3, %v8493_v30, %v1424_v60  ;;  %v1163_v17 = vadd.f32 1.0, %v7291_v2  ;;  %v8756_v47 = vmul.f32 100.0, %v8734_v45  ;;  %v1148_v23 = vmul.f32 -0.5, %v7289_v31 }
 0x139   : > { %13915 = vst [vmem:[#allocation41_spill] sm:$0xff] %v8747_v19  ;;  %7298 = vlog2.f32 %v1145_v9  ;;  %13916 = vst [vmem:[#allocation42_spill] sm:$0xff] %v8753_v35  ;;  %v1071_v30 = vmul.f32 1.442695, %v994_v27  ;;  %v1089_v61 = vmul.f32 1.442695, %v1003_v7  ;;  %v8761_v36 = vadd.f32 %v8497_v37, %v8387_v56 }
 0x13a   : > { %7300 = vpow2.f32 %v1055_v41  ;;  %13917 = vst [vmem:[#allocation43_spill] sm:$0xff] %v8756_v47  ;;  %v8765_v21 = vadd.f32 %v13919_v50, %v8437_v26  ;;  %v1166_v34 = vmul.f32 -0.5, %v7291_v2  ;;  %v8768_v32 = vmul.f32 100.0, %v8753_v35  ;;  %v13922_v50 = vld [vmem:[#allocation28_spill] sm:$0xff] }
 0x13b   : > { %7302 = vlog2.f32 %v1163_v17  ;;  %13918 = vst [vmem:[#allocation44_spill] sm:$0xff] %v8761_v36  ;;  %v1151_v9 = vand.u32 2147483647, %v7289_v31  ;;  %v996_v41 = vmin.f32 %v8756_v47, 20.0  ;;  %v1169_v17 = vand.u32 2147483647, %v7291_v2 }
 0x13c   : > { %7304 = vpow2.f32 %v1085_v54  ;;  %13920 = vst [vmem:[#allocation27_spill] sm:$0xff] %v8768_v32  ;;  %v1149_v54 = vadd.f32 1.0, %v1148_v23  ;;  %v8777_v37 = vmul.f32 100.0, %v8765_v21  ;;  %v8781_v7 = vmul.f32 100.0, %v8761_v36 }
 0x13d   : > { %7306 = vpow2.f32 %v1059_v28  ;;  %v8770_v60 = vpop.eup %7292  ;;  %v8785_v62 = vadd.f32 %v13922_v50, %v8437_v26  ;;  %v1167_v25 = vadd.f32 1.0, %v1166_v34  ;;  %v1002_v23 = vmin.f32 %v8768_v32, 20.0 }
 0x13e   : > { %7308 = vpow2.f32 %v1089_v61  ;;  %v8773_v27 = vpop.eup %7294  ;;  %v1217_v56 = vadd.f32 1.0, %v8770_v60  ;;  %13921 = vst [vmem:[#allocation45_spill] sm:$0xff] %v8781_v7  ;;  %vm8790_vm4 = vcmp.lt.f32.partialorder %v1151_v9, 0.0004427343  ;;  %v1220_v46 = vmul.f32 -0.5, %v8770_v60 }
 0x13f   : > { %7310 = vpow2.f32 %v1071_v30  ;;  %v1235_v28 = vadd.f32 1.0, %v8773_v27  ;;  %v8787_v61 = vpop.eup %7296  ;;  %v1075_v36 = vmul.f32 1.442695, %v996_v41  ;;  %v1150_v45 = vmul.f32 %v7289_v31, %v1149_v54 }
 0x140   : > { %7312 = vlog2.f32 %v1217_v56  ;;  %v1238_v50 = vmul.f32 -0.5, %v8773_v27  ;;  %v1009_v18 = vmin.f32 %v8777_v37, 20.0  ;;  %vm8799_vm5 = vcmp.lt.f32.partialorder %v1169_v17, 0.0004427343 }
 0x141   : > { %7314 = vlog2.f32 %v1235_v28  ;;  %v1223_v9 = vand.u32 2147483647, %v8770_v60  ;;  %v1004_v56 = vmin.f32 %v8781_v7, 20.0  ;;  %v8806_v32 = vmul.f32 100.0, %v8785_v62 }
 0x142   : > { %vm1017_vm6 = vcmp.gt.f32.partialorder %v8595_v15, 20.0  ;;  %v1168_v31 = vmul.f32 %v7291_v2, %v1167_v25  ;;  %v1087_v54 = vmul.f32 1.442695, %v1002_v23  ;;  %v1101_v28 = vmul.f32 1.442695, %v1009_v18 }
 0x143   : > { %v7299_v30 = vpop.eup %7298  ;;  %v1221_v24 = vadd.f32 1.0, %v1220_v46  ;;  %v1241_v20 = vand.u32 2147483647, %v8773_v27  ;;  %v1011_v7 = vmin.f32 %v8806_v32, 20.0  ;;  %vm1019_vm7 = vcmp.gt.f32.partialorder %v8620_v38, 20.0 }
 0x144   : > { %v1147_v35 = vmul.f32 0.6931472, %v7299_v30  ;;  %v8797_v47 = vpop.eup %7300  ;;  %v13927_v30 = vld [vmem:[#allocation29_spill] sm:$0xff]  ;;  %v1239_v25 = vadd.f32 1.0, %v1238_v50  ;;  %7316 = vpow2.f32 %v1101_v28  ;;  %vm1025_vm8 = vcmp.gt.f32.partialorder %v8682_v14, 20.0 }
 0x145   : > { %v7303_v41 = vpop.eup %7302  ;;  %v8811_v52 = vadd.f32 %v13927_v30, %v8437_v26  ;;  %vm8823_vm9 = vcmp.lt.f32.partialorder %v1223_v9, 0.0004427343  ;;  %7318 = vpow2.f32 %v1075_v36  ;;  %v1091_v23 = vmul.f32 1.442695, %v1004_v56 }
 0x146   : > { %v7305_v17 = vpop.eup %7304  ;;  %v1165_v48 = vmul.f32 0.6931472, %v7303_v41  ;;  %v1153_v22 = vsel %vm8790_vm4, %v1150_v45, %v1147_v35  ;;  %v1105_v41 = vmul.f32 1.442695, %v1011_v7  ;;  %vm1027_vm10 = vcmp.gt.f32.partialorder %v8685_v51, 20.0 }
 0x147   : > { %13928 = vst [vmem:[#allocation28_spill] sm:$0xff] %v8811_v52  ;;  %v8815_v19 = vpop.eup %7306  ;;  %v1289_v18 = vadd.f32 1.0, %v7305_v17  ;;  %v1292_v45 = vmul.f32 -0.5, %v7305_v17  ;;  %v8833_v35 = vmul.f32 100.0, %v8811_v52  ;;  %v1402_v50 = vmul.f32 0.01, %v1153_v22 }
 0x148   : > { %v8820_v2 = vpop.eup %7308  ;;  %v1171_v59 = vsel %vm8799_vm5, %v1168_v31, %v1165_v48  ;;  %v1295_v9 = vand.u32 2147483647, %v7305_v17  ;;  %v1222_v7 = vmul.f32 %v8770_v60, %v1221_v24  ;;  %v1240_v56 = vmul.f32 %v8773_v27, %v1239_v25  ;;  %v13933_v22 = vld [vmem:[#allocation30_spill] sm:$0xff] }
 0x149   : > { %v8827_v30 = vpop.eup %7310  ;;  %7320 = vlog2.f32 %v1289_v18  ;;  %v1307_v28 = vadd.f32 1.0, %v8820_v2  ;;  %vm8838_vm11 = vcmp.lt.f32.partialorder %v1241_v20, 0.0004427343  ;;  %v1404_v31 = vmul.f32 0.01, %v1171_v59 }
 0x14a   : > { %7322 = vpow2.f32 %v1105_v41  ;;  %v7313_v36 = vpop.eup %7312  ;;  %v8844_v52 = vadd.f32 %v13933_v22, %v8437_v26  ;;  %v1293_v41 = vadd.f32 1.0, %v1292_v45  ;;  %v1010_v43 = vmin.f32 %v8833_v35, 20.0 }
 0x14b   : > { %7324 = vpow2.f32 %v1087_v54  ;;  %v7315_v48 = vpop.eup %7314  ;;  %v1219_v18 = vmul.f32 0.6931472, %v7313_v36  ;;  %v1118_v24 = vadd.f32 1.0, %v8537_v8  ;;  %v8851_v20 = vsel %vm1017_vm6, %v8569_v40, %v1402_v50 }
 0x14c   : > { %7326 = vlog2.f32 %v1307_v28  ;;  %v1237_v49 = vmul.f32 0.6931472, %v7315_v48  ;;  %vm8855_vm12 = vcmp.lt.f32.partialorder %v1295_v9, 0.0004427343  ;;  %v1310_v25 = vmul.f32 -0.5, %v8820_v2 }
 0x14d   : > { %v1225_v60 = vsel %vm8823_vm9, %v1222_v7, %v1219_v18  ;;  %7328 = vpow2.f32 %v1091_v23  ;;  %v1313_v59 = vand.u32 2147483647, %v8820_v2  ;;  %v8866_v40 = vsel %vm1019_vm7, %v8588_v0, %v1404_v31 }
 0x14e   : > { %v1410_v26 = vmul.f32 0.01, %v1225_v60  ;;  %v1243_v54 = vsel %vm8838_vm11, %v1240_v56, %v1237_v49  ;;  %v8869_v46 = vmul.f32 100.0, %v8844_v52  ;;  %7330 = vlog2.f32 %v1118_v24  ;;  %v7317_v45 = vpop.eup %7316 }
 0x14f   : > { %v1412_v15 = vmul.f32 0.01, %v1243_v54  ;;  %v1294_v49 = vmul.f32 %v7305_v17, %v1293_v41  ;;  %v1103_v50 = vmul.f32 1.442695, %v1010_v43  ;;  %v1121_v9 = vmul.f32 -0.5, %v8537_v8  ;;  %v8877_v28 = vpop.eup %7318 }
 0x150   : > { %v8874_v23 = vsel %vm1025_vm8, %v8672_v16, %v1410_v26  ;;  %v1361_v36 = vadd.f32 1.0, %v7317_v45  ;;  %v1190_v7 = vadd.f32 1.0, %v8550_v13  ;;  %v1311_v43 = vadd.f32 1.0, %v1310_v25  ;;  %v13942_v16 = vld [vmem:[#allocation18_spill] sm:$0xff] }
 0x151   : > { %v6980_v0 = vpack.c.bf16 %v8874_v23, %v8851_v20  ;;  %v8884_v38 = vsel %vm1027_vm10, %v8676_v53, %v1412_v15  ;;  %vm8889_vm13 = vcmp.lt.f32.partialorder %v1313_v59, 0.0004427343  ;;  %v1364_v56 = vmul.f32 -0.5, %v7317_v45  ;;  %v13993_v23 = vld [vmem:[#allocation34_spill] sm:$0xff] }
 0x152   : > { %vm1033_vm14 = vcmp.gt.f32.partialorder %v8720_v6, 20.0  ;;  %7332 = vlog2.f32 %v1361_v36  ;;  %v1012_v53 = vmin.f32 %v8869_v46, 20.0  ;;  %v1124_v51 = vand.u32 2147483647, %v8537_v8 }
 0x153   : > { %v7321_v14 = vpop.eup %7320  ;;  %7334 = vpow2.f32 %v1103_v50  ;;  %v1122_v22 = vadd.f32 1.0, %v1121_v9  ;;  %v1193_v41 = vmul.f32 -0.5, %v8550_v13  ;;  %v1367_v26 = vand.u32 2147483647, %v7317_v45  ;;  %v13954_v9 = vld [vmem:[#allocation15_spill] sm:$0xff] }
 0x154   : > { %v7323_v34 = vpop.eup %7322  ;;  %v1291_v48 = vmul.f32 0.6931472, %v7321_v14  ;;  %7336 = vlog2.f32 %v1190_v7  ;;  %vm1035_vm15 = vcmp.gt.f32.partialorder %v8739_v12, 20.0  ;;  %v1312_v59 = vmul.f32 %v8820_v2, %v1311_v43 }
 0x155   : > { %v8896_v31 = vpop.eup %7324  ;;  %v1379_v18 = vadd.f32 1.0, %v7323_v34  ;;  %v1382_v54 = vmul.f32 -0.5, %v7323_v34  ;;  %v1365_v15 = vadd.f32 1.0, %v1364_v56  ;;  %v8905_v50 = vmul.f32 1.442695, %v1012_v53 }
 0x156   : > { %v7327_v24 = vpop.eup %7326  ;;  %v1297_v60 = vsel %vm8855_vm12, %v1294_v49, %v1291_v48  ;;  %vm8907_vm2 = vcmp.lt.f32.partialorder %v1124_v51, 0.0004427343  ;;  %v1136_v27 = vadd.f32 1.0, %v8541_v57  ;;  %v1139_v49 = vmul.f32 -0.5, %v8541_v57 }
 0x157   : > { %v1309_v25 = vmul.f32 0.6931472, %v7327_v24  ;;  %7338 = vlog2.f32 %v1379_v18  ;;  %v8903_v36 = vpop.eup %7328  ;;  %v1418_v7 = vmul.f32 0.01, %v1297_v60  ;;  %v1385_v48 = vand.u32 2147483647, %v7323_v34 }
 0x158   : > { %v1194_v2 = vadd.f32 1.0, %v1193_v41  ;;  %v7331_v43 = vpop.eup %7330  ;;  %vm8915_vm3 = vcmp.lt.f32.partialorder %v1367_v26, 0.0004427343  ;;  %v1383_v53 = vadd.f32 1.0, %v1382_v54  ;;  %v1123_v51 = vmul.f32 %v8537_v8, %v1122_v22  ;;  %v13943_v54 = vld [vmem:[#allocation21_spill] sm:$0xff] }
 0x159   : > { %v1315_v14 = vsel %vm8889_vm13, %v1312_v59, %v1309_v25  ;;  %7340 = vlog2.f32 %v1136_v27  ;;  %vm1041_vm4 = vcmp.gt.f32.partialorder %v8777_v37, 20.0  ;;  %v1366_v18 = vmul.f32 %v7317_v45, %v1365_v15 }
 0x15a   : > { %v1120_v24 = vmul.f32 0.6931472, %v7331_v43  ;;  %v1196_v60 = vand.u32 2147483647, %v8550_v13  ;;  %v1208_v17 = vadd.f32 1.0, %v8561_v58  ;;  %v1140_v59 = vadd.f32 1.0, %v1139_v49 }
 0x15b   : > { %v1420_v25 = vmul.f32 0.01, %v1315_v14  ;;  %v1142_v41 = vand.u32 2147483647, %v8541_v57  ;;  %v1262_v26 = vadd.f32 1.0, %v8636_v3  ;;  %vm1014_vm5 = vcmp.gt.f32.partialorder %v13942_v16, 20.0 }
 0x15c   : > { %vm1022_vm6 = vcmp.gt.f32.partialorder %v13943_v54, 20.0  ;;  %v8930_v8 = vsel %vm1033_vm14, %v8697_v29, %v1418_v7  ;;  %vm8932_vm7 = vcmp.lt.f32.partialorder %v1385_v48, 0.0004427343  ;;  %v1195_v22 = vmul.f32 %v8550_v13, %v1194_v2  ;;  %v7333_v15 = vpop.eup %7332 }
 0x15d   : > { %7342 = vlog2.f32 %v1208_v17  ;;  %vm1043_vm8 = vcmp.gt.f32.partialorder %v8806_v32, 20.0  ;;  %v1384_v27 = vmul.f32 %v7323_v34, %v1383_v53  ;;  %v1126_v49 = vsel %vm8907_vm2, %v1123_v51, %v1120_v24  ;;  %v8941_v6 = vpop.eup %7334 }
 0x15e   : > { %v1211_v14 = vmul.f32 -0.5, %v8561_v58  ;;  %7344 = vlog2.f32 %v1262_v26  ;;  %v1363_v29 = vmul.f32 0.6931472, %v7333_v15  ;;  %v1214_v7 = vand.u32 2147483647, %v8561_v58  ;;  %v7337_v2 = vpop.eup %7336 }
 0x15f   : > { %v1265_v48 = vmul.f32 -0.5, %v8636_v3  ;;  %v1334_v13 = vadd.f32 1.0, %v8722_v33  ;;  %v8949_v34 = vsel %vm1035_vm15, %v8728_v1, %v1420_v25  ;;  %vm8951_vm9 = vcmp.lt.f32.partialorder %v1196_v60, 0.0004427343 }
 0x160   : > { %v1141_v43 = vmul.f32 %v8541_v57, %v1140_v59  ;;  %vm8956_vm10 = vcmp.lt.f32.partialorder %v1142_v41, 0.0004427343  ;;  %v1369_v24 = vsel %vm8915_vm3, %v1366_v18, %v1363_v29  ;;  %v1192_v17 = vmul.f32 0.6931472, %v7337_v2  ;;  %v13952_v18 = vld [vmem:[#allocation20_spill] sm:$0xff] }
 0x161   : > { %v7339_v51 = vpop.eup %7338  ;;  %v1399_v26 = vmul.f32 0.01, %v1126_v49  ;;  %7346 = vlog2.f32 %v1334_v13  ;;  %v1426_v12 = vmul.f32 0.01, %v1369_v24  ;;  %v1212_v25 = vadd.f32 1.0, %v1211_v14  ;;  %v13953_v49 = vld [vmem:[#allocation22_spill] sm:$0xff] }
 0x162   : > { %v1381_v1 = vmul.f32 0.6931472, %v7339_v51  ;;  %v1280_v60 = vadd.f32 1.0, %v8702_v4  ;;  %v1198_v15 = vsel %vm8951_vm9, %v1195_v22, %v1192_v17  ;;  %vm8965_vm11 = vcmp.lt.f32.partialorder %v1214_v7, 0.0004427343  ;;  %v13955_v24 = vld [vmem:[#allocation17_spill] sm:$0xff] }
 0x163   : > { %v1266_v59 = vadd.f32 1.0, %v1265_v48  ;;  %v1268_v41 = vand.u32 2147483647, %v8636_v3  ;;  %v7341_v56 = vpop.eup %7340  ;;  %vm1016_vm12 = vcmp.gt.f32.partialorder %v13952_v18, 20.0  ;;  %vm1024_vm13 = vcmp.gt.f32.partialorder %v13953_v49, 20.0 }
 0x164   : > { %v8975_v14 = vsel %vm1041_vm4, %v8765_v21, %v1426_v12  ;;  %v1387_v22 = vsel %vm8932_vm7, %v1384_v27, %v1381_v1  ;;  %v1407_v29 = vmul.f32 0.01, %v1198_v15  ;;  %v1337_v7 = vmul.f32 -0.5, %v8722_v33 }
 0x165   : > { %v6984_v48 = vpack.c.bf16 %v8975_v14, %v8930_v8  ;;  %v1428_v13 = vmul.f32 0.01, %v1387_v22  ;;  %v1138_v2 = vmul.f32 0.6931472, %v7341_v56  ;;  %7348 = vlog2.f32 %v1280_v60  ;;  %v13956_v60 = vld [vmem:[#allocation25_spill] sm:$0xff] }
 0x166   : > { %v1431_v51 = vsel %vm1014_vm5, %v13954_v9, %v1399_v26  ;;  %v1439_v21 = vsel %vm1022_vm6, %v13955_v24, %v1407_v29  ;;  %v1213_v37 = vmul.f32 %v8561_v58, %v1212_v25  ;;  %v1352_v45 = vadd.f32 1.0, %v8787_v61 }
 0x167   : > { %v7343_v27 = vpop.eup %7342  ;;  %v8993_v17 = vsel %vm1043_vm8, %v8785_v62, %v1428_v13  ;;  %v6962_v12 = vpack.c.bf16 %v1439_v21, %v1431_v51  ;;  %v1144_v1 = vsel %vm8956_vm10, %v1141_v43, %v1138_v2  ;;  %v1340_v16 = vand.u32 2147483647, %v8722_v33 }
 0x168   : > { %v7345_v26 = vpop.eup %7344  ;;  %vm1030_vm14 = vcmp.gt.f32.partialorder %v13956_v60, 20.0  ;;  %vm1038_vm15 = vcmp.gt.f32.partialorder %v8548_v11, 20.0  ;;  %v6992_v58 = vpack.c.bf16 %v8993_v17, %v8949_v34  ;;  %v1210_v54 = vmul.f32 0.6931472, %v7343_v27 }
 0x169   : > { %v1338_v25 = vadd.f32 1.0, %v1337_v7  ;;  %v1283_v32 = vmul.f32 -0.5, %v8702_v4  ;;  %6963 = vmatprep.subr.bf16.mxu0 %v6962_v12  ;;  %v1401_v62 = vmul.f32 0.01, %v1144_v1  ;;  %v1264_v15 = vmul.f32 0.6931472, %v7345_v26 }
 0x16a   : > { %v1267_v53 = vmul.f32 %v8636_v3, %v1266_v59  ;;  %7350 = vlog2.f32 %v1352_v45  ;;  %v1216_v43 = vsel %vm8965_vm11, %v1213_v37, %v1210_v54  ;;  %v13957_v56 = vpack.c.bf16 %v8617_v10, %v8607_v44  ;;  %v13960_v44 = vld [vmem:[#allocation16_spill] sm:$0xff]  ;;  %v13962_v1 = vld [vmem:[#allocation26_spill] sm:$0xff] }
 0x16b   : > { %vm1269_vm2 = vcmp.lt.f32.partialorder %v1268_v41, 0.0004427343  ;;  %v1355_v22 = vmul.f32 -0.5, %v8787_v61  ;;  %v1154_v29 = vadd.f32 1.0, %v8797_v47  ;;  %v7347_v7 = vpop.eup %7346  ;;  %v1409_v13 = vmul.f32 0.01, %v1216_v43 }
 0x16c   : > { %6965 = vmatpush1.bf16.msra.mxu0 %v13957_v56  ;;  %v1270_v2 = vsel %vm1269_vm2, %v1267_v53, %v1264_v15  ;;  %vm9011_vm3 = vcmp.lt.f32.partialorder %v1340_v16, 0.0004427343  ;;  %v1286_v3 = vand.u32 2147483647, %v8702_v4  ;;  %v1336_v57 = vmul.f32 0.6931472, %v7347_v7 }
 0x16d   : > { %v1339_v59 = vmul.f32 %v8722_v33, %v1338_v25  ;;  %v1284_v51 = vadd.f32 1.0, %v1283_v32  ;;  %7352 = vlog2.f32 %v1154_v29  ;;  %v1433_v10 = vsel %vm1016_vm12, %v13960_v44, %v1401_v62  ;;  %v13961_v41 = vld [vmem:[#allocation19_spill] sm:$0xff] }
 0x16e   : > { %v1441_v24 = vsel %vm1024_vm13, %v13961_v41, %v1409_v13  ;;  %v1415_v21 = vmul.f32 0.01, %v1270_v2  ;;  %v1226_v37 = vadd.f32 1.0, %v8827_v30  ;;  %7354 = vpow2.f32 %v8905_v50  ;;  %v13966_v62 = vld [vmem:[#allocation23_spill] sm:$0xff] }
 0x16f   : > { %v6970_v45 = vpack.c.bf16 %v1441_v24, %v1433_v10  ;;  %v1342_v27 = vsel %vm9011_vm3, %v1339_v59, %v1336_v57  ;;  %v1356_v33 = vadd.f32 1.0, %v1355_v22  ;;  %v7349_v12 = vpop.eup %7348  ;;  %vm1032_vm4 = vcmp.gt.f32.partialorder %v13962_v1, 20.0  ;;  %v13967_v53 = vld [vmem:[#allocation31_spill] sm:$0xff]  ;;  %v9091_v1 = vld [vmem:[%s13627_s3 + $0x8] sm:$0xff] }
 0x170   : > { %v1423_v16 = vmul.f32 0.01, %v1342_v27  ;;  %v1157_v18 = vmul.f32 -0.5, %v8797_v47  ;;  %7356 = vlog2.f32 %v1226_v37  ;;  %v1229_v49 = vmul.f32 -0.5, %v8827_v30  ;;  %v13971_v10 = vld [vmem:[#allocation35_spill] sm:$0xff] }
 0x171   : > { %vm1040_vm5 = vcmp.gt.f32.partialorder %v8649_v63, 20.0  ;;  %6971 = vmatprep.subr.bf16.mxu1 %v6970_v45  ;;  %v1282_v26 = vmul.f32 0.6931472, %v7349_v12  ;;  %v1285_v50 = vmul.f32 %v8702_v4, %v1284_v51  ;;  %vm9032_vm6 = vcmp.lt.f32.partialorder %v1286_v3, 0.0004427343  ;;  %v13977_v63 = vld [vmem:[#allocation38_spill] sm:$0xff] }
 0x172   : > { %v1172_v25 = vadd.f32 1.0, %v8815_v19  ;;  %v13965_v32 = vpack.c.bf16 %v8629_v42, %v8612_v55  ;;  %v1447_v15 = vsel %vm1030_vm14, %v13966_v62, %v1415_v21  ;;  %v1455_v43 = vsel %vm1038_vm15, %v13967_v53, %v1423_v16 }
 0x173   : > { %v1358_v4 = vand.u32 2147483647, %v8787_v61  ;;  %v1160_v56 = vand.u32 2147483647, %v8797_v47  ;;  %v6966_v22 = vpack.c.bf16 %v1455_v43, %v1447_v15  ;;  %v1288_v29 = vsel %vm9032_vm6, %v1285_v50, %v1282_v26 }
 0x174   : > { %6973 = vmatpush1.bf16.msra.mxu1 %v13965_v32  ;;  %v1357_v7 = vmul.f32 %v8787_v61, %v1356_v33  ;;  %7358 = vlog2.f32 %v1172_v25  ;;  %v7351_v55 = vpop.eup %7350  ;;  %v1158_v42 = vadd.f32 1.0, %v1157_v18  ;;  %v1230_v13 = vadd.f32 1.0, %v1229_v49  ;;  %v9061_v61 = vld [vmem:[%s13627_s3] sm:$0xff]  ;;  %v13972_v33 = vld [vmem:[#allocation24_spill] sm:$0xff]  ;;  %v9144_v18 = vld [vmem:[%s13627_s3 + $0x18] sm:$0xff] }
 0x175   : > { %v1232_v60 = vand.u32 2147483647, %v8827_v30  ;;  %v1244_v2 = vadd.f32 1.0, %v8877_v28  ;;  %6967 = vmatprep.subr.bf16.mxu0 %v6966_v22  ;;  %v1354_v11 = vmul.f32 0.6931472, %v7351_v55  ;;  %v1175_v3 = vmul.f32 -0.5, %v8815_v19 }
 0x176   : > { %v1417_v9 = vmul.f32 0.01, %v1288_v29  ;;  %v1298_v57 = vadd.f32 1.0, %v8896_v31  ;;  %vm1359_vm7 = vcmp.lt.f32.partialorder %v1358_v4, 0.0004427343  ;;  %v13968_v59 = vpack.c.bf16 %v8714_v39, %v8707_v5 }
 0x177   : > { %vm1490_vm8 = vcmask 261120   ;;  %vm9063_vm9 = vcmp.lt.f32.partialorder %v1160_v56, 0.0004427343  ;;  %7360 = vlog2.f32 %v1244_v2  ;;  %v7353_v44 = vpop.eup %7352  ;;  %vm1018_vm10 = vcmp.gt.f32.partialorder %v13971_v10, 20.0 }
 0x178   : > { %6969 = vmatpush1.bf16.msra.mxu0 %v13968_v59  ;;  %v1360_v41 = vsel %vm1359_vm7, %v1357_v7, %v1354_v11  ;;  %v1178_v24 = vand.u32 2147483647, %v8815_v19  ;;  %v1247_v5 = vmul.f32 -0.5, %v8877_v28  ;;  %7362 = vlog2.f32 %v1298_v57  ;;  %v9072_v27 = vpop.eup %7354  ;;  %v13997_v59 = vld [vmem:[#allocation42_spill] sm:$0xff] }
 0x179   : > { %v1425_v39 = vmul.f32 0.01, %v1360_v41  ;;  %v1156_v21 = vmul.f32 0.6931472, %v7353_v44  ;;  %v1159_v37 = vmul.f32 %v8797_v47, %v1158_v42  ;;  %v1370_v45 = vadd.f32 1.0, %v8941_v6  ;;  %v13975_v47 = vld [vmem:[#allocation32_spill] sm:$0xff] }
 0x17a   : > { %v1449_v12 = vsel %vm1032_vm4, %v13972_v33, %v1417_v9  ;;  %v1231_v16 = vmul.f32 %v8827_v30, %v1230_v13  ;;  %vm9080_vm11 = vcmp.lt.f32.partialorder %v1232_v60, 0.0004427343  ;;  %v1176_v49 = vadd.f32 1.0, %v1175_v3  ;;  %v7357_v26 = vpop.eup %7356  ;;  %v13980_v13 = vld [vmem:[#allocation41_spill] sm:$0xff]  ;;  %v13981_v60 = vld [vmem:[#allocation40_spill] sm:$0xff] }
 0x17b   : > { %6840 = vmatmul.mubr.msk.f32.vlgmr.msra.gmra.mrb[16].mxu0 %vm1490_vm8, %v9061_v61  ;;  %v1457_v50 = vsel %vm1040_vm5, %v13975_v47, %v1425_v39  ;;  %v13976_v54 = vmov 0.0   ;;  %v1162_v30 = vsel %vm9063_vm9, %v1159_v37, %v1156_v21  ;;  %v1301_v25 = vmul.f32 -0.5, %v8896_v31  ;;  %v9117_v3 = vld [vmem:[%s13627_s3 + $0x10] sm:$0xff] }
 0x17c   : > { %1573 = vmatprep.mubr.f32.mxu0 %v13976_v54  ;;  %7364 = vlog2.f32 %v1370_v45  ;;  %v6974_v32 = vpack.c.bf16 %v1457_v50, %v1449_v12  ;;  %v1228_v62 = vmul.f32 0.6931472, %v7357_v26  ;;  %v1248_v15 = vadd.f32 1.0, %v1247_v5  ;;  %v13985_v41 = vld [vmem:[#allocation33_spill] sm:$0xff]  ;;  %v13987_v50 = vld [vmem:[#allocation36_spill] sm:$0xff] }
 0x17d   : > { %v1250_v53 = vand.u32 2147483647, %v8877_v28  ;;  %vm1026_vm12 = vcmp.gt.f32.partialorder %v13977_v63, 20.0  ;;  %v1403_v43 = vmul.f32 0.01, %v1162_v30  ;;  %v1316_v56 = vadd.f32 1.0, %v8903_v36 }
 0x17e   : > { %vm9098_vm13 = vcmp.lt.f32.partialorder %v1178_v24, 0.0004427343  ;;  %v7359_v22 = vpop.eup %7358  ;;  %6975 = vmatprep.subr.bf16.mxu1 %v6974_v32  ;;  %v1234_v29 = vsel %vm9080_vm11, %v1231_v16, %v1228_v62  ;;  %v1177_v7 = vmul.f32 %v8815_v19, %v1176_v49  ;;  %v1373_v55 = vmul.f32 -0.5, %v8941_v6  ;;  %v13986_v5 = vld [vmem:[#allocation37_spill] sm:$0xff]  ;;  %v13990_v62 = vld [vmem:[#allocation43_spill] sm:$0xff] }
 0x17f   : > { %6841 = vmatmul.mubr.msk.f32.gmra.mrb[18].mxu0 %vm1490_vm8, %v9091_v1  ;;  %v1388_v42 = vadd.f32 1.0, %v9072_v27  ;;  %v13982_v2 = vpack.c.bf16 %v13980_v13, %v13981_v60  ;;  %v1411_v11 = vmul.f32 0.01, %v1234_v29  ;;  %v1174_v9 = vmul.f32 0.6931472, %v7359_v22  ;;  %v13995_v60 = vld [vmem:[#allocation27_spill] sm:$0xff] }
 0x180   : > { %1579 = vmatprep.mubr.f32.mxu0 %v13976_v54  ;;  %v1302_v57 = vadd.f32 1.0, %v1301_v25  ;;  %7366 = vlog2.f32 %v1316_v56  ;;  %v1249_v19 = vmul.f32 %v8877_v28, %v1248_v15  ;;  %vm9120_vm14 = vcmp.lt.f32.partialorder %v1250_v53, 0.0004427343  ;;  %v13994_v56 = vld [vmem:[#allocation39_spill] sm:$0xff] }
 0x181   : > { %6977 = vmatpush1.bf16.msra.mxu1 %v13982_v2  ;;  %v1304_v51 = vand.u32 2147483647, %v8896_v31  ;;  %7368 = vlog2.f32 %v1388_v42  ;;  %v7361_v44 = vpop.eup %7360  ;;  %v1435_v24 = vsel %vm1018_vm10, %v13985_v41, %v1403_v43  ;;  %v1443_v39 = vsel %vm1026_vm12, %v13986_v5, %v1411_v11 }
 0x182   : > { %v1180_v21 = vsel %vm9098_vm13, %v1177_v7, %v1174_v9  ;;  %v1376_v28 = vand.u32 2147483647, %v8941_v6  ;;  %v7363_v37 = vpop.eup %7362  ;;  %v6978_v45 = vpack.c.bf16 %v1443_v39, %v1435_v24  ;;  %v1246_v33 = vmul.f32 0.6931472, %v7361_v44  ;;  %v13998_v44 = vld [vmem:[#allocation28_spill] sm:$0xff] }
 0x183   : > { %6842 = vmatmul.mubr.msk.f32.gmra.mrb[20].mxu0 %vm1490_vm8, %v9117_v3  ;;  %v1374_v10 = vadd.f32 1.0, %v1373_v55  ;;  %v1319_v12 = vmul.f32 -0.5, %v8903_v36  ;;  %v1405_v16 = vmul.f32 0.01, %v1180_v21  ;;  %v1300_v49 = vmul.f32 0.6931472, %v7363_v37 }
 0x184   : > { %6844 = vmatmul.mubr.msk.f32.vlgmr.msra.gmra.mrb[16].mxu1 %vm1490_vm8, %v9061_v61  ;;  %1585 = vmatprep.mubr.f32.mxu0 %v13976_v54  ;;  %v1303_v26 = vmul.f32 %v8896_v31, %v1302_v57  ;;  %v1391_v47 = vmul.f32 -0.5, %v9072_v27  ;;  %vm1020_vm15 = vcmp.gt.f32.partialorder %v13987_v50, 20.0  ;;  %v1252_v30 = vsel %vm9120_vm14, %v1249_v19, %v1246_v33 }
 0x185   : > { %1662 = vmatprep.mubr.f32.mxu1 %v13976_v54  ;;  %6979 = vmatprep.subr.bf16.mxu0 %v6978_v45  ;;  %vm9151_vm2 = vcmp.lt.f32.partialorder %v1304_v51, 0.0004427343  ;;  %vm1028_vm3 = vcmp.gt.f32.partialorder %v13990_v62, 20.0  ;;  %v1413_v15 = vmul.f32 0.01, %v1252_v30  ;;  %v1375_v43 = vmul.f32 %v8941_v6, %v1374_v10 }
 0x186   : > { %v7365_v32 = vpop.eup %7364  ;;  %6981 = vmatpush1.bf16.msra.mxu0 %v6980_v0  ;;  %v1306_v31 = vsel %vm9151_vm2, %v1303_v26, %v1300_v49  ;;  %vm9161_vm4 = vcmp.lt.f32.partialorder %v1376_v28, 0.0004427343  ;;  %v1320_v4 = vadd.f32 1.0, %v1319_v12  ;;  %v1322_v20 = vand.u32 2147483647, %v8903_v36 }
 0x187   : > { %6843 = vmatmul.mubr.msk.f32.gmra.mrb[22].mxu0 %vm1490_vm8, %v9144_v18  ;;  %v1372_v63 = vmul.f32 0.6931472, %v7365_v32  ;;  %v1437_v0 = vsel %vm1020_vm15, %v13993_v23, %v1405_v16  ;;  %v1445_v22 = vsel %vm1028_vm3, %v13994_v56, %v1413_v15  ;;  %v1419_v29 = vmul.f32 0.01, %v1306_v31 }
 0x188   : > { %6845 = vmatmul.mubr.msk.f32.gmra.mrb[18].mxu1 %vm1490_vm8, %v9091_v1  ;;  %v1392_v7 = vadd.f32 1.0, %v1391_v47  ;;  %1745 = vmatprep.mubr.f32.mxu0 %v13976_v54  ;;  %v6986_v55 = vpack.c.bf16 %v1445_v22, %v1437_v0  ;;  %v1394_v6 = vand.u32 2147483647, %v9072_v27  ;;  %vm1034_vm5 = vcmp.gt.f32.partialorder %v13995_v60, 20.0 }
 0x189   : > { %1668 = vmatprep.mubr.f32.mxu1 %v13976_v54  ;;  %v1378_v42 = vsel %vm9161_vm4, %v1375_v43, %v1372_v63  ;;  %vm1042_vm6 = vcmp.gt.f32.partialorder %v8833_v35, 20.0  ;;  %v1321_v57 = vmul.f32 %v8903_v36, %v1320_v4  ;;  %vm1323_vm7 = vcmp.lt.f32.partialorder %v1322_v20, 0.0004427343  ;;  %v14000_v36 = vld [vmem:[#allocation44_spill] sm:$0xff] }
 0x18a   : > { %v7367_v13 = vpop.eup %7366  ;;  %v1427_v2 = vmul.f32 0.01, %v1378_v42  ;;  %6987 = vmatprep.subr.bf16.mxu1 %v6986_v55  ;;  %v13996_v19 = vpack.c.bf16 %v8884_v38, %v8866_v40  ;;  %v1451_v51 = vsel %vm1034_vm5, %v13997_v59, %v1419_v29  ;;  %v1393_v35 = vmul.f32 %v9072_v27, %v1392_v7  ;;  %v13999_v38 = vld [vmem:[#allocation45_spill] sm:$0xff] }
 0x18b   : > { %v7369_v11 = vpop.eup %7368  ;;  %v1318_v9 = vmul.f32 0.6931472, %v7367_v13  ;;  %vm1395_vm9 = vcmp.lt.f32.partialorder %v1394_v6, 0.0004427343  ;;  %vm1036_vm10 = vcmp.gt.f32.partialorder %v13999_v38, 20.0  ;;  %vm1044_vm11 = vcmp.gt.f32.partialorder %v8869_v46, 20.0 }
 0x18c   : > { %6846 = vmatmul.mubr.msk.f32.gmra.mrb[20].mxu1 %vm1490_vm8, %v9117_v3  ;;  %v1459_v41 = vsel %vm1042_vm6, %v13998_v44, %v1427_v2  ;;  %v1390_v24 = vmul.f32 0.6931472, %v7369_v11 }
 0x18d   : > { %6989 = vmatpush1.bf16.msra.mxu1 %v13996_v19  ;;  %1674 = vmatprep.mubr.f32.mxu1 %v13976_v54  ;;  %v6982_v5 = vpack.c.bf16 %v1459_v41, %v1451_v51  ;;  %v1324_v39 = vsel %vm1323_vm7, %v1321_v57, %v1318_v9 }
 0x18e   : > { %v1396_v21 = vsel %vm1395_vm9, %v1393_v35, %v1390_v24  ;;  %v1421_v28 = vmul.f32 0.01, %v1324_v39 }
 0x18f   : > { %6983 = vmatprep.subr.bf16.mxu0 %v6982_v5  ;;  %v1429_v40 = vmul.f32 0.01, %v1396_v21 }
 0x190   : > { %6847 = vmatmul.mubr.msk.f32.gmra.mrb[22].mxu1 %vm1490_vm8, %v9144_v18  ;;  %6985 = vmatpush1.bf16.msra.mxu0 %v6984_v48  ;;  %v1453_v27 = vsel %vm1036_vm10, %v14000_v36, %v1421_v28  ;;  %v9237_v48 = vpop.permute.xlu1 %1477 }
 0x191   : > { %1834 = vmatprep.mubr.f32.mxu1 %v13976_v54  ;;  %v1461_v37 = vsel %vm1044_vm11, %v8844_v52, %v1429_v40  ;;  %v9229_v52 = vpop.permute.xlu0 %1472 }
 0x192   : > { %v6990_v45 = vpack.c.bf16 %v1461_v37, %v1453_v27 }
 0x193   : > { %6848 = vmatmul.mubr.msk.f32.vlgmr.msra.gmra.mrb[24].mxu0 %vm1490_vm8, %v9061_v61 }
 0x194   : > { %6991 = vmatprep.subr.bf16.mxu1 %v6990_v45  ;;  %1751 = vmatprep.mubr.f32.mxu0 %v13976_v54  ;;  %v9281_v42 = vpop.permute.xlu1 %1487 }
 0x195   : > { %6993 = vmatpush1.bf16.msra.mxu1 %v6992_v58  ;;  %v9250_v47 = vpop.permute.xlu0 %1482 }
 0x197   : > { %6849 = vmatmul.mubr.msk.f32.gmra.mrb[26].mxu0 %vm1490_vm8, %v9091_v1 }
 0x198   : > { %6852 = vmatmul.mubr.msk.f32.vlgmr.msra.gmra.mrb[24].mxu1 %vm1490_vm8, %v9061_v61  ;;  %1757 = vmatprep.mubr.f32.mxu0 %v13976_v54 }
 0x199   : > { %1840 = vmatprep.mubr.f32.mxu1 %v13976_v54 }
 0x19b   : > { %6850 = vmatmul.mubr.msk.f32.gmra.mrb[28].mxu0 %vm1490_vm8, %v9117_v3 }
 0x19c   : > { %6853 = vmatmul.mubr.msk.f32.gmra.mrb[26].mxu1 %vm1490_vm8, %v9091_v1  ;;  %1763 = vmatprep.mubr.f32.mxu0 %v13976_v54 }
 0x19d   : > { %1846 = vmatprep.mubr.f32.mxu1 %v13976_v54 }
 0x19f   : > { %6851 = vmatmul.mubr.msk.f32.gmra.mrb[30].mxu0 %vm1490_vm8, %v9144_v18 }
 0x1a0   : > { %6854 = vmatmul.mubr.msk.f32.gmra.mrb[28].mxu1 %vm1490_vm8, %v9117_v3  ;;  %2475 = vmatprep.mubr.f32.mxu0 %v13976_v54 }
 0x1a1   : > { %1852 = vmatprep.mubr.f32.mxu1 %v13976_v54 }
 0x1a4   : > { %6855 = vmatmul.mubr.msk.f32.gmra.mrb[30].mxu1 %vm1490_vm8, %v9144_v18 }
 0x1a5   : > { %2564 = vmatprep.mubr.f32.mxu1 %v13976_v54 }
 0x24e   : > { %v1569_v46 = vpop.f32.mrb[16].mxu0 }
 0x24f   : > { %v9232_v8 = vadd.f32 %v1569_v46, %v9229_v52  ;;  %v1571_v34 = vpop.f32.mrb[17].mxu0 }
 0x250   : > { %v9260_v31 = vadd.f32 %v1571_v34, %v9229_v52 }
 0x251   : > { %v9235_v14 = vmul.f32 100.0, %v9232_v8 }
 0x252   : > { %v1575_v17 = vpop.f32.mrb[18].mxu0  ;;  %14001 = vst [vmem:[#allocation29_spill] sm:$0xff] %v9260_v31  ;;  %v9277_v22 = vmul.f32 100.0, %v9260_v31 }
 0x253   : > { %v1891_v58 = vmin.f32 %v9235_v14, 20.0  ;;  %v9241_v61 = vadd.f32 %v1575_v17, %v9237_v48  ;;  %v1577_v1 = vpop.f32.mrb[19].mxu0  ;;  %vm1923_vm12 = vcmp.gt.f32.partialorder %v9235_v14, 20.0 }
 0x254   : > { %v9271_v23 = vadd.f32 %v1577_v1, %v9237_v48  ;;  %v1892_v57 = vmin.f32 %v9277_v22, 20.0 }
 0x255   : > { %v1955_v3 = vmul.f32 1.442695, %v1891_v58  ;;  %v9244_v33 = vmul.f32 100.0, %v9241_v61 }
 0x256   : > { %v1581_v12 = vpop.f32.mrb[20].mxu0  ;;  %14002 = vst [vmem:[#allocation30_spill] sm:$0xff] %v9271_v23  ;;  %v9286_v60 = vmul.f32 100.0, %v9271_v23  ;;  %v1957_v36 = vmul.f32 1.442695, %v1892_v57 }
 0x257   : > { %v1658_v10 = vpop.f32.mrb[16].mxu1  ;;  %7370 = vpow2.f32 %v1955_v3  ;;  %v1899_v49 = vmin.f32 %v9244_v33, 20.0  ;;  %v1583_v26 = vpop.f32.mrb[21].mxu0  ;;  %v9256_v25 = vadd.f32 %v1581_v12, %v9250_v47  ;;  %vm1931_vm13 = vcmp.gt.f32.partialorder %v9244_v33, 20.0 }
 0x258   : > { %v9247_v16 = vadd.f32 %v1658_v10, %v9229_v52  ;;  %v1660_v18 = vpop.f32.mrb[17].mxu1  ;;  %v1900_v35 = vmin.f32 %v9286_v60, 20.0  ;;  %v9325_v34 = vadd.f32 %v1583_v26, %v9250_v47 }
 0x259   : > { %v1971_v30 = vmul.f32 1.442695, %v1899_v49  ;;  %v9274_v0 = vmul.f32 100.0, %v9256_v25  ;;  %v9300_v44 = vadd.f32 %v1660_v18, %v9229_v52 }
 0x25a   : > { %v9253_v50 = vmul.f32 100.0, %v9247_v16  ;;  %v1587_v62 = vpop.f32.mrb[22].mxu0  ;;  %14006 = vst [vmem:[#allocation22_spill] sm:$0xff] %v9325_v34  ;;  %v1973_v58 = vmul.f32 1.442695, %v1900_v35 }
 0x25b   : > { %v1664_v32 = vpop.f32.mrb[18].mxu1  ;;  %7372 = vpow2.f32 %v1971_v30  ;;  %v9265_v43 = vpop.f32.mrb[23].mxu0  ;;  %v1907_v7 = vmin.f32 %v9274_v0, 20.0  ;;  %v9292_v11 = vadd.f32 %v1587_v62, %v9281_v42  ;;  %14003 = vst [vmem:[#allocation18_spill] sm:$0xff] %v9300_v44  ;;  %v9322_v46 = vmul.f32 100.0, %v9300_v44 }
 0x25c   : > { %v1893_v15 = vmin.f32 %v9253_v50, 20.0  ;;  %v9263_v53 = vadd.f32 %v1664_v32, %v9237_v48  ;;  %v1666_v63 = vpop.f32.mrb[19].mxu1  ;;  %vm1925_vm3 = vcmp.gt.f32.partialorder %v9253_v50, 20.0  ;;  %vm1939_vm6 = vcmp.gt.f32.partialorder %v9274_v0, 20.0 }
 0x25d   : > { %v1987_v19 = vmul.f32 1.442695, %v1907_v7  ;;  %v9308_v5 = vadd.f32 %v1666_v63, %v9237_v48  ;;  %v9312_v21 = vmul.f32 100.0, %v9292_v11  ;;  %14005 = vst [vmem:[#allocation20_spill] sm:$0xff] %v9322_v46  ;;  %v9346_v63 = vmul.f32 100.0, %v9325_v34 }
 0x25e   : > { %v1959_v4 = vmul.f32 1.442695, %v1893_v15  ;;  %v9268_v20 = vmul.f32 100.0, %v9263_v53  ;;  %v1894_v15 = vmin.f32 %v9322_v46, 20.0 }
 0x25f   : > { %v1670_v56 = vpop.f32.mrb[20].mxu1  ;;  %14004 = vst [vmem:[#allocation21_spill] sm:$0xff] %v9308_v5  ;;  %v1915_v37 = vmin.f32 %v9312_v21, 20.0  ;;  %v9330_v1 = vmul.f32 100.0, %v9308_v5  ;;  %14008 = vst [vmem:[#allocation17_spill] sm:$0xff] %v9346_v63  ;;  %vm1947_vm9 = vcmp.gt.f32.partialorder %v9312_v21, 20.0 }
 0x260   : > { %7374 = vpow2.f32 %v1959_v4  ;;  %v1901_v29 = vmin.f32 %v9268_v20, 20.0  ;;  %v1672_v55 = vpop.f32.mrb[21].mxu1  ;;  %v9289_v2 = vadd.f32 %v1670_v56, %v9250_v47  ;;  %vm1933_vm4 = vcmp.gt.f32.partialorder %v9268_v20, 20.0 }
 0x261   : > { %v9283_v6 = vpop.eup %7370  ;;  %14007 = vst [vmem:[#allocation15_spill] sm:$0xff] %v9330_v1  ;;  %v2003_v49 = vmul.f32 1.442695, %v1915_v37  ;;  %v9354_v7 = vadd.f32 %v1672_v55, %v9250_v47  ;;  %v1961_v37 = vmul.f32 1.442695, %v1894_v15 }
 0x262   : > { %v1975_v13 = vmul.f32 1.442695, %v1901_v29  ;;  %v2019_v9 = vadd.f32 1.0, %v9283_v6  ;;  %v9297_v59 = vmul.f32 100.0, %v9289_v2  ;;  %v2022_v28 = vmul.f32 -0.5, %v9283_v6 }
 0x263   : > { %v1676_v51 = vpop.f32.mrb[22].mxu1  ;;  %v2025_v62 = vand.u32 2147483647, %v9283_v6  ;;  %v1902_v29 = vmin.f32 %v9330_v1, 20.0  ;;  %14009 = vst [vmem:[#allocation25_spill] sm:$0xff] %v9354_v7 }
 0x264   : > { %7376 = vpow2.f32 %v1975_v13  ;;  %v9302_v41 = vpop.f32.mrb[23].mxu1  ;;  %v1909_v39 = vmin.f32 %v9297_v59, 20.0  ;;  %v2023_v3 = vadd.f32 1.0, %v2022_v28  ;;  %v9337_v30 = vadd.f32 %v1676_v51, %v9281_v42 }
 0x265   : > { %7378 = vlog2.f32 %v2019_v9  ;;  %v9304_v24 = vpop.eup %7372  ;;  %vm9372_vm14 = vcmp.lt.f32.partialorder %v2025_v62, 0.0004427343  ;;  %vm1941_vm11 = vcmp.gt.f32.partialorder %v9297_v59, 20.0 }
 0x266   : > { %v2091_v40 = vadd.f32 1.0, %v9304_v24  ;;  %v9316_v38 = vpop.f32.mrb[24].mxu0  ;;  %7380 = vpow2.f32 %v1987_v19  ;;  %v1991_v27 = vmul.f32 1.442695, %v1909_v39  ;;  %v2094_v12 = vmul.f32 -0.5, %v9304_v24 }
 0x267   : > { %v9319_v45 = vpop.f32.mrb[25].mxu0  ;;  %v9357_v13 = vmul.f32 100.0, %v9337_v30  ;;  %v2024_v57 = vmul.f32 %v9283_v6, %v2023_v3  ;;  %v2097_v51 = vand.u32 2147483647, %v9304_v24 }
 0x268   : > { %7382 = vlog2.f32 %v2091_v40  ;;  %v2095_v19 = vadd.f32 1.0, %v2094_v12 }
 0x269   : > { %7384 = vpow2.f32 %v1991_v27  ;;  %v1917_v55 = vmin.f32 %v9357_v13, 20.0  ;;  %vm9388_vm15 = vcmp.lt.f32.partialorder %v2097_v51, 0.0004427343 }
 0x26a   : > { %v9327_v17 = vpop.eup %7374  ;;  %v9334_v18 = vpop.f32.mrb[26].mxu0  ;;  %7386 = vpow2.f32 %v1957_v36  ;;  %v2096_v15 = vmul.f32 %v9304_v24, %v2095_v19  ;;  %v9403_v19 = vadd.f32 %v9316_v38, %v9229_v52 }
 0x26b   : > { %v2037_v10 = vadd.f32 1.0, %v9327_v17  ;;  %v9339_v26 = vpop.f32.mrb[24].mxu1  ;;  %v9341_v32 = vpop.f32.mrb[27].mxu0  ;;  %v2040_v40 = vmul.f32 -0.5, %v9327_v17  ;;  %v2007_v54 = vmul.f32 1.442695, %v1917_v55 }
 0x26c   : > { %v9348_v4 = vpop.f32.mrb[25].mxu1  ;;  %v2043_v34 = vand.u32 2147483647, %v9327_v17 }
 0x26d   : > { %7388 = vlog2.f32 %v2037_v10 }
 0x26e   : > { %v9350_v56 = vpop.eup %7376  ;;  %7390 = vpow2.f32 %v1973_v58  ;;  %v9362_v39 = vpop.f32.mrb[28].mxu0  ;;  %v1908_v58 = vmin.f32 %v9346_v63, 20.0  ;;  %vm9417_vm2 = vcmp.lt.f32.partialorder %v2043_v34, 0.0004427343 }
 0x26f   : > { %v7379_v9 = vpop.eup %7378  ;;  %v2109_v35 = vadd.f32 1.0, %v9350_v56  ;;  %7392 = vpow2.f32 %v2003_v49  ;;  %v9368_v36 = vpop.f32.mrb[26].mxu1  ;;  %v1977_v49 = vmul.f32 1.442695, %v1902_v29  ;;  %v2041_v29 = vadd.f32 1.0, %v2040_v40 }
 0x270   : > { %v2021_v28 = vmul.f32 0.6931472, %v7379_v9  ;;  %v9370_v6 = vpop.f32.mrb[29].mxu0  ;;  %v9377_v3 = vpop.f32.mrb[27].mxu1  ;;  %v9384_v9 = vmul.f32 100.0, %v9354_v7 }
 0x271   : > { %7394 = vlog2.f32 %v2109_v35  ;;  %v9379_v10 = vpop.eup %7380  ;;  %v1989_v40 = vmul.f32 1.442695, %v1908_v58  ;;  %v2042_v58 = vmul.f32 %v9327_v17, %v2041_v29 }
 0x272   : > { %v2027_v12 = vsel %vm9372_vm14, %v2024_v57, %v2021_v28  ;;  %14012 = vst [vmem:[#allocation16_spill] sm:$0xff] %v9384_v9  ;;  %v7383_v62 = vpop.eup %7382  ;;  %v2163_v5 = vadd.f32 1.0, %v9379_v10  ;;  %v9393_v44 = vpop.f32.mrb[30].mxu0  ;;  %v2112_v28 = vmul.f32 -0.5, %v9350_v56  ;;  %7396 = vpow2.f32 %v2007_v54 }
 0x273   : > { %v9395_v27 = vpop.eup %7384  ;;  %v2093_v57 = vmul.f32 0.6931472, %v7383_v62  ;;  %v9398_v55 = vpop.f32.mrb[28].mxu1  ;;  %v2307_v7 = vmul.f32 0.01, %v2027_v12  ;;  %v1910_v1 = vmin.f32 %v9384_v9, 20.0  ;;  %v9462_v62 = vadd.f32 %v9302_v41, %v9281_v42 }
 0x274   : > { %7398 = vlog2.f32 %v2163_v5  ;;  %v2181_v24 = vadd.f32 1.0, %v9395_v27  ;;  %v9405_v51 = vpop.f32.mrb[29].mxu1  ;;  %v9407_v63 = vpop.f32.mrb[31].mxu0  ;;  %v9415_v5 = vadd.f32 %v9265_v43, %v9281_v42  ;;  %v2115_v43 = vand.u32 2147483647, %v9350_v56 }
 0x275   : > { %v9409_v23 = vpop.eup %7386  ;;  %7400 = vpow2.f32 %v1961_v37  ;;  %v2099_v54 = vsel %vm9388_vm15, %v2096_v15, %v2093_v57  ;;  %v2113_v15 = vadd.f32 1.0, %v2112_v28  ;;  %v9432_v34 = vsel %vm1923_vm12, %v9232_v8, %v2307_v7  ;;  %14020 = vst [vmem:[#allocation31_spill] sm:$0xff] %v9462_v62 }
 0x276   : > { %14015 = vst [vmem:[#allocation19_spill] sm:$0xff] %v9415_v5  ;;  %v2315_v38 = vmul.f32 0.01, %v2099_v54  ;;  %7402 = vpow2.f32 %v1977_v49  ;;  %14018 = vst [vmem:[#allocation26_spill] sm:$0xff] %v9432_v34  ;;  %v9440_v57 = vmul.f32 100.0, %v9403_v19  ;;  %v2166_v14 = vmul.f32 -0.5, %v9379_v10 }
 0x277   : > { %v7389_v12 = vpop.eup %7388  ;;  %v9427_v35 = vpop.f32.mrb[30].mxu1  ;;  %7404 = vlog2.f32 %v2181_v24  ;;  %v9456_v7 = vmul.f32 1.442695, %v1910_v1  ;;  %vm2116_vm5 = vcmp.lt.f32.partialorder %v2115_v43, 0.0004427343  ;;  %v2184_v41 = vmul.f32 -0.5, %v9395_v27 }
 0x278   : > { %v9422_v46 = vpop.eup %7390  ;;  %v2039_v37 = vmul.f32 0.6931472, %v7389_v12  ;;  %v9437_v49 = vsel %vm1931_vm13, %v9241_v61, %v2315_v38  ;;  %v9442_v17 = vpop.f32.mrb[31].mxu1  ;;  %v9453_v61 = vadd.f32 %v9339_v26, %v9229_v52  ;;  %7406 = vpow2.f32 %v1989_v40 }
 0x279   : > { %14019 = vst [vmem:[#allocation23_spill] sm:$0xff] %v9437_v49  ;;  %v9444_v29 = vpop.eup %7392  ;;  %v2114_v12 = vmul.f32 %v9350_v56, %v2113_v15  ;;  %v1895_v38 = vmin.f32 %v9440_v57, 20.0  ;;  %v9466_v26 = vmul.f32 100.0, %v9415_v5  ;;  %v2169_v43 = vand.u32 2147483647, %v9379_v10 }
 0x27a   : > { %v2045_v28 = vsel %vm9417_vm2, %v2042_v58, %v2039_v37  ;;  %v2235_v24 = vadd.f32 1.0, %v9444_v29  ;;  %v2167_v58 = vadd.f32 1.0, %v2166_v14  ;;  %v2238_v9 = vmul.f32 -0.5, %v9444_v29 }
 0x27b   : > { %v7395_v33 = vpop.eup %7394  ;;  %v2309_v37 = vmul.f32 0.01, %v2045_v28  ;;  %v1963_v8 = vmul.f32 1.442695, %v1895_v38  ;;  %v2187_v5 = vand.u32 2147483647, %v9395_v27 }
 0x27c   : > { %v2111_v54 = vmul.f32 0.6931472, %v7395_v33  ;;  %7408 = vlog2.f32 %v2235_v24  ;;  %v7397_v40 = vpop.eup %7396  ;;  %v9469_v33 = vmul.f32 100.0, %v9453_v61  ;;  %v9477_v24 = vmul.f32 100.0, %v9462_v62 }
 0x27d   : > { %v2253_v34 = vadd.f32 1.0, %v7397_v40  ;;  %7410 = vpow2.f32 %v1963_v8  ;;  %v2168_v8 = vmul.f32 %v9379_v10, %v2167_v58  ;;  %v2256_v49 = vmul.f32 -0.5, %v7397_v40 }
 0x27e   : > { %v2117_v1 = vsel %vm2116_vm5, %v2114_v12, %v2111_v54  ;;  %v7399_v56 = vpop.eup %7398  ;;  %14021 = vst [vmem:[#allocation35_spill] sm:$0xff] %v9477_v24  ;;  %v1897_v14 = vmin.f32 %v9469_v33, 20.0  ;;  %v9485_v12 = vsel %vm1925_vm3, %v9247_v16, %v2309_v37  ;;  %v2185_v16 = vadd.f32 1.0, %v2184_v41 }
 0x27f   : > { %v2317_v15 = vmul.f32 0.01, %v2117_v1  ;;  %v9473_v28 = vpop.eup %7400  ;;  %14022 = vst [vmem:[#allocation24_spill] sm:$0xff] %v9485_v12  ;;  %v2165_v1 = vmul.f32 0.6931472, %v7399_v56  ;;  %7412 = vlog2.f32 %v2253_v34  ;;  %v2239_v50 = vadd.f32 1.0, %v2238_v9 }
 0x280   : > { %v9480_v54 = vpop.eup %7402  ;;  %v1967_v37 = vmul.f32 1.442695, %v1897_v14  ;;  %vm9501_vm7 = vcmp.lt.f32.partialorder %v2169_v43, 0.0004427343  ;;  %v1916_v10 = vmin.f32 %v9466_v26, 20.0  ;;  %v1918_v34 = vmin.f32 %v9477_v24, 20.0 }
 0x281   : > { %v9490_v38 = vsel %vm1933_vm4, %v9263_v53, %v2317_v15  ;;  %v7405_v31 = vpop.eup %7404  ;;  %v9499_v53 = vadd.f32 %v9319_v45, %v9229_v52  ;;  %v9510_v58 = vadd.f32 %v9334_v18, %v9237_v48  ;;  %v2171_v45 = vsel %vm9501_vm7, %v2168_v8, %v2165_v1 }
 0x282   : > { %v9512_v9 = vpop.eup %7406  ;;  %v2241_v56 = vand.u32 2147483647, %v9444_v29  ;;  %v2259_v15 = vand.u32 2147483647, %v7397_v40  ;;  %7414 = vpow2.f32 %v1967_v37  ;;  %v2183_v41 = vmul.f32 0.6931472, %v7405_v31 }
 0x283   : > { %14023 = vst [vmem:[#allocation32_spill] sm:$0xff] %v9499_v53  ;;  %v2257_v43 = vadd.f32 1.0, %v2256_v49  ;;  %v9518_v14 = vmul.f32 100.0, %v9510_v58  ;;  %v9522_v62 = vadd.f32 %v9368_v36, %v9237_v48  ;;  %v2186_v24 = vmul.f32 %v9395_v27, %v2185_v16 }
 0x284   : > { %vm9525_vm10 = vcmp.lt.f32.partialorder %v2187_v5, 0.0004427343  ;;  %v2240_v1 = vmul.f32 %v9444_v29, %v2239_v50  ;;  %v9531_v8 = vmul.f32 100.0, %v9499_v53  ;;  %v2323_v31 = vmul.f32 0.01, %v2171_v45 }
 0x285   : > { %v9536_v36 = vadd.f32 %v9348_v4, %v9229_v52  ;;  %v1903_v37 = vmin.f32 %v9518_v14, 20.0  ;;  %vm2242_vm12 = vcmp.lt.f32.partialorder %v2241_v56, 0.0004427343  ;;  %vm9539_vm13 = vcmp.lt.f32.partialorder %v2259_v15, 0.0004427343 }
 0x286   : > { %v7409_v18 = vpop.eup %7408  ;;  %v9544_v5 = vmul.f32 100.0, %v9522_v62  ;;  %v9548_v29 = vadd.f32 %v9341_v32, %v9237_v48  ;;  %v2189_v52 = vsel %vm9525_vm10, %v2186_v24, %v2183_v41  ;;  %v2258_v50 = vmul.f32 %v7397_v40, %v2257_v43 }
 0x287   : > { %v2237_v49 = vmul.f32 0.6931472, %v7409_v18  ;;  %14028 = vst [vmem:[#allocation38_spill] sm:$0xff] %v9536_v36  ;;  %v9550_v16 = vpop.eup %7410  ;;  %v1979_v20 = vmul.f32 1.442695, %v1903_v37  ;;  %v1896_v18 = vmin.f32 %v9531_v8, 20.0  ;;  %v9558_v53 = vadd.f32 %v9362_v39, %v9250_v47 }
 0x288   : > { %v2055_v15 = vadd.f32 1.0, %v9550_v16  ;;  %v9563_v32 = vsel %vm1939_vm6, %v9256_v25, %v2323_v31  ;;  %v9566_v24 = vmul.f32 100.0, %v9536_v36  ;;  %v1905_v40 = vmin.f32 %v9544_v5, 20.0 }
 0x289   : > { %v2243_v4 = vsel %vm2242_vm12, %v2240_v1, %v2237_v49  ;;  %v7413_v45 = vpop.eup %7412  ;;  %v2325_v41 = vmul.f32 0.01, %v2189_v52  ;;  %v9575_v39 = vmul.f32 100.0, %v9548_v29  ;;  %vm1949_vm14 = vcmp.gt.f32.partialorder %v9357_v13, 20.0 }
 0x28a   : > { %v2331_v56 = vmul.f32 0.01, %v2243_v4  ;;  %v2255_v12 = vmul.f32 0.6931472, %v7413_v45  ;;  %7416 = vlog2.f32 %v2055_v15  ;;  %v1983_v1 = vmul.f32 1.442695, %v1905_v40 }
 0x28b   : > { %7418 = vpow2.f32 %v1979_v20  ;;  %v9589_v21 = vmul.f32 100.0, %v9558_v53  ;;  %v2005_v37 = vmul.f32 1.442695, %v1916_v10  ;;  %v1898_v27 = vmin.f32 %v9566_v24, 20.0 }
 0x28c   : > { %v9572_v43 = vsel %vm1947_vm9, %v9292_v11, %v2331_v56  ;;  %v2261_v0 = vsel %vm9539_vm13, %v2258_v50, %v2255_v12  ;;  %v9581_v31 = vpop.eup %7414  ;;  %v9586_v11 = vadd.f32 %v9377_v3, %v9237_v48  ;;  %7420 = vpow2.f32 %v1983_v1 }
 0x28d   : > { %v2333_v49 = vmul.f32 0.01, %v2261_v0  ;;  %v2073_v52 = vadd.f32 1.0, %v9581_v31  ;;  %v9596_v4 = vsel %vm1941_vm11, %v9289_v2, %v2325_v41  ;;  %v2009_v50 = vmul.f32 1.442695, %v1918_v34 }
 0x28e   : > { %14031 = vst [vmem:[#allocation41_spill] sm:$0xff] %v9586_v11  ;;  %v2058_v48 = vmul.f32 -0.5, %v9550_v16  ;;  %v1965_v10 = vmul.f32 1.442695, %v1896_v18  ;;  %v1904_v20 = vmin.f32 %v9575_v39, 20.0  ;;  %v9607_v45 = vmul.f32 100.0, %v9586_v11 }
 0x28f   : > { %v9599_v13 = vsel %vm1949_vm14, %v9337_v30, %v2333_v49  ;;  %7422 = vlog2.f32 %v2073_v52  ;;  %v1911_v2 = vmin.f32 %v9589_v21, 20.0  ;;  %v1969_v59 = vmul.f32 1.442695, %v1898_v27 }
 0x290   : > { %7424 = vpow2.f32 %v9456_v7  ;;  %14032 = vst [vmem:[#allocation40_spill] sm:$0xff] %v9607_v45  ;;  %v9612_v30 = vadd.f32 %v9398_v55, %v9250_v47  ;;  %v9616_v34 = vadd.f32 %v9370_v6, %v9250_v47  ;;  %v2059_v56 = vadd.f32 1.0, %v2058_v48 }
 0x291   : > { %7426 = vpow2.f32 %v2005_v37  ;;  %v2061_v15 = vand.u32 2147483647, %v9550_v16  ;;  %v1995_v7 = vmul.f32 1.442695, %v1911_v2  ;;  %v2076_v18 = vmul.f32 -0.5, %v9581_v31 }
 0x292   : > { %14033 = vst [vmem:[#allocation33_spill] sm:$0xff] %v9616_v34  ;;  %7428 = vpow2.f32 %v2009_v50  ;;  %v1981_v12 = vmul.f32 1.442695, %v1904_v20  ;;  %v9621_v40 = vmul.f32 100.0, %v9612_v30  ;;  %v1906_v55 = vmin.f32 %v9607_v45, 20.0 }
 0x293   : > { %7430 = vpow2.f32 %v1965_v10  ;;  %v9626_v6 = vadd.f32 %v9405_v51, %v9250_v47  ;;  %v9630_v0 = vadd.f32 %v9393_v44, %v9281_v42  ;;  %v9636_v37 = vmul.f32 100.0, %v9616_v34 }
 0x294   : > { %v7417_v41 = vpop.eup %7416  ;;  %7432 = vpow2.f32 %v1995_v7  ;;  %v1913_v49 = vmin.f32 %v9621_v40, 20.0  ;;  %v9640_v52 = vadd.f32 %v9427_v35, %v9281_v42  ;;  %v2060_v47 = vmul.f32 %v9550_v16, %v2059_v56 }
 0x295   : > { %14034 = vst [vmem:[#allocation37_spill] sm:$0xff] %v9626_v6  ;;  %v9632_v1 = vpop.eup %7418  ;;  %7434 = vpow2.f32 %v1969_v59  ;;  %14035 = vst [vmem:[#allocation36_spill] sm:$0xff] %v9636_v37  ;;  %v2057_v27 = vmul.f32 0.6931472, %v7417_v41  ;;  %vm9643_vm15 = vcmp.lt.f32.partialorder %v2061_v15, 0.0004427343  ;;  %v9681_v51 = vadd.f32 %v9442_v17, %v9281_v42 }
 0x296   : > { %v2127_v44 = vadd.f32 1.0, %v9632_v1  ;;  %v9648_v50 = vpop.eup %7420  ;;  %v2077_v48 = vadd.f32 1.0, %v2076_v18  ;;  %v2079_v10 = vand.u32 2147483647, %v9581_v31  ;;  %7436 = vpow2.f32 %v1981_v12 }
 0x297   : > { %v1999_v20 = vmul.f32 1.442695, %v1913_v49  ;;  %v1985_v2 = vmul.f32 1.442695, %v1906_v55  ;;  %v9652_v35 = vmul.f32 100.0, %v9626_v6  ;;  %v9655_v16 = vmul.f32 100.0, %v9630_v0 }
 0x298   : > { %7438 = vlog2.f32 %v2127_v44  ;;  %vm1927_vm2 = vcmp.gt.f32.partialorder %v9440_v57, 20.0  ;;  %v2145_v56 = vadd.f32 1.0, %v9648_v50  ;;  %v1912_v15 = vmin.f32 %v9636_v37, 20.0  ;;  %14042 = vst [vmem:[#allocation39_spill] sm:$0xff] %v9681_v51 }
 0x299   : > { %14038 = vst [vmem:[#allocation43_spill] sm:$0xff] %v9652_v35  ;;  %v7423_v59 = vpop.eup %7422  ;;  %7440 = vpow2.f32 %v1999_v20  ;;  %v9661_v7 = vmul.f32 100.0, %v9640_v52  ;;  %v2063_v12 = vsel %vm9643_vm15, %v2060_v47, %v2057_v27  ;;  %v2130_v55 = vmul.f32 -0.5, %v9632_v1 }
 0x29a   : > { %v9663_v18 = vpop.eup %7424  ;;  %v2075_v41 = vmul.f32 0.6931472, %v7423_v59  ;;  %v9670_v49 = vadd.f32 %v9407_v63, %v9281_v42  ;;  %vm9674_vm3 = vcmp.lt.f32.partialorder %v2079_v10, 0.0004427343  ;;  %v2133_v3 = vand.u32 2147483647, %v9632_v1 }
 0x29b   : > { %v9672_v44 = vpop.eup %7426  ;;  %7442 = vlog2.f32 %v2145_v56  ;;  %vm1929_vm4 = vcmp.gt.f32.partialorder %v9469_v33, 20.0  ;;  %v2078_v63 = vmul.f32 %v9581_v31, %v2077_v48  ;;  %v2148_v47 = vmul.f32 -0.5, %v9648_v50 }
 0x29c   : > { %14039 = vst [vmem:[#allocation34_spill] sm:$0xff] %v9670_v49  ;;  %v9683_v27 = vpop.eup %7428  ;;  %7444 = vpow2.f32 %v1985_v2  ;;  %v1919_v10 = vmin.f32 %v9655_v16, 20.0  ;;  %v2311_v25 = vmul.f32 0.01, %v2063_v12  ;;  %v1997_v6 = vmul.f32 1.442695, %v1912_v15 }
 0x29d   : > { %v9689_v59 = vpop.eup %7430  ;;  %v1914_v56 = vmin.f32 %v9652_v35, 20.0  ;;  %v1921_v42 = vmin.f32 %v9661_v7, 20.0  ;;  %v2081_v34 = vsel %vm9674_vm3, %v2078_v63, %v2075_v41  ;;  %v2131_v37 = vadd.f32 1.0, %v2130_v55 }
 0x29e   : > { %v7433_v17 = vpop.eup %7432  ;;  %v2011_v11 = vmul.f32 1.442695, %v1919_v10  ;;  %v9696_v31 = vmul.f32 100.0, %v9670_v49  ;;  %vm1935_vm5 = vcmp.gt.f32.partialorder %v9518_v14, 20.0  ;;  %vm9701_vm6 = vcmp.lt.f32.partialorder %v2133_v3, 0.0004427343 }
 0x29f   : > { %v9698_v48 = vpop.eup %7434  ;;  %v2199_v15 = vadd.f32 1.0, %v7433_v17  ;;  %v2202_v12 = vmul.f32 -0.5, %v7433_v17  ;;  %v9706_v35 = vmul.f32 100.0, %v9681_v51  ;;  %v2149_v20 = vadd.f32 1.0, %v2148_v47 }
 0x2a0   : > { %14043 = vst [vmem:[#allocation27_spill] sm:$0xff] %v9696_v31  ;;  %v2151_v41 = vand.u32 2147483647, %v9648_v50  ;;  %7446 = vpow2.f32 %v2011_v11  ;;  %v2015_v55 = vmul.f32 1.442695, %v1921_v42  ;;  %v9709_v63 = vpop.eup %7436  ;;  %v1920_v3 = vmin.f32 %v9696_v31, 20.0 }
 0x2a1   : > { %14046 = vst [vmem:[#allocation42_spill] sm:$0xff] %v9706_v35  ;;  %v2313_v10 = vmul.f32 0.01, %v2081_v34  ;;  %7448 = vlog2.f32 %v2199_v15  ;;  %v2001_v49 = vmul.f32 1.442695, %v1914_v56  ;;  %v9715_v45 = vsel %vm1927_vm2, %v9403_v19, %v2311_v25 }
 0x2a2   : > { %v7439_v36 = vpop.eup %7438  ;;  %v2132_v51 = vmul.f32 %v9632_v1, %v2131_v37  ;;  %vm1937_vm7 = vcmp.gt.f32.partialorder %v9544_v5, 20.0  ;;  %v2205_v47 = vand.u32 2147483647, %v7433_v17  ;;  %7450 = vpow2.f32 %v2015_v55 }
 0x2a3   : > { %v9719_v11 = vpop.eup %7440  ;;  %v2129_v42 = vmul.f32 0.6931472, %v7439_v36  ;;  %v2203_v34 = vadd.f32 1.0, %v2202_v12  ;;  %v1922_v56 = vmin.f32 %v9706_v35, 20.0  ;;  %v2028_v15 = vadd.f32 1.0, %v9409_v23 }
 0x2a4   : > { %v2150_v31 = vmul.f32 %v9648_v50, %v2149_v20  ;;  %vm9724_vm9 = vcmp.lt.f32.partialorder %v2151_v41, 0.0004427343  ;;  %v2217_v19 = vadd.f32 1.0, %v9719_v11  ;;  %7452 = vpow2.f32 %v1997_v6 }
 0x2a5   : > { %v7443_v25 = vpop.eup %7442  ;;  %v9732_v1 = vsel %vm1929_vm4, %v9453_v61, %v2313_v10  ;;  %v2135_v36 = vsel %vm9701_vm6, %v2132_v51, %v2129_v42  ;;  %7454 = vpow2.f32 %v2001_v49  ;;  %v2013_v37 = vmul.f32 1.442695, %v1920_v3 }
 0x2a6   : > { %14049 = vst [vmem:[#allocation28_spill] sm:$0xff] %v9732_v1  ;;  %v9736_v12 = vpop.eup %7444  ;;  %v2319_v50 = vmul.f32 0.01, %v2135_v36  ;;  %v2147_v20 = vmul.f32 0.6931472, %v7443_v25  ;;  %7456 = vlog2.f32 %v2217_v19  ;;  %v2031_v41 = vmul.f32 -0.5, %v9409_v23 }
 0x2a7   : > { %v2204_v55 = vmul.f32 %v7433_v17, %v2203_v34  ;;  %vm9739_vm10 = vcmp.lt.f32.partialorder %v2205_v47, 0.0004427343  ;;  %v2017_v33 = vmul.f32 1.442695, %v1922_v56  ;;  %7458 = vlog2.f32 %v2028_v15 }
 0x2a8   : > { %v9746_v61 = vsel %vm1935_vm5, %v9510_v58, %v2319_v50  ;;  %v2153_v49 = vsel %vm9724_vm9, %v2150_v31, %v2147_v20  ;;  %v2220_v51 = vmul.f32 -0.5, %v9719_v11  ;;  %v2100_v2 = vadd.f32 1.0, %v9422_v46 }
 0x2a9   : > { %v2321_v10 = vmul.f32 0.01, %v2153_v49  ;;  %v2223_v3 = vand.u32 2147483647, %v9719_v11  ;;  %7460 = vpow2.f32 %v2013_v37  ;;  %v2032_v42 = vadd.f32 1.0, %v2031_v41 }
 0x2aa   : > { %v7447_v47 = vpop.eup %7446  ;;  %v2034_v14 = vand.u32 2147483647, %v9409_v23  ;;  %7462 = vlog2.f32 %v2100_v2  ;;  %v2103_v58 = vmul.f32 -0.5, %v9422_v46  ;;  %v2106_v15 = vand.u32 2147483647, %v9422_v46 }
 0x2ab   : > { %v7449_v34 = vpop.eup %7448  ;;  %v9760_v31 = vsel %vm1937_vm7, %v9522_v62, %v2321_v10  ;;  %v2271_v56 = vadd.f32 1.0, %v7447_v47  ;;  %7464 = vpow2.f32 %v2017_v33  ;;  %v2274_v36 = vmul.f32 -0.5, %v7447_v47 }
 0x2ac   : > { %v7451_v57 = vpop.eup %7450  ;;  %v2201_v25 = vmul.f32 0.6931472, %v7449_v34  ;;  %v2046_v37 = vadd.f32 1.0, %v9473_v28  ;;  %vm1943_vm11 = vcmp.gt.f32.partialorder %v9589_v21, 20.0  ;;  %v2221_v50 = vadd.f32 1.0, %v2220_v51 }
 0x2ad   : > { %7466 = vlog2.f32 %v2271_v56  ;;  %v2277_v20 = vand.u32 2147483647, %v7447_v47  ;;  %v2289_v5 = vadd.f32 1.0, %v7451_v57  ;;  %vm9769_vm12 = vcmp.lt.f32.partialorder %v2223_v3, 0.0004427343 }
 0x2ae   : > { %v9767_v62 = vpop.eup %7452  ;;  %v2033_v33 = vmul.f32 %v9409_v23, %v2032_v42  ;;  %vm9774_vm13 = vcmp.lt.f32.partialorder %v2034_v14, 0.0004427343  ;;  %v2104_v2 = vadd.f32 1.0, %v2103_v58  ;;  %v2207_v51 = vsel %vm9739_vm10, %v2204_v55, %v2201_v25 }
 0x2af   : > { %v9778_v10 = vpop.eup %7454  ;;  %7468 = vlog2.f32 %v2289_v5  ;;  %v2292_v34 = vmul.f32 -0.5, %v7451_v57  ;;  %v2049_v56 = vmul.f32 -0.5, %v9473_v28  ;;  %vm1924_vm14 = vcmp.gt.f32.partialorder %v9277_v22, 20.0 }
 0x2b0   : > { %v7457_v3 = vpop.eup %7456  ;;  %v2275_v19 = vadd.f32 1.0, %v2274_v36  ;;  %vm9784_vm15 = vcmp.lt.f32.partialorder %v2106_v15, 0.0004427343  ;;  %7470 = vlog2.f32 %v2046_v37  ;;  %v2052_v42 = vand.u32 2147483647, %v9473_v28 }
 0x2b1   : > { %v7459_v14 = vpop.eup %7458  ;;  %vm1932_vm2 = vcmp.gt.f32.partialorder %v9286_v60, 20.0  ;;  %v2219_v6 = vmul.f32 0.6931472, %v7457_v3  ;;  %v2222_v55 = vmul.f32 %v9719_v11, %v2221_v50  ;;  %vm9791_vm3 = vcmp.lt.f32.partialorder %v2277_v20, 0.0004427343 }
 0x2b2   : > { %v2118_v25 = vadd.f32 1.0, %v9480_v54  ;;  %v2327_v36 = vmul.f32 0.01, %v2207_v51  ;;  %v2295_v15 = vand.u32 2147483647, %v7451_v57  ;;  %v2105_v17 = vmul.f32 %v9422_v46, %v2104_v2 }
 0x2b3   : > { %v2030_v5 = vmul.f32 0.6931472, %v7459_v14  ;;  %v9797_v37 = vpop.eup %7460  ;;  %vm1945_vm4 = vcmp.gt.f32.partialorder %v9621_v40, 20.0  ;;  %v2293_v35 = vadd.f32 1.0, %v2292_v34  ;;  %v2050_v1 = vadd.f32 1.0, %v2049_v56  ;;  %v14070_v40 = vld [vmem:[#allocation17_spill] sm:$0xff] }
 0x2b4   : > { %7472 = vlog2.f32 %v2118_v25  ;;  %v2172_v11 = vadd.f32 1.0, %v9512_v9  ;;  %v7463_v50 = vpop.eup %7462  ;;  %vm1951_vm5 = vcmp.gt.f32.partialorder %v9655_v16, 20.0  ;;  %v2276_v20 = vmul.f32 %v7447_v47, %v2275_v19 }
 0x2b5   : > { %v2036_v51 = vsel %vm9774_vm13, %v2033_v33, %v2030_v5  ;;  %v2121_v3 = vmul.f32 -0.5, %v9480_v54  ;;  %v2124_v46 = vand.u32 2147483647, %v9480_v54  ;;  %v9806_v2 = vpop.eup %7464  ;;  %v2225_v34 = vsel %vm9769_vm12, %v2222_v55, %v2219_v6 }
 0x2b6   : > { %v2102_v56 = vmul.f32 0.6931472, %v7463_v50  ;;  %v2308_v14 = vmul.f32 0.01, %v2036_v51  ;;  %7474 = vlog2.f32 %v2172_v11  ;;  %v9813_v25 = vsel %vm1943_vm11, %v9558_v53, %v2327_v36 }
 0x2b7   : > { %vm1953_vm6 = vcmp.gt.f32.partialorder %v9661_v7, 20.0  ;;  %vm9816_vm7 = vcmp.lt.f32.partialorder %v2295_v15, 0.0004427343  ;;  %vm9820_vm9 = vcmp.lt.f32.partialorder %v2052_v42, 0.0004427343  ;;  %v2244_v41 = vadd.f32 1.0, %v9672_v44  ;;  %v7467_v33 = vpop.eup %7466 }
 0x2b8   : > { %v2294_v49 = vmul.f32 %v7451_v57, %v2293_v35  ;;  %v2108_v6 = vsel %vm9784_vm15, %v2105_v17, %v2102_v56  ;;  %v2051_v53 = vmul.f32 %v9473_v28, %v2050_v1  ;;  %v2175_v21 = vmul.f32 -0.5, %v9512_v9  ;;  %v14064_v42 = vld [vmem:[#allocation29_spill] sm:$0xff]  ;;  %v14067_v28 = vld [vmem:[#allocation20_spill] sm:$0xff]  ;;  %v14068_v1 = vld [vmem:[#allocation15_spill] sm:$0xff] }
 0x2b9   : > { %v2329_v55 = vmul.f32 0.01, %v2225_v34  ;;  %v2273_v36 = vmul.f32 0.6931472, %v7467_v33  ;;  %v2316_v15 = vmul.f32 0.01, %v2108_v6  ;;  %7476 = vlog2.f32 %v2244_v41  ;;  %v7469_v5 = vpop.eup %7468 }
 0x2ba   : > { %v2340_v11 = vsel %vm1924_vm14, %v14064_v42, %v2308_v14  ;;  %v2122_v50 = vadd.f32 1.0, %v2121_v3  ;;  %vm9832_vm10 = vcmp.lt.f32.partialorder %v2124_v46, 0.0004427343  ;;  %v2190_v35 = vadd.f32 1.0, %v9663_v18  ;;  %v7471_v17 = vpop.eup %7470  ;;  %v14069_v34 = vld [vmem:[#allocation30_spill] sm:$0xff] }
 0x2bb   : > { %vm1926_vm11 = vcmp.gt.f32.partialorder %v14067_v28, 20.0  ;;  %vm1934_vm12 = vcmp.gt.f32.partialorder %v14068_v1, 20.0  ;;  %v2279_v57 = vsel %vm9791_vm3, %v2276_v20, %v2273_v36  ;;  %v2291_v23 = vmul.f32 0.6931472, %v7469_v5  ;;  %v14072_v5 = vld [vmem:[#allocation26_spill] sm:$0xff] }
 0x2bc   : > { %v2348_v22 = vsel %vm1932_vm2, %v14069_v34, %v2316_v15  ;;  %v2247_v3 = vmul.f32 -0.5, %v9672_v44  ;;  %v2335_v46 = vmul.f32 0.01, %v2279_v57  ;;  %v2048_v14 = vmul.f32 0.6931472, %v7471_v17  ;;  %v14071_v15 = vld [vmem:[#allocation23_spill] sm:$0xff] }
 0x2bd   : > { %v6994_v56 = vpack.c.bf16 %v2348_v22, %v2340_v11  ;;  %v2176_v41 = vadd.f32 1.0, %v2175_v21  ;;  %v9848_v33 = vsel %vm1945_vm4, %v9612_v30, %v2329_v55  ;;  %v2297_v58 = vsel %vm9816_vm7, %v2294_v49, %v2291_v23 }
 0x2be   : > { %v2178_v20 = vand.u32 2147483647, %v9512_v9  ;;  %7478 = vlog2.f32 %v2190_v35  ;;  %v7473_v6 = vpop.eup %7472  ;;  %v9856_v60 = vsel %vm1951_vm5, %v9630_v0, %v2335_v46  ;;  %v2337_v36 = vmul.f32 0.01, %v2297_v58  ;;  %v14074_v46 = vld [vmem:[#allocation18_spill] sm:$0xff] }
 0x2bf   : > { %6995 = vmatprep.subr.bf16.mxu0 %v6994_v56  ;;  %v2054_v21 = vsel %vm9820_vm9, %v2051_v53, %v2048_v14  ;;  %v2193_v30 = vmul.f32 -0.5, %v9663_v18  ;;  %vm1940_vm13 = vcmp.gt.f32.partialorder %v14070_v40, 20.0  ;;  %v7016_v47 = vpack.c.bf16 %v9856_v60, %v9813_v25  ;;  %v14075_v56 = vld [vmem:[#allocation21_spill] sm:$0xff]  ;;  %v10090_v25 = vpop.permute.xlu0 %2381 }
 0x2c0   : > { %v2120_v49 = vmul.f32 0.6931472, %v7473_v6  ;;  %v2123_v55 = vmul.f32 %v9480_v54, %v2122_v50  ;;  %v14073_v16 = vpack.c.bf16 %v14071_v15, %v14072_v5  ;;  %v2248_v0 = vadd.f32 1.0, %v2247_v3  ;;  %v7475_v42 = vpop.eup %7474  ;;  %v14076_v15 = vld [vmem:[#allocation24_spill] sm:$0xff] }
 0x2c1   : > { %v9871_v19 = vsel %vm1953_vm6, %v9640_v52, %v2337_v36  ;;  %v2310_v53 = vmul.f32 0.01, %v2054_v21  ;;  %v2177_v11 = vmul.f32 %v9512_v9, %v2176_v41  ;;  %v2262_v35 = vadd.f32 1.0, %v9683_v27 }
 0x2c2   : > { %6997 = vmatpush1.bf16.msra.mxu0 %v14073_v16  ;;  %v7024_v17 = vpack.c.bf16 %v9871_v19, %v9848_v33  ;;  %v2126_v54 = vsel %vm9832_vm10, %v2123_v55, %v2120_v49  ;;  %v2174_v50 = vmul.f32 0.6931472, %v7475_v42  ;;  %v2250_v57 = vand.u32 2147483647, %v9672_v44  ;;  %v14078_v16 = vld [vmem:[#allocation22_spill] sm:$0xff] }
 0x2c3   : > { %v2318_v23 = vmul.f32 0.01, %v2126_v54  ;;  %vm2179_vm14 = vcmp.lt.f32.partialorder %v2178_v20, 0.0004427343  ;;  %v2194_v34 = vadd.f32 1.0, %v2193_v30  ;;  %7480 = vlog2.f32 %v2262_v35  ;;  %v7477_v52 = vpop.eup %7476 }
 0x2c4   : > { %v2180_v7 = vsel %vm2179_vm14, %v2177_v11, %v2174_v50  ;;  %v2249_v22 = vmul.f32 %v9672_v44, %v2248_v0  ;;  %v2265_v9 = vmul.f32 -0.5, %v9683_v27  ;;  %v2064_v3 = vadd.f32 1.0, %v9689_v59 }
 0x2c5   : > { %v2342_v51 = vsel %vm1926_vm11, %v14074_v46, %v2310_v53  ;;  %v2350_v14 = vsel %vm1934_vm12, %v14075_v56, %v2318_v23  ;;  %v2246_v41 = vmul.f32 0.6931472, %v7477_v52  ;;  %v2324_v58 = vmul.f32 0.01, %v2180_v7  ;;  %v14079_v53 = vld [vmem:[#allocation19_spill] sm:$0xff]  ;;  %v14082_v23 = vld [vmem:[#allocation16_spill] sm:$0xff] }
 0x2c6   : > { %vm1948_vm15 = vcmp.gt.f32.partialorder %v9466_v26, 20.0  ;;  %v7002_v20 = vpack.c.bf16 %v2350_v14, %v2342_v51  ;;  %vm2251_vm2 = vcmp.lt.f32.partialorder %v2250_v57, 0.0004427343  ;;  %7482 = vlog2.f32 %v2064_v3  ;;  %v9930_v14 = vld [vmem:[%s13629_s5] sm:$0xff] }
 0x2c7   : > { %v2252_v44 = vsel %vm2251_vm2, %v2249_v22, %v2246_v41  ;;  %v2195_v6 = vmul.f32 %v9663_v18, %v2194_v34  ;;  %v2196_v36 = vand.u32 2147483647, %v9663_v18  ;;  %v2136_v21 = vadd.f32 1.0, %v9709_v63  ;;  %v14083_v34 = vld [vmem:[#allocation35_spill] sm:$0xff] }
 0x2c8   : > { %v7479_v28 = vpop.eup %7478  ;;  %7003 = vmatprep.subr.bf16.mxu1 %v7002_v20  ;;  %v2332_v30 = vmul.f32 0.01, %v2252_v44  ;;  %v2266_v49 = vadd.f32 1.0, %v2265_v9  ;;  %v2268_v1 = vand.u32 2147483647, %v9683_v27  ;;  %v2082_v55 = vadd.f32 1.0, %v9698_v48 }
 0x2c9   : > { %v14077_v5 = vpack.c.bf16 %v9490_v38, %v14076_v15  ;;  %v2356_v0 = vsel %vm1940_vm13, %v14078_v16, %v2324_v58  ;;  %v2192_v42 = vmul.f32 0.6931472, %v7479_v28  ;;  %v2067_v18 = vmul.f32 -0.5, %v9689_v59  ;;  %v9954_v15 = vld [vmem:[%s13629_s5 + $0x8] sm:$0xff] }
 0x2ca   : > { %7484 = vlog2.f32 %v2136_v21  ;;  %v2364_v11 = vsel %vm1948_vm15, %v14079_v53, %v2332_v30  ;;  %v2139_v35 = vmul.f32 -0.5, %v9709_v63  ;;  %v2085_v54 = vmul.f32 -0.5, %v9698_v48  ;;  %v14093_v53 = vld [vmem:[#allocation31_spill] sm:$0xff] }
 0x2cb   : > { %7005 = vmatpush1.bf16.msra.mxu1 %v14077_v5  ;;  %7486 = vlog2.f32 %v2082_v55  ;;  %v6998_v50 = vpack.c.bf16 %v2364_v11, %v2356_v0  ;;  %vm9907_vm3 = vcmp.lt.f32.partialorder %v2196_v36, 0.0004427343  ;;  %v2070_v40 = vand.u32 2147483647, %v9689_v59 }
 0x2cc   : > { %v2142_v57 = vand.u32 2147483647, %v9709_v63  ;;  %vm1942_vm4 = vcmp.gt.f32.partialorder %v14082_v23, 20.0  ;;  %vm1950_vm5 = vcmp.gt.f32.partialorder %v14083_v34, 20.0  ;;  %v2198_v26 = vsel %vm9907_vm3, %v2195_v6, %v2192_v42 }
 0x2cd   : > { %v2154_v52 = vadd.f32 1.0, %v9736_v12  ;;  %v7481_v7 = vpop.eup %7480  ;;  %6999 = vmatprep.subr.bf16.mxu0 %v6998_v50  ;;  %v2267_v22 = vmul.f32 %v9683_v27, %v2266_v49  ;;  %vm9919_vm6 = vcmp.lt.f32.partialorder %v2268_v1, 0.0004427343  ;;  %v2068_v3 = vadd.f32 1.0, %v2067_v18  ;;  %v14092_v18 = vld [vmem:[#allocation25_spill] sm:$0xff] }
 0x2ce   : > { %v2208_v46 = vadd.f32 1.0, %v9767_v62  ;;  %v2264_v51 = vmul.f32 0.6931472, %v7481_v7  ;;  %v14086_v56 = vpack.c.bf16 %v9572_v43, %v9563_v32  ;;  %v2140_v41 = vadd.f32 1.0, %v2139_v35  ;;  %v9982_v7 = vld [vmem:[%s13629_s5 + $0x10] sm:$0xff] }
 0x2cf   : > { %v2086_v58 = vadd.f32 1.0, %v2085_v54  ;;  %7488 = vlog2.f32 %v2154_v52  ;;  %v2326_v27 = vmul.f32 0.01, %v2198_v26  ;;  %vm9932_vm7 = vcmp.lt.f32.partialorder %v2070_v40, 0.0004427343 }
 0x2d0   : > { %7001 = vmatpush1.bf16.msra.mxu0 %v14086_v56  ;;  %vm9936_vm9 = vcmp.lt.f32.partialorder %v2142_v57, 0.0004427343  ;;  %7490 = vlog2.f32 %v2208_v46  ;;  %v7483_v32 = vpop.eup %7482  ;;  %vm1928_vm10 = vcmp.gt.f32.partialorder %v9531_v8, 20.0  ;;  %v2270_v43 = vsel %vm9919_vm6, %v2267_v22, %v2264_v51 }
 0x2d1   : > { %v2157_v6 = vmul.f32 -0.5, %v9736_v12  ;;  %v2211_v36 = vmul.f32 -0.5, %v9767_v62  ;;  %v2280_v21 = vadd.f32 1.0, %v9797_v37  ;;  %v2334_v28 = vmul.f32 0.01, %v2270_v43 }
 0x2d2   : > { %v2066_v30 = vmul.f32 0.6931472, %v7483_v32  ;;  %v2069_v49 = vmul.f32 %v9689_v59, %v2068_v3  ;;  %v2088_v1 = vand.u32 2147483647, %v9698_v48  ;;  %v14091_v55 = vmov 0.0  }
 0x2d3   : > { %6856 = vmatmul.mubr.msk.f32.vlgmr.msra.gmra.mrb[32].mxu0 %vm1490_vm8, %v9930_v14  ;;  %v2141_v5 = vmul.f32 %v9709_v63, %v2140_v41  ;;  %v2087_v16 = vmul.f32 %v9698_v48, %v2086_v58  ;;  %7492 = vlog2.f32 %v2280_v21  ;;  %v2226_v0 = vadd.f32 1.0, %v9778_v10 }
 0x2d4   : > { %2481 = vmatprep.mubr.f32.mxu0 %v14091_v55  ;;  %v7485_v42 = vpop.eup %7484  ;;  %v2358_v59 = vsel %vm1942_vm4, %v14092_v18, %v2326_v27  ;;  %v2366_v11 = vsel %vm1950_vm5, %v14093_v53, %v2334_v28  ;;  %v2072_v35 = vsel %vm9932_vm7, %v2069_v49, %v2066_v30  ;;  %v2160_v54 = vand.u32 2147483647, %v9736_v12 }
 0x2d5   : > { %v7487_v63 = vpop.eup %7486  ;;  %v7006_v50 = vpack.c.bf16 %v2366_v11, %v2358_v59  ;;  %v2138_v48 = vmul.f32 0.6931472, %v7485_v42  ;;  %v2158_v38 = vadd.f32 1.0, %v2157_v6  ;;  %v2212_v40 = vadd.f32 1.0, %v2211_v36  ;;  %v14105_v11 = vld [vmem:[#allocation41_spill] sm:$0xff] }
 0x2d6   : > { %v2312_v57 = vmul.f32 0.01, %v2072_v35  ;;  %v2084_v23 = vmul.f32 0.6931472, %v7487_v63  ;;  %v2283_v26 = vmul.f32 -0.5, %v9797_v37  ;;  %7494 = vlog2.f32 %v2226_v0 }
 0x2d7   : > { %6857 = vmatmul.mubr.msk.f32.gmra.mrb[34].mxu0 %vm1490_vm8, %v9954_v15  ;;  %vm1936_vm11 = vcmp.gt.f32.partialorder %v9575_v39, 20.0  ;;  %7007 = vmatprep.subr.bf16.mxu1 %v7006_v50  ;;  %v2144_v34 = vsel %vm9936_vm9, %v2141_v5, %v2138_v48  ;;  %vm9974_vm12 = vcmp.lt.f32.partialorder %v2088_v1, 0.0004427343  ;;  %v2298_v22 = vadd.f32 1.0, %v9806_v2  ;;  %v10016_v39 = vld [vmem:[%s13629_s5 + $0x18] sm:$0xff] }
 0x2d8   : > { %2487 = vmatprep.mubr.f32.mxu0 %v14091_v55  ;;  %v14096_v9 = vpack.c.bf16 %v9599_v13, %v9596_v4  ;;  %v2320_v3 = vmul.f32 0.01, %v2144_v34  ;;  %v2090_v46 = vsel %vm9974_vm12, %v2087_v16, %v2084_v23  ;;  %vm9990_vm13 = vcmp.lt.f32.partialorder %v2160_v54, 0.0004427343  ;;  %v14099_v13 = vld [vmem:[#allocation32_spill] sm:$0xff]  ;;  %v14107_v23 = vld [vmem:[#allocation27_spill] sm:$0xff] }
 0x2d9   : > { %v2214_v56 = vand.u32 2147483647, %v9767_v62  ;;  %v7489_v41 = vpop.eup %7488  ;;  %v2159_v58 = vmul.f32 %v9736_v12, %v2158_v38  ;;  %v2213_v27 = vmul.f32 %v9767_v62, %v2212_v40  ;;  %v2229_v20 = vmul.f32 -0.5, %v9778_v10  ;;  %v14102_v16 = vld [vmem:[#allocation40_spill] sm:$0xff] }
 0x2da   : > { %7009 = vmatpush1.bf16.msra.mxu1 %v14096_v9  ;;  %7496 = vlog2.f32 %v2298_v22  ;;  %v7491_v4 = vpop.eup %7490  ;;  %v2344_v44 = vsel %vm1928_vm10, %v14099_v13, %v2312_v57  ;;  %v2352_v32 = vsel %vm1936_vm11, %v9548_v29, %v2320_v3  ;;  %v2156_v43 = vmul.f32 0.6931472, %v7489_v41  ;;  %v14106_v57 = vld [vmem:[#allocation36_spill] sm:$0xff]  ;;  %v14110_v22 = vld [vmem:[#allocation33_spill] sm:$0xff]  ;;  %v14111_v3 = vld [vmem:[#allocation34_spill] sm:$0xff] }
 0x2db   : > { %6858 = vmatmul.mubr.msk.f32.gmra.mrb[36].mxu0 %vm1490_vm8, %v9982_v7  ;;  %v2284_v6 = vadd.f32 1.0, %v2283_v26  ;;  %v7010_v12 = vpack.c.bf16 %v2352_v32, %v2344_v44  ;;  %v2314_v62 = vmul.f32 0.01, %v2090_v46  ;;  %v2210_v36 = vmul.f32 0.6931472, %v7491_v4  ;;  %v14108_v34 = vld [vmem:[#allocation28_spill] sm:$0xff] }
 0x2dc   : > { %2493 = vmatprep.mubr.f32.mxu0 %v14091_v55  ;;  %v2286_v8 = vand.u32 2147483647, %v9797_v37  ;;  %v2162_v29 = vsel %vm9990_vm13, %v2159_v58, %v2156_v43  ;;  %vm10018_vm14 = vcmp.lt.f32.partialorder %v2214_v56, 0.0004427343  ;;  %v2301_v28 = vmul.f32 -0.5, %v9806_v2  ;;  %v14113_v4 = vld [vmem:[#allocation42_spill] sm:$0xff] }
 0x2dd   : > { %6860 = vmatmul.mubr.msk.f32.vlgmr.msra.gmra.mrb[32].mxu1 %vm1490_vm8, %v9930_v14  ;;  %v7493_v30 = vpop.eup %7492  ;;  %vm1930_vm15 = vcmp.gt.f32.partialorder %v9566_v24, 20.0  ;;  %7011 = vmatprep.subr.bf16.mxu0 %v7010_v12  ;;  %v2322_v49 = vmul.f32 0.01, %v2162_v29  ;;  %v2216_v1 = vsel %vm10018_vm14, %v2213_v27, %v2210_v36  ;;  %v2230_v5 = vadd.f32 1.0, %v2229_v20  ;;  %v14104_v24 = vld [vmem:[#allocation38_spill] sm:$0xff]  ;;  %v14112_v20 = vld [vmem:[#allocation43_spill] sm:$0xff]  ;;  %v10107_v36 = vpop.permute.xlu0 %2391 }
 0x2de   : > { %2570 = vmatprep.mubr.f32.mxu1 %v14091_v55  ;;  %vm1938_vm2 = vcmp.gt.f32.partialorder %v14102_v16, 20.0  ;;  %v14103_v0 = vpack.c.bf16 %v9746_v61, %v9715_v45  ;;  %v2282_v42 = vmul.f32 0.6931472, %v7493_v30  ;;  %v2285_v18 = vmul.f32 %v9797_v37, %v2284_v6  ;;  %v14114_v13 = vld [vmem:[#allocation37_spill] sm:$0xff]  ;;  %v14115_v44 = vld [vmem:[#allocation39_spill] sm:$0xff] }
 0x2df   : > { %v2232_v59 = vand.u32 2147483647, %v9778_v10  ;;  %v2346_v53 = vsel %vm1930_vm15, %v14104_v24, %v2314_v62  ;;  %v2354_v35 = vsel %vm1938_vm2, %v14105_v11, %v2322_v49  ;;  %6859 = vmatmul.mubr.msk.f32.gmra.mrb[38].mxu0 %vm1490_vm8, %v10016_v39  ;;  %vm2287_vm3 = vcmp.lt.f32.partialorder %v2286_v8, 0.0004427343 }
 0x2e0   : > { %7013 = vmatpush1.bf16.msra.mxu0 %v14103_v0  ;;  %v2328_v54 = vmul.f32 0.01, %v2216_v1  ;;  %v7495_v63 = vpop.eup %7494  ;;  %v7018_v45 = vpack.c.bf16 %v2354_v35, %v2346_v53  ;;  %v2288_v61 = vsel %vm2287_vm3, %v2285_v18, %v2282_v42  ;;  %v2302_v37 = vadd.f32 1.0, %v2301_v28  ;;  %2653 = vmatprep.mubr.f32.mxu0 %v14091_v55 }
 0x2e1   : > { %6861 = vmatmul.mubr.msk.f32.gmra.mrb[34].mxu1 %vm1490_vm8, %v9954_v15  ;;  %v2336_v50 = vmul.f32 0.01, %v2288_v61  ;;  %v2228_v48 = vmul.f32 0.6931472, %v7495_v63  ;;  %v2231_v38 = vmul.f32 %v9778_v10, %v2230_v5  ;;  %v2304_v40 = vand.u32 2147483647, %v9806_v2 }
 0x2e2   : > { %2576 = vmatprep.mubr.f32.mxu1 %v14091_v55  ;;  %vm1944_vm4 = vcmp.gt.f32.partialorder %v14106_v57, 20.0  ;;  %vm1952_vm5 = vcmp.gt.f32.partialorder %v14107_v23, 20.0  ;;  %7019 = vmatprep.subr.bf16.mxu1 %v7018_v45  ;;  %vm2233_vm6 = vcmp.lt.f32.partialorder %v2232_v59, 0.0004427343  ;;  %v14109_v52 = vpack.c.bf16 %v9760_v31, %v14108_v34 }
 0x2e3   : > { %v2360_v9 = vsel %vm1944_vm4, %v14110_v22, %v2328_v54  ;;  %v2368_v46 = vsel %vm1952_vm5, %v14111_v3, %v2336_v50  ;;  %v2234_v51 = vsel %vm2233_vm6, %v2231_v38, %v2228_v48  ;;  %v2303_v41 = vmul.f32 %v9806_v2, %v2302_v37 }
 0x2e4   : > { %v7497_v26 = vpop.eup %7496  ;;  %7021 = vmatpush1.bf16.msra.mxu1 %v14109_v52  ;;  %v7014_v10 = vpack.c.bf16 %v2368_v46, %v2360_v9  ;;  %vm2305_vm7 = vcmp.lt.f32.partialorder %v2304_v40, 0.0004427343  ;;  %v2330_v58 = vmul.f32 0.01, %v2234_v51  ;;  %vm1946_vm9 = vcmp.gt.f32.partialorder %v14112_v20, 20.0 }
 0x2e5   : > { %6862 = vmatmul.mubr.msk.f32.gmra.mrb[36].mxu1 %vm1490_vm8, %v9982_v7  ;;  %v2300_v56 = vmul.f32 0.6931472, %v7497_v26  ;;  %vm1954_vm10 = vcmp.gt.f32.partialorder %v14113_v4, 20.0 }
 0x2e6   : > { %2582 = vmatprep.mubr.f32.mxu1 %v14091_v55  ;;  %7015 = vmatprep.subr.bf16.mxu0 %v7014_v10  ;;  %v2362_v2 = vsel %vm1946_vm9, %v14114_v13, %v2330_v58 }
 0x2e7   : > { %v2306_v27 = vsel %vm2305_vm7, %v2303_v41, %v2300_v56  ;;  %7017 = vmatpush1.bf16.msra.mxu0 %v7016_v47 }
 0x2e8   : > { %v2338_v31 = vmul.f32 0.01, %v2306_v27 }
 0x2e9   : > { %6863 = vmatmul.mubr.msk.f32.gmra.mrb[38].mxu1 %vm1490_vm8, %v10016_v39 }
 0x2ea   : > { %v2370_v32 = vsel %vm1954_vm10, %v14115_v44, %v2338_v31  ;;  %2742 = vmatprep.mubr.f32.mxu1 %v14091_v55  ;;  %6864 = vmatmul.mubr.msk.f32.vlgmr.msra.gmra.mrb[40].mxu0 %vm1490_vm8, %v9930_v14 }
 0x2eb   : > { %v7022_v43 = vpack.c.bf16 %v2370_v32, %v2362_v2  ;;  %2659 = vmatprep.mubr.f32.mxu0 %v14091_v55 }
 0x2ed   : > { %7023 = vmatprep.subr.bf16.mxu1 %v7022_v43 }
 0x2ee   : > { %7025 = vmatpush1.bf16.msra.mxu1 %v7024_v17  ;;  %6865 = vmatmul.mubr.msk.f32.gmra.mrb[42].mxu0 %vm1490_vm8, %v9954_v15  ;;  %v10098_v17 = vpop.permute.xlu1 %2386 }
 0x2ef   : > { %2665 = vmatprep.mubr.f32.mxu0 %v14091_v55 }
 0x2f1   : > { %6868 = vmatmul.mubr.msk.f32.vlgmr.msra.gmra.mrb[40].mxu1 %vm1490_vm8, %v9930_v14 }
 0x2f2   : > { %2748 = vmatprep.mubr.f32.mxu1 %v14091_v55  ;;  %6866 = vmatmul.mubr.msk.f32.gmra.mrb[44].mxu0 %vm1490_vm8, %v9982_v7  ;;  %v10138_v37 = vpop.permute.xlu1 %2396 }
 0x2f3   : > { %2671 = vmatprep.mubr.f32.mxu0 %v14091_v55 }
 0x2f5   : > { %6869 = vmatmul.mubr.msk.f32.gmra.mrb[42].mxu1 %vm1490_vm8, %v9954_v15 }
 0x2f6   : > { %2754 = vmatprep.mubr.f32.mxu1 %v14091_v55  ;;  %6867 = vmatmul.mubr.msk.f32.gmra.mrb[46].mxu0 %vm1490_vm8, %v10016_v39 }
 0x2f7   : > { %3383 = vmatprep.mubr.f32.mxu0 %v14091_v55 }
 0x2f9   : > { %6870 = vmatmul.mubr.msk.f32.gmra.mrb[44].mxu1 %vm1490_vm8, %v9982_v7 }
 0x2fa   : > { %2760 = vmatprep.mubr.f32.mxu1 %v14091_v55 }
 0x2fd   : > { %6871 = vmatmul.mubr.msk.f32.gmra.mrb[46].mxu1 %vm1490_vm8, %v10016_v39 }
 0x2fe   : > { %3472 = vmatprep.mubr.f32.mxu1 %v14091_v55 }
 0x3a6   : > { %v2477_v33 = vpop.f32.mrb[32].mxu0 }
 0x3a7   : > { %v10093_v60 = vadd.f32 %v2477_v33, %v10090_v25  ;;  %v2479_v47 = vpop.f32.mrb[33].mxu0 }
 0x3a8   : > { %v10130_v63 = vadd.f32 %v2479_v47, %v10090_v25 }
 0x3a9   : > { %v10096_v19 = vmul.f32 100.0, %v10093_v60 }
 0x3aa   : > { %v2483_v14 = vpop.f32.mrb[34].mxu0  ;;  %v10157_v22 = vmul.f32 100.0, %v10130_v63 }
 0x3ab   : > { %v2799_v15 = vmin.f32 %v10096_v19, 20.0  ;;  %v10102_v7 = vadd.f32 %v2483_v14, %v10098_v17  ;;  %v2485_v6 = vpop.f32.mrb[35].mxu0  ;;  %vm2831_vm11 = vcmp.gt.f32.partialorder %v10096_v19, 20.0 }
 0x3ac   : > { %v10136_v61 = vadd.f32 %v2485_v6, %v10098_v17  ;;  %v2800_v4 = vmin.f32 %v10157_v22, 20.0 }
 0x3ad   : > { %v2863_v12 = vmul.f32 1.442695, %v2799_v15  ;;  %v10105_v62 = vmul.f32 100.0, %v10102_v7 }
 0x3ae   : > { %v2489_v8 = vpop.f32.mrb[36].mxu0  ;;  %14116 = vst [vmem:[#allocation45_spill] sm:$0xff] %v10136_v61  ;;  %v10160_v3 = vmul.f32 100.0, %v10136_v61 }
 0x3af   : > { %7498 = vpow2.f32 %v2863_v12  ;;  %v2807_v39 = vmin.f32 %v10105_v62, 20.0  ;;  %v10111_v21 = vadd.f32 %v2489_v8, %v10107_v36  ;;  %v2491_v28 = vpop.f32.mrb[37].mxu0  ;;  %vm2839_vm12 = vcmp.gt.f32.partialorder %v10105_v62, 20.0 }
 0x3b0   : > { %v2566_v29 = vpop.f32.mrb[32].mxu1  ;;  %v10169_v10 = vadd.f32 %v2491_v28, %v10107_v36  ;;  %v2808_v2 = vmin.f32 %v10160_v3, 20.0 }
 0x3b1   : > { %v10114_v30 = vadd.f32 %v2566_v29, %v10090_v25  ;;  %v2568_v49 = vpop.f32.mrb[33].mxu1  ;;  %v2879_v1 = vmul.f32 1.442695, %v2807_v39  ;;  %v10117_v5 = vmul.f32 100.0, %v10111_v21  ;;  %v2865_v29 = vmul.f32 1.442695, %v2800_v4 }
 0x3b2   : > { %v2495_v18 = vpop.f32.mrb[38].mxu0  ;;  %v10141_v50 = vadd.f32 %v2568_v49, %v10090_v25  ;;  %14120 = vst [vmem:[#allocation15_spill] sm:$0xff] %v10169_v10  ;;  %v10193_v15 = vmul.f32 100.0, %v10169_v10  ;;  %v2881_v28 = vmul.f32 1.442695, %v2808_v2 }
 0x3b3   : > { %v10120_v16 = vmul.f32 100.0, %v10114_v30  ;;  %7500 = vpow2.f32 %v2879_v1  ;;  %v2815_v42 = vmin.f32 %v10117_v5, 20.0  ;;  %v10127_v11 = vpop.f32.mrb[39].mxu0  ;;  %v10153_v34 = vadd.f32 %v2495_v18, %v10138_v37 }
 0x3b4   : > { %v2572_v0 = vpop.f32.mrb[34].mxu1  ;;  %14117 = vst [vmem:[#allocation44_spill] sm:$0xff] %v10141_v50  ;;  %v10166_v51 = vmul.f32 100.0, %v10141_v50  ;;  %14122 = vst [vmem:[#allocation17_spill] sm:$0xff] %v10193_v15  ;;  %vm2847_vm6 = vcmp.gt.f32.partialorder %v10117_v5, 20.0 }
 0x3b5   : > { %v2801_v59 = vmin.f32 %v10120_v16, 20.0  ;;  %v10125_v24 = vadd.f32 %v2572_v0, %v10098_v17  ;;  %v2574_v53 = vpop.f32.mrb[35].mxu1  ;;  %v2895_v35 = vmul.f32 1.442695, %v2815_v42  ;;  %v10178_v31 = vmul.f32 100.0, %v10153_v34 }
 0x3b6   : > { %v10147_v57 = vadd.f32 %v2574_v53, %v10098_v17  ;;  %14119 = vst [vmem:[#allocation20_spill] sm:$0xff] %v10166_v51  ;;  %v2802_v14 = vmin.f32 %v10166_v51, 20.0  ;;  %vm2833_vm15 = vcmp.gt.f32.partialorder %v10120_v16, 20.0 }
 0x3b7   : > { %v2867_v54 = vmul.f32 1.442695, %v2801_v59  ;;  %v10133_v45 = vmul.f32 100.0, %v10125_v24  ;;  %7502 = vpow2.f32 %v2895_v35  ;;  %v2823_v33 = vmin.f32 %v10178_v31, 20.0 }
 0x3b8   : > { %v2578_v38 = vpop.f32.mrb[36].mxu1  ;;  %14118 = vst [vmem:[#allocation29_spill] sm:$0xff] %v10147_v57  ;;  %v10174_v58 = vmul.f32 100.0, %v10147_v57  ;;  %v2869_v35 = vmul.f32 1.442695, %v2802_v14  ;;  %vm2855_vm7 = vcmp.gt.f32.partialorder %v10178_v31, 20.0 }
 0x3b9   : > { %7504 = vpow2.f32 %v2867_v54  ;;  %v2809_v48 = vmin.f32 %v10133_v45, 20.0  ;;  %v10144_v40 = vpop.eup %7498  ;;  %v10150_v23 = vadd.f32 %v2578_v38, %v10107_v36  ;;  %v2580_v26 = vpop.f32.mrb[37].mxu1  ;;  %v2911_v18 = vmul.f32 1.442695, %v2823_v33 }
 0x3ba   : > { %v2927_v52 = vadd.f32 1.0, %v10144_v40  ;;  %14121 = vst [vmem:[#allocation30_spill] sm:$0xff] %v10174_v58  ;;  %v2930_v32 = vmul.f32 -0.5, %v10144_v40  ;;  %v2810_v12 = vmin.f32 %v10174_v58, 20.0  ;;  %v10202_v49 = vadd.f32 %v2580_v26, %v10107_v36 }
 0x3bb   : > { %v2883_v9 = vmul.f32 1.442695, %v2809_v48  ;;  %v10163_v46 = vmul.f32 100.0, %v10150_v23  ;;  %v2933_v53 = vand.u32 2147483647, %v10144_v40  ;;  %v2816_v54 = vmin.f32 %v10193_v15, 20.0 }
 0x3bc   : > { %7506 = vlog2.f32 %v2927_v52  ;;  %v2584_v56 = vpop.f32.mrb[38].mxu1  ;;  %14123 = vst [vmem:[#allocation23_spill] sm:$0xff] %v10202_v49  ;;  %v2931_v0 = vadd.f32 1.0, %v2930_v32  ;;  %v2885_v38 = vmul.f32 1.442695, %v2810_v12  ;;  %v10221_v2 = vmul.f32 100.0, %v10202_v49 }
 0x3bd   : > { %v10171_v41 = vpop.eup %7500  ;;  %7508 = vpow2.f32 %v2883_v9  ;;  %v2817_v27 = vmin.f32 %v10163_v46, 20.0  ;;  %v10180_v20 = vpop.f32.mrb[39].mxu1  ;;  %v10215_v52 = vadd.f32 %v2584_v56, %v10138_v37  ;;  %vm10235_vm13 = vcmp.lt.f32.partialorder %v2933_v53, 0.0004427343 }
 0x3be   : > { %v2999_v13 = vadd.f32 1.0, %v10171_v41  ;;  %v10185_v44 = vpop.f32.mrb[40].mxu0  ;;  %v3002_v39 = vmul.f32 -0.5, %v10171_v41  ;;  %14124 = vst [vmem:[#allocation26_spill] sm:$0xff] %v10221_v2  ;;  %v2932_v14 = vmul.f32 %v10144_v40, %v2931_v0  ;;  %v2897_v49 = vmul.f32 1.442695, %v2816_v54 }
 0x3bf   : > { %v2899_v43 = vmul.f32 1.442695, %v2817_v27  ;;  %v10189_v47 = vpop.f32.mrb[41].mxu0  ;;  %v10231_v56 = vmul.f32 100.0, %v10215_v52  ;;  %v2818_v54 = vmin.f32 %v10221_v2, 20.0  ;;  %v10261_v50 = vadd.f32 %v10185_v44, %v10090_v25 }
 0x3c0   : > { %7510 = vlog2.f32 %v2999_v13  ;;  %v3003_v4 = vadd.f32 1.0, %v3002_v39  ;;  %v3005_v13 = vand.u32 2147483647, %v10171_v41  ;;  %vm2841_vm3 = vcmp.gt.f32.partialorder %v10133_v45, 20.0 }
 0x3c1   : > { %v10195_v6 = vpop.eup %7502  ;;  %7512 = vpow2.f32 %v2899_v43  ;;  %v10204_v1 = vpop.f32.mrb[42].mxu0  ;;  %v2901_v51 = vmul.f32 1.442695, %v2818_v54  ;;  %vm2849_vm10 = vcmp.gt.f32.partialorder %v10163_v46, 20.0 }
 0x3c2   : > { %v10207_v59 = vpop.f32.mrb[43].mxu0  ;;  %v3071_v26 = vadd.f32 1.0, %v10195_v6  ;;  %v3004_v10 = vmul.f32 %v10171_v41, %v3003_v4  ;;  %vm10249_vm14 = vcmp.lt.f32.partialorder %v3005_v13, 0.0004427343  ;;  %v10266_v13 = vadd.f32 %v10127_v11, %v10138_v37 }
 0x3c3   : > { %v10198_v8 = vpop.eup %7504  ;;  %v10279_v11 = vmul.f32 100.0, %v10261_v50 }
 0x3c4   : > { %v2945_v42 = vadd.f32 1.0, %v10198_v8  ;;  %v10211_v48 = vpop.f32.mrb[40].mxu1  ;;  %v2948_v0 = vmul.f32 -0.5, %v10198_v8  ;;  %14129 = vst [vmem:[#allocation18_spill] sm:$0xff] %v10266_v13 }
 0x3c5   : > { %v10217_v9 = vpop.f32.mrb[41].mxu1  ;;  %v10223_v32 = vpop.f32.mrb[44].mxu0 }
 0x3c6   : > { %7514 = vlog2.f32 %v2945_v42  ;;  %v7507_v27 = vpop.eup %7506  ;;  %v10233_v12 = vpop.f32.mrb[45].mxu0 }
 0x3c7   : > { %v10225_v43 = vpop.eup %7508  ;;  %v2929_v33 = vmul.f32 0.6931472, %v7507_v27  ;;  %7516 = vpow2.f32 %v2911_v18  ;;  %v2825_v18 = vmin.f32 %v10231_v56, 20.0 }
 0x3c8   : > { %7518 = vpow2.f32 %v2865_v29  ;;  %v3017_v42 = vadd.f32 1.0, %v10225_v43  ;;  %v10240_v55 = vpop.f32.mrb[42].mxu1  ;;  %v3020_v15 = vmul.f32 -0.5, %v10225_v43 }
 0x3c9   : > { %v2935_v40 = vsel %vm10235_vm13, %v2932_v14, %v2929_v33  ;;  %7520 = vlog2.f32 %v3071_v26  ;;  %v10246_v27 = vpop.f32.mrb[43].mxu1  ;;  %v10254_v57 = vpop.f32.mrb[46].mxu0  ;;  %v3074_v26 = vmul.f32 -0.5, %v10195_v6  ;;  %v2915_v39 = vmul.f32 1.442695, %v2825_v18 }
 0x3ca   : > { %v7511_v53 = vpop.eup %7510  ;;  %7522 = vlog2.f32 %v3017_v42  ;;  %v3215_v41 = vmul.f32 0.01, %v2935_v40  ;;  %v10270_v2 = vpop.f32.mrb[47].mxu0 }
 0x3cb   : > { %v10256_v33 = vpop.eup %7512  ;;  %v3001_v14 = vmul.f32 0.6931472, %v7511_v53  ;;  %7524 = vpow2.f32 %v2881_v28  ;;  %v2949_v53 = vadd.f32 1.0, %v2948_v0  ;;  %v2951_v28 = vand.u32 2147483647, %v10198_v8 }
 0x3cc   : > { %v3089_v4 = vadd.f32 1.0, %v10256_v33  ;;  %v10268_v42 = vpop.f32.mrb[44].mxu1  ;;  %7526 = vpow2.f32 %v2915_v39  ;;  %v3075_v58 = vadd.f32 1.0, %v3074_v26  ;;  %v3077_v0 = vand.u32 2147483647, %v10195_v6 }
 0x3cd   : > { %v3007_v18 = vsel %vm10249_vm14, %v3004_v10, %v3001_v14  ;;  %v10275_v44 = vpop.f32.mrb[45].mxu1  ;;  %7528 = vpow2.f32 %v2869_v35  ;;  %v10285_v10 = vsel %vm2831_vm11, %v10093_v60, %v3215_v41  ;;  %v3021_v60 = vadd.f32 1.0, %v3020_v15 }
 0x3ce   : > { %v3223_v40 = vmul.f32 0.01, %v3007_v18  ;;  %7530 = vpow2.f32 %v2885_v38  ;;  %14130 = vst [vmem:[#allocation21_spill] sm:$0xff] %v10285_v10  ;;  %v2950_v38 = vmul.f32 %v10198_v8, %v2949_v53  ;;  %vm10305_vm2 = vcmp.lt.f32.partialorder %v2951_v28, 0.0004427343 }
 0x3cf   : > { %7532 = vlog2.f32 %v3089_v4  ;;  %v3023_v26 = vand.u32 2147483647, %v10225_v43  ;;  %vm10314_vm4 = vcmp.lt.f32.partialorder %v3077_v0, 0.0004427343  ;;  %v3076_v18 = vmul.f32 %v10195_v6, %v3075_v58 }
 0x3d0   : > { %v7515_v61 = vpop.eup %7514  ;;  %v10290_v35 = vsel %vm2839_vm12, %v10102_v7, %v3223_v40  ;;  %v10292_v14 = vpop.f32.mrb[46].mxu1  ;;  %7534 = vpow2.f32 %v2897_v49  ;;  %v10320_v28 = vmul.f32 100.0, %v10266_v13  ;;  %v3022_v19 = vmul.f32 %v10225_v43, %v3021_v60 }
 0x3d1   : > { %v2947_v29 = vmul.f32 0.6931472, %v7515_v61  ;;  %v10294_v39 = vpop.eup %7516  ;;  %v2803_v61 = vmin.f32 %v10279_v11, 20.0  ;;  %v10301_v54 = vpop.f32.mrb[47].mxu1  ;;  %7536 = vpow2.f32 %v2901_v51  ;;  %v10326_v0 = vadd.f32 %v10211_v48, %v10090_v25 }
 0x3d2   : > { %v10303_v62 = vpop.eup %7518  ;;  %v3143_v41 = vadd.f32 1.0, %v10294_v39  ;;  %14135 = vst [vmem:[#allocation24_spill] sm:$0xff] %v10320_v28  ;;  %vm3024_vm5 = vcmp.lt.f32.partialorder %v3023_v26, 0.0004427343  ;;  %v10335_v43 = vadd.f32 %v10180_v20, %v10138_v37  ;;  %v10350_v20 = vadd.f32 %v10204_v1, %v10098_v17 }
 0x3d3   : > { %v7521_v8 = vpop.eup %7520  ;;  %v2953_v4 = vsel %vm10305_vm2, %v2950_v38, %v2947_v29  ;;  %v2871_v49 = vmul.f32 1.442695, %v2803_v61  ;;  %v3092_v29 = vmul.f32 -0.5, %v10256_v33  ;;  %v3146_v61 = vmul.f32 -0.5, %v10294_v39 }
 0x3d4   : > { %v7523_v53 = vpop.eup %7522  ;;  %7538 = vlog2.f32 %v3143_v41  ;;  %v3217_v51 = vmul.f32 0.01, %v2953_v4  ;;  %v3073_v7 = vmul.f32 0.6931472, %v7521_v8  ;;  %14136 = vst [vmem:[#allocation22_spill] sm:$0xff] %v10335_v43  ;;  %v10338_v60 = vmul.f32 100.0, %v10326_v0 }
 0x3d5   : > { %v3019_v40 = vmul.f32 0.6931472, %v7523_v53  ;;  %v10328_v38 = vpop.eup %7524  ;;  %7540 = vpow2.f32 %v2871_v49  ;;  %v3095_v4 = vand.u32 2147483647, %v10256_v33  ;;  %v2824_v8 = vmin.f32 %v10320_v28, 20.0 }
 0x3d6   : > { %v10330_v58 = vpop.eup %7526  ;;  %v2805_v49 = vmin.f32 %v10338_v60, 20.0  ;;  %v10359_v13 = vsel %vm2833_vm15, %v10114_v30, %v3217_v51  ;;  %v3079_v1 = vsel %vm10314_vm4, %v3076_v18, %v3073_v7  ;;  %v3147_v28 = vadd.f32 1.0, %v3146_v61 }
 0x3d7   : > { %v3025_v6 = vsel %vm3024_vm5, %v3022_v19, %v3019_v40  ;;  %v10340_v48 = vpop.eup %7528  ;;  %v3161_v26 = vadd.f32 1.0, %v10330_v58  ;;  %v3093_v19 = vadd.f32 1.0, %v3092_v29  ;;  %v10354_v40 = vadd.f32 %v10240_v55, %v10098_v17  ;;  %14137 = vst [vmem:[#allocation19_spill] sm:$0xff] %v10359_v13 }
 0x3d8   : > { %v3225_v41 = vmul.f32 0.01, %v3025_v6  ;;  %v10345_v53 = vpop.eup %7530  ;;  %v2875_v16 = vmul.f32 1.442695, %v2805_v49  ;;  %v10374_v30 = vadd.f32 %v10189_v47, %v10090_v25  ;;  %v3164_v51 = vmul.f32 -0.5, %v10330_v58 }
 0x3d9   : > { %v7533_v6 = vpop.eup %7532  ;;  %7542 = vlog2.f32 %v3161_v26  ;;  %v2913_v15 = vmul.f32 1.442695, %v2824_v8  ;;  %v10382_v18 = vadd.f32 %v10217_v9, %v10090_v25  ;;  %v10387_v61 = vmul.f32 100.0, %v10350_v20 }
 0x3da   : > { %v10364_v29 = vsel %vm2841_vm3, %v10125_v24, %v3225_v41  ;;  %14139 = vst [vmem:[#allocation35_spill] sm:$0xff] %v10374_v30  ;;  %v10376_v45 = vpop.eup %7534  ;;  %v3149_v24 = vand.u32 2147483647, %v10294_v39  ;;  %v3091_v41 = vmul.f32 0.6931472, %v7533_v6  ;;  %7544 = vpow2.f32 %v2875_v16 }
 0x3db   : > { %14138 = vst [vmem:[#allocation16_spill] sm:$0xff] %v10364_v29  ;;  %14140 = vst [vmem:[#allocation25_spill] sm:$0xff] %v10382_v18  ;;  %v10384_v7 = vpop.eup %7536  ;;  %v10390_v47 = vmul.f32 100.0, %v10354_v40  ;;  %v3231_v49 = vmul.f32 0.01, %v3079_v1  ;;  %v3094_v55 = vmul.f32 %v10256_v33, %v3093_v19  ;;  %v10398_v25 = vmul.f32 100.0, %v10335_v43 }
 0x3dc   : > { %vm10393_vm9 = vcmp.lt.f32.partialorder %v3095_v4, 0.0004427343  ;;  %v3148_v6 = vmul.f32 %v10294_v39, %v3147_v28  ;;  %v10402_v16 = vmul.f32 100.0, %v10374_v30  ;;  %v2811_v13 = vmin.f32 %v10387_v61, 20.0 }
 0x3dd   : > { %vm3150_vm11 = vcmp.lt.f32.partialorder %v3149_v24, 0.0004427343  ;;  %v3165_v33 = vadd.f32 1.0, %v3164_v51  ;;  %v3167_v4 = vand.u32 2147483647, %v10330_v58  ;;  %v2813_v19 = vmin.f32 %v10390_v47, 20.0 }
 0x3de   : > { %v7539_v26 = vpop.eup %7538  ;;  %v3097_v1 = vsel %vm10393_vm9, %v3094_v55, %v3091_v41  ;;  %v10414_v28 = vmul.f32 100.0, %v10382_v18  ;;  %v2887_v43 = vmul.f32 1.442695, %v2811_v13  ;;  %v10418_v24 = vadd.f32 %v10207_v59, %v10098_v17 }
 0x3df   : > { %v3145_v9 = vmul.f32 0.6931472, %v7539_v26  ;;  %v10405_v29 = vpop.eup %7540  ;;  %v2891_v10 = vmul.f32 1.442695, %v2813_v19  ;;  %v10423_v51 = vsel %vm2847_vm6, %v10111_v21, %v3231_v49  ;;  %v2826_v55 = vmin.f32 %v10398_v25, 20.0 }
 0x3e0   : > { %v2963_v39 = vadd.f32 1.0, %v10405_v29  ;;  %14143 = vst [vmem:[#allocation31_spill] sm:$0xff] %v10414_v28  ;;  %14144 = vst [vmem:[#allocation32_spill] sm:$0xff] %v10418_v24  ;;  %v2804_v41 = vmin.f32 %v10402_v16, 20.0  ;;  %v3166_v59 = vmul.f32 %v10330_v58, %v3165_v33  ;;  %v2806_v49 = vmin.f32 %v10414_v28, 20.0 }
 0x3e1   : > { %v3151_v26 = vsel %vm3150_vm11, %v3148_v6, %v3145_v9  ;;  %v3233_v9 = vmul.f32 0.01, %v3097_v1  ;;  %vm2857_vm12 = vcmp.gt.f32.partialorder %v10231_v56, 20.0  ;;  %vm3168_vm13 = vcmp.lt.f32.partialorder %v3167_v4, 0.0004427343 }
 0x3e2   : > { %v3239_v30 = vmul.f32 0.01, %v3151_v26  ;;  %7546 = vlog2.f32 %v2963_v39  ;;  %v10438_v6 = vmul.f32 100.0, %v10418_v24  ;;  %v10453_v4 = vadd.f32 %v10268_v42, %v10107_v36 }
 0x3e3   : > { %v7543_v8 = vpop.eup %7542  ;;  %7548 = vpow2.f32 %v2887_v43  ;;  %v2917_v43 = vmul.f32 1.442695, %v2826_v55  ;;  %v2877_v1 = vmul.f32 1.442695, %v2806_v49  ;;  %v10472_v42 = vadd.f32 %v10233_v12, %v10107_v36 }
 0x3e4   : > { %v10430_v13 = vsel %vm2855_vm7, %v10153_v34, %v3239_v30  ;;  %v3163_v21 = vmul.f32 0.6931472, %v7543_v8  ;;  %7550 = vpow2.f32 %v2891_v10  ;;  %v10442_v34 = vadd.f32 %v10223_v32, %v10107_v36  ;;  %v10444_v31 = vpop.eup %7544 }
 0x3e5   : > { %7552 = vpow2.f32 %v2913_v15  ;;  %v2873_v30 = vmul.f32 1.442695, %v2804_v41  ;;  %v2981_v19 = vadd.f32 1.0, %v10444_v31  ;;  %v10449_v10 = vadd.f32 %v10246_v27, %v10098_v17  ;;  %14148 = vst [vmem:[#allocation36_spill] sm:$0xff] %v10472_v42 }
 0x3e6   : > { %v3169_v58 = vsel %vm3168_vm13, %v3166_v59, %v3163_v21  ;;  %v10458_v32 = vsel %vm2849_vm10, %v10150_v23, %v3233_v9  ;;  %v2966_v15 = vmul.f32 -0.5, %v10405_v29  ;;  %v10462_v26 = vmul.f32 100.0, %v10442_v34 }
 0x3e7   : > { %v3241_v33 = vmul.f32 0.01, %v3169_v58  ;;  %14145 = vst [vmem:[#allocation40_spill] sm:$0xff] %v10449_v10  ;;  %14146 = vst [vmem:[#allocation38_spill] sm:$0xff] %v10458_v32  ;;  %7554 = vlog2.f32 %v2981_v19  ;;  %v2812_v27 = vmin.f32 %v10438_v6, 20.0  ;;  %v10479_v56 = vmul.f32 100.0, %v10449_v10 }
 0x3e8   : > { %7556 = vpow2.f32 %v2917_v43  ;;  %v2819_v46 = vmin.f32 %v10462_v26, 20.0  ;;  %v2969_v39 = vand.u32 2147483647, %v10405_v29  ;;  %v10486_v12 = vadd.f32 %v10254_v57, %v10138_v37 }
 0x3e9   : > { %v10467_v17 = vsel %vm2857_vm12, %v10215_v52, %v3241_v33  ;;  %7558 = vpow2.f32 %v2873_v30  ;;  %14149 = vst [vmem:[#allocation27_spill] sm:$0xff] %v10479_v56  ;;  %v10482_v52 = vmul.f32 100.0, %v10453_v4  ;;  %v2967_v9 = vadd.f32 1.0, %v2966_v15 }
 0x3ea   : > { %14147 = vst [vmem:[#allocation41_spill] sm:$0xff] %v10467_v17  ;;  %7560 = vpow2.f32 %v2877_v1  ;;  %v2903_v41 = vmul.f32 1.442695, %v2819_v46  ;;  %v2889_v59 = vmul.f32 1.442695, %v2812_v27  ;;  %v10490_v49 = vmul.f32 100.0, %v10472_v42 }
 0x3eb   : > { %v2821_v21 = vmin.f32 %v10482_v52, 20.0  ;;  %v2984_v43 = vmul.f32 -0.5, %v10444_v31  ;;  %v10497_v33 = vadd.f32 %v10275_v44, %v10107_v36  ;;  %vm10499_vm14 = vcmp.lt.f32.partialorder %v2969_v39, 0.0004427343 }
 0x3ec   : > { %v7547_v55 = vpop.eup %7546  ;;  %14150 = vst [vmem:[#allocation28_spill] sm:$0xff] %v10490_v49  ;;  %7562 = vpow2.f32 %v2903_v41  ;;  %v2987_v19 = vand.u32 2147483647, %v10444_v31  ;;  %v2814_v1 = vmin.f32 %v10479_v56, 20.0  ;;  %v10509_v41 = vmul.f32 100.0, %v10486_v12 }
 0x3ed   : > { %v7549_v8 = vpop.eup %7548  ;;  %14151 = vst [vmem:[#allocation33_spill] sm:$0xff] %v10497_v33  ;;  %v2965_v46 = vmul.f32 0.6931472, %v7547_v55  ;;  %v10513_v36 = vadd.f32 %v10292_v14, %v10138_v37  ;;  %v2907_v39 = vmul.f32 1.442695, %v2821_v21  ;;  %v2820_v23 = vmin.f32 %v10490_v49, 20.0 }
 0x3ee   : > { %v10492_v58 = vpop.eup %7550  ;;  %v3035_v30 = vadd.f32 1.0, %v7549_v8  ;;  %v3038_v44 = vmul.f32 -0.5, %v7549_v8  ;;  %v2968_v5 = vmul.f32 %v10405_v29, %v2967_v9  ;;  %v2985_v42 = vadd.f32 1.0, %v2984_v43 }
 0x3ef   : > { %v3053_v15 = vadd.f32 1.0, %v10492_v58  ;;  %v10506_v27 = vpop.eup %7552  ;;  %v10518_v10 = vmul.f32 100.0, %v10497_v33  ;;  %vm10520_vm15 = vcmp.lt.f32.partialorder %v2987_v19, 0.0004427343  ;;  %v3041_v18 = vand.u32 2147483647, %v7549_v8 }
 0x3f0   : > { %7564 = vlog2.f32 %v3035_v30  ;;  %v2893_v14 = vmul.f32 1.442695, %v2814_v1  ;;  %v2971_v21 = vsel %vm10499_vm14, %v2968_v5, %v2965_v46  ;;  %v3056_v29 = vmul.f32 -0.5, %v10492_v58 }
 0x3f1   : > { %7566 = vlog2.f32 %v3053_v15  ;;  %14154 = vst [vmem:[#allocation34_spill] sm:$0xff] %v10518_v10  ;;  %v7555_v55 = vpop.eup %7554  ;;  %v3059_v9 = vand.u32 2147483647, %v10492_v58  ;;  %v3039_v19 = vadd.f32 1.0, %v3038_v44  ;;  %v2905_v15 = vmul.f32 1.442695, %v2820_v23 }
 0x3f2   : > { %7568 = vpow2.f32 %v2889_v59  ;;  %v10524_v56 = vpop.eup %7556  ;;  %v2827_v59 = vmin.f32 %v10509_v41, 20.0  ;;  %v10534_v33 = vmul.f32 100.0, %v10513_v36  ;;  %v10538_v1 = vadd.f32 %v10270_v2, %v10138_v37 }
 0x3f3   : > { %7570 = vpow2.f32 %v2907_v39  ;;  %v10531_v43 = vpop.eup %7558  ;;  %v2983_v5 = vmul.f32 0.6931472, %v7555_v55  ;;  %v2986_v57 = vmul.f32 %v10444_v31, %v2985_v42  ;;  %v2822_v46 = vmin.f32 %v10518_v10, 20.0 }
 0x3f4   : > { %14157 = vst [vmem:[#allocation43_spill] sm:$0xff] %v10538_v1  ;;  %v10540_v39 = vpop.eup %7560  ;;  %v2919_v49 = vmul.f32 1.442695, %v2827_v59  ;;  %vm2835_vm2 = vcmp.gt.f32.partialorder %v10279_v11, 20.0  ;;  %v3219_v28 = vmul.f32 0.01, %v2971_v21  ;;  %7572 = vpow2.f32 %v2893_v14 }
 0x3f5   : > { %vm2843_vm3 = vcmp.gt.f32.partialorder %v10387_v61, 20.0  ;;  %vm10546_vm4 = vcmp.lt.f32.partialorder %v3041_v18, 0.0004427343  ;;  %v2829_v2 = vmin.f32 %v10534_v33, 20.0  ;;  %vm2837_vm5 = vcmp.gt.f32.partialorder %v10338_v60, 20.0 }
 0x3f6   : > { %v7563_v44 = vpop.eup %7562  ;;  %vm2845_vm6 = vcmp.gt.f32.partialorder %v10390_v47, 20.0  ;;  %v3057_v31 = vadd.f32 1.0, %v3056_v29  ;;  %7574 = vpow2.f32 %v2919_v49  ;;  %v10554_v42 = vmul.f32 100.0, %v10538_v1 }
 0x3f7   : > { %v10558_v55 = vadd.f32 %v10301_v54, %v10138_v37  ;;  %v3040_v18 = vmul.f32 %v7549_v8, %v3039_v19  ;;  %vm10560_vm7 = vcmp.lt.f32.partialorder %v3059_v9, 0.0004427343  ;;  %v3107_v14 = vadd.f32 1.0, %v7563_v44 }
 0x3f8   : > { %v2936_v59 = vadd.f32 1.0, %v10303_v62  ;;  %v2989_v29 = vsel %vm10520_vm15, %v2986_v57, %v2983_v5  ;;  %7576 = vpow2.f32 %v2905_v15  ;;  %v2909_v49 = vmul.f32 1.442695, %v2822_v46 }
 0x3f9   : > { %14160 = vst [vmem:[#allocation42_spill] sm:$0xff] %v10558_v55  ;;  %v2923_v1 = vmul.f32 1.442695, %v2829_v2  ;;  %7578 = vlog2.f32 %v3107_v14  ;;  %v3110_v37 = vmul.f32 -0.5, %v7563_v44  ;;  %v2828_v54 = vmin.f32 %v10554_v42, 20.0 }
 0x3fa   : > { %v7565_v10 = vpop.eup %7564  ;;  %v3058_v19 = vmul.f32 %v10492_v58, %v3057_v31  ;;  %v10572_v17 = vmul.f32 100.0, %v10558_v55  ;;  %v3221_v15 = vmul.f32 0.01, %v2989_v29  ;;  %v10585_v14 = vsel %vm2835_vm2, %v10261_v50, %v3219_v28 }
 0x3fb   : > { %v7567_v24 = vpop.eup %7566  ;;  %v3037_v32 = vmul.f32 0.6931472, %v7565_v10  ;;  %7580 = vpow2.f32 %v2923_v1  ;;  %v2939_v10 = vmul.f32 -0.5, %v10303_v62  ;;  %v3111_v2 = vadd.f32 1.0, %v3110_v37 }
 0x3fc   : > { %v10568_v8 = vpop.eup %7568  ;;  %v3055_v9 = vmul.f32 0.6931472, %v7567_v24  ;;  %7582 = vlog2.f32 %v2936_v59  ;;  %v3113_v24 = vand.u32 2147483647, %v7563_v44  ;;  %v2921_v31 = vmul.f32 1.442695, %v2828_v54 }
 0x3fd   : > { %v10574_v30 = vpop.eup %7570  ;;  %v3043_v5 = vsel %vm10546_vm4, %v3040_v18, %v3037_v32  ;;  %7584 = vpow2.f32 %v2909_v49  ;;  %v2830_v23 = vmin.f32 %v10572_v17, 20.0  ;;  %v10598_v21 = vsel %vm2837_vm5, %v10326_v0, %v3221_v15 }
 0x3fe   : > { %v3227_v57 = vmul.f32 0.01, %v3043_v5  ;;  %v3061_v46 = vsel %vm10560_vm7, %v3058_v19, %v3055_v9  ;;  %v3125_v58 = vadd.f32 1.0, %v10574_v30  ;;  %v10593_v18 = vpop.eup %7572  ;;  %vm10609_vm9 = vcmp.lt.f32.partialorder %v3113_v24, 0.0004427343 }
 0x3ff   : > { %v3229_v1 = vmul.f32 0.01, %v3061_v46  ;;  %v3128_v0 = vmul.f32 -0.5, %v10574_v30  ;;  %v3008_v60 = vadd.f32 1.0, %v10328_v38  ;;  %v3112_v29 = vmul.f32 %v7563_v44, %v3111_v2 }
 0x400   : > { %v10590_v32 = vsel %vm2843_vm3, %v10350_v20, %v3227_v57  ;;  %7586 = vlog2.f32 %v3125_v58  ;;  %v2940_v20 = vadd.f32 1.0, %v2939_v10  ;;  %v7575_v61 = vpop.eup %7574  ;;  %v3131_v49 = vand.u32 2147483647, %v10574_v30 }
 0x401   : > { %v10605_v50 = vsel %vm2845_vm6, %v10354_v40, %v3229_v1  ;;  %v3179_v37 = vadd.f32 1.0, %v7575_v61  ;;  %7588 = vpow2.f32 %v2921_v31  ;;  %v10618_v47 = vmul.f32 1.442695, %v2830_v23 }
 0x402   : > { %v10616_v40 = vpop.eup %7576  ;;  %v2942_v54 = vand.u32 2147483647, %v10303_v62  ;;  %7590 = vlog2.f32 %v3008_v60  ;;  %v2954_v9 = vadd.f32 1.0, %v10340_v48  ;;  %vm2851_vm10 = vcmp.gt.f32.partialorder %v10462_v26, 20.0 }
 0x403   : > { %v7579_v19 = vpop.eup %7578  ;;  %7592 = vlog2.f32 %v3179_v37  ;;  %v3182_v15 = vmul.f32 -0.5, %v7575_v61  ;;  %v3011_v44 = vmul.f32 -0.5, %v10328_v38  ;;  %v2957_v5 = vmul.f32 -0.5, %v10340_v48 }
 0x404   : > { %v3109_v57 = vmul.f32 0.6931472, %v7579_v19  ;;  %v3129_v46 = vadd.f32 1.0, %v3128_v0  ;;  %v2941_v24 = vmul.f32 %v10303_v62, %v2940_v20  ;;  %7594 = vlog2.f32 %v2954_v9 }
 0x405   : > { %v7581_v10 = vpop.eup %7580  ;;  %vm10626_vm11 = vcmp.lt.f32.partialorder %v3131_v49, 0.0004427343  ;;  %v3185_v2 = vand.u32 2147483647, %v7575_v61  ;;  %vm10632_vm12 = vcmp.lt.f32.partialorder %v2942_v54, 0.0004427343 }
 0x406   : > { %v7583_v58 = vpop.eup %7582  ;;  %v3197_v31 = vadd.f32 1.0, %v7581_v10  ;;  %v3200_v23 = vmul.f32 -0.5, %v7581_v10  ;;  %v3115_v60 = vsel %vm10609_vm9, %v3112_v29, %v3109_v57  ;;  %v3014_v0 = vand.u32 2147483647, %v10328_v38 }
 0x407   : > { %v2938_v37 = vmul.f32 0.6931472, %v7583_v58  ;;  %v10637_v62 = vpop.eup %7584  ;;  %vm2832_vm13 = vcmp.gt.f32.partialorder %v10157_v22, 20.0  ;;  %v3183_v20 = vadd.f32 1.0, %v3182_v15  ;;  %v3012_v49 = vadd.f32 1.0, %v3011_v44 }
 0x408   : > { %7596 = vlog2.f32 %v3197_v31  ;;  %v2958_v9 = vadd.f32 1.0, %v2957_v5  ;;  %v3235_v11 = vmul.f32 0.01, %v3115_v60  ;;  %v3201_v55 = vadd.f32 1.0, %v3200_v23 }
 0x409   : > { %v3203_v59 = vand.u32 2147483647, %v7581_v10  ;;  %v3026_v29 = vadd.f32 1.0, %v10345_v53  ;;  %vm2840_vm14 = vcmp.gt.f32.partialorder %v10160_v3, 20.0  ;;  %v3130_v54 = vmul.f32 %v10574_v30, %v3129_v46 }
 0x40a   : > { %v7587_v19 = vpop.eup %7586  ;;  %vm10643_vm15 = vcmp.lt.f32.partialorder %v3185_v2, 0.0004427343  ;;  %v2944_v15 = vsel %vm10632_vm12, %v2941_v24, %v2938_v37  ;;  %v3029_v44 = vmul.f32 -0.5, %v10345_v53  ;;  %vm2859_vm2 = vcmp.gt.f32.partialorder %v10509_v41, 20.0 }
 0x40b   : > { %v3127_v5 = vmul.f32 0.6931472, %v7587_v19  ;;  %vm10651_vm3 = vcmp.lt.f32.partialorder %v3014_v0, 0.0004427343  ;;  %v2960_v31 = vand.u32 2147483647, %v10340_v48  ;;  %7598 = vlog2.f32 %v3026_v29  ;;  %v10656_v30 = vpop.eup %7588 }
 0x40c   : > { %v3184_v46 = vmul.f32 %v7575_v61, %v3183_v20  ;;  %v3013_v2 = vmul.f32 %v10328_v38, %v3012_v49  ;;  %v2959_v28 = vmul.f32 %v10340_v48, %v2958_v9  ;;  %v3080_v24 = vadd.f32 1.0, %v10376_v45  ;;  %v7591_v23 = vpop.eup %7590 }
 0x40d   : > { %v10664_v60 = vsel %vm2851_vm10, %v10442_v34, %v3235_v11  ;;  %vm2853_vm4 = vcmp.gt.f32.partialorder %v10482_v52, 20.0  ;;  %v3202_v37 = vmul.f32 %v7581_v10, %v3201_v55  ;;  %vm10667_vm5 = vcmp.lt.f32.partialorder %v3203_v59, 0.0004427343  ;;  %v7593_v20 = vpop.eup %7592  ;;  %v14182_v55 = vld [vmem:[#allocation17_spill] sm:$0xff] }
 0x40e   : > { %v3216_v61 = vmul.f32 0.01, %v2944_v15  ;;  %v3010_v38 = vmul.f32 0.6931472, %v7591_v23  ;;  %v3030_v49 = vadd.f32 1.0, %v3029_v44  ;;  %7600 = vlog2.f32 %v3080_v24  ;;  %v7595_v9 = vpop.eup %7594 }
 0x40f   : > { %v3152_v48 = vadd.f32 1.0, %v10506_v27  ;;  %v3133_v26 = vsel %vm10626_vm11, %v3130_v54, %v3127_v5  ;;  %v3181_v34 = vmul.f32 0.6931472, %v7593_v20  ;;  %vm2861_vm6 = vcmp.gt.f32.partialorder %v10534_v33, 20.0  ;;  %v14177_v5 = vld [vmem:[#allocation20_spill] sm:$0xff] }
 0x410   : > { %vm10675_vm7 = vcmp.lt.f32.partialorder %v2960_v31, 0.0004427343  ;;  %v3083_v11 = vmul.f32 -0.5, %v10376_v45  ;;  %v3016_v10 = vsel %vm10651_vm3, %v3013_v2, %v3010_v38  ;;  %v2956_v19 = vmul.f32 0.6931472, %v7595_v9  ;;  %v14178_v31 = vld [vmem:[#allocation30_spill] sm:$0xff] }
 0x411   : > { %v3032_v59 = vand.u32 2147483647, %v10345_v53  ;;  %7602 = vlog2.f32 %v3152_v48  ;;  %v3187_v1 = vsel %vm10643_vm15, %v3184_v46, %v3181_v34  ;;  %v3224_v29 = vmul.f32 0.01, %v3016_v10  ;;  %v14179_v46 = vld [vmem:[#allocation45_spill] sm:$0xff] }
 0x412   : > { %v3248_v54 = vsel %vm2832_vm13, %v10130_v63, %v3216_v61  ;;  %v3155_v15 = vmul.f32 -0.5, %v10506_v27  ;;  %v7597_v44 = vpop.eup %7596  ;;  %vm2834_vm9 = vcmp.gt.f32.partialorder %v14177_v5, 20.0  ;;  %vm2842_vm10 = vcmp.gt.f32.partialorder %v14178_v31, 20.0 }
 0x413   : > { %v3237_v58 = vmul.f32 0.01, %v3133_v26  ;;  %v3243_v2 = vmul.f32 0.01, %v3187_v1  ;;  %v3031_v24 = vmul.f32 %v10345_v53, %v3030_v49  ;;  %v3098_v23 = vadd.f32 1.0, %v10384_v7 }
 0x414   : > { %v3199_v57 = vmul.f32 0.6931472, %v7597_v44  ;;  %v3256_v20 = vsel %vm2840_vm14, %v14179_v46, %v3224_v29  ;;  %v3084_v22 = vadd.f32 1.0, %v3083_v11  ;;  %v3086_v63 = vand.u32 2147483647, %v10376_v45 }
 0x415   : > { %v10700_v61 = vsel %vm2859_vm2, %v10486_v12, %v3243_v2  ;;  %v7026_v38 = vpack.c.bf16 %v3256_v20, %v3248_v54  ;;  %v2962_v48 = vsel %vm10675_vm7, %v2959_v28, %v2956_v19  ;;  %7604 = vlog2.f32 %v3098_v23  ;;  %v7599_v53 = vpop.eup %7598  ;;  %v14189_v2 = vld [vmem:[#allocation44_spill] sm:$0xff]  ;;  %v14190_v23 = vld [vmem:[#allocation29_spill] sm:$0xff]  ;;  %v14195_v19 = vld [vmem:[#allocation26_spill] sm:$0xff] }
 0x416   : > { %v7048_v49 = vpack.c.bf16 %v10700_v61, %v10664_v60  ;;  %v3205_v3 = vsel %vm10667_vm5, %v3202_v37, %v3199_v57  ;;  %vm10708_vm11 = vcmp.lt.f32.partialorder %v3032_v59, 0.0004427343  ;;  %v3156_v26 = vadd.f32 1.0, %v3155_v15  ;;  %v14183_v37 = vld [vmem:[#allocation21_spill] sm:$0xff]  ;;  %v14235_v61 = vld [vmem:[#allocation12_spill] sm:$0xff] }
 0x417   : > { %v10715_v12 = vsel %vm2853_vm4, %v10453_v4, %v3237_v58  ;;  %v3245_v41 = vmul.f32 0.01, %v3205_v3  ;;  %7027 = vmatprep.subr.bf16.mxu0 %v7026_v38  ;;  %v3028_v28 = vmul.f32 0.6931472, %v7599_v53  ;;  %v3158_v34 = vand.u32 2147483647, %v10506_v27 }
 0x418   : > { %vm2848_vm12 = vcmp.gt.f32.partialorder %v14182_v55, 20.0  ;;  %v3218_v11 = vmul.f32 0.01, %v2962_v48  ;;  %v14184_v0 = vpack.c.bf16 %v10290_v35, %v14183_v37  ;;  %v3085_v10 = vmul.f32 %v10376_v45, %v3084_v22  ;;  %v7601_v52 = vpop.eup %7600  ;;  %v14191_v48 = vld [vmem:[#allocation24_spill] sm:$0xff]  ;;  %v14234_v60 = vld [vmem:[#allocation13_spill] sm:$0xff] }
 0x419   : > { %vm10723_vm13 = vcmp.lt.f32.partialorder %v3086_v63, 0.0004427343  ;;  %v3170_v4 = vadd.f32 1.0, %v10524_v56  ;;  %v10731_v59 = vsel %vm2861_vm6, %v10513_v36, %v3245_v41  ;;  %v3034_v1 = vsel %vm10708_vm11, %v3031_v24, %v3028_v28  ;;  %v14192_v28 = vld [vmem:[#allocation16_spill] sm:$0xff] }
 0x41a   : > { %7029 = vmatpush1.bf16.msra.mxu0 %v14184_v0  ;;  %v3101_v35 = vmul.f32 -0.5, %v10384_v7  ;;  %v2972_v29 = vadd.f32 1.0, %v10531_v43  ;;  %v7056_v45 = vpack.c.bf16 %v10731_v59, %v10715_v12  ;;  %v3226_v54 = vmul.f32 0.01, %v3034_v1  ;;  %v14236_v12 = vld [vmem:[#allocation14_spill] sm:$0xff]  ;;  %v4191_v59 = vld [vmem:[%s13634_s10] sm:$0xff] }
 0x41b   : > { %v3082_v15 = vmul.f32 0.6931472, %v7601_v52  ;;  %7606 = vlog2.f32 %v3170_v4  ;;  %v7603_v44 = vpop.eup %7602  ;;  %v3157_v58 = vmul.f32 %v10506_v27, %v3156_v26  ;;  %vm10740_vm14 = vcmp.lt.f32.partialorder %v3158_v34, 0.0004427343  ;;  %v14193_v34 = vld [vmem:[#allocation19_spill] sm:$0xff]  ;;  %v14197_v52 = vld [vmem:[#allocation18_spill] sm:$0xff] }
 0x41c   : > { %v3173_v36 = vmul.f32 -0.5, %v10524_v56  ;;  %7608 = vlog2.f32 %v2972_v29  ;;  %v3250_v24 = vsel %vm2834_vm9, %v14189_v2, %v3218_v11  ;;  %v3258_v57 = vsel %vm2842_vm10, %v14190_v23, %v3226_v54  ;;  %v14196_v4 = vld [vmem:[#allocation15_spill] sm:$0xff]  ;;  %v14212_v2 = vld [vmem:[#allocation41_spill] sm:$0xff] }
 0x41d   : > { %v3088_v46 = vsel %vm10723_vm13, %v3085_v10, %v3082_v15  ;;  %v3154_v20 = vmul.f32 0.6931472, %v7603_v44  ;;  %v7034_v27 = vpack.c.bf16 %v3258_v57, %v3250_v24  ;;  %v3102_v63 = vadd.f32 1.0, %v3101_v35 }
 0x41e   : > { %v3232_v22 = vmul.f32 0.01, %v3088_v46  ;;  %v2975_v38 = vmul.f32 -0.5, %v10531_v43  ;;  %vm2856_vm15 = vcmp.gt.f32.partialorder %v14191_v48, 20.0  ;;  %v3104_v5 = vand.u32 2147483647, %v10384_v7 }
 0x41f   : > { %v3160_v53 = vsel %vm10740_vm14, %v3157_v58, %v3154_v20  ;;  %v3044_v3 = vadd.f32 1.0, %v10568_v8  ;;  %v7605_v31 = vpop.eup %7604  ;;  %7610 = vpow2.f32 %v10618_v47  ;;  %7035 = vmatprep.subr.bf16.mxu1 %v7034_v27  ;;  %v3174_v26 = vadd.f32 1.0, %v3173_v36  ;;  %v10800_v27 = vld [vmem:[%s13631_s7] sm:$0xff] }
 0x420   : > { %v3240_v9 = vmul.f32 0.01, %v3160_v53  ;;  %v3176_v41 = vand.u32 2147483647, %v10524_v56  ;;  %v14194_v11 = vpack.c.bf16 %v14192_v28, %v14193_v34  ;;  %v3100_v37 = vmul.f32 0.6931472, %v7605_v31 }
 0x421   : > { %v2978_v0 = vand.u32 2147483647, %v10531_v43  ;;  %7612 = vlog2.f32 %v3044_v3  ;;  %v2990_v10 = vadd.f32 1.0, %v10540_v39  ;;  %vm2850_vm2 = vcmp.gt.f32.partialorder %v14195_v19, 20.0 }
 0x422   : > { %7037 = vmatpush1.bf16.msra.mxu1 %v14194_v11  ;;  %v3264_v47 = vsel %vm2848_vm12, %v14196_v4, %v3232_v22  ;;  %v3272_v1 = vsel %vm2856_vm15, %v14197_v52, %v3240_v9  ;;  %v3103_v35 = vmul.f32 %v10384_v7, %v3102_v63  ;;  %v2976_v29 = vadd.f32 1.0, %v2975_v38  ;;  %v14209_v4 = vld [vmem:[#allocation22_spill] sm:$0xff] }
 0x423   : > { %vm2858_vm3 = vcmp.gt.f32.partialorder %v10398_v25, 20.0  ;;  %v7030_v54 = vpack.c.bf16 %v3272_v1, %v3264_v47  ;;  %vm10775_vm4 = vcmp.lt.f32.partialorder %v3104_v5, 0.0004427343  ;;  %7614 = vlog2.f32 %v2990_v10 }
 0x424   : > { %v3106_v44 = vsel %vm10775_vm4, %v3103_v35, %v3100_v37  ;;  %vm10781_vm5 = vcmp.lt.f32.partialorder %v3176_v41, 0.0004427343  ;;  %v3047_v58 = vmul.f32 -0.5, %v10568_v8  ;;  %v3062_v7 = vadd.f32 1.0, %v10593_v18  ;;  %v10824_v41 = vld [vmem:[%s13631_s7 + $0x8] sm:$0xff] }
 0x425   : > { %v7607_v33 = vpop.eup %7606  ;;  %7031 = vmatprep.subr.bf16.mxu0 %v7030_v54  ;;  %v3175_v36 = vmul.f32 %v10524_v56, %v3174_v26  ;;  %vm10788_vm6 = vcmp.lt.f32.partialorder %v2978_v0, 0.0004427343  ;;  %v3050_v24 = vand.u32 2147483647, %v10568_v8  ;;  %v3116_v23 = vadd.f32 1.0, %v10616_v40  ;;  %v14208_v0 = vld [vmem:[#allocation23_spill] sm:$0xff] }
 0x426   : > { %v7609_v57 = vpop.eup %7608  ;;  %v3172_v46 = vmul.f32 0.6931472, %v7607_v33  ;;  %v14204_v20 = vpack.c.bf16 %v10430_v13, %v10423_v51  ;;  %v2977_v56 = vmul.f32 %v10531_v43, %v2976_v29  ;;  %v2993_v22 = vmul.f32 -0.5, %v10540_v39  ;;  %v10851_v33 = vld [vmem:[%s13631_s7 + $0x10] sm:$0xff] }
 0x427   : > { %7616 = vlog2.f32 %v3062_v7  ;;  %v3234_v63 = vmul.f32 0.01, %v3106_v44  ;;  %v2974_v38 = vmul.f32 0.6931472, %v7609_v57  ;;  %v3065_v48 = vmul.f32 -0.5, %v10593_v18 }
 0x428   : > { %7033 = vmatpush1.bf16.msra.mxu0 %v14204_v20  ;;  %7618 = vlog2.f32 %v3116_v23  ;;  %vm2836_vm7 = vcmp.gt.f32.partialorder %v10402_v16, 20.0  ;;  %vm2844_vm9 = vcmp.gt.f32.partialorder %v10438_v6, 20.0  ;;  %v3178_v51 = vsel %vm10781_vm5, %v3175_v36, %v3172_v46 }
 0x429   : > { %v3048_v13 = vadd.f32 1.0, %v3047_v58  ;;  %v3119_v53 = vmul.f32 -0.5, %v10616_v40  ;;  %v3188_v43 = vadd.f32 1.0, %v10656_v30  ;;  %v3242_v5 = vmul.f32 0.01, %v3178_v51  ;;  %v10818_v9 = vpop.eup %7610  ;;  %v14217_v51 = vld [vmem:[#allocation35_spill] sm:$0xff] }
 0x42a   : > { %vm10813_vm10 = vcmp.lt.f32.partialorder %v3050_v24, 0.0004427343  ;;  %v2996_v31 = vand.u32 2147483647, %v10540_v39  ;;  %v14207_v26 = vmov 0.0   ;;  %v2980_v28 = vsel %vm10788_vm6, %v2977_v56, %v2974_v38  ;;  %v14213_v24 = vld [vmem:[#allocation38_spill] sm:$0xff] }
 0x42b   : > { %6872 = vmatmul.mubr.msk.f32.vlgmr.msra.gmra.mrb[48].mxu0 %vm1490_vm8, %v10800_v27  ;;  %v2994_v34 = vadd.f32 1.0, %v2993_v22  ;;  %v3068_v11 = vand.u32 2147483647, %v10593_v18  ;;  %7620 = vlog2.f32 %v3188_v43  ;;  %v7613_v37 = vpop.eup %7612  ;;  %v3266_v10 = vsel %vm2850_vm2, %v14208_v0, %v3234_v63  ;;  %v14221_v0 = vld [vmem:[#allocation31_spill] sm:$0xff] }
 0x42c   : > { %3389 = vmatprep.mubr.f32.mxu0 %v14207_v26  ;;  %v3274_v47 = vsel %vm2858_vm3, %v14209_v4, %v3242_v5  ;;  %v3066_v52 = vadd.f32 1.0, %v3065_v48  ;;  %v3134_v1 = vadd.f32 1.0, %v10637_v62  ;;  %v3046_v29 = vmul.f32 0.6931472, %v7613_v37 }
 0x42d   : > { %v7038_v35 = vpack.c.bf16 %v3274_v47, %v3266_v10  ;;  %v3049_v54 = vmul.f32 %v10568_v8, %v3048_v13  ;;  %v3120_v15 = vadd.f32 1.0, %v3119_v53  ;;  %v7615_v44 = vpop.eup %7614  ;;  %v3220_v55 = vmul.f32 0.01, %v2980_v28  ;;  %v14218_v13 = vld [vmem:[#allocation32_spill] sm:$0xff]  ;;  %v10885_v28 = vld [vmem:[%s13631_s7 + $0x18] sm:$0x1f] }
 0x42e   : > { %vm10839_vm11 = vcmp.lt.f32.partialorder %v2996_v31, 0.0004427343  ;;  %v3191_v25 = vmul.f32 -0.5, %v10656_v30  ;;  %7622 = vlog2.f32 %v3134_v1  ;;  %v2992_v7 = vmul.f32 0.6931472, %v7615_v44 }
 0x42f   : > { %6873 = vmatmul.mubr.msk.f32.gmra.mrb[50].mxu0 %vm1490_vm8, %v10824_v41  ;;  %7039 = vmatprep.subr.bf16.mxu1 %v7038_v35  ;;  %v3052_v58 = vsel %vm10813_vm10, %v3049_v54, %v3046_v29  ;;  %v2995_v8 = vmul.f32 %v10540_v39, %v2994_v34  ;;  %v3206_v36 = vadd.f32 1.0, %v10818_v9  ;;  %v14214_v23 = vpack.c.bf16 %v14212_v2, %v14213_v24  ;;  %v14226_v24 = vld [vmem:[#allocation28_spill] sm:$0xff] }
 0x430   : > { %3395 = vmatprep.mubr.f32.mxu0 %v14207_v26  ;;  %v3228_v57 = vmul.f32 0.01, %v3052_v58  ;;  %v3067_v46 = vmul.f32 %v10593_v18, %v3066_v52  ;;  %vm10858_vm12 = vcmp.lt.f32.partialorder %v3068_v11, 0.0004427343  ;;  %v3122_v39 = vand.u32 2147483647, %v10616_v40 }
 0x431   : > { %7041 = vmatpush1.bf16.msra.mxu1 %v14214_v23  ;;  %v7617_v56 = vpop.eup %7616  ;;  %v2998_v22 = vsel %vm10839_vm11, %v2995_v8, %v2992_v7  ;;  %v3121_v63 = vmul.f32 %v10616_v40, %v3120_v15  ;;  %v3137_v38 = vmul.f32 -0.5, %v10637_v62  ;;  %7624 = vlog2.f32 %v3206_v36  ;;  %v14222_v52 = vld [vmem:[#allocation27_spill] sm:$0xff]  ;;  %v14224_v15 = vld [vmem:[#allocation25_spill] sm:$0xff] }
 0x432   : > { %v7619_v48 = vpop.eup %7618  ;;  %v3252_v18 = vsel %vm2836_vm7, %v14217_v51, %v3220_v55  ;;  %v3260_v53 = vsel %vm2844_vm9, %v14218_v13, %v3228_v57  ;;  %v3064_v43 = vmul.f32 0.6931472, %v7617_v56  ;;  %v3192_v5 = vadd.f32 1.0, %v3191_v25  ;;  %v14225_v55 = vld [vmem:[#allocation40_spill] sm:$0xff]  ;;  %v14232_v51 = vld [vmem:[#allocation33_spill] sm:$0xff]  ;;  %v14233_v13 = vld [vmem:[#allocation42_spill] sm:$0xff] }
 0x433   : > { %6874 = vmatmul.mubr.msk.f32.gmra.mrb[52].mxu0 %vm1490_vm8, %v10851_v33  ;;  %v7042_v40 = vpack.c.bf16 %v3260_v53, %v3252_v18  ;;  %v3222_v3 = vmul.f32 0.01, %v2998_v22  ;;  %v3118_v31 = vmul.f32 0.6931472, %v7619_v48  ;;  %v3194_v16 = vand.u32 2147483647, %v10656_v30 }
 0x434   : > { %6876 = vmatmul.mubr.msk.f32.vlgmr.msra.gmra.mrb[48].mxu1 %vm1490_vm8, %v10800_v27  ;;  %3401 = vmatprep.mubr.f32.mxu0 %v14207_v26  ;;  %v3070_v6 = vsel %vm10858_vm12, %v3067_v46, %v3064_v43  ;;  %vm10887_vm13 = vcmp.lt.f32.partialorder %v3122_v39, 0.0004427343  ;;  %v3209_v11 = vmul.f32 -0.5, %v10818_v9  ;;  %vm2838_vm14 = vcmp.gt.f32.partialorder %v14221_v0, 20.0  ;;  %v14228_v46 = vld [vmem:[#allocation36_spill] sm:$0xff]  ;;  %v14229_v39 = vld [vmem:[#allocation43_spill] sm:$0xff] }
 0x435   : > { %3478 = vmatprep.mubr.f32.mxu1 %v14207_v26  ;;  %v7621_v37 = vpop.eup %7620  ;;  %7043 = vmatprep.subr.bf16.mxu0 %v7042_v40  ;;  %v3230_v10 = vmul.f32 0.01, %v3070_v6  ;;  %v3124_v4 = vsel %vm10887_vm13, %v3121_v63, %v3118_v31  ;;  %v3138_v47 = vadd.f32 1.0, %v3137_v38  ;;  %vm2846_vm15 = vcmp.gt.f32.partialorder %v14222_v52, 20.0  ;;  %v14230_v48 = vld [vmem:[#allocation34_spill] sm:$0xff]  ;;  %v11019_v40 = vpop.permute.xlu0 %3289 }
 0x436   : > { %v14223_v1 = vpack.c.bf16 %v10590_v32, %v10585_v14  ;;  %v3190_v35 = vmul.f32 0.6931472, %v7621_v37  ;;  %v3193_v29 = vmul.f32 %v10656_v30, %v3192_v5  ;;  %v3140_v54 = vand.u32 2147483647, %v10637_v62  ;;  %v4194_v5 = vld [vmem:[%s13634_s10 + $0x18] sm:$0xff] }
 0x437   : > { %v3254_v44 = vsel %vm2838_vm14, %v14224_v15, %v3222_v3  ;;  %v3262_v19 = vsel %vm2846_vm15, %v14225_v55, %v3230_v10  ;;  %6875 = vmatmul.mubr.msk.f32.gmra.mrb[54].mxu0 %vm1490_vm8, %v10885_v28  ;;  %vm3195_vm2 = vcmp.lt.f32.partialorder %v3194_v16, 0.0004427343  ;;  %v3236_v25 = vmul.f32 0.01, %v3124_v4 }
 0x438   : > { %7045 = vmatpush1.bf16.msra.mxu0 %v14223_v1  ;;  %6877 = vmatmul.mubr.msk.f32.gmra.mrb[50].mxu1 %vm1490_vm8, %v10824_v41  ;;  %v7623_v58 = vpop.eup %7622  ;;  %v7050_v14 = vpack.c.bf16 %v3262_v19, %v3254_v44  ;;  %v3196_v32 = vsel %vm3195_vm2, %v3193_v29, %v3190_v35  ;;  %v3210_v30 = vadd.f32 1.0, %v3209_v11  ;;  %v3139_v36 = vmul.f32 %v10637_v62, %v3138_v47 }
 0x439   : > { %3484 = vmatprep.mubr.f32.mxu1 %v14207_v26  ;;  %3561 = vmatprep.mubr.f32.mxu0 %v14207_v26  ;;  %v3244_v7 = vmul.f32 0.01, %v3196_v32  ;;  %v3136_v8 = vmul.f32 0.6931472, %v7623_v58  ;;  %v3212_v2 = vand.u32 2147483647, %v10818_v9  ;;  %v14227_v57 = vpack.c.bf16 %v10605_v50, %v10598_v21  ;;  %v11036_v47 = vpop.permute.xlu0 %3299 }
 0x43a   : > { %vm2852_vm3 = vcmp.gt.f32.partialorder %v14226_v24, 20.0  ;;  %vm2860_vm4 = vcmp.gt.f32.partialorder %v10554_v42, 20.0  ;;  %7051 = vmatprep.subr.bf16.mxu1 %v7050_v14  ;;  %vm3141_vm5 = vcmp.lt.f32.partialorder %v3140_v54, 0.0004427343  ;;  %v3211_v38 = vmul.f32 %v10818_v9, %v3210_v30  ;;  %v14231_v9 = vld [vmem:[#allocation11_spill] sm:$0xff] }
 0x43b   : > { %v7625_v23 = vpop.eup %7624  ;;  %7053 = vmatpush1.bf16.msra.mxu1 %v14227_v57  ;;  %v3268_v20 = vsel %vm2852_vm3, %v14228_v46, %v3236_v25  ;;  %v3276_v56 = vsel %vm2860_vm4, %v14229_v39, %v3244_v7  ;;  %v3142_v22 = vsel %vm3141_vm5, %v3139_v36, %v3136_v8  ;;  %vm3213_vm6 = vcmp.lt.f32.partialorder %v3212_v2, 0.0004427343 }
 0x43c   : > { %6878 = vmatmul.mubr.msk.f32.gmra.mrb[52].mxu1 %vm1490_vm8, %v10851_v33  ;;  %v7046_v62 = vpack.c.bf16 %v3276_v56, %v3268_v20  ;;  %v3208_v63 = vmul.f32 0.6931472, %v7625_v23  ;;  %v3238_v42 = vmul.f32 0.01, %v3142_v22  ;;  %vm2854_vm7 = vcmp.gt.f32.partialorder %v14230_v48, 20.0 }
 0x43d   : > { %3490 = vmatprep.mubr.f32.mxu1 %v14207_v26  ;;  %vm2862_vm9 = vcmp.gt.f32.partialorder %v10572_v17, 20.0  ;;  %v8010_v17 = vld [vmem:[%s8233_s24] sm:$0x77] }
 0x43e   : > { %7047 = vmatprep.subr.bf16.mxu0 %v7046_v62  ;;  %v3214_v21 = vsel %vm3213_vm6, %v3211_v38, %v3208_v63  ;;  %v3270_v18 = vsel %vm2854_vm7, %v14232_v51, %v3238_v42 }
 0x43f   : > { %v3246_v50 = vmul.f32 0.01, %v3214_v21  ;;  %7049 = vmatpush1.bf16.msra.mxu0 %v7048_v49  ;;  %v8011_v49 = vld [vmem:[%s8233_s24 + $0x8] sm:$0x77] }
 0x440   : > { %6879 = vmatmul.mubr.msk.f32.gmra.mrb[54].mxu1 %vm1490_vm8, %v10885_v28  ;;  %6888 = vmatprep.subr.msk.mxu0 %vm576_vm0, %v14231_v9 }
 0x441   : > { %v3278_v53 = vsel %vm2862_vm9, %v14233_v13, %v3246_v50  ;;  %3650 = vmatprep.mubr.f32.mxu1 %v14207_v26 }
 0x442   : > { %v7054_v43 = vpack.c.bf16 %v3278_v53, %v3270_v18  ;;  %6880 = vmatmul.mubr.msk.f32.vlgmr.msra.gmra.mrb[56].mxu0 %vm1490_vm8, %v10800_v27 }
 0x443   : > { %3567 = vmatprep.mubr.f32.mxu0 %v14207_v26  ;;  %6889 = vmatpush1.msk.msra.mxu0 %vm576_vm0, %v8010_v17 }
 0x444   : > { %7055 = vmatprep.subr.bf16.mxu1 %v7054_v43  ;;  %6900 = vmatprep.subr.msk.mxu0 %vm576_vm0, %v14234_v60 }
 0x445   : > { %7057 = vmatpush1.bf16.msra.mxu1 %v7056_v45  ;;  %v8012_v45 = vld [vmem:[%s8233_s24 + $0x10] sm:$0x77] }
 0x446   : > { %6881 = vmatmul.mubr.msk.f32.gmra.mrb[58].mxu0 %vm1490_vm8, %v10824_v41  ;;  %6894 = vmatprep.subr.msk.mxu1 %vm576_vm0, %v14235_v61 }
 0x447   : > { %3573 = vmatprep.mubr.f32.mxu0 %v14207_v26 }
 0x448   : > { %6884 = vmatmul.mubr.msk.f32.vlgmr.msra.gmra.mrb[56].mxu1 %vm1490_vm8, %v10800_v27  ;;  %v8013_v27 = vld [vmem:[%s8233_s24 + $0x18] sm:$0x77]  ;;  %s6750_s24 = sshll.u32 %s515_s27, 4  ;;  %s13582_s24 = int_to_ptr.vmem [resolvable:$true] %s6750_s24 }
 0x449   : > { %3656 = vmatprep.mubr.f32.mxu1 %v14207_v26  ;;  %6895 = vmatpush1.msk.msra.mxu1 %vm576_vm0, %v8011_v49  ;;  %s8014_s25 = scalar_lea.vmem %s13582_s24, 1024  ;;  %p8021_p0 = scmp.lt.s32.totalorder %s13582_s24, %s8019_s29 }
 0x44a   : > { %6882 = vmatmul.mubr.msk.f32.gmra.mrb[60].mxu0 %vm1490_vm8, %v10851_v33  ;;  %6906 = vmatprep.subr.msk.mxu1 %vm576_vm0, %v14236_v12  ;;  %p8015_p11 = scmp.ne.s32.totalorder %s13582_s24, %s8014_s25  ;;  %p8022_p1 = scmp.lt.s32.totalorder %s8020_s19, %s8014_s25 }
 0x44b   : > { %3579 = vmatprep.mubr.f32.mxu0 %v14207_v26 }
 0x44c   : > { %6885 = vmatmul.mubr.msk.f32.gmra.mrb[58].mxu1 %vm1490_vm8, %v10824_v41  ;;  %v4192_v41 = vld [vmem:[%s13634_s10 + $0x8] sm:$0xff]  ;;  %p8016_p12 = pnand %p8015_p11, %p8205_p5  ;;  %p8023_p2 = por %p8022_p1, %p8021_p0 }
 0x44d   : > { %3662 = vmatprep.mubr.f32.mxu1 %v14207_v26 }
 0x44e   : > { %6883 = vmatmul.mubr.msk.f32.gmra.mrb[62].mxu0 %vm1490_vm8, %v10885_v28  ;;  %p8017_p13 = pneg %p8016_p12 }
 0x44f   : > { %4275 = vmatprep.mubr.f32.mxu0 %v14207_v26 }
 0x450   : > { %6886 = vmatmul.mubr.msk.f32.gmra.mrb[60].mxu1 %vm1490_vm8, %v10851_v33  ;;  %v4193_v33 = vld [vmem:[%s13634_s10 + $0x10] sm:$0xff]  ;;  %p8024_p3 = pnand %p8023_p2, %p8017_p13 }
 0x451   : > { %3668 = vmatprep.mubr.f32.mxu1 %v14207_v26 }
 0x452   : > { %6890 = vmatmul.mubr.msk.f32.vlgmr.msra.gmra.mrb[64].mxu0 %vm563_vm1, %v4191_v59 }
 0x453   : > { %4281 = vmatprep.mubr.f32.mxu0 %v14207_v26  ;;  %6901 = vmatpush1.msk.msra.mxu0 %vm576_vm0, %v8012_v45 }
 0x454   : > { %6887 = vmatmul.mubr.msk.f32.gmra.mrb[62].mxu1 %vm1490_vm8, %v10885_v28  ;;  %v11027_v28 = vpop.permute.xlu1 %3294 }
 0x455   : > { %4364 = vmatprep.mubr.f32.mxu1 %v14207_v26 }
 0x456   : > { %6891 = vmatmul.mubr.msk.f32.gmra.mrb[66].mxu0 %vm563_vm1, %v4192_v41 }
 0x457   : > { %4287 = vmatprep.mubr.f32.mxu0 %v14207_v26 }
 0x458   : > { %6896 = vmatmul.mubr.msk.f32.vlgmr.msra.gmra.mrb[64].mxu1 %vm563_vm1, %v4191_v59  ;;  %v11071_v56 = vpop.permute.xlu1 %3304 }
 0x459   : > { %4370 = vmatprep.mubr.f32.mxu1 %v14207_v26  ;;  %6907 = vmatpush1.msk.msra.mxu1 %vm576_vm0, %v8013_v27 }
 0x45a   : > { %6892 = vmatmul.mubr.msk.f32.gmra.mrb[68].mxu0 %vm563_vm1, %v4193_v33 }
 0x45b   : > { %4293 = vmatprep.mubr.f32.mxu0 %v14207_v26 }
 0x45c   : > { %6897 = vmatmul.mubr.msk.f32.gmra.mrb[66].mxu1 %vm563_vm1, %v4192_v41 }
 0x45d   : > { %4376 = vmatprep.mubr.f32.mxu1 %v14207_v26 }
 0x45e   : > { %6893 = vmatmul.mubr.msk.f32.gmra.mrb[70].mxu0 %vm563_vm1, %v4194_v5 }
 0x45f   : > { %4453 = vmatprep.mubr.f32.mxu0 %v14207_v26 }
 0x460   : > { %6898 = vmatmul.mubr.msk.f32.gmra.mrb[68].mxu1 %vm563_vm1, %v4193_v33 }
 0x461   : > { %4382 = vmatprep.mubr.f32.mxu1 %v14207_v26 }
 0x462   : > { %6902 = vmatmul.mubr.msk.f32.vlgmr.msra.gmra.mrb[72].mxu0 %vm563_vm1, %v4191_v59 }
 0x463   : > { %4459 = vmatprep.mubr.f32.mxu0 %v14207_v26 }
 0x464   : > { %6899 = vmatmul.mubr.msk.f32.gmra.mrb[70].mxu1 %vm563_vm1, %v4194_v5 }
 0x465   : > { %4542 = vmatprep.mubr.f32.mxu1 %v14207_v26 }
 0x466   : > { %6903 = vmatmul.mubr.msk.f32.gmra.mrb[74].mxu0 %vm563_vm1, %v4192_v41 }
 0x467   : > { %4465 = vmatprep.mubr.f32.mxu0 %v14207_v26 }
 0x468   : > { %6908 = vmatmul.mubr.msk.f32.vlgmr.msra.gmra.mrb[72].mxu1 %vm563_vm1, %v4191_v59 }
 0x469   : > { %4548 = vmatprep.mubr.f32.mxu1 %v14207_v26 }
 0x46a   : > { %6904 = vmatmul.mubr.msk.f32.gmra.mrb[76].mxu0 %vm563_vm1, %v4193_v33 }
 0x46b   : > { %4471 = vmatprep.mubr.f32.mxu0 %v14207_v26 }
 0x46c   : > { %6909 = vmatmul.mubr.msk.f32.gmra.mrb[74].mxu1 %vm563_vm1, %v4192_v41 }
 0x46d   : > { %4554 = vmatprep.mubr.f32.mxu1 %v14207_v26 }
 0x46e   : > { %6905 = vmatmul.mubr.msk.f32.gmra.mrb[78].mxu0 %vm563_vm1, %v4194_v5 }
 0x46f   : > { %4669 = vmatprep.mubr.f32.mxu0 %v14207_v26 }
 0x470   : > { %6910 = vmatmul.mubr.msk.f32.gmra.mrb[76].mxu1 %vm563_vm1, %v4193_v33 }
 0x471   : > { %4560 = vmatprep.mubr.f32.mxu1 %v14207_v26 }
 0x474   : > { %6911 = vmatmul.mubr.msk.f32.gmra.mrb[78].mxu1 %vm563_vm1, %v4194_v5 }
 0x475   : > { %4758 = vmatprep.mubr.f32.mxu1 %v14207_v26 }
 0x4fe   : > { %v3385_v3 = vpop.f32.mrb[48].mxu0 }
 0x4ff   : > { %v11022_v31 = vadd.f32 %v3385_v3, %v11019_v40  ;;  %v3387_v16 = vpop.f32.mrb[49].mxu0 }
 0x500   : > { %v11052_v58 = vadd.f32 %v3387_v16, %v11019_v40 }
 0x501   : > { %v11025_v6 = vmul.f32 100.0, %v11022_v31 }
 0x502   : > { %v3391_v34 = vpop.f32.mrb[50].mxu0  ;;  %14237 = vst [vmem:[#allocation37_spill] sm:$0xff] %v11052_v58  ;;  %v11063_v46 = vmul.f32 100.0, %v11052_v58 }
 0x503   : > { %v3707_v11 = vmin.f32 %v11025_v6, 20.0  ;;  %v11031_v37 = vadd.f32 %v3391_v34, %v11027_v28  ;;  %v3393_v0 = vpop.f32.mrb[51].mxu0  ;;  %vm3739_vm10 = vcmp.gt.f32.partialorder %v11025_v6, 20.0 }
 0x504   : > { %14238 = vst [vmem:[#allocation39_spill] sm:$0xff] %v11063_v46  ;;  %v11075_v62 = vadd.f32 %v3393_v0, %v11027_v28  ;;  %v3708_v9 = vmin.f32 %v11063_v46, 20.0 }
 0x505   : > { %v3771_v10 = vmul.f32 1.442695, %v3707_v11  ;;  %v11034_v4 = vmul.f32 100.0, %v11031_v37 }
 0x506   : > { %v3397_v52 = vpop.f32.mrb[52].mxu0  ;;  %14239 = vst [vmem:[#allocation20_spill] sm:$0xff] %v11075_v62  ;;  %v11092_v43 = vmul.f32 100.0, %v11075_v62  ;;  %v3773_v27 = vmul.f32 1.442695, %v3708_v9 }
 0x507   : > { %7626 = vpow2.f32 %v3771_v10  ;;  %v3474_v1 = vpop.f32.mrb[48].mxu1  ;;  %v3715_v35 = vmin.f32 %v11034_v4, 20.0  ;;  %v11040_v29 = vadd.f32 %v3397_v52, %v11036_v47  ;;  %v3399_v54 = vpop.f32.mrb[53].mxu0  ;;  %vm3747_vm11 = vcmp.gt.f32.partialorder %v11034_v4, 20.0 }
 0x508   : > { %v11043_v15 = vadd.f32 %v3474_v1, %v11019_v40  ;;  %v3476_v44 = vpop.f32.mrb[49].mxu1  ;;  %v11056_v30 = vadd.f32 %v3399_v54, %v11036_v47  ;;  %14241 = vst [vmem:[#allocation45_spill] sm:$0xff] %v11092_v43  ;;  %v3716_v0 = vmin.f32 %v11092_v43, 20.0 }
 0x509   : > { %v3787_v55 = vmul.f32 1.442695, %v3715_v35  ;;  %v11046_v19 = vmul.f32 100.0, %v11040_v29  ;;  %v11089_v53 = vadd.f32 %v3476_v44, %v11019_v40 }
 0x50a   : > { %v11049_v25 = vmul.f32 100.0, %v11043_v15  ;;  %v3403_v7 = vpop.f32.mrb[54].mxu0  ;;  %v11069_v39 = vmul.f32 100.0, %v11056_v30 }
 0x50b   : > { %7628 = vpow2.f32 %v3787_v55  ;;  %v3480_v14 = vpop.f32.mrb[50].mxu1  ;;  %v3723_v32 = vmin.f32 %v11046_v19, 20.0  ;;  %v3405_v24 = vpop.f32.mrb[55].mxu0  ;;  %v11081_v50 = vadd.f32 %v3403_v7, %v11071_v56  ;;  %14240 = vst [vmem:[#allocation30_spill] sm:$0xff] %v11089_v53  ;;  %v11112_v11 = vmul.f32 100.0, %v11089_v53 }
 0x50c   : > { %v3709_v8 = vmin.f32 %v11049_v25, 20.0  ;;  %v11060_v36 = vadd.f32 %v3480_v14, %v11027_v28  ;;  %v3482_v2 = vpop.f32.mrb[51].mxu1  ;;  %v3724_v13 = vmin.f32 %v11069_v39, 20.0  ;;  %v11127_v14 = vadd.f32 %v3405_v24, %v11071_v56 }
 0x50d   : > { %v3803_v23 = vmul.f32 1.442695, %v3723_v32  ;;  %v11101_v12 = vmul.f32 100.0, %v11081_v50  ;;  %14242 = vst [vmem:[#allocation17_spill] sm:$0xff] %v11112_v11  ;;  %v11121_v35 = vadd.f32 %v3482_v2, %v11027_v28  ;;  %v3710_v2 = vmin.f32 %v11112_v11, 20.0 }
 0x50e   : > { %v3775_v57 = vmul.f32 1.442695, %v3709_v8  ;;  %v11066_v20 = vmul.f32 100.0, %v11060_v36  ;;  %v3805_v3 = vmul.f32 1.442695, %v3724_v13  ;;  %vm3741_vm12 = vcmp.gt.f32.partialorder %v11049_v25, 20.0 }
 0x50f   : > { %7630 = vpow2.f32 %v3803_v23  ;;  %v3486_v63 = vpop.f32.mrb[52].mxu1  ;;  %v3731_v16 = vmin.f32 %v11101_v12, 20.0  ;;  %14243 = vst [vmem:[#allocation21_spill] sm:$0xff] %v11121_v35  ;;  %vm3755_vm2 = vcmp.gt.f32.partialorder %v11046_v19, 20.0  ;;  %vm3763_vm5 = vcmp.gt.f32.partialorder %v11101_v12, 20.0 }
 0x510   : > { %7632 = vpow2.f32 %v3775_v57  ;;  %v3717_v22 = vmin.f32 %v11066_v20, 20.0  ;;  %v11078_v42 = vadd.f32 %v3486_v63, %v11036_v47  ;;  %v3488_v21 = vpop.f32.mrb[53].mxu1  ;;  %vm3749_vm13 = vcmp.gt.f32.partialorder %v11066_v20, 20.0 }
 0x511   : > { %v7627_v38 = vpop.eup %7626  ;;  %v11095_v17 = vadd.f32 %v3488_v21, %v11036_v47  ;;  %v3819_v23 = vmul.f32 1.442695, %v3731_v16 }
 0x512   : > { %v3835_v48 = vadd.f32 1.0, %v7627_v38  ;;  %v3791_v51 = vmul.f32 1.442695, %v3717_v22  ;;  %v11085_v18 = vmul.f32 100.0, %v11078_v42  ;;  %v3838_v45 = vmul.f32 -0.5, %v7627_v38 }
 0x513   : > { %v3492_v60 = vpop.f32.mrb[54].mxu1  ;;  %v11116_v10 = vmul.f32 100.0, %v11095_v17  ;;  %v3841_v1 = vand.u32 2147483647, %v7627_v38  ;;  %v3789_v22 = vmul.f32 1.442695, %v3716_v0 }
 0x514   : > { %7634 = vlog2.f32 %v3835_v48  ;;  %v3725_v49 = vmin.f32 %v11085_v18, 20.0  ;;  %v11103_v59 = vpop.f32.mrb[55].mxu1  ;;  %v3839_v44 = vadd.f32 1.0, %v3838_v45  ;;  %v11144_v48 = vmul.f32 100.0, %v11121_v35 }
 0x515   : > { %v11097_v61 = vpop.eup %7628  ;;  %7636 = vpow2.f32 %v3791_v51  ;;  %v11106_v33 = vpop.f32.mrb[56].mxu0  ;;  %v3726_v63 = vmin.f32 %v11116_v10, 20.0  ;;  %vm11139_vm0 = vcmp.lt.f32.partialorder %v3841_v1, 0.0004427343  ;;  %v11147_v9 = vadd.f32 %v3492_v60, %v11071_v56 }
 0x516   : > { %v3907_v41 = vadd.f32 1.0, %v11097_v61  ;;  %v3807_v5 = vmul.f32 1.442695, %v3725_v49  ;;  %v11109_v34 = vpop.f32.mrb[57].mxu0  ;;  %v3910_v8 = vmul.f32 -0.5, %v11097_v61  ;;  %14246 = vst [vmem:[#allocation44_spill] sm:$0xff] %v11144_v48  ;;  %v3840_v49 = vmul.f32 %v7627_v38, %v3839_v44 }
 0x517   : > { %v3913_v45 = vand.u32 2147483647, %v11097_v61  ;;  %v11160_v60 = vmul.f32 100.0, %v11147_v9  ;;  %v3809_v1 = vmul.f32 1.442695, %v3726_v63  ;;  %v3718_v63 = vmin.f32 %v11144_v48, 20.0 }
 0x518   : > { %7638 = vlog2.f32 %v3907_v41  ;;  %v3911_v16 = vadd.f32 1.0, %v3910_v8  ;;  %v3777_v8 = vmul.f32 1.442695, %v3710_v2  ;;  %vm3757_vm9 = vcmp.gt.f32.partialorder %v11085_v18, 20.0 }
 0x519   : > { %v11118_v52 = vpop.eup %7630  ;;  %7640 = vpow2.f32 %v3807_v5  ;;  %v11129_v32 = vpop.f32.mrb[58].mxu0  ;;  %vm11175_vm1 = vcmp.lt.f32.partialorder %v3913_v45, 0.0004427343 }
 0x51a   : > { %v11123_v54 = vpop.eup %7632  ;;  %v3979_v55 = vadd.f32 1.0, %v11118_v52  ;;  %7642 = vpow2.f32 %v3805_v3  ;;  %v11133_v57 = vpop.f32.mrb[59].mxu0  ;;  %v3912_v2 = vmul.f32 %v11097_v61, %v3911_v16  ;;  %v3982_v43 = vmul.f32 -0.5, %v11118_v52 }
 0x51b   : > { %v3853_v7 = vadd.f32 1.0, %v11123_v54  ;;  %7644 = vpow2.f32 %v3773_v27  ;;  %v11137_v21 = vpop.f32.mrb[56].mxu1  ;;  %v11153_v27 = vmul.f32 100.0, %v11127_v14  ;;  %v3859_v11 = vand.u32 2147483647, %v11123_v54 }
 0x51c   : > { %v11149_v51 = vpop.f32.mrb[57].mxu1 }
 0x51d   : > { %7646 = vlog2.f32 %v3853_v7  ;;  %v11155_v41 = vpop.f32.mrb[60].mxu0  ;;  %v3732_v44 = vmin.f32 %v11153_v27, 20.0  ;;  %vm11226_vm14 = vcmp.lt.f32.partialorder %v3859_v11, 0.0004427343 }
 0x51e   : > { %v7635_v13 = vpop.eup %7634  ;;  %7648 = vlog2.f32 %v3979_v55  ;;  %v11162_v0 = vpop.f32.mrb[61].mxu0 }
 0x51f   : > { %v11157_v5 = vpop.eup %7636  ;;  %v3837_v3 = vmul.f32 0.6931472, %v7635_v13  ;;  %7650 = vpow2.f32 %v3819_v23  ;;  %v11166_v55 = vpop.f32.mrb[58].mxu1  ;;  %v3856_v13 = vmul.f32 -0.5, %v11123_v54  ;;  %v3733_v23 = vmin.f32 %v11160_v60, 20.0 }
 0x520   : > { %v3925_v38 = vadd.f32 1.0, %v11157_v5  ;;  %7652 = vpow2.f32 %v3789_v22  ;;  %v11172_v35 = vpop.f32.mrb[59].mxu1  ;;  %v3821_v62 = vmul.f32 1.442695, %v3732_v44  ;;  %v3928_v61 = vmul.f32 -0.5, %v11157_v5 }
 0x521   : > { %v3843_v7 = vsel %vm11139_vm0, %v3840_v49, %v3837_v3  ;;  %v11180_v26 = vpop.f32.mrb[62].mxu0  ;;  %v3823_v3 = vmul.f32 1.442695, %v3733_v23  ;;  %v11203_v23 = vadd.f32 %v11103_v59, %v11071_v56  ;;  %vm3765_vm0 = vcmp.gt.f32.partialorder %v11160_v60, 20.0 }
 0x522   : > { %v7639_v53 = vpop.eup %7638  ;;  %7654 = vlog2.f32 %v3925_v38  ;;  %14249 = vst [vmem:[#allocation29_spill] sm:$0xff] %v11180_v26  ;;  %v4123_v58 = vmul.f32 0.01, %v3843_v7  ;;  %v11189_v38 = vpop.f32.mrb[63].mxu0  ;;  %v3857_v26 = vadd.f32 1.0, %v3856_v13 }
 0x523   : > { %v11182_v24 = vpop.eup %7640  ;;  %v3909_v49 = vmul.f32 0.6931472, %v7639_v53  ;;  %7656 = vpow2.f32 %v3809_v1  ;;  %v11187_v46 = vpop.f32.mrb[60].mxu1  ;;  %14250 = vst [vmem:[#allocation24_spill] sm:$0xff] %v11189_v38  ;;  %v3793_v13 = vmul.f32 1.442695, %v3718_v63 }
 0x524   : > { %v3997_v45 = vadd.f32 1.0, %v11182_v24  ;;  %v11191_v48 = vpop.eup %7642  ;;  %7658 = vpow2.f32 %v3823_v3  ;;  %v11196_v16 = vpop.f32.mrb[61].mxu1  ;;  %v3858_v6 = vmul.f32 %v11123_v54, %v3857_v26  ;;  %v11232_v26 = vmul.f32 100.0, %v11203_v23 }
 0x525   : > { %v3915_v53 = vsel %vm11175_vm1, %v3912_v2, %v3909_v49  ;;  %v11198_v44 = vpop.eup %7644  ;;  %v3988_v1 = vadd.f32 1.0, %v11191_v48  ;;  %v11208_v49 = vsel %vm3739_vm10, %v11022_v31, %v4123_v58  ;;  %v3929_v31 = vadd.f32 1.0, %v3928_v61 }
 0x526   : > { %v4131_v7 = vmul.f32 0.01, %v3915_v53  ;;  %7660 = vlog2.f32 %v3997_v45  ;;  %14251 = vst [vmem:[#allocation16_spill] sm:$0xff] %v11208_v49  ;;  %v3983_v45 = vadd.f32 1.0, %v3982_v43  ;;  %v3931_v43 = vand.u32 2147483647, %v11157_v5 }
 0x527   : > { %v7647_v38 = vpop.eup %7646  ;;  %7662 = vpow2.f32 %v3821_v62  ;;  %v11213_v53 = vpop.f32.mrb[62].mxu1  ;;  %v3985_v63 = vand.u32 2147483647, %v11118_v52  ;;  %v4003_v61 = vand.u32 2147483647, %v11182_v24  ;;  %v3930_v49 = vmul.f32 %v11157_v5, %v3929_v31 }
 0x528   : > { %v7649_v22 = vpop.eup %7648  ;;  %v3855_v2 = vmul.f32 0.6931472, %v7647_v38  ;;  %v11211_v3 = vsel %vm3747_vm11, %v11031_v37, %v4131_v7  ;;  %7664 = vlog2.f32 %v3988_v1  ;;  %v11222_v58 = vpop.f32.mrb[63].mxu1  ;;  %v4000_v38 = vmul.f32 -0.5, %v11182_v24 }
 0x529   : > { %14252 = vst [vmem:[#allocation19_spill] sm:$0xff] %v11211_v3  ;;  %v11215_v59 = vpop.eup %7650  ;;  %14253 = vst [vmem:[#allocation26_spill] sm:$0xff] %v11222_v58  ;;  %7666 = vpow2.f32 %v3777_v8  ;;  %v3981_v11 = vmul.f32 0.6931472, %v7649_v22  ;;  %v3991_v1 = vmul.f32 -0.5, %v11191_v48  ;;  %v3984_v3 = vmul.f32 %v11118_v52, %v3983_v45 }
 0x52a   : > { %v11224_v37 = vpop.eup %7652  ;;  %v3861_v54 = vsel %vm11226_vm14, %v3858_v6, %v3855_v2  ;;  %7668 = vpow2.f32 %v3793_v13  ;;  %v4051_v8 = vadd.f32 1.0, %v11215_v59  ;;  %v11245_v2 = vadd.f32 %v11106_v33, %v11019_v40 }
 0x52b   : > { %14254 = vst [vmem:[#allocation15_spill] sm:$0xff] %v11224_v37  ;;  %v4125_v62 = vmul.f32 0.01, %v3861_v54  ;;  %vm3932_vm15 = vcmp.lt.f32.partialorder %v3931_v43, 0.0004427343  ;;  %v3734_v13 = vmin.f32 %v11232_v26, 20.0 }
 0x52c   : > { %v7655_v7 = vpop.eup %7654  ;;  %7670 = vlog2.f32 %v4051_v8  ;;  %vm11253_vm3 = vcmp.lt.f32.partialorder %v3985_v63, 0.0004427343  ;;  %v4001_v52 = vadd.f32 1.0, %v4000_v38  ;;  %vm11257_vm4 = vcmp.lt.f32.partialorder %v4003_v61, 0.0004427343 }
 0x52d   : > { %v3927_v4 = vmul.f32 0.6931472, %v7655_v7  ;;  %v11247_v6 = vpop.eup %7656  ;;  %v3987_v43 = vsel %vm11253_vm3, %v3984_v3, %v3981_v11  ;;  %v3992_v54 = vadd.f32 1.0, %v3991_v1  ;;  %v4054_v63 = vmul.f32 -0.5, %v11215_v59 }
 0x52e   : > { %v11250_v22 = vpop.eup %7658  ;;  %v3825_v8 = vmul.f32 1.442695, %v3734_v13  ;;  %v11269_v38 = vmul.f32 100.0, %v11245_v2  ;;  %v4139_v13 = vmul.f32 0.01, %v3987_v43  ;;  %v4002_v5 = vmul.f32 %v11182_v24, %v4001_v52 }
 0x52f   : > { %v3933_v37 = vsel %vm3932_vm15, %v3930_v49, %v3927_v4  ;;  %v4069_v7 = vadd.f32 1.0, %v11250_v22  ;;  %v4006_v4 = vadd.f32 1.0, %v11247_v6  ;;  %v3994_v58 = vand.u32 2147483647, %v11191_v48 }
 0x530   : > { %v7661_v45 = vpop.eup %7660  ;;  %v4133_v31 = vmul.f32 0.01, %v3933_v37  ;;  %v11274_v37 = vsel %vm3741_vm12, %v11043_v15, %v4125_v62  ;;  %v4057_v62 = vand.u32 2147483647, %v11215_v59  ;;  %v11291_v20 = vmul.f32 -0.5, %v11247_v6 }
 0x531   : > { %v11264_v49 = vpop.eup %7662  ;;  %14261 = vst [vmem:[#allocation18_spill] sm:$0xff] %v11274_v37  ;;  %7672 = vlog2.f32 %v4069_v7  ;;  %v3999_v15 = vmul.f32 0.6931472, %v7661_v45  ;;  %v3711_v43 = vmin.f32 %v11269_v38, 20.0  ;;  %v3993_v7 = vmul.f32 %v11191_v48, %v3992_v54 }
 0x532   : > { %v11279_v3 = vsel %vm3749_vm13, %v11060_v36, %v4133_v31  ;;  %v4060_v61 = vadd.f32 1.0, %v11264_v49  ;;  %v7665_v11 = vpop.eup %7664  ;;  %v4072_v36 = vmul.f32 -0.5, %v11250_v22  ;;  %v4055_v31 = vadd.f32 1.0, %v4054_v63 }
 0x533   : > { %v11286_v25 = vpop.eup %7666  ;;  %v3990_v52 = vmul.f32 0.6931472, %v7665_v11  ;;  %v4063_v45 = vmul.f32 -0.5, %v11264_v49  ;;  %vm11299_vm6 = vcmp.lt.f32.partialorder %v3994_v58, 0.0004427343  ;;  %v11306_v63 = vadd.f32 %v11137_v21, %v11019_v40  ;;  %v14280_v58 = vld [vmem:[#allocation29_spill] sm:$0xff] }
 0x534   : > { %7674 = vlog2.f32 %v4060_v61  ;;  %v11295_v24 = vpop.eup %7668  ;;  %v4075_v61 = vand.u32 2147483647, %v11250_v22  ;;  %v3779_v37 = vmul.f32 1.442695, %v3711_v43  ;;  %v11311_v11 = vsel %vm3755_vm2, %v11040_v29, %v4139_v13 }
 0x535   : > { %7676 = vpow2.f32 %v3825_v8  ;;  %v4005_v48 = vsel %vm11257_vm4, %v4002_v5, %v3999_v15  ;;  %vm11315_vm7 = vcmp.lt.f32.partialorder %v4057_v62, 0.0004427343  ;;  %v4073_v54 = vadd.f32 1.0, %v4072_v36 }
 0x536   : > { %7678 = vlog2.f32 %v4006_v4  ;;  %v7671_v8 = vpop.eup %7670  ;;  %v4056_v21 = vmul.f32 %v11215_v59, %v4055_v31  ;;  %v11323_v19 = vmul.f32 100.0, %v11306_v63  ;;  %v3996_v29 = vsel %vm11299_vm6, %v3993_v7, %v3990_v52 }
 0x537   : > { %v4053_v4 = vmul.f32 0.6931472, %v7671_v8  ;;  %7680 = vpow2.f32 %v3779_v37  ;;  %v4064_v33 = vadd.f32 1.0, %v4063_v45  ;;  %v11329_v13 = vadd.f32 %v11109_v34, %v11019_v40 }
 0x538   : > { %v11333_v5 = vadd.f32 %v11129_v32, %v11027_v28  ;;  %v4141_v15 = vmul.f32 0.01, %v4005_v48  ;;  %vm3756_vm1 = vcmp.gt.f32.partialorder %v11069_v39, 20.0  ;;  %vm11338_vm10 = vcmp.lt.f32.partialorder %v4075_v61, 0.0004427343 }
 0x539   : > { %14266 = vst [vmem:[#allocation23_spill] sm:$0xff] %v11329_v13  ;;  %v4059_v59 = vsel %vm11315_vm7, %v4056_v21, %v4053_v4  ;;  %vm3764_vm11 = vcmp.gt.f32.partialorder %v11153_v27, 20.0  ;;  %v3713_v1 = vmin.f32 %v11323_v19, 20.0  ;;  %v4074_v36 = vmul.f32 %v11250_v22, %v4073_v54 }
 0x53a   : > { %v4147_v62 = vmul.f32 0.01, %v4059_v59  ;;  %v4066_v32 = vand.u32 2147483647, %v11264_v49  ;;  %v11348_v31 = vadd.f32 %v11149_v51, %v11019_v40  ;;  %v4140_v43 = vmul.f32 0.01, %v3996_v29 }
 0x53b   : > { %v7673_v34 = vpop.eup %7672  ;;  %v3783_v7 = vmul.f32 1.442695, %v3713_v1  ;;  %v11352_v45 = vadd.f32 %v11166_v55, %v11027_v28  ;;  %v4065_v22 = vmul.f32 %v11264_v49, %v4064_v33  ;;  %v11361_v48 = vmul.f32 100.0, %v11329_v13 }
 0x53c   : > { %14269 = vst [vmem:[#allocation22_spill] sm:$0xff] %v11348_v31  ;;  %v4071_v52 = vmul.f32 0.6931472, %v7673_v34  ;;  %v11357_v8 = vsel %vm3763_vm5, %v11081_v50, %v4147_v62  ;;  %v11364_v40 = vmul.f32 100.0, %v11333_v5  ;;  %vm4067_vm12 = vcmp.lt.f32.partialorder %v4066_v32, 0.0004427343 }
 0x53d   : > { %7682 = vpow2.f32 %v3783_v7  ;;  %v11371_v49 = vmul.f32 100.0, %v11348_v31  ;;  %v4012_v21 = vand.u32 2147483647, %v11247_v6  ;;  %v11376_v59 = vmul.f32 100.0, %v11352_v45 }
 0x53e   : > { %v7675_v61 = vpop.eup %7674  ;;  %v4077_v55 = vsel %vm11338_vm10, %v4074_v36, %v4071_v52  ;;  %v3719_v33 = vmin.f32 %v11364_v40, 20.0  ;;  %v11381_v37 = vsel %vm3757_vm9, %v11078_v42, %v4141_v15  ;;  %v4010_v32 = vadd.f32 1.0, %v11291_v20 }
 0x53f   : > { %v7677_v51 = vpop.eup %7676  ;;  %v4062_v54 = vmul.f32 0.6931472, %v7675_v61  ;;  %v4149_v50 = vmul.f32 0.01, %v4077_v55  ;;  %14270 = vst [vmem:[#allocation41_spill] sm:$0xff] %v11371_v49  ;;  %v3712_v7 = vmin.f32 %v11361_v48, 20.0  ;;  %v11397_v42 = vsel %vm3756_vm1, %v11056_v30, %v4140_v43 }
 0x540   : > { %v7679_v12 = vpop.eup %7678  ;;  %v4078_v4 = vadd.f32 1.0, %v7677_v51  ;;  %v3714_v60 = vmin.f32 %v11371_v49, 20.0  ;;  %v4081_v15 = vmul.f32 -0.5, %v7677_v51  ;;  %v3795_v61 = vmul.f32 1.442695, %v3719_v33 }
 0x541   : > { %v4068_v29 = vsel %vm4067_vm12, %v4065_v22, %v4062_v54  ;;  %v11386_v1 = vsel %vm3765_vm0, %v11147_v9, %v4149_v50  ;;  %v11388_v62 = vpop.eup %7680  ;;  %v4008_v36 = vmul.f32 0.6931472, %v7679_v12  ;;  %v3721_v22 = vmin.f32 %v11376_v59, 20.0 }
 0x542   : > { %v4148_v34 = vmul.f32 0.01, %v4068_v29  ;;  %7684 = vlog2.f32 %v4078_v4  ;;  %v3871_v9 = vadd.f32 1.0, %v11388_v62  ;;  %v4011_v30 = vmul.f32 %v11247_v6, %v4010_v32 }
 0x543   : > { %v3781_v39 = vmul.f32 1.442695, %v3712_v7  ;;  %v3799_v43 = vmul.f32 1.442695, %v3721_v22  ;;  %vm3758_vm13 = vcmp.gt.f32.partialorder %v11116_v10, 20.0  ;;  %v11417_v55 = vadd.f32 %v11155_v41, %v11036_v47 }
 0x544   : > { %v11402_v18 = vsel %vm3764_vm11, %v11127_v14, %v4148_v34  ;;  %7686 = vlog2.f32 %v3871_v9  ;;  %vm11411_vm14 = vcmp.lt.f32.partialorder %v4012_v21, 0.0004427343  ;;  %v4084_v27 = vand.u32 2147483647, %v7677_v51 }
 0x545   : > { %7688 = vpow2.f32 %v3795_v61  ;;  %v4014_v12 = vsel %vm11411_vm14, %v4011_v30, %v4008_v36  ;;  %v4082_v6 = vadd.f32 1.0, %v4081_v15  ;;  %v3785_v50 = vmul.f32 1.442695, %v3714_v60 }
 0x546   : > { %7690 = vpow2.f32 %v3799_v43  ;;  %v11426_v21 = vadd.f32 %v11133_v57, %v11027_v28  ;;  %v11430_v29 = vadd.f32 %v11187_v46, %v11036_v47  ;;  %v11434_v41 = vadd.f32 %v11162_v0, %v11036_v47 }
 0x547   : > { %v11419_v54 = vpop.eup %7682  ;;  %v3874_v33 = vmul.f32 -0.5, %v11388_v62  ;;  %7692 = vpow2.f32 %v3781_v39  ;;  %v11439_v34 = vadd.f32 %v11172_v35, %v11027_v28  ;;  %v11442_v36 = vmul.f32 100.0, %v11417_v55 }
 0x548   : > { %v3889_v4 = vadd.f32 1.0, %v11419_v54  ;;  %14273 = vst [vmem:[#allocation38_spill] sm:$0xff] %v11426_v21  ;;  %v4142_v32 = vmul.f32 0.01, %v4014_v12  ;;  %vm11444_vm15 = vcmp.lt.f32.partialorder %v4084_v27, 0.0004427343  ;;  %v11450_v46 = vadd.f32 %v11196_v16, %v11036_v47 }
 0x549   : > { %14274 = vst [vmem:[#allocation35_spill] sm:$0xff] %v11439_v34  ;;  %v4083_v9 = vmul.f32 %v7677_v51, %v4082_v6  ;;  %v3727_v28 = vmin.f32 %v11442_v36, 20.0  ;;  %v3877_v35 = vand.u32 2147483647, %v11388_v62  ;;  %v11455_v60 = vmul.f32 100.0, %v11426_v21 }
 0x54a   : > { %7694 = vlog2.f32 %v3889_v4  ;;  %v11458_v15 = vmul.f32 100.0, %v11430_v29  ;;  %v11461_v61 = vmul.f32 100.0, %v11434_v41  ;;  %v3875_v16 = vadd.f32 1.0, %v3874_v33 }
 0x54b   : > { %7696 = vpow2.f32 %v3785_v50  ;;  %v11466_v51 = vmul.f32 100.0, %v11439_v34  ;;  %v3811_v22 = vmul.f32 1.442695, %v3727_v28  ;;  %v11471_v27 = vmul.f32 100.0, %v11450_v46 }
 0x54c   : > { %v7685_v57 = vpop.eup %7684  ;;  %v3729_v43 = vmin.f32 %v11458_v15, 20.0  ;;  %v3728_v14 = vmin.f32 %v11461_v61, 20.0  ;;  %v11476_v6 = vsel %vm3758_vm13, %v11095_v17, %v4142_v32  ;;  %vm3766_vm2 = vcmp.gt.f32.partialorder %v11232_v26, 20.0 }
 0x54d   : > { %v4080_v0 = vmul.f32 0.6931472, %v7685_v57  ;;  %14277 = vst [vmem:[#allocation32_spill] sm:$0xff] %v11466_v51  ;;  %v3892_v50 = vmul.f32 -0.5, %v11419_v54  ;;  %7698 = vpow2.f32 %v3811_v22  ;;  %v3720_v7 = vmin.f32 %v11455_v60, 20.0 }
 0x54e   : > { %v7687_v30 = vpop.eup %7686  ;;  %v3722_v10 = vmin.f32 %v11466_v51, 20.0  ;;  %v3815_v17 = vmul.f32 1.442695, %v3729_v43  ;;  %v3813_v32 = vmul.f32 1.442695, %v3728_v14  ;;  %v3876_v26 = vmul.f32 %v11388_v62, %v3875_v16 }
 0x54f   : > { %v4086_v47 = vsel %vm11444_vm15, %v4083_v9, %v4080_v0  ;;  %v7689_v12 = vpop.eup %7688  ;;  %v3873_v33 = vmul.f32 0.6931472, %v7687_v30  ;;  %vm11488_vm3 = vcmp.lt.f32.partialorder %v3877_v35, 0.0004427343  ;;  %v3893_v22 = vadd.f32 1.0, %v3892_v50 }
 0x550   : > { %v4150_v39 = vmul.f32 0.01, %v4086_v47  ;;  %v3943_v57 = vadd.f32 1.0, %v7689_v12  ;;  %v7691_v0 = vpop.eup %7690  ;;  %v3946_v30 = vmul.f32 -0.5, %v7689_v12  ;;  %vm3743_vm4 = vcmp.gt.f32.partialorder %v11269_v38, 20.0 }
 0x551   : > { %v11493_v47 = vpop.eup %7692  ;;  %v3879_v43 = vsel %vm11488_vm3, %v3876_v26, %v3873_v33  ;;  %v3895_v62 = vand.u32 2147483647, %v11419_v54  ;;  %v3964_v16 = vmul.f32 -0.5, %v7691_v0  ;;  %v3797_v14 = vmul.f32 1.442695, %v3720_v7 }
 0x552   : > { %v11481_v4 = vsel %vm3766_vm2, %v11203_v23, %v4150_v39  ;;  %7700 = vlog2.f32 %v3943_v57  ;;  %v3730_v23 = vmin.f32 %v11471_v27, 20.0  ;;  %v3961_v39 = vadd.f32 1.0, %v7691_v0 }
 0x553   : > { %7702 = vpow2.f32 %v3815_v17  ;;  %v3801_v57 = vmul.f32 1.442695, %v3722_v10  ;;  %v11503_v17 = vadd.f32 %v14280_v58, %v11071_v56  ;;  %v11507_v20 = vadd.f32 %v11213_v53, %v11071_v56  ;;  %v14283_v10 = vld [vmem:[#allocation24_spill] sm:$0xff] }
 0x554   : > { %v7695_v52 = vpop.eup %7694  ;;  %7704 = vpow2.f32 %v3813_v32  ;;  %v3817_v50 = vmul.f32 1.442695, %v3730_v23  ;;  %v4127_v33 = vmul.f32 0.01, %v3879_v43  ;;  %v3894_v26 = vmul.f32 %v11419_v54, %v3893_v22 }
 0x555   : > { %v11499_v35 = vpop.eup %7696  ;;  %7706 = vlog2.f32 %v3961_v39  ;;  %v3891_v9 = vmul.f32 0.6931472, %v7695_v52  ;;  %v3947_v32 = vadd.f32 1.0, %v3946_v30  ;;  %v3949_v28 = vand.u32 2147483647, %v7689_v12 }
 0x556   : > { %vm3745_vm5 = vcmp.gt.f32.partialorder %v11323_v19, 20.0  ;;  %v3967_v39 = vand.u32 2147483647, %v7691_v0  ;;  %7708 = vpow2.f32 %v3817_v50  ;;  %v11512_v52 = vmul.f32 100.0, %v11503_v17  ;;  %v14287_v50 = vld [vmem:[#allocation26_spill] sm:$0xff] }
 0x557   : > { %v11515_v7 = vmul.f32 100.0, %v11507_v20  ;;  %v11517_v58 = vpop.eup %7698  ;;  %vm11519_vm6 = vcmp.lt.f32.partialorder %v3895_v62, 0.0004427343  ;;  %vm3751_vm7 = vcmp.gt.f32.partialorder %v11364_v40, 20.0  ;;  %v3965_v54 = vadd.f32 1.0, %v3964_v16 }
 0x558   : > { %7710 = vpow2.f32 %v3797_v14  ;;  %v11526_v23 = vadd.f32 %v14283_v10, %v11071_v56  ;;  %v3897_v22 = vsel %vm11519_vm6, %v3894_v26, %v3891_v9  ;;  %v4015_v30 = vadd.f32 1.0, %v11517_v58 }
 0x559   : > { %7712 = vpow2.f32 %v3801_v57  ;;  %v3844_v43 = vadd.f32 1.0, %v11198_v44  ;;  %v11535_v62 = vsel %vm3743_vm4, %v11245_v2, %v4127_v33  ;;  %vm11537_vm9 = vcmp.lt.f32.partialorder %v3949_v28, 0.0004427343 }
 0x55a   : > { %14284 = vst [vmem:[#allocation31_spill] sm:$0xff] %v11535_v62  ;;  %v3735_v14 = vmin.f32 %v11512_v52, 20.0  ;;  %v11544_v53 = vadd.f32 %v14287_v50, %v11071_v56  ;;  %v3948_v57 = vmul.f32 %v7689_v12, %v3947_v32  ;;  %vm3753_vm0 = vcmp.gt.f32.partialorder %v11376_v59, 20.0 }
 0x55b   : > { %vm11547_vm1 = vcmp.lt.f32.partialorder %v3967_v39, 0.0004427343  ;;  %7714 = vlog2.f32 %v4015_v30  ;;  %v3737_v2 = vmin.f32 %v11515_v7, 20.0  ;;  %v4129_v33 = vmul.f32 0.01, %v3897_v22 }
 0x55c   : > { %v7701_v9 = vpop.eup %7700  ;;  %v3966_v10 = vmul.f32 %v7691_v0, %v3965_v54  ;;  %v11555_v34 = vmul.f32 100.0, %v11526_v23  ;;  %v4018_v12 = vmul.f32 -0.5, %v11517_v58  ;;  %v3827_v39 = vmul.f32 1.442695, %v3735_v14 }
 0x55d   : > { %v11552_v38 = vpop.eup %7702  ;;  %v3945_v28 = vmul.f32 0.6931472, %v7701_v9  ;;  %7716 = vlog2.f32 %v3844_v43  ;;  %v11565_v22 = vmul.f32 100.0, %v11544_v53  ;;  %v3847_v0 = vmul.f32 -0.5, %v11198_v44 }
 0x55e   : > { %v11557_v56 = vpop.eup %7704  ;;  %v4033_v32 = vadd.f32 1.0, %v11552_v38  ;;  %v3831_v51 = vmul.f32 1.442695, %v3737_v2  ;;  %v11571_v14 = vsel %vm3745_vm5, %v11306_v63, %v4129_v33  ;;  %v4021_v43 = vand.u32 2147483647, %v11517_v58 }
 0x55f   : > { %v7707_v50 = vpop.eup %7706  ;;  %v3951_v30 = vsel %vm11537_vm9, %v3948_v57, %v3945_v28  ;;  %v4024_v31 = vadd.f32 1.0, %v11557_v56  ;;  %14290 = vst [vmem:[#allocation27_spill] sm:$0xff] %v11571_v14  ;;  %v3736_v16 = vmin.f32 %v11555_v34, 20.0  ;;  %v4019_v2 = vadd.f32 1.0, %v4018_v12 }
 0x560   : > { %v4135_v54 = vmul.f32 0.01, %v3951_v30  ;;  %v3963_v9 = vmul.f32 0.6931472, %v7707_v50  ;;  %7718 = vlog2.f32 %v4033_v32  ;;  %v7709_v57 = vpop.eup %7708  ;;  %v4039_v40 = vand.u32 2147483647, %v11552_v38 }
 0x561   : > { %7720 = vlog2.f32 %v4024_v31  ;;  %v4036_v31 = vmul.f32 -0.5, %v11552_v38  ;;  %v4042_v33 = vadd.f32 1.0, %v7709_v57  ;;  %v3738_v12 = vmin.f32 %v11565_v22, 20.0 }
 0x562   : > { %v11578_v28 = vsel %vm3751_vm7, %v11333_v5, %v4135_v54  ;;  %v3969_v32 = vsel %vm11547_vm1, %v3966_v10, %v3963_v9  ;;  %7722 = vpow2.f32 %v3827_v39  ;;  %v11582_v50 = vpop.eup %7710  ;;  %v4027_v5 = vmul.f32 -0.5, %v11557_v56 }
 0x563   : > { %14291 = vst [vmem:[#allocation25_spill] sm:$0xff] %v11578_v28  ;;  %v4137_v19 = vmul.f32 0.01, %v3969_v32  ;;  %v11587_v30 = vpop.eup %7712  ;;  %v4045_v54 = vmul.f32 -0.5, %v7709_v57  ;;  %7724 = vpow2.f32 %v3831_v51  ;;  %v3829_v10 = vmul.f32 1.442695, %v3736_v16 }
 0x564   : > { %7726 = vlog2.f32 %v4042_v33  ;;  %v4020_v32 = vmul.f32 %v11517_v58, %v4019_v2  ;;  %vm11600_vm10 = vcmp.lt.f32.partialorder %v4021_v43, 0.0004427343  ;;  %v4030_v51 = vand.u32 2147483647, %v11557_v56  ;;  %v14295_v28 = vld [vmem:[#allocation15_spill] sm:$0xff] }
 0x565   : > { %v11594_v26 = vsel %vm3753_vm0, %v11352_v45, %v4137_v19  ;;  %v7715_v39 = vpop.eup %7714  ;;  %v4037_v59 = vadd.f32 1.0, %v4036_v31  ;;  %7728 = vpow2.f32 %v3829_v10  ;;  %v3833_v45 = vmul.f32 1.442695, %v3738_v12 }
 0x566   : > { %14292 = vst [vmem:[#allocation40_spill] sm:$0xff] %v11594_v26  ;;  %v4017_v49 = vmul.f32 0.6931472, %v7715_v39  ;;  %vm3759_vm11 = vcmp.gt.f32.partialorder %v11442_v36, 20.0  ;;  %v4028_v16 = vadd.f32 1.0, %v4027_v5  ;;  %v4046_v33 = vadd.f32 1.0, %v4045_v54 }
 0x567   : > { %v7717_v19 = vpop.eup %7716  ;;  %v4048_v62 = vand.u32 2147483647, %v7709_v57  ;;  %v3916_v9 = vadd.f32 1.0, %v14295_v28  ;;  %vm11607_vm12 = vcmp.lt.f32.partialorder %v4039_v40, 0.0004427343  ;;  %7730 = vpow2.f32 %v3833_v45 }
 0x568   : > { %v3848_v43 = vadd.f32 1.0, %v3847_v0  ;;  %v3850_v2 = vand.u32 2147483647, %v11198_v44  ;;  %v4023_v31 = vsel %vm11600_vm10, %v4020_v32, %v4017_v49  ;;  %vm11614_vm13 = vcmp.lt.f32.partialorder %v4030_v51, 0.0004427343 }
 0x569   : > { %7732 = vlog2.f32 %v3916_v9  ;;  %v3919_v5 = vmul.f32 -0.5, %v14295_v28  ;;  %v4038_v12 = vmul.f32 %v11552_v38, %v4037_v59  ;;  %v3846_v14 = vmul.f32 0.6931472, %v7717_v19 }
 0x56a   : > { %v7719_v39 = vpop.eup %7718  ;;  %v3922_v0 = vand.u32 2147483647, %v14295_v28  ;;  %vm3761_vm14 = vcmp.gt.f32.partialorder %v11458_v15, 20.0  ;;  %v4029_v49 = vmul.f32 %v11557_v56, %v4028_v16  ;;  %v4047_v63 = vmul.f32 %v7709_v57, %v4046_v33 }
 0x56b   : > { %v7721_v54 = vpop.eup %7720  ;;  %v4035_v40 = vmul.f32 0.6931472, %v7719_v39  ;;  %vm11623_vm15 = vcmp.lt.f32.partialorder %v4048_v62, 0.0004427343  ;;  %v4143_v9 = vmul.f32 0.01, %v4023_v31  ;;  %v3849_v38 = vmul.f32 %v11198_v44, %v3848_v43 }
 0x56c   : > { %v7723_v45 = vpop.eup %7722  ;;  %v4026_v26 = vmul.f32 0.6931472, %v7721_v54  ;;  %vm3760_vm2 = vcmp.gt.f32.partialorder %v11461_v61, 20.0  ;;  %vm11629_vm3 = vcmp.lt.f32.partialorder %v3850_v2, 0.0004427343  ;;  %v14304_v39 = vld [vmem:[#allocation39_spill] sm:$0xff] }
 0x56d   : > { %v4087_v51 = vadd.f32 1.0, %v7723_v45  ;;  %v7725_v19 = vpop.eup %7724  ;;  %vm3740_vm4 = vcmp.gt.f32.partialorder %v14304_v39, 20.0  ;;  %v4041_v56 = vsel %vm11607_vm12, %v4038_v12, %v4035_v40  ;;  %v4090_v57 = vmul.f32 -0.5, %v7723_v45 }
 0x56e   : > { %v4032_v62 = vsel %vm11614_vm13, %v4029_v49, %v4026_v26  ;;  %v3920_v16 = vadd.f32 1.0, %v3919_v5  ;;  %v7727_v33 = vpop.eup %7726  ;;  %vm3762_vm5 = vcmp.gt.f32.partialorder %v11471_v27, 20.0  ;;  %v3852_v44 = vsel %vm11629_vm3, %v3849_v38, %v3846_v14 }
 0x56f   : > { %7734 = vlog2.f32 %v4087_v51  ;;  %vm11641_vm6 = vcmp.lt.f32.partialorder %v3922_v0, 0.0004427343  ;;  %v3862_v2 = vadd.f32 1.0, %v11286_v25  ;;  %v4044_v58 = vmul.f32 0.6931472, %v7727_v33  ;;  %v7729_v10 = vpop.eup %7728  ;;  %v14307_v0 = vld [vmem:[#allocation45_spill] sm:$0xff] }
 0x570   : > { %v4105_v31 = vadd.f32 1.0, %v7725_v19  ;;  %v4108_v54 = vmul.f32 -0.5, %v7725_v19  ;;  %v3865_v26 = vmul.f32 -0.5, %v11286_v25  ;;  %v11650_v5 = vsel %vm3759_vm11, %v11417_v55, %v4143_v9 }
 0x571   : > { %v4145_v40 = vmul.f32 0.01, %v4041_v56  ;;  %v4144_v12 = vmul.f32 0.01, %v4032_v62  ;;  %v4093_v14 = vand.u32 2147483647, %v7723_v45  ;;  %v4050_v49 = vsel %vm11623_vm15, %v4047_v63, %v4044_v58  ;;  %v11655_v59 = vpop.eup %7730 }
 0x572   : > { %vm3748_vm7 = vcmp.gt.f32.partialorder %v14307_v0, 20.0  ;;  %v4091_v51 = vadd.f32 1.0, %v4090_v57  ;;  %7736 = vlog2.f32 %v4105_v31  ;;  %v4096_v38 = vadd.f32 1.0, %v7729_v10  ;;  %v14312_v58 = vld [vmem:[#allocation37_spill] sm:$0xff] }
 0x573   : > { %v4111_v33 = vand.u32 2147483647, %v7725_v19  ;;  %v3921_v21 = vmul.f32 %v14295_v28, %v3920_v16  ;;  %v4124_v13 = vmul.f32 0.01, %v3852_v44  ;;  %7738 = vlog2.f32 %v3862_v2  ;;  %v7733_v55 = vpop.eup %7732 }
 0x574   : > { %v4146_v36 = vmul.f32 0.01, %v4050_v49  ;;  %v4109_v9 = vadd.f32 1.0, %v4108_v54  ;;  %7740 = vlog2.f32 %v4096_v38  ;;  %v4114_v56 = vadd.f32 1.0, %v11655_v59 }
 0x575   : > { %v11662_v63 = vsel %vm3761_vm14, %v11430_v29, %v4145_v40  ;;  %vm11664_vm9 = vcmp.lt.f32.partialorder %v4093_v14, 0.0004427343  ;;  %v4099_v62 = vmul.f32 -0.5, %v7729_v10  ;;  %v4102_v57 = vand.u32 2147483647, %v7729_v10 }
 0x576   : > { %v11671_v28 = vsel %vm3760_vm2, %v11434_v41, %v4144_v12  ;;  %vm3767_vm0 = vcmp.gt.f32.partialorder %v11512_v52, 20.0  ;;  %v4092_v16 = vmul.f32 %v7723_v45, %v4091_v51  ;;  %7742 = vlog2.f32 %v4114_v56 }
 0x577   : > { %v3918_v44 = vmul.f32 0.6931472, %v7733_v55  ;;  %vm11674_vm1 = vcmp.lt.f32.partialorder %v4111_v33, 0.0004427343  ;;  %v4117_v29 = vmul.f32 -0.5, %v11655_v59  ;;  %v4156_v31 = vsel %vm3740_vm4, %v14312_v58, %v4124_v13 }
 0x578   : > { %v4120_v2 = vand.u32 2147483647, %v11655_v59  ;;  %v11686_v41 = vsel %vm3762_vm5, %v11450_v46, %v4146_v36  ;;  %v4110_v61 = vmul.f32 %v7725_v19, %v4109_v9  ;;  %v3934_v54 = vadd.f32 1.0, %v11295_v24  ;;  %v14317_v19 = vld [vmem:[#allocation20_spill] sm:$0xff] }
 0x579   : > { %v3924_v45 = vsel %vm11641_vm6, %v3921_v21, %v3918_v44  ;;  %v7735_v40 = vpop.eup %7734  ;;  %vm3769_vm10 = vcmp.gt.f32.partialorder %v11515_v7, 20.0  ;;  %v4100_v12 = vadd.f32 1.0, %v4099_v62  ;;  %vm11692_vm11 = vcmp.lt.f32.partialorder %v4102_v57, 0.0004427343 }
 0x57a   : > { %v4132_v13 = vmul.f32 0.01, %v3924_v45  ;;  %v3866_v39 = vadd.f32 1.0, %v3865_v26  ;;  %v4089_v49 = vmul.f32 0.6931472, %v7735_v40  ;;  %7744 = vlog2.f32 %v3934_v54  ;;  %v14320_v45 = vld [vmem:[#allocation19_spill] sm:$0xff] }
 0x57b   : > { %v3937_v46 = vmul.f32 -0.5, %v11295_v24  ;;  %vm4580_vm12 = vcmask 1044480   ;;  %vm3768_vm13 = vcmp.gt.f32.partialorder %v11555_v34, 20.0  ;;  %v4118_v21 = vadd.f32 1.0, %v4117_v29  ;;  %v14321_v54 = vld [vmem:[#allocation16_spill] sm:$0xff] }
 0x57c   : > { %vm11698_vm14 = vcmp.lt.f32.partialorder %v4120_v2, 0.0004427343  ;;  %v4164_v43 = vsel %vm3748_vm7, %v14317_v19, %v4132_v13  ;;  %v7737_v51 = vpop.eup %7736  ;;  %v4095_v26 = vsel %vm11664_vm9, %v4092_v16, %v4089_v49  ;;  %v3868_v33 = vand.u32 2147483647, %v11286_v25  ;;  %v14334_v49 = vld [vmem:[#allocation18_spill] sm:$0xff] }
 0x57d   : > { %v7058_v38 = vpack.c.bf16 %v4164_v43, %v4156_v31  ;;  %v3880_v55 = vadd.f32 1.0, %v11493_v47  ;;  %v7739_v36 = vpop.eup %7738  ;;  %v4151_v9 = vmul.f32 0.01, %v4095_v26  ;;  %v4107_v56 = vmul.f32 0.6931472, %v7737_v51 }
 0x57e   : > { %v4101_v62 = vmul.f32 %v7729_v10, %v4100_v12  ;;  %vm3770_vm15 = vcmp.gt.f32.partialorder %v11565_v22, 20.0  ;;  %v3940_v57 = vand.u32 2147483647, %v11295_v24  ;;  %vm8080_vm2 = vmmov 1   ;;  %v7741_v32 = vpop.eup %7740 }
 0x57f   : > { %vm11712_vm3 = vmpackc.low %vm4580_vm12, %vm8080_vm2  ;;  %7059 = vmatprep.subr.bf16.mxu0 %v7058_v38  ;;  %v3867_v16 = vmul.f32 %v11286_v25, %v3866_v39  ;;  %v3938_v44 = vadd.f32 1.0, %v3937_v46  ;;  %7746 = vlog2.f32 %v3880_v55  ;;  %v3952_v29 = vadd.f32 1.0, %v11582_v50 }
 0x580   : > { %v11721_v10 = vsel %vm3767_vm0, %v11503_v17, %v4151_v9  ;;  %v4113_v2 = vsel %vm11674_vm1, %v4110_v61, %v4107_v56  ;;  %v4098_v58 = vmul.f32 0.6931472, %v7741_v32  ;;  %v3864_v31 = vmul.f32 0.6931472, %v7739_v36  ;;  %v7743_v12 = vpop.eup %7742 }
 0x581   : > { %v14322_v40 = vpack.c.bf16 %v14320_v45, %v14321_v54  ;;  %v7085_v25 = vpack.c.bf16 %v11721_v10, %v11650_v5  ;;  %v4153_v13 = vmul.f32 0.01, %v4113_v2  ;;  %v4119_v39 = vmul.f32 %v11655_v59, %v4118_v21  ;;  %v14333_v45 = vld [vmem:[#allocation21_spill] sm:$0xff]  ;;  %v11906_v5 = vpop.permute.xlu0 %4963 }
 0x582   : > { %vm11731_vm4 = vcmp.lt.f32.partialorder %v3868_v33, 0.0004427343  ;;  %v14325_v17 = vpack.c.bf16 %v11402_v18, %v11397_v42  ;;  %v4104_v15 = vsel %vm11692_vm11, %v4101_v62, %v4098_v58  ;;  %v4116_v61 = vmul.f32 0.6931472, %v7743_v12  ;;  %v14330_v62 = vld [vmem:[#allocation17_spill] sm:$0xff]  ;;  %v14332_v58 = vld [vmem:[#allocation30_spill] sm:$0xff] }
 0x583   : > { %7061 = vmatpush1.bf16.msra.mxu0 %v14322_v40  ;;  %vm11742_vm5 = vcmp.lt.f32.partialorder %v3940_v57, 0.0004427343  ;;  %v3883_v59 = vmul.f32 -0.5, %v11493_v47  ;;  %v11750_v46 = vsel %vm3769_vm10, %v11507_v20, %v4153_v13  ;;  %v4152_v21 = vmul.f32 0.01, %v4104_v15  ;;  %v11767_v20 = vld [vmem:[%s13633_s9] sm:$0xff] }
 0x584   : > { %7064 = vmatprep.subr.msk.bf16.mxu0 %vm11712_vm3, %v14325_v17  ;;  %vm4567_vm6 = vcmask 236544   ;;  %7748 = vlog2.f32 %v3952_v29  ;;  %v7095_v42 = vpack.c.bf16 %v11750_v46, %v11662_v63  ;;  %v4122_v18 = vsel %vm11698_vm14, %v4119_v39, %v4116_v61  ;;  %v7745_v7 = vpop.eup %7744  ;;  %v14331_v57 = vld [vmem:[#allocation44_spill] sm:$0xff] }
 0x585   : > { %v3870_v14 = vsel %vm11731_vm4, %v3867_v16, %v3864_v31  ;;  %v3939_v19 = vmul.f32 %v11295_v24, %v3938_v44  ;;  %v14328_v43 = vpack.c.bf16 %v11357_v8, %v11311_v11  ;;  %v11772_v27 = vsel %vm3768_vm13, %v11526_v23, %v4152_v21 }
 0x586   : > { %v4154_v51 = vmul.f32 0.01, %v4122_v18  ;;  %v3886_v24 = vand.u32 2147483647, %v11493_v47  ;;  %v3898_v26 = vadd.f32 1.0, %v11499_v35  ;;  %v7082_v11 = vpack.c.bf16 %v11772_v27, %v11671_v28  ;;  %v14347_v28 = vld [vmem:[#allocation40_spill] sm:$0xff] }
 0x587   : > { %7067 = vmatpush1.bf16.msk.msra.mxu0 %vm11712_vm3, %v14328_v43  ;;  %v3936_v8 = vmul.f32 0.6931472, %v7745_v7  ;;  %v3884_v38 = vadd.f32 1.0, %v3883_v59  ;;  %v3955_v33 = vmul.f32 -0.5, %v11582_v50  ;;  %v4126_v34 = vmul.f32 0.01, %v3870_v14 }
 0x588   : > { %v11782_v55 = vsel %vm3770_vm15, %v11544_v53, %v4154_v51  ;;  %7750 = vlog2.f32 %v3898_v26  ;;  %v3970_v23 = vadd.f32 1.0, %v11587_v30  ;;  %v14329_v56 = vmov 0.0   ;;  %v11795_v53 = vld [vmem:[%s13633_s9 + $0x8] sm:$0xff]  ;;  %v14348_v27 = vld [vmem:[#allocation27_spill] sm:$0xff] }
 0x589   : > { %v7092_v36 = vpack.c.bf16 %v11782_v55, %v11686_v41  ;;  %v3942_v9 = vsel %vm11742_vm5, %v3939_v19, %v3936_v8  ;;  %v7747_v22 = vpop.eup %7746  ;;  %vm3742_vm7 = vcmp.gt.f32.partialorder %v14330_v62, 20.0  ;;  %vm3750_vm9 = vcmp.gt.f32.partialorder %v14331_v57, 20.0  ;;  %v14338_v8 = vld [vmem:[#allocation23_spill] sm:$0xff] }
 0x58a   : > { %6914 = vmatmul.mubr.msk.f32.vlgmr.msra.gmra.mrb[64].mxu0 %vm4567_vm6, %v11767_v20  ;;  %v4134_v32 = vmul.f32 0.01, %v3942_v9  ;;  %7752 = vlog2.f32 %v3970_v23  ;;  %v3882_v16 = vmul.f32 0.6931472, %v7747_v22  ;;  %v3885_v44 = vmul.f32 %v11493_v47, %v3884_v38  ;;  %v11811_v47 = vld [vmem:[%s13633_s9 + $0x10] sm:$0xff]  ;;  %v14341_v62 = vld [vmem:[#allocation31_spill] sm:$0xff] }
 0x58b   : > { %4675 = vmatprep.mubr.f32.mxu0 %v14329_v56  ;;  %v3956_v29 = vadd.f32 1.0, %v3955_v33  ;;  %v3901_v2 = vmul.f32 -0.5, %v11499_v35  ;;  %v4158_v31 = vsel %vm3742_vm7, %v14332_v58, %v4126_v34  ;;  %vm3887_vm0 = vcmp.lt.f32.partialorder %v3886_v24, 0.0004427343  ;;  %v14339_v33 = vld [vmem:[#allocation38_spill] sm:$0xff]  ;;  %v14340_v22 = vld [vmem:[#allocation25_spill] sm:$0xff] }
 0x58c   : > { %v4166_v54 = vsel %vm3750_vm9, %v14333_v45, %v4134_v32  ;;  %v3958_v40 = vand.u32 2147483647, %v11582_v50  ;;  %v3888_v13 = vsel %vm3887_vm0, %v3885_v44, %v3882_v16  ;;  %v3973_v39 = vmul.f32 -0.5, %v11587_v30  ;;  %v14343_v32 = vld [vmem:[#allocation41_spill] sm:$0xff]  ;;  %v14344_v16 = vld [vmem:[#allocation32_spill] sm:$0xff] }
 0x58d   : > { %v7068_v12 = vpack.c.bf16 %v4166_v54, %v4158_v31  ;;  %v3957_v15 = vmul.f32 %v11582_v50, %v3956_v29  ;;  %v3902_v61 = vadd.f32 1.0, %v3901_v2  ;;  %v14335_v59 = vpack.c.bf16 %v11279_v3, %v14334_v49  ;;  %v4190_v3 = vld [vmem:[%s13633_s9 + $0x18] sm:$0xff]  ;;  %v14346_v29 = vld [vmem:[#allocation35_spill] sm:$0xff]  ;;  %v11923_v31 = vpop.permute.xlu0 %4973 }
 0x58e   : > { %6915 = vmatmul.mubr.msk.f32.gmra.mrb[66].mxu0 %vm4567_vm6, %v11795_v53  ;;  %v7749_v52 = vpop.eup %7748  ;;  %vm3959_vm1 = vcmp.lt.f32.partialorder %v3958_v40, 0.0004427343  ;;  %v4128_v21 = vmul.f32 0.01, %v3888_v13  ;;  %v3904_v18 = vand.u32 2147483647, %v11499_v35  ;;  %v14336_v14 = vpack.c.bf16 %v11481_v4, %v11476_v6 }
 0x58f   : > { %4681 = vmatprep.mubr.f32.mxu0 %v14329_v56  ;;  %7069 = vmatprep.subr.bf16.mxu1 %v7068_v12  ;;  %v3954_v17 = vmul.f32 0.6931472, %v7749_v52  ;;  %v3974_v50 = vadd.f32 1.0, %v3973_v39  ;;  %v3976_v51 = vand.u32 2147483647, %v11587_v30  ;;  %vm3744_vm10 = vcmp.gt.f32.partialorder %v11361_v48, 20.0 }
 0x590   : > { %7071 = vmatpush1.bf16.msra.mxu1 %v14335_v59  ;;  %vm3752_vm11 = vcmp.gt.f32.partialorder %v11455_v60, 20.0  ;;  %v3903_v4 = vmul.f32 %v11499_v35, %v3902_v61  ;;  %v14337_v26 = vpack.c.bf16 %v11386_v1, %v11381_v37  ;;  %v4160_v38 = vsel %vm3744_vm10, %v14338_v8, %v4128_v21 }
 0x591   : > { %7074 = vmatprep.subr.msk.bf16.mxu1 %vm11712_vm3, %v14336_v14  ;;  %v3960_v19 = vsel %vm3959_vm1, %v3957_v15, %v3954_v17  ;;  %vm3905_vm12 = vcmp.lt.f32.partialorder %v3904_v18, 0.0004427343  ;;  %v3975_v9 = vmul.f32 %v11587_v30, %v3974_v50  ;;  %vm3977_vm13 = vcmp.lt.f32.partialorder %v3976_v51, 0.0004427343  ;;  %v14345_v30 = vld [vmem:[#allocation22_spill] sm:$0xff] }
 0x592   : > { %6916 = vmatmul.mubr.msk.f32.gmra.mrb[68].mxu0 %vm4567_vm6, %v11811_v47  ;;  %v7751_v43 = vpop.eup %7750  ;;  %v4136_v7 = vmul.f32 0.01, %v3960_v19  ;;  %v14342_v57 = vpack.c.bf16 %v14340_v22, %v14341_v62  ;;  %vm3746_vm14 = vcmp.gt.f32.partialorder %v14343_v32, 20.0  ;;  %vm3754_vm15 = vcmp.gt.f32.partialorder %v14344_v16, 20.0 }
 0x593   : > { %4687 = vmatprep.mubr.f32.mxu0 %v14329_v56  ;;  %v3900_v6 = vmul.f32 0.6931472, %v7751_v43 }
 0x594   : > { %v7753_v24 = vpop.eup %7752  ;;  %7077 = vmatpush1.bf16.msk.msra.mxu1 %vm11712_vm3, %v14337_v26  ;;  %v4168_v34 = vsel %vm3752_vm11, %v14339_v33, %v4136_v7 }
 0x595   : > { %v7078_v48 = vpack.c.bf16 %v4168_v34, %v4160_v38  ;;  %v3906_v23 = vsel %vm3905_vm12, %v3903_v4, %v3900_v6  ;;  %v3972_v60 = vmul.f32 0.6931472, %v7753_v24 }
 0x596   : > { %6917 = vmatmul.mubr.msk.f32.gmra.mrb[70].mxu0 %vm4567_vm6, %v4190_v3  ;;  %v4130_v35 = vmul.f32 0.01, %v3906_v23 }
 0x597   : > { %4847 = vmatprep.mubr.f32.mxu0 %v14329_v56  ;;  %6920 = vmatmul.mubr.msk.f32.vlgmr.msra.gmra.mrb[64].mxu1 %vm4567_vm6, %v11767_v20  ;;  %v3978_v37 = vsel %vm3977_vm13, %v3975_v9, %v3972_v60 }
 0x598   : > { %7079 = vmatprep.subr.bf16.mxu0 %v7078_v48  ;;  %4764 = vmatprep.mubr.f32.mxu1 %v14329_v56  ;;  %v4138_v1 = vmul.f32 0.01, %v3978_v37  ;;  %v4162_v44 = vsel %vm3746_vm14, %v14345_v30, %v4130_v35 }
 0x599   : > { %7081 = vmatpush1.bf16.msra.mxu0 %v14342_v57 }
 0x59a   : > { %7084 = vmatprep.subr.msk.bf16.mxu0 %vm11712_vm3, %v7082_v11  ;;  %v4170_v2 = vsel %vm3754_vm15, %v14346_v29, %v4138_v1  ;;  %v14349_v11 = vpack.c.bf16 %v14347_v28, %v14348_v27 }
 0x59b   : > { %6921 = vmatmul.mubr.msk.f32.gmra.mrb[66].mxu1 %vm4567_vm6, %v11795_v53  ;;  %v7088_v58 = vpack.c.bf16 %v4170_v2, %v4162_v44 }
 0x59c   : > { %4770 = vmatprep.mubr.f32.mxu1 %v14329_v56 }
 0x59d   : > { %7087 = vmatpush1.bf16.msk.msra.mxu0 %vm11712_vm3, %v7085_v25  ;;  %7089 = vmatprep.subr.bf16.mxu1 %v7088_v58  ;;  %v11914_v25 = vpop.permute.xlu1 %4968 }
 0x59e   : > { %7091 = vmatpush1.bf16.msra.mxu1 %v14349_v11 }
 0x59f   : > { %6922 = vmatmul.mubr.msk.f32.gmra.mrb[68].mxu1 %vm4567_vm6, %v11811_v47  ;;  %7094 = vmatprep.subr.msk.bf16.mxu1 %vm11712_vm3, %v7092_v36 }
 0x5a0   : > { %4776 = vmatprep.mubr.f32.mxu1 %v14329_v56  ;;  %6926 = vmatmul.mubr.msk.f32.vlgmr.msra.gmra.mrb[72].mxu0 %vm4567_vm6, %v11767_v20 }
 0x5a1   : > { %4853 = vmatprep.mubr.f32.mxu0 %v14329_v56 }
 0x5a2   : > { %7097 = vmatpush1.bf16.msk.msra.mxu1 %vm11712_vm3, %v7095_v42 }
 0x5a3   : > { %6923 = vmatmul.mubr.msk.f32.gmra.mrb[70].mxu1 %vm4567_vm6, %v4190_v3 }
 0x5a4   : > { %4936 = vmatprep.mubr.f32.mxu1 %v14329_v56  ;;  %6927 = vmatmul.mubr.msk.f32.gmra.mrb[74].mxu0 %vm4567_vm6, %v11795_v53 }
 0x5a5   : > { %4859 = vmatprep.mubr.f32.mxu0 %v14329_v56 }
 0x5a7   : > { %6932 = vmatmul.mubr.msk.f32.vlgmr.msra.gmra.mrb[72].mxu1 %vm4567_vm6, %v11767_v20 }
 0x5a8   : > { %4942 = vmatprep.mubr.f32.mxu1 %v14329_v56  ;;  %6928 = vmatmul.mubr.msk.f32.gmra.mrb[76].mxu0 %vm4567_vm6, %v11811_v47 }
 0x5a9   : > { %4865 = vmatprep.mubr.f32.mxu0 %v14329_v56 }
 0x5ab   : > { %6933 = vmatmul.mubr.msk.f32.gmra.mrb[74].mxu1 %vm4567_vm6, %v11795_v53 }
 0x5ac   : > { %4948 = vmatprep.mubr.f32.mxu1 %v14329_v56  ;;  %6929 = vmatmul.mubr.msk.f32.gmra.mrb[78].mxu0 %vm4567_vm6, %v4190_v3 }
 0x5ad   : > { %5629 = vmatprep.mubr.f32.mxu0 %v14329_v56 }
 0x5af   : > { %6934 = vmatmul.mubr.msk.f32.gmra.mrb[76].mxu1 %vm4567_vm6, %v11811_v47  ;;  %v11932_v47 = vpop.permute.xlu1 %4978 }
 0x5b0   : > { %4954 = vmatprep.mubr.f32.mxu1 %v14329_v56 }
 0x5b3   : > { %6935 = vmatmul.mubr.msk.f32.gmra.mrb[78].mxu1 %vm4567_vm6, %v4190_v3 }
 0x5b4   : > { %5718 = vmatprep.mubr.f32.mxu1 %v14329_v56 }
 0x65d   : > { %v4671_v63 = vpop.f32.mrb[64].mxu0 }
 0x65e   : > { %v11909_v41 = vadd.f32 %v11906_v5, %v4671_v63  ;;  %v4673_v0 = vpop.f32.mrb[65].mxu0 }
 0x65f   : > { %v11939_v49 = vadd.f32 %v11906_v5, %v4673_v0 }
 0x660   : > { %v11912_v10 = vmul.f32 100.0, %v11909_v41 }
 0x661   : > { %v4677_v46 = vpop.f32.mrb[66].mxu0  ;;  %14350 = vst [vmem:[#allocation28_spill] sm:$0xff] %v11939_v49  ;;  %v11952_v43 = vmul.f32 100.0, %v11939_v49 }
 0x662   : > { %v5045_v42 = vmin.f32 %v11912_v10, 20.0  ;;  %v11918_v20 = vadd.f32 %v11914_v25, %v4677_v46  ;;  %v4679_v55 = vpop.f32.mrb[67].mxu0  ;;  %vm5077_vm2 = vcmp.gt.f32.partialorder %v11912_v10, 20.0 }
 0x663   : > { %14351 = vst [vmem:[#allocation36_spill] sm:$0xff] %v11952_v43  ;;  %v11955_v7 = vadd.f32 %v11914_v25, %v4679_v55  ;;  %v5046_v48 = vmin.f32 %v11952_v43, 20.0 }
 0x664   : > { %v5109_v36 = vmul.f32 1.442695, %v5045_v42  ;;  %v11921_v53 = vmul.f32 100.0, %v11918_v20 }
 0x665   : > { %v4683_v45 = vpop.f32.mrb[68].mxu0  ;;  %14352 = vst [vmem:[#allocation43_spill] sm:$0xff] %v11955_v7  ;;  %v11969_v23 = vmul.f32 100.0, %v11955_v7  ;;  %v5111_v44 = vmul.f32 1.442695, %v5046_v48 }
 0x666   : > { %7754 = vpow2.f32 %v5109_v36  ;;  %v5053_v54 = vmin.f32 %v11921_v53, 20.0  ;;  %v11927_v40 = vadd.f32 %v11923_v31, %v4683_v45  ;;  %v4685_v12 = vpop.f32.mrb[69].mxu0  ;;  %vm5085_vm3 = vcmp.gt.f32.partialorder %v11921_v53, 20.0 }
 0x667   : > { %v11960_v4 = vadd.f32 %v11923_v31, %v4685_v12  ;;  %14354 = vst [vmem:[#allocation11_spill] sm:$0xff] %v11969_v23  ;;  %v5054_v29 = vmin.f32 %v11969_v23, 20.0 }
 0x668   : > { %v5125_v13 = vmul.f32 1.442695, %v5053_v54  ;;  %v11930_v39 = vmul.f32 100.0, %v11927_v40 }
 0x669   : > { %v4689_v52 = vpop.f32.mrb[70].mxu0  ;;  %14353 = vst [vmem:[#allocation34_spill] sm:$0xff] %v11960_v4  ;;  %v11977_v37 = vmul.f32 100.0, %v11960_v4 }
 0x66a   : > { %7756 = vpow2.f32 %v5125_v13  ;;  %v5061_v17 = vmin.f32 %v11930_v39, 20.0  ;;  %v11936_v15 = vadd.f32 %v11932_v47, %v4689_v52  ;;  %v4691_v61 = vpop.f32.mrb[71].mxu0  ;;  %v4760_v59 = vpop.f32.mrb[64].mxu1  ;;  %v5127_v52 = vmul.f32 1.442695, %v5054_v29 }
 0x66b   : > { %v11945_v14 = vadd.f32 %v11906_v5, %v4760_v59  ;;  %v4762_v19 = vpop.f32.mrb[65].mxu1  ;;  %14355 = vst [vmem:[#allocation33_spill] sm:$0xff] %v11977_v37  ;;  %v5062_v27 = vmin.f32 %v11977_v37, 20.0  ;;  %v12001_v42 = vadd.f32 %v11932_v47, %v4691_v61  ;;  %vm5093_vm7 = vcmp.gt.f32.partialorder %v11930_v39, 20.0 }
 0x66c   : > { %v5141_v21 = vmul.f32 1.442695, %v5061_v17  ;;  %v11942_v18 = vmul.f32 100.0, %v11936_v15  ;;  %v11981_v22 = vadd.f32 %v11906_v5, %v4762_v19 }
 0x66d   : > { %v11949_v3 = vmul.f32 100.0, %v11945_v14  ;;  %14358 = vst [vmem:[#allocation12_spill] sm:$0xff] %v12001_v42 }
 0x66e   : > { %7758 = vpow2.f32 %v5141_v21  ;;  %v5069_v50 = vmin.f32 %v11942_v18, 20.0  ;;  %v4766_v6 = vpop.f32.mrb[66].mxu1  ;;  %14356 = vst [vmem:[#allocation42_spill] sm:$0xff] %v11981_v22  ;;  %v11997_v0 = vmul.f32 100.0, %v11981_v22  ;;  %vm5101_vm9 = vcmp.gt.f32.partialorder %v11942_v18, 20.0 }
 0x66f   : > { %v5047_v8 = vmin.f32 %v11949_v3, 20.0  ;;  %v4768_v38 = vpop.f32.mrb[67].mxu1  ;;  %v11965_v33 = vadd.f32 %v11914_v25, %v4766_v6  ;;  %vm5079_vm0 = vcmp.gt.f32.partialorder %v11949_v3, 20.0 }
 0x670   : > { %v11957_v51 = vpop.eup %7754  ;;  %v5157_v24 = vmul.f32 1.442695, %v5069_v50  ;;  %14357 = vst [vmem:[#allocation13_spill] sm:$0xff] %v11997_v0  ;;  %v12018_v61 = vadd.f32 %v11914_v25, %v4768_v38  ;;  %v5048_v6 = vmin.f32 %v11997_v0, 20.0 }
 0x671   : > { %v5173_v26 = vadd.f32 1.0, %v11957_v51  ;;  %v5113_v34 = vmul.f32 1.442695, %v5047_v8  ;;  %v11974_v9 = vmul.f32 100.0, %v11965_v33  ;;  %v5176_v1 = vmul.f32 -0.5, %v11957_v51 }
 0x672   : > { %v4772_v35 = vpop.f32.mrb[68].mxu1  ;;  %v5179_v13 = vand.u32 2147483647, %v11957_v51  ;;  %14359 = vst [vmem:[#allocation14_spill] sm:$0xff] %v12018_v61 }
 0x673   : > { %7760 = vlog2.f32 %v5173_v26  ;;  %v4774_v57 = vpop.f32.mrb[69].mxu1  ;;  %v11984_v32 = vpop.f32.mrb[72].mxu0  ;;  %v5055_v16 = vmin.f32 %v11974_v9, 20.0  ;;  %v11991_v2 = vadd.f32 %v11923_v31, %v4772_v35  ;;  %v5177_v63 = vadd.f32 1.0, %v5176_v1 }
 0x674   : > { %v11971_v60 = vpop.eup %7756  ;;  %7762 = vpow2.f32 %v5157_v24  ;;  %v11987_v30 = vpop.f32.mrb[73].mxu0  ;;  %v5143_v24 = vmul.f32 1.442695, %v5062_v27  ;;  %v12026_v26 = vmul.f32 100.0, %v12001_v42  ;;  %vm12041_vm4 = vcmp.lt.f32.partialorder %v5179_v13, 0.0004427343 }
 0x675   : > { %7764 = vpow2.f32 %v5113_v34  ;;  %v5245_v62 = vadd.f32 1.0, %v11971_v60  ;;  %v5129_v28 = vmul.f32 1.442695, %v5055_v16  ;;  %v5248_v45 = vmul.f32 -0.5, %v11971_v60 }
 0x676   : > { %v4778_v11 = vpop.f32.mrb[70].mxu1  ;;  %v12009_v54 = vmul.f32 100.0, %v11991_v2  ;;  %v5178_v50 = vmul.f32 %v11957_v51, %v5177_v63  ;;  %v12037_v51 = vadd.f32 %v11923_v31, %v4774_v57  ;;  %v12053_v57 = vmul.f32 100.0, %v12018_v61 }
 0x677   : > { %7766 = vlog2.f32 %v5245_v62  ;;  %v12003_v55 = vpop.f32.mrb[71].mxu1  ;;  %v12005_v36 = vpop.f32.mrb[74].mxu0  ;;  %v12015_v17 = vadd.f32 %v11932_v47, %v4778_v11  ;;  %v5249_v35 = vadd.f32 1.0, %v5248_v45  ;;  %v5115_v13 = vmul.f32 1.442695, %v5048_v6 }
 0x678   : > { %v11993_v58 = vpop.eup %7758  ;;  %7768 = vpow2.f32 %v5129_v28  ;;  %v12011_v12 = vpop.f32.mrb[75].mxu0  ;;  %v5063_v59 = vmin.f32 %v12009_v54, 20.0  ;;  %14360 = vst [vmem:[#allocation29_spill] sm:$0xff] %v12037_v51  ;;  %14363 = vst [vmem:[#allocation24_spill] sm:$0xff] %v12053_v57  ;;  %v12066_v16 = vmul.f32 100.0, %v12037_v51  ;;  %vm5087_vm1 = vcmp.gt.f32.partialorder %v11974_v9, 20.0 }
 0x679   : > { %v5317_v46 = vadd.f32 1.0, %v11993_v58  ;;  %7770 = vpow2.f32 %v5111_v44  ;;  %v5251_v44 = vand.u32 2147483647, %v11971_v60  ;;  %v12047_v29 = vmul.f32 100.0, %v12015_v17 }
 0x67a   : > { %v12021_v21 = vpop.f32.mrb[72].mxu1  ;;  %v5145_v1 = vmul.f32 1.442695, %v5063_v59  ;;  %14364 = vst [vmem:[#allocation26_spill] sm:$0xff] %v12066_v16  ;;  %vm5095_vm14 = vcmp.gt.f32.partialorder %v12009_v54, 20.0 }
 0x67b   : > { %7772 = vlog2.f32 %v5317_v46  ;;  %v12028_v8 = vpop.f32.mrb[73].mxu1  ;;  %v12030_v34 = vpop.f32.mrb[76].mxu0  ;;  %vm5252_vm5 = vcmp.lt.f32.partialorder %v5251_v44, 0.0004427343  ;;  %v5071_v6 = vmin.f32 %v12047_v29, 20.0  ;;  %vm5103_vm15 = vcmp.gt.f32.partialorder %v12047_v29, 20.0 }
 0x67c   : > { %7774 = vpow2.f32 %v5127_v52  ;;  %v12058_v46 = vpop.f32.mrb[77].mxu0  ;;  %v5320_v52 = vmul.f32 -0.5, %v11993_v58 }
 0x67d   : > { %v7761_v19 = vpop.eup %7760  ;;  %7776 = vpow2.f32 %v5145_v1  ;;  %v5161_v22 = vmul.f32 1.442695, %v5071_v6 }
 0x67e   : > { %v12032_v38 = vpop.eup %7762  ;;  %v5175_v48 = vmul.f32 0.6931472, %v7761_v19  ;;  %v12056_v63 = vpop.f32.mrb[74].mxu1 }
 0x67f   : > { %v12039_v62 = vpop.eup %7764  ;;  %v5389_v11 = vadd.f32 1.0, %v12032_v38  ;;  %v12062_v19 = vpop.f32.mrb[75].mxu1 }
 0x680   : > { %v5181_v28 = vsel %vm12041_vm4, %v5178_v50, %v5175_v48  ;;  %v5191_v27 = vadd.f32 1.0, %v12039_v62  ;;  %v5250_v48 = vmul.f32 %v11971_v60, %v5249_v35  ;;  %v12068_v56 = vpop.f32.mrb[78].mxu0 }
 0x681   : > { %v7767_v45 = vpop.eup %7766  ;;  %v5461_v42 = vmul.f32 0.01, %v5181_v28  ;;  %v12071_v4 = vpop.f32.mrb[79].mxu0  ;;  %v12084_v28 = vadd.f32 %v11906_v5, %v11984_v32  ;;  %v5392_v32 = vmul.f32 -0.5, %v12032_v38 }
 0x682   : > { %7778 = vlog2.f32 %v5191_v27  ;;  %v5247_v50 = vmul.f32 0.6931472, %v7767_v45  ;;  %v12073_v1 = vpop.eup %7768  ;;  %v5056_v27 = vmin.f32 %v12053_v57, 20.0  ;;  %v5323_v45 = vand.u32 2147483647, %v11993_v58  ;;  %v12077_v60 = vpop.f32.mrb[76].mxu1 }
 0x683   : > { %7780 = vpow2.f32 %v5143_v24  ;;  %v12079_v35 = vpop.eup %7770  ;;  %v5263_v44 = vadd.f32 1.0, %v12073_v1  ;;  %v5321_v24 = vadd.f32 1.0, %v5320_v52  ;;  %v12113_v53 = vmul.f32 100.0, %v12084_v28 }
 0x684   : > { %v5253_v59 = vsel %vm5252_vm5, %v5250_v48, %v5247_v50  ;;  %7782 = vlog2.f32 %v5389_v11  ;;  %v5194_v50 = vmul.f32 -0.5, %v12039_v62  ;;  %v5064_v48 = vmin.f32 %v12066_v16, 20.0  ;;  %v12088_v11 = vpop.f32.mrb[77].mxu1 }
 0x685   : > { %v5469_v51 = vmul.f32 0.01, %v5253_v59  ;;  %v7773_v61 = vpop.eup %7772  ;;  %7784 = vpow2.f32 %v5115_v13  ;;  %v12093_v59 = vsel %vm5077_vm2, %v11909_v41, %v5461_v42  ;;  %v5131_v16 = vmul.f32 1.442695, %v5056_v27 }
 0x686   : > { %14365 = vst [vmem:[#allocation15_spill] sm:$0xff] %v12093_v59  ;;  %7786 = vlog2.f32 %v5263_v44  ;;  %vm12103_vm6 = vcmp.lt.f32.partialorder %v5323_v45, 0.0004427343  ;;  %v12107_v10 = vpop.f32.mrb[78].mxu1  ;;  %v12109_v41 = vpop.eup %7774  ;;  %v5319_v42 = vmul.f32 0.6931472, %v7773_v61  ;;  %v12124_v13 = vadd.f32 %v11932_v47, %v12003_v55 }
 0x687   : > { %v12098_v52 = vsel %vm5085_vm3, %v11918_v20, %v5469_v51  ;;  %7788 = vpow2.f32 %v5161_v22  ;;  %v5322_v20 = vmul.f32 %v11993_v58, %v5321_v24  ;;  %v12117_v51 = vadd.f32 %v11906_v5, %v12021_v21  ;;  %v12119_v27 = vpop.f32.mrb[79].mxu1  ;;  %v12126_v61 = vpop.eup %7776 }
 0x688   : > { %14366 = vst [vmem:[#allocation39_spill] sm:$0xff] %v12098_v52  ;;  %v5195_v45 = vadd.f32 1.0, %v5194_v50  ;;  %v5266_v44 = vmul.f32 -0.5, %v12073_v1  ;;  %v5147_v22 = vmul.f32 1.442695, %v5064_v48  ;;  %14369 = vst [vmem:[#allocation45_spill] sm:$0xff] %v12124_v13  ;;  %7790 = vpow2.f32 %v5131_v16 }
 0x689   : > { %v5197_v58 = vand.u32 2147483647, %v12039_v62  ;;  %v5393_v21 = vadd.f32 1.0, %v5392_v32  ;;  %v5049_v24 = vmin.f32 %v12113_v53, 20.0  ;;  %v12133_v50 = vmul.f32 100.0, %v12117_v51 }
 0x68a   : > { %v5269_v48 = vand.u32 2147483647, %v12073_v1  ;;  %v5335_v55 = vadd.f32 1.0, %v12126_v61  ;;  %v5395_v59 = vand.u32 2147483647, %v12032_v38  ;;  %v5325_v7 = vsel %vm12103_vm6, %v5322_v20, %v5319_v42 }
 0x68b   : > { %v5117_v32 = vmul.f32 1.442695, %v5049_v24  ;;  %v5051_v0 = vmin.f32 %v12133_v50, 20.0  ;;  %v5196_v23 = vmul.f32 %v12039_v62, %v5195_v45  ;;  %v5267_v16 = vadd.f32 1.0, %v5266_v44 }
 0x68c   : > { %v7779_v37 = vpop.eup %7778  ;;  %7792 = vlog2.f32 %v5335_v55  ;;  %v12147_v43 = vmul.f32 100.0, %v12124_v13  ;;  %vm12149_vm10 = vcmp.lt.f32.partialorder %v5197_v58, 0.0004427343  ;;  %v5394_v42 = vmul.f32 %v12032_v38, %v5393_v21 }
 0x68d   : > { %v12138_v52 = vpop.eup %7780  ;;  %v5193_v57 = vmul.f32 0.6931472, %v7779_v37  ;;  %v5121_v20 = vmul.f32 1.442695, %v5051_v0  ;;  %v5477_v45 = vmul.f32 0.01, %v5325_v7  ;;  %7794 = vpow2.f32 %v5117_v32 }
 0x68e   : > { %v7783_v49 = vpop.eup %7782  ;;  %vm5396_vm11 = vcmp.lt.f32.partialorder %v5395_v59, 0.0004427343  ;;  %vm12158_vm12 = vcmp.lt.f32.partialorder %v5269_v48, 0.0004427343  ;;  %v14374_v13 = vmin.f32 %v12026_v26, 20.0  ;;  %v5268_v21 = vmul.f32 %v12073_v1, %v5267_v16 }
 0x68f   : > { %v5391_v6 = vmul.f32 0.6931472, %v7783_v49  ;;  %v12154_v24 = vpop.eup %7784  ;;  %v5199_v62 = vsel %vm12149_vm10, %v5196_v23, %v5193_v57  ;;  %7796 = vpow2.f32 %v5121_v20  ;;  %v5072_v7 = vmin.f32 %v12147_v43, 20.0 }
 0x690   : > { %v7787_v44 = vpop.eup %7786  ;;  %v5159_v49 = vmul.f32 1.442695, %v14374_v13  ;;  %v5463_v23 = vmul.f32 0.01, %v5199_v62  ;;  %v5338_v57 = vmul.f32 -0.5, %v12126_v61  ;;  %v12172_v48 = vadd.f32 %v11906_v5, %v11987_v30 }
 0x691   : > { %v5397_v58 = vsel %vm5396_vm11, %v5394_v42, %v5391_v6  ;;  %v12164_v38 = vpop.eup %7788  ;;  %v5265_v0 = vmul.f32 0.6931472, %v7787_v44  ;;  %v12179_v32 = vsel %vm5093_vm7, %v11927_v40, %v5477_v45  ;;  %7798 = vpow2.f32 %v5147_v22 }
 0x692   : > { %v5485_v37 = vmul.f32 0.01, %v5397_v58  ;;  %v5407_v59 = vadd.f32 1.0, %v12164_v38  ;;  %v12190_v30 = vadd.f32 %v11906_v5, %v12028_v8  ;;  %v12192_v42 = vpop.eup %7790  ;;  %v5341_v40 = vand.u32 2147483647, %v12126_v61 }
 0x693   : > { %v5271_v13 = vsel %vm12158_vm12, %v5268_v21, %v5265_v0  ;;  %v5163_v39 = vmul.f32 1.442695, %v5072_v7  ;;  %v12197_v22 = vadd.f32 %v11914_v25, %v12005_v36  ;;  %v12206_v18 = vsel %vm5079_vm0, %v11945_v14, %v5463_v23 }
 0x694   : > { %v12184_v1 = vsel %vm5101_vm9, %v11936_v15, %v5485_v37  ;;  %v5471_v16 = vmul.f32 0.01, %v5271_v13  ;;  %7800 = vlog2.f32 %v5407_v59  ;;  %14375 = vst [vmem:[#allocation37_spill] sm:$0xff] %v12190_v30  ;;  %v12201_v15 = vadd.f32 %v11914_v25, %v12056_v63 }
 0x695   : > { %v5339_v8 = vadd.f32 1.0, %v5338_v57  ;;  %v12214_v20 = vmul.f32 100.0, %v12172_v48  ;;  %v5410_v63 = vmul.f32 -0.5, %v12164_v38  ;;  %v12220_v45 = vmul.f32 100.0, %v12197_v22 }
 0x696   : > { %v12211_v5 = vsel %vm5087_vm1, %v11965_v33, %v5471_v16  ;;  %v7793_v36 = vpop.eup %7792  ;;  %v12223_v14 = vmul.f32 100.0, %v12201_v15  ;;  %7802 = vpow2.f32 %v5159_v49  ;;  %vm12227_vm13 = vcmp.lt.f32.partialorder %v5341_v40, 0.0004427343 }
 0x697   : > { %v5337_v3 = vmul.f32 0.6931472, %v7793_v36  ;;  %v12225_v33 = vpop.eup %7794  ;;  %7804 = vpow2.f32 %v5163_v39  ;;  %v5057_v44 = vmin.f32 %v12220_v45, 20.0  ;;  %v12234_v55 = vadd.f32 %v11914_v25, %v12011_v12 }
 0x698   : > { %v5340_v0 = vmul.f32 %v12126_v61, %v5339_v8  ;;  %v5209_v21 = vadd.f32 1.0, %v12225_v33  ;;  %v5050_v49 = vmin.f32 %v12214_v20, 20.0  ;;  %v5059_v37 = vmin.f32 %v12223_v14, 20.0 }
 0x699   : > { %14378 = vst [vmem:[#allocation20_spill] sm:$0xff] %v12234_v55  ;;  %v12236_v58 = vpop.eup %7796  ;;  %v5411_v7 = vadd.f32 1.0, %v5410_v63  ;;  %v5413_v23 = vand.u32 2147483647, %v12164_v38  ;;  %v12245_v59 = vmul.f32 100.0, %v12190_v30  ;;  %v12251_v61 = vadd.f32 %v11923_v31, %v12030_v34 }
 0x69a   : > { %v5227_v57 = vadd.f32 1.0, %v12236_v58  ;;  %v5343_v12 = vsel %vm12227_vm13, %v5340_v0, %v5337_v3  ;;  %7806 = vlog2.f32 %v5209_v21  ;;  %v5133_v13 = vmul.f32 1.442695, %v5057_v44 }
 0x69b   : > { %14379 = vst [vmem:[#allocation19_spill] sm:$0xff] %v12245_v59  ;;  %v12253_v16 = vpop.eup %7798  ;;  %v12256_v40 = vmul.f32 100.0, %v12234_v55  ;;  %v12260_v39 = vadd.f32 %v11914_v25, %v12062_v19  ;;  %v5137_v36 = vmul.f32 1.442695, %v5059_v37  ;;  %v5479_v63 = vmul.f32 0.01, %v5343_v12 }
 0x69c   : > { %7808 = vlog2.f32 %v5227_v57  ;;  %v5412_v3 = vmul.f32 %v12164_v38, %v5411_v7  ;;  %v5052_v9 = vmin.f32 %v12245_v59, 20.0  ;;  %vm5414_vm2 = vcmp.lt.f32.partialorder %v5413_v23, 0.0004427343 }
 0x69d   : > { %14380 = vst [vmem:[#allocation16_spill] sm:$0xff] %v12260_v39  ;;  %7810 = vpow2.f32 %v5133_v13  ;;  %v5119_v44 = vmul.f32 1.442695, %v5050_v49  ;;  %v12267_v0 = vmul.f32 100.0, %v12251_v61  ;;  %v5058_v19 = vmin.f32 %v12256_v40, 20.0 }
 0x69e   : > { %v7801_v8 = vpop.eup %7800  ;;  %7812 = vpow2.f32 %v5137_v36  ;;  %v12271_v21 = vmul.f32 100.0, %v12260_v39  ;;  %v12275_v37 = vadd.f32 %v11923_v31, %v12077_v60  ;;  %v5212_v7 = vmul.f32 -0.5, %v12225_v33 }
 0x69f   : > { %v5409_v34 = vmul.f32 0.6931472, %v7801_v8  ;;  %v5065_v49 = vmin.f32 %v12267_v0, 20.0  ;;  %v12283_v23 = vadd.f32 %v11923_v31, %v12058_v46  ;;  %v12290_v13 = vsel %vm5095_vm14, %v11991_v2, %v5479_v63 }
 0x6a0   : > { %14381 = vst [vmem:[#allocation17_spill] sm:$0xff] %v12271_v21  ;;  %v12277_v57 = vpop.eup %7802  ;;  %v5230_v60 = vmul.f32 -0.5, %v12236_v58  ;;  %v5123_v8 = vmul.f32 1.442695, %v5052_v9  ;;  %v12294_v36 = vmul.f32 100.0, %v12275_v37  ;;  %v12307_v2 = vadd.f32 %v11932_v47, %v12068_v56 }
 0x6a1   : > { %v5415_v25 = vsel %vm5414_vm2, %v5412_v3, %v5409_v34  ;;  %14382 = vst [vmem:[#allocation44_spill] sm:$0xff] %v12283_v23  ;;  %v12285_v12 = vpop.eup %7804  ;;  %v5149_v46 = vmul.f32 1.442695, %v5065_v49  ;;  %v12303_v3 = vadd.f32 %v11923_v31, %v12088_v11  ;;  %v5135_v63 = vmul.f32 1.442695, %v5058_v19 }
 0x6a2   : > { %v5487_v38 = vmul.f32 0.01, %v5415_v25  ;;  %v5060_v9 = vmin.f32 %v12271_v21, 20.0  ;;  %v5067_v25 = vmin.f32 %v12294_v36, 20.0  ;;  %v12317_v31 = vmul.f32 100.0, %v12307_v2 }
 0x6a3   : > { %14383 = vst [vmem:[#allocation30_spill] sm:$0xff] %v12303_v3  ;;  %7814 = vpow2.f32 %v5149_v46  ;;  %v5215_v56 = vand.u32 2147483647, %v12225_v33  ;;  %v5233_v6 = vand.u32 2147483647, %v12236_v58  ;;  %v12322_v62 = vmul.f32 100.0, %v12303_v3 }
 0x6a4   : > { %v12299_v34 = vsel %vm5103_vm15, %v12015_v17, %v5487_v38  ;;  %v7807_v29 = vpop.eup %7806  ;;  %v5213_v17 = vadd.f32 1.0, %v5212_v7  ;;  %v12314_v38 = vmul.f32 100.0, %v12283_v23  ;;  %7816 = vpow2.f32 %v5119_v44 }
 0x6a5   : > { %v5153_v49 = vmul.f32 1.442695, %v5067_v25  ;;  %v5211_v19 = vmul.f32 0.6931472, %v7807_v29  ;;  %7818 = vpow2.f32 %v5123_v8  ;;  %14385 = vst [vmem:[#allocation18_spill] sm:$0xff] %v12322_v62  ;;  %v5231_v7 = vadd.f32 1.0, %v5230_v60 }
 0x6a6   : > { %14384 = vst [vmem:[#allocation21_spill] sm:$0xff] %v12314_v38  ;;  %v7809_v11 = vpop.eup %7808  ;;  %7820 = vpow2.f32 %v5135_v63  ;;  %v5139_v23 = vmul.f32 1.442695, %v5060_v9  ;;  %v5214_v30 = vmul.f32 %v12225_v33, %v5213_v17  ;;  %v5066_v44 = vmin.f32 %v12314_v38, 20.0 }
 0x6a7   : > { %v7811_v54 = vpop.eup %7810  ;;  %7822 = vpow2.f32 %v5153_v49  ;;  %v5073_v25 = vmin.f32 %v12317_v31, 20.0  ;;  %vm5081_vm3 = vcmp.gt.f32.partialorder %v12113_v53, 20.0  ;;  %vm12330_vm4 = vcmp.lt.f32.partialorder %v5215_v56, 0.0004427343 }
 0x6a8   : > { %v5281_v46 = vadd.f32 1.0, %v7811_v54  ;;  %v12324_v39 = vpop.eup %7812  ;;  %v5229_v29 = vmul.f32 0.6931472, %v7809_v11  ;;  %v12336_v60 = vadd.f32 %v11932_v47, %v12107_v10  ;;  %v5217_v33 = vsel %vm12330_vm4, %v5214_v30, %v5211_v19 }
 0x6a9   : > { %v5284_v63 = vmul.f32 -0.5, %v7811_v54  ;;  %v5299_v9 = vadd.f32 1.0, %v12324_v39  ;;  %v5068_v17 = vmin.f32 %v12322_v62, 20.0  ;;  %v5232_v49 = vmul.f32 %v12236_v58, %v5231_v7 }
 0x6aa   : > { %7824 = vlog2.f32 %v5281_v46  ;;  %vm12343_vm5 = vcmp.lt.f32.partialorder %v5233_v6, 0.0004427343  ;;  %v12349_v11 = vadd.f32 %v11932_v47, %v12071_v4  ;;  %vm5083_vm6 = vcmp.gt.f32.partialorder %v12133_v50, 20.0 }
 0x6ab   : > { %7826 = vpow2.f32 %v5139_v23  ;;  %v5287_v10 = vand.u32 2147483647, %v7811_v54  ;;  %v5151_v30 = vmul.f32 1.442695, %v5066_v44  ;;  %v5165_v19 = vmul.f32 1.442695, %v5073_v25 }
 0x6ac   : > { %14390 = vst [vmem:[#allocation23_spill] sm:$0xff] %v12349_v11  ;;  %7828 = vlog2.f32 %v5299_v9  ;;  %v5465_v46 = vmul.f32 0.01, %v5217_v33  ;;  %v5235_v8 = vsel %vm12343_vm5, %v5232_v49, %v5229_v29  ;;  %v12355_v6 = vmul.f32 100.0, %v12336_v60 }
 0x6ad   : > { %v12359_v58 = vadd.f32 %v11932_v47, %v12119_v27  ;;  %v7815_v23 = vpop.eup %7814  ;;  %v5285_v4 = vadd.f32 1.0, %v5284_v63  ;;  %v5155_v7 = vmul.f32 1.442695, %v5068_v17  ;;  %7830 = vpow2.f32 %v5165_v19 }
 0x6ae   : > { %v5182_v3 = vadd.f32 1.0, %v12079_v35  ;;  %v12362_v9 = vpop.eup %7816  ;;  %v5302_v44 = vmul.f32 -0.5, %v12324_v39  ;;  %v5353_v25 = vadd.f32 1.0, %v7815_v23  ;;  %v5075_v29 = vmin.f32 %v12355_v6, 20.0 }
 0x6af   : > { %14391 = vst [vmem:[#allocation38_spill] sm:$0xff] %v12359_v58  ;;  %v12367_v33 = vmul.f32 100.0, %v12349_v11  ;;  %v12369_v49 = vpop.eup %7818  ;;  %v5467_v47 = vmul.f32 0.01, %v5235_v8  ;;  %vm5089_vm7 = vcmp.gt.f32.partialorder %v12220_v45, 20.0  ;;  %v5356_v63 = vmul.f32 -0.5, %v7815_v23 }
 0x6b0   : > { %vm12372_vm9 = vcmp.lt.f32.partialorder %v5287_v10, 0.0004427343  ;;  %7832 = vpow2.f32 %v5151_v30  ;;  %v12376_v17 = vpop.eup %7820  ;;  %v5305_v56 = vand.u32 2147483647, %v12324_v39  ;;  %v5169_v19 = vmul.f32 1.442695, %v5075_v29 }
 0x6b1   : > { %14392 = vst [vmem:[#allocation25_spill] sm:$0xff] %v12367_v33  ;;  %7834 = vlog2.f32 %v5353_v25  ;;  %v12380_v62 = vmul.f32 100.0, %v12359_v58  ;;  %v12382_v11 = vpop.eup %7822  ;;  %v12387_v10 = vsel %vm5081_vm3, %v12084_v28, %v5465_v46  ;;  %v5286_v8 = vmul.f32 %v7811_v54, %v5285_v4 }
 0x6b2   : > { %v5359_v38 = vand.u32 2147483647, %v7815_v23  ;;  %7836 = vlog2.f32 %v5182_v3  ;;  %vm5091_vm0 = vcmp.gt.f32.partialorder %v12223_v14, 20.0  ;;  %v5303_v21 = vadd.f32 1.0, %v5302_v44  ;;  %v14404_v14 = vld [vmem:[#allocation36_spill] sm:$0xff] }
 0x6b3   : > { %14395 = vst [vmem:[#allocation31_spill] sm:$0xff] %v12380_v62  ;;  %v5371_v25 = vadd.f32 1.0, %v12382_v11  ;;  %7838 = vpow2.f32 %v5155_v7  ;;  %v5074_v29 = vmin.f32 %v12367_v33, 20.0  ;;  %v5357_v59 = vadd.f32 1.0, %v5356_v63 }
 0x6b4   : > { %v7825_v30 = vpop.eup %7824  ;;  %7840 = vpow2.f32 %v5169_v19  ;;  %v5185_v55 = vmul.f32 -0.5, %v12079_v35  ;;  %v12398_v28 = vsel %vm5083_vm6, %v12117_v51, %v5467_v47  ;;  %vm12400_vm1 = vcmp.lt.f32.partialorder %v5305_v56, 0.0004427343 }
 0x6b5   : > { %v5283_v58 = vmul.f32 0.6931472, %v7825_v30  ;;  %v12393_v53 = vpop.eup %7826  ;;  %14396 = vst [vmem:[#allocation41_spill] sm:$0xff] %v12398_v28  ;;  %7842 = vlog2.f32 %v5371_v25  ;;  %v5076_v54 = vmin.f32 %v12380_v62, 20.0  ;;  %vm12407_vm10 = vcmp.lt.f32.partialorder %v5359_v38, 0.0004427343 }
 0x6b6   : > { %v7829_v46 = vpop.eup %7828  ;;  %v5374_v44 = vmul.f32 -0.5, %v12382_v11  ;;  %v5254_v51 = vadd.f32 1.0, %v12109_v41  ;;  %v5304_v63 = vmul.f32 %v12324_v39, %v5303_v21  ;;  %v5167_v56 = vmul.f32 1.442695, %v5074_v29 }
 0x6b7   : > { %v5289_v4 = vsel %vm12372_vm9, %v5286_v8, %v5283_v58  ;;  %v5301_v47 = vmul.f32 0.6931472, %v7829_v46  ;;  %v7831_v19 = vpop.eup %7830  ;;  %v5358_v30 = vmul.f32 %v7815_v23, %v5357_v59  ;;  %v5377_v25 = vand.u32 2147483647, %v12382_v11 }
 0x6b8   : > { %v5473_v50 = vmul.f32 0.01, %v5289_v4  ;;  %v5186_v62 = vadd.f32 1.0, %v5185_v55  ;;  %7844 = vlog2.f32 %v5254_v51  ;;  %v5425_v27 = vadd.f32 1.0, %v7831_v19 }
 0x6b9   : > { %v5307_v58 = vsel %vm12400_vm1, %v5304_v63, %v5301_v47  ;;  %v12422_v8 = vmul.f32 1.442695, %v5076_v54  ;;  %v5375_v21 = vadd.f32 1.0, %v5374_v44  ;;  %v5188_v55 = vand.u32 2147483647, %v12079_v35 }
 0x6ba   : > { %v12418_v38 = vsel %vm5089_vm7, %v12197_v22, %v5473_v50  ;;  %v12424_v46 = vpop.eup %7832  ;;  %v5475_v39 = vmul.f32 0.01, %v5307_v58  ;;  %7846 = vlog2.f32 %v5425_v27  ;;  %v5428_v45 = vmul.f32 -0.5, %v7831_v19 }
 0x6bb   : > { %v7835_v23 = vpop.eup %7834  ;;  %v5257_v22 = vmul.f32 -0.5, %v12109_v41  ;;  %v5200_v29 = vadd.f32 1.0, %v12154_v24  ;;  %vm5097_vm11 = vcmp.gt.f32.partialorder %v12267_v0, 20.0  ;;  %vm12437_vm12 = vcmp.lt.f32.partialorder %v5377_v25, 0.0004427343 }
 0x6bc   : > { %v7837_v3 = vpop.eup %7836  ;;  %v12434_v54 = vsel %vm5091_vm0, %v12201_v15, %v5475_v39  ;;  %v5355_v4 = vmul.f32 0.6931472, %v7835_v23  ;;  %v5187_v51 = vmul.f32 %v12079_v35, %v5186_v62  ;;  %v5260_v58 = vand.u32 2147483647, %v12109_v41  ;;  %v14405_v23 = vld [vmem:[#allocation11_spill] sm:$0xff] }
 0x6bd   : > { %14401 = vst [vmem:[#allocation32_spill] sm:$0xff] %v12434_v54  ;;  %v12442_v50 = vpop.eup %7838  ;;  %v5184_v63 = vmul.f32 0.6931472, %v7837_v3  ;;  %7848 = vlog2.f32 %v5200_v29  ;;  %vm5078_vm13 = vcmp.gt.f32.partialorder %v14404_v14, 20.0  ;;  %v5431_v27 = vand.u32 2147483647, %v7831_v19 }
 0x6be   : > { %v12447_v15 = vpop.eup %7840  ;;  %v5361_v25 = vsel %vm12407_vm10, %v5358_v30, %v5355_v4  ;;  %v5203_v39 = vmul.f32 -0.5, %v12154_v24  ;;  %v5272_v35 = vadd.f32 1.0, %v12192_v42  ;;  %vm5086_vm14 = vcmp.gt.f32.partialorder %v14405_v23, 20.0  ;;  %v14417_v14 = vld [vmem:[#allocation24_spill] sm:$0xff] }
 0x6bf   : > { %v7843_v62 = vpop.eup %7842  ;;  %v5429_v47 = vadd.f32 1.0, %v5428_v45  ;;  %v5443_v3 = vadd.f32 1.0, %v12447_v15  ;;  %vm12456_vm15 = vcmp.lt.f32.partialorder %v5188_v55, 0.0004427343  ;;  %v5258_v59 = vadd.f32 1.0, %v5257_v22  ;;  %v14428_v55 = vld [vmem:[#allocation42_spill] sm:$0xff] }
 0x6c0   : > { %v5373_v33 = vmul.f32 0.6931472, %v7843_v62  ;;  %7850 = vpow2.f32 %v5167_v56  ;;  %v5190_v7 = vsel %vm12456_vm15, %v5187_v51, %v5184_v63  ;;  %v5206_v30 = vand.u32 2147483647, %v12154_v24 }
 0x6c1   : > { %v5481_v4 = vmul.f32 0.01, %v5361_v25  ;;  %v5376_v28 = vmul.f32 %v12382_v11, %v5375_v21  ;;  %7852 = vlog2.f32 %v5443_v3  ;;  %v5446_v45 = vmul.f32 -0.5, %v12447_v15  ;;  %v14414_v3 = vld [vmem:[#allocation28_spill] sm:$0xff] }
 0x6c2   : > { %v7845_v54 = vpop.eup %7844  ;;  %vm5105_vm2 = vcmp.gt.f32.partialorder %v12317_v31, 20.0  ;;  %vm12466_vm3 = vcmp.lt.f32.partialorder %v5431_v27, 0.0004427343  ;;  %vm12470_vm4 = vcmp.lt.f32.partialorder %v5260_v58, 0.0004427343  ;;  %v5204_v22 = vadd.f32 1.0, %v5203_v39 }
 0x6c3   : > { %7854 = vlog2.f32 %v5272_v35  ;;  %vm5099_vm5 = vcmp.gt.f32.partialorder %v12294_v36, 20.0  ;;  %v5430_v51 = vmul.f32 %v7831_v19, %v5429_v47  ;;  %v5256_v11 = vmul.f32 0.6931472, %v7845_v54 }
 0x6c4   : > { %v5259_v21 = vmul.f32 %v12109_v41, %v5258_v59  ;;  %v5462_v63 = vmul.f32 0.01, %v5190_v7  ;;  %v5379_v25 = vsel %vm12437_vm12, %v5376_v28, %v5373_v33  ;;  %v5449_v27 = vand.u32 2147483647, %v12447_v15  ;;  %v7847_v39 = vpop.eup %7846  ;;  %v14415_v7 = vld [vmem:[#allocation13_spill] sm:$0xff] }
 0x6c5   : > { %vm12479_vm6 = vcmp.lt.f32.partialorder %v5206_v30, 0.0004427343  ;;  %v5326_v58 = vadd.f32 1.0, %v12138_v52  ;;  %v12487_v19 = vsel %vm5097_vm11, %v12251_v61, %v5481_v4  ;;  %v5447_v54 = vadd.f32 1.0, %v5446_v45  ;;  %v14416_v4 = vld [vmem:[#allocation43_spill] sm:$0xff] }
 0x6c6   : > { %v5262_v41 = vsel %vm12470_vm4, %v5259_v21, %v5256_v11  ;;  %v5275_v33 = vmul.f32 -0.5, %v12192_v42  ;;  %v5427_v28 = vmul.f32 0.6931472, %v7847_v39  ;;  %v5205_v44 = vmul.f32 %v12154_v24, %v5204_v22 }
 0x6c7   : > { %v5470_v59 = vmul.f32 0.01, %v5262_v41  ;;  %7856 = vlog2.f32 %v5326_v58  ;;  %v7849_v47 = vpop.eup %7848  ;;  %v5483_v35 = vmul.f32 0.01, %v5379_v25  ;;  %v5494_v29 = vsel %vm5078_vm13, %v14414_v3, %v5462_v63 }
 0x6c8   : > { %v5329_v61 = vmul.f32 -0.5, %v12138_v52  ;;  %v5398_v0 = vadd.f32 1.0, %v12277_v57  ;;  %vm5080_vm7 = vcmp.gt.f32.partialorder %v14415_v7, 20.0  ;;  %v5433_v30 = vsel %vm12466_vm3, %v5430_v51, %v5427_v28 }
 0x6c9   : > { %vm5107_vm9 = vcmp.gt.f32.partialorder %v12355_v6, 20.0  ;;  %v5502_v24 = vsel %vm5086_vm14, %v14416_v4, %v5470_v59  ;;  %v5202_v45 = vmul.f32 0.6931472, %v7849_v47  ;;  %v5278_v56 = vand.u32 2147483647, %v12192_v42 }
 0x6ca   : > { %vm5088_vm0 = vcmp.gt.f32.partialorder %v14417_v14, 20.0  ;;  %v5489_v22 = vmul.f32 0.01, %v5433_v30  ;;  %v7098_v11 = vpack.c.bf16 %v5502_v24, %v5494_v29  ;;  %v5276_v21 = vadd.f32 1.0, %v5275_v33  ;;  %v12507_v63 = vpop.eup %7850 }
 0x6cb   : > { %7858 = vlog2.f32 %v5398_v0  ;;  %vm12509_vm1 = vcmp.lt.f32.partialorder %v5449_v27, 0.0004427343  ;;  %v5208_v51 = vsel %vm12479_vm6, %v5205_v44, %v5202_v45  ;;  %v5332_v23 = vand.u32 2147483647, %v12138_v52  ;;  %v7853_v58 = vpop.eup %7852  ;;  %v14427_v45 = vld [vmem:[#allocation33_spill] sm:$0xff] }
 0x6cc   : > { %v5344_v25 = vadd.f32 1.0, %v12253_v16  ;;  %v12520_v39 = vsel %vm5105_vm2, %v12307_v2, %v5489_v22  ;;  %v5448_v41 = vmul.f32 %v12447_v15, %v5447_v54  ;;  %7099 = vmatprep.subr.bf16.mxu0 %v7098_v11  ;;  %v5330_v27 = vadd.f32 1.0, %v5329_v61  ;;  %v14422_v2 = vld [vmem:[#allocation39_spill] sm:$0xff] }
 0x6cd   : > { %v5401_v33 = vmul.f32 -0.5, %v12277_v57  ;;  %v7855_v28 = vpop.eup %7854  ;;  %v12527_v62 = vsel %vm5099_vm5, %v12275_v37, %v5483_v35  ;;  %v7120_v59 = vpack.c.bf16 %v12520_v39, %v12487_v19  ;;  %v5445_v44 = vmul.f32 0.6931472, %v7853_v58  ;;  %v14423_v15 = vld [vmem:[#allocation15_spill] sm:$0xff]  ;;  %v14429_v58 = vld [vmem:[#allocation14_spill] sm:$0xff]  ;;  %v12770_v19 = vpop.permute.xlu0 %5535 }
 0x6ce   : > { %vm12531_vm10 = vcmp.lt.f32.partialorder %v5278_v56, 0.0004427343  ;;  %v14424_v54 = vpack.c.bf16 %v14422_v2, %v14423_v15  ;;  %v5274_v47 = vmul.f32 0.6931472, %v7855_v28  ;;  %v5277_v3 = vmul.f32 %v12192_v42, %v5276_v21 }
 0x6cf   : > { %v5464_v29 = vmul.f32 0.01, %v5208_v51  ;;  %7860 = vlog2.f32 %v5344_v25  ;;  %v5451_v37 = vsel %vm12509_vm1, %v5448_v41, %v5445_v44  ;;  %vm12541_vm11 = vcmp.lt.f32.partialorder %v5332_v23, 0.0004427343 }
 0x6d0   : > { %7101 = vmatpush1.bf16.msra.mxu0 %v14424_v54  ;;  %v5347_v35 = vmul.f32 -0.5, %v12253_v16  ;;  %v5416_v61 = vadd.f32 1.0, %v12285_v12  ;;  %v5491_v0 = vmul.f32 0.01, %v5451_v37  ;;  %v5280_v30 = vsel %vm12531_vm10, %v5277_v3, %v5274_v47  ;;  %v14433_v37 = vld [vmem:[#allocation26_spill] sm:$0xff] }
 0x6d1   : > { %v5331_v4 = vmul.f32 %v12138_v52, %v5330_v27  ;;  %v5402_v42 = vadd.f32 1.0, %v5401_v33  ;;  %v7857_v24 = vpop.eup %7856  ;;  %vm5094_vm12 = vcmp.gt.f32.partialorder %v14427_v45, 20.0  ;;  %vm5102_vm13 = vcmp.gt.f32.partialorder %v12026_v26, 20.0 }
 0x6d2   : > { %v5472_v56 = vmul.f32 0.01, %v5280_v30  ;;  %v5404_v22 = vand.u32 2147483647, %v12277_v57  ;;  %7862 = vlog2.f32 %v5416_v61  ;;  %v5218_v11 = vadd.f32 1.0, %v12362_v9 }
 0x6d3   : > { %v12557_v21 = vsel %vm5107_vm9, %v12336_v60, %v5491_v0  ;;  %v5496_v52 = vsel %vm5080_vm7, %v14428_v55, %v5464_v29  ;;  %v5328_v51 = vmul.f32 0.6931472, %v7857_v24  ;;  %v5350_v23 = vand.u32 2147483647, %v12253_v16 }
 0x6d4   : > { %v7128_v25 = vpack.c.bf16 %v12557_v21, %v12527_v62  ;;  %v5504_v41 = vsel %vm5088_vm0, %v14429_v58, %v5472_v56  ;;  %v5348_v27 = vadd.f32 1.0, %v5347_v35  ;;  %7864 = vlog2.f32 %v5218_v11 }
 0x6d5   : > { %v7859_v33 = vpop.eup %7858  ;;  %7866 = vpow2.f32 %v12422_v8  ;;  %v7106_v60 = vpack.c.bf16 %v5504_v41, %v5496_v52  ;;  %v5334_v6 = vsel %vm12541_vm11, %v5331_v4, %v5328_v51  ;;  %v5419_v7 = vmul.f32 -0.5, %v12285_v12 }
 0x6d6   : > { %v5400_v28 = vmul.f32 0.6931472, %v7859_v33  ;;  %v5403_v44 = vmul.f32 %v12277_v57, %v5402_v42  ;;  %v5221_v31 = vmul.f32 -0.5, %v12362_v9  ;;  %v5290_v2 = vadd.f32 1.0, %v12376_v17  ;;  %v14435_v42 = vld [vmem:[#allocation12_spill] sm:$0xff] }
 0x6d7   : > { %7107 = vmatprep.subr.bf16.mxu1 %v7106_v60  ;;  %vm5405_vm14 = vcmp.lt.f32.partialorder %v5404_v22, 0.0004427343  ;;  %v5478_v14 = vmul.f32 0.01, %v5334_v6  ;;  %v5293_v15 = vmul.f32 -0.5, %v12376_v17  ;;  %v5236_v8 = vadd.f32 1.0, %v12369_v49 }
 0x6d8   : > { %v14430_v54 = vpack.c.bf16 %v12211_v5, %v12206_v18  ;;  %v5406_v47 = vsel %vm5405_vm14, %v5403_v44, %v5400_v28  ;;  %v5349_v3 = vmul.f32 %v12253_v16, %v5348_v27  ;;  %vm12581_vm15 = vcmp.lt.f32.partialorder %v5350_v23, 0.0004427343  ;;  %v14434_v16 = vld [vmem:[#allocation34_spill] sm:$0xff]  ;;  %v12608_v27 = vld [vmem:[%s13636_s12] sm:$0xff] }
 0x6d9   : > { %7868 = vlog2.f32 %v5290_v2  ;;  %v7861_v29 = vpop.eup %7860  ;;  %vm5096_vm2 = vcmp.gt.f32.partialorder %v14433_v37, 20.0  ;;  %v5486_v36 = vmul.f32 0.01, %v5406_v47  ;;  %v5420_v35 = vadd.f32 1.0, %v5419_v7 }
 0x6da   : > { %7109 = vmatpush1.bf16.msra.mxu1 %v14430_v54  ;;  %v5422_v61 = vand.u32 2147483647, %v12285_v12  ;;  %7870 = vlog2.f32 %v5236_v8  ;;  %v5346_v0 = vmul.f32 0.6931472, %v7861_v29  ;;  %v5222_v30 = vadd.f32 1.0, %v5221_v31  ;;  %v14444_v29 = vld [vmem:[#allocation45_spill] sm:$0xff] }
 0x6db   : > { %v5224_v18 = vand.u32 2147483647, %v12362_v9  ;;  %v5308_v5 = vadd.f32 1.0, %v12393_v53  ;;  %v5510_v4 = vsel %vm5094_vm12, %v14434_v16, %v5478_v14  ;;  %v5518_v24 = vsel %vm5102_vm13, %v14435_v42, %v5486_v36  ;;  %v12701_v31 = vld [vmem:[%s13636_s12 + $0x18] sm:$0xff] }
 0x6dc   : > { %v5294_v56 = vadd.f32 1.0, %v5293_v15  ;;  %v5296_v22 = vand.u32 2147483647, %v12376_v17  ;;  %v7863_v11 = vpop.eup %7862  ;;  %v7102_v55 = vpack.c.bf16 %v5518_v24, %v5510_v4  ;;  %v5352_v52 = vsel %vm12581_vm15, %v5349_v3, %v5346_v0  ;;  %v14443_v3 = vld [vmem:[#allocation29_spill] sm:$0xff] }
 0x6dd   : > { %v5239_v51 = vmul.f32 -0.5, %v12369_v49  ;;  %7872 = vlog2.f32 %v5308_v5  ;;  %vm5104_vm3 = vcmp.gt.f32.partialorder %v12147_v43, 20.0  ;;  %v5418_v23 = vmul.f32 0.6931472, %v7863_v11 }
 0x6de   : > { %v5421_v45 = vmul.f32 %v12285_v12, %v5420_v35  ;;  %vm12601_vm4 = vcmp.lt.f32.partialorder %v5422_v61, 0.0004427343  ;;  %v7865_v26 = vpop.eup %7864  ;;  %7103 = vmatprep.subr.bf16.mxu0 %v7102_v55  ;;  %v5480_v41 = vmul.f32 0.01, %v5352_v52  ;;  %v5223_v33 = vmul.f32 %v12362_v9, %v5222_v30  ;;  %v14453_v9 = vld [vmem:[#allocation17_spill] sm:$0xff] }
 0x6df   : > { %v5311_v60 = vmul.f32 -0.5, %v12393_v53  ;;  %v5362_v6 = vadd.f32 1.0, %v12424_v46  ;;  %v12613_v7 = vpop.eup %7866  ;;  %vm5082_vm5 = vcmp.gt.f32.partialorder %v12214_v20, 20.0  ;;  %vm5090_vm6 = vcmp.gt.f32.partialorder %v12256_v40, 20.0 }
 0x6e0   : > { %v5424_v12 = vsel %vm12601_vm4, %v5421_v45, %v5418_v23  ;;  %v14438_v28 = vpack.c.bf16 %v12184_v1, %v12179_v32  ;;  %v5220_v44 = vmul.f32 0.6931472, %v7865_v26  ;;  %vm12622_vm7 = vcmp.lt.f32.partialorder %v5224_v18, 0.0004427343  ;;  %v12649_v18 = vld [vmem:[%s13636_s12 + $0x8] sm:$0xff] }
 0x6e1   : > { %vm12626_vm9 = vcmp.lt.f32.partialorder %v5296_v22, 0.0004427343  ;;  %v5488_v2 = vmul.f32 0.01, %v5424_v12  ;;  %v5295_v14 = vmul.f32 %v12376_v17, %v5294_v56  ;;  %v5240_v15 = vadd.f32 1.0, %v5239_v51 }
 0x6e2   : > { %7105 = vmatpush1.bf16.msra.mxu0 %v14438_v28  ;;  %7874 = vlog2.f32 %v5362_v6  ;;  %v5226_v8 = vsel %vm12622_vm7, %v5223_v33, %v5220_v44  ;;  %v5242_v32 = vand.u32 2147483647, %v12369_v49  ;;  %v5314_v1 = vand.u32 2147483647, %v12393_v53  ;;  %v14451_v33 = vld [vmem:[#allocation20_spill] sm:$0xff] }
 0x6e3   : > { %v5434_v54 = vadd.f32 1.0, %v12507_v63  ;;  %v7869_v47 = vpop.eup %7868  ;;  %v5512_v57 = vsel %vm5096_vm2, %v14443_v3, %v5480_v41  ;;  %v5520_v17 = vsel %vm5104_vm3, %v14444_v29, %v5488_v2  ;;  %v5312_v36 = vadd.f32 1.0, %v5311_v60 }
 0x6e4   : > { %v5380_v35 = vadd.f32 1.0, %v12442_v50  ;;  %v7871_v61 = vpop.eup %7870  ;;  %v7110_v0 = vpack.c.bf16 %v5520_v17, %v5512_v57  ;;  %v14445_v30 = vmov 0.0   ;;  %v5292_v37 = vmul.f32 0.6931472, %v7869_v47 }
 0x6e5   : > { %6936 = vmatmul.mubr.msk.f32.vlgmr.msra.gmra.mrb[80].mxu0 %vm1490_vm8, %v12608_v27  ;;  %v5365_v5 = vmul.f32 -0.5, %v12424_v46  ;;  %7876 = vlog2.f32 %v5434_v54  ;;  %v5466_v43 = vmul.f32 0.01, %v5226_v8  ;;  %v5238_v16 = vmul.f32 0.6931472, %v7871_v61  ;;  %v14455_v54 = vld [vmem:[#allocation16_spill] sm:$0xff] }
 0x6e6   : > { %5635 = vmatprep.mubr.f32.mxu0 %v14445_v30  ;;  %v5241_v4 = vmul.f32 %v12369_v49, %v5240_v15  ;;  %7878 = vlog2.f32 %v5380_v35  ;;  %7111 = vmatprep.subr.bf16.mxu1 %v7110_v0  ;;  %v5298_v42 = vsel %vm12626_vm9, %v5295_v14, %v5292_v37  ;;  %vm12655_vm0 = vcmp.lt.f32.partialorder %v5242_v32, 0.0004427343  ;;  %v14454_v32 = vld [vmem:[#allocation37_spill] sm:$0xff] }
 0x6e7   : > { %vm12659_vm1 = vcmp.lt.f32.partialorder %v5314_v1, 0.0004427343  ;;  %v5368_v22 = vand.u32 2147483647, %v12424_v46  ;;  %v7873_v11 = vpop.eup %7872  ;;  %v14450_v55 = vpack.c.bf16 %v12299_v34, %v12290_v13  ;;  %v5474_v49 = vmul.f32 0.01, %v5298_v42 }
 0x6e8   : > { %v5244_v52 = vsel %vm12655_vm0, %v5241_v4, %v5238_v16  ;;  %v5437_v51 = vmul.f32 -0.5, %v12507_v63  ;;  %v5452_v23 = vadd.f32 1.0, %v12613_v7  ;;  %v5310_v45 = vmul.f32 0.6931472, %v7873_v11  ;;  %v12678_v13 = vld [vmem:[%s13636_s12 + $0x10] sm:$0xff]  ;;  %v14462_v11 = vld [vmem:[#allocation44_spill] sm:$0xff] }
 0x6e9   : > { %7113 = vmatpush1.bf16.msra.mxu1 %v14450_v55  ;;  %6937 = vmatmul.mubr.msk.f32.gmra.mrb[82].mxu0 %vm1490_vm8, %v12649_v18  ;;  %v5313_v58 = vmul.f32 %v12393_v53, %v5312_v36  ;;  %v5366_v34 = vadd.f32 1.0, %v5365_v5  ;;  %v5383_v26 = vmul.f32 -0.5, %v12442_v50  ;;  %v5498_v41 = vsel %vm5082_vm5, %v12172_v48, %v5466_v43  ;;  %v14452_v53 = vld [vmem:[#allocation19_spill] sm:$0xff]  ;;  %v14457_v5 = vld [vmem:[#allocation32_spill] sm:$0xff]  ;;  %v14458_v43 = vld [vmem:[#allocation41_spill] sm:$0xff] }
 0x6ea   : > { %5641 = vmatprep.mubr.f32.mxu0 %v14445_v30  ;;  %v5506_v60 = vsel %vm5090_vm6, %v14451_v33, %v5474_v49  ;;  %v5468_v6 = vmul.f32 0.01, %v5244_v52  ;;  %7880 = vlog2.f32 %v5452_v23  ;;  %vm5084_vm10 = vcmp.gt.f32.partialorder %v14452_v53, 20.0  ;;  %v14463_v49 = vld [vmem:[#allocation23_spill] sm:$0xff] }
 0x6eb   : > { %v7114_v12 = vpack.c.bf16 %v5506_v60, %v5498_v41  ;;  %v5316_v28 = vsel %vm12659_vm1, %v5313_v58, %v5310_v45  ;;  %vm5092_vm11 = vcmp.gt.f32.partialorder %v14453_v9, 20.0  ;;  %v5438_v20 = vadd.f32 1.0, %v5437_v51  ;;  %v14464_v41 = vld [vmem:[#allocation18_spill] sm:$0xff]  ;;  %v14465_v33 = vld [vmem:[#allocation31_spill] sm:$0xff] }
 0x6ec   : > { %6940 = vmatmul.mubr.msk.f32.vlgmr.msra.gmra.mrb[80].mxu1 %vm1490_vm8, %v12608_v27  ;;  %v7875_v44 = vpop.eup %7874  ;;  %v5476_v48 = vmul.f32 0.01, %v5316_v28  ;;  %v5440_v40 = vand.u32 2147483647, %v12507_v63  ;;  %v5367_v14 = vmul.f32 %v12424_v46, %v5366_v34  ;;  %v5384_v15 = vadd.f32 1.0, %v5383_v26 }
 0x6ed   : > { %5724 = vmatprep.mubr.f32.mxu1 %v14445_v30  ;;  %6938 = vmatmul.mubr.msk.f32.gmra.mrb[84].mxu0 %vm1490_vm8, %v12678_v13  ;;  %v5364_v2 = vmul.f32 0.6931472, %v7875_v44  ;;  %v5455_v8 = vmul.f32 -0.5, %v12613_v7  ;;  %v5500_v1 = vsel %vm5084_vm10, %v14454_v32, %v5468_v6  ;;  %v14456_v3 = vpack.c.bf16 %v12418_v38, %v12387_v10  ;;  %v14467_v6 = vld [vmem:[#allocation38_spill] sm:$0xff] }
 0x6ee   : > { %7115 = vmatprep.subr.bf16.mxu0 %v7114_v12  ;;  %5647 = vmatprep.mubr.f32.mxu0 %v14445_v30  ;;  %v5508_v47 = vsel %vm5092_vm11, %v14455_v54, %v5476_v48  ;;  %vm5369_vm12 = vcmp.lt.f32.partialorder %v5368_v22, 0.0004427343  ;;  %v5386_v57 = vand.u32 2147483647, %v12442_v50  ;;  %v5439_v61 = vmul.f32 %v12507_v63, %v5438_v20  ;;  %v14460_v22 = vld [vmem:[#allocation21_spill] sm:$0xff] }
 0x6ef   : > { %7117 = vmatpush1.bf16.msra.mxu0 %v14456_v3  ;;  %v7877_v29 = vpop.eup %7876  ;;  %v7122_v46 = vpack.c.bf16 %v5508_v47, %v5500_v1  ;;  %v5370_v17 = vsel %vm5369_vm12, %v5367_v14, %v5364_v2  ;;  %vm5441_vm13 = vcmp.lt.f32.partialorder %v5440_v40, 0.0004427343  ;;  %v5385_v0 = vmul.f32 %v12442_v50, %v5384_v15  ;;  %v14461_v50 = vld [vmem:[#allocation25_spill] sm:$0xff] }
 0x6f0   : > { %6941 = vmatmul.mubr.msk.f32.gmra.mrb[82].mxu1 %vm1490_vm8, %v12649_v18  ;;  %v7879_v36 = vpop.eup %7878  ;;  %v5436_v35 = vmul.f32 0.6931472, %v7877_v29  ;;  %v5482_v10 = vmul.f32 0.01, %v5370_v17  ;;  %v5456_v37 = vadd.f32 1.0, %v5455_v8  ;;  %v14459_v16 = vpack.c.bf16 %v14457_v5, %v14458_v43  ;;  %v12794_v8 = vpop.permute.xlu0 %5545 }
 0x6f1   : > { %5730 = vmatprep.mubr.f32.mxu1 %v14445_v30  ;;  %6939 = vmatmul.mubr.msk.f32.gmra.mrb[86].mxu0 %vm1490_vm8, %v12701_v31  ;;  %v5382_v38 = vmul.f32 0.6931472, %v7879_v36  ;;  %vm5387_vm14 = vcmp.lt.f32.partialorder %v5386_v57, 0.0004427343  ;;  %v5458_v42 = vand.u32 2147483647, %v12613_v7 }
 0x6f2   : > { %7123 = vmatprep.subr.bf16.mxu1 %v7122_v46  ;;  %5807 = vmatprep.mubr.f32.mxu0 %v14445_v30  ;;  %v5442_v4 = vsel %vm5441_vm13, %v5439_v61, %v5436_v35  ;;  %vm5098_vm15 = vcmp.gt.f32.partialorder %v14460_v22, 20.0  ;;  %vm5106_vm2 = vcmp.gt.f32.partialorder %v14461_v50, 20.0  ;;  %v5457_v23 = vmul.f32 %v12613_v7, %v5456_v37  ;;  %v14466_v7 = vld [vmem:[#allocation30_spill] sm:$0xff] }
 0x6f3   : > { %7125 = vmatpush1.bf16.msra.mxu1 %v14459_v16  ;;  %v5490_v63 = vmul.f32 0.01, %v5442_v4  ;;  %v5388_v24 = vsel %vm5387_vm14, %v5385_v0, %v5382_v38  ;;  %v5514_v55 = vsel %vm5098_vm15, %v14462_v11, %v5482_v10  ;;  %vm5459_vm3 = vcmp.lt.f32.partialorder %v5458_v42, 0.0004427343 }
 0x6f4   : > { %6942 = vmatmul.mubr.msk.f32.gmra.mrb[84].mxu1 %vm1490_vm8, %v12678_v13  ;;  %v7881_v56 = vpop.eup %7880  ;;  %v5484_v58 = vmul.f32 0.01, %v5388_v24  ;;  %vm5100_vm4 = vcmp.gt.f32.partialorder %v14464_v41, 20.0  ;;  %vm5108_vm5 = vcmp.gt.f32.partialorder %v14465_v33, 20.0 }
 0x6f5   : > { %5736 = vmatprep.mubr.f32.mxu1 %v14445_v30  ;;  %v5522_v52 = vsel %vm5106_vm2, %v14463_v49, %v5490_v63  ;;  %v5454_v51 = vmul.f32 0.6931472, %v7881_v56 }
 0x6f6   : > { %v7118_v45 = vpack.c.bf16 %v5522_v52, %v5514_v55  ;;  %v5516_v60 = vsel %vm5100_vm4, %v14466_v7, %v5484_v58 }
 0x6f7   : > { %v5460_v34 = vsel %vm5459_vm3, %v5457_v23, %v5454_v51 }
 0x6f8   : > { %6943 = vmatmul.mubr.msk.f32.gmra.mrb[86].mxu1 %vm1490_vm8, %v12701_v31  ;;  %7119 = vmatprep.subr.bf16.mxu0 %v7118_v45  ;;  %v5492_v26 = vmul.f32 0.01, %v5460_v34 }
 0x6f9   : > { %5896 = vmatprep.mubr.f32.mxu1 %v14445_v30  ;;  %7121 = vmatpush1.bf16.msra.mxu0 %v7120_v59 }
 0x6fa   : > { %v5524_v53 = vsel %vm5108_vm5, %v14467_v6, %v5492_v26 }
 0x6fb   : > { %v7126_v12 = vpack.c.bf16 %v5524_v53, %v5516_v60 }
 0x6fc   : > { %6944 = vmatmul.mubr.msk.f32.vlgmr.msra.gmra.mrb[88].mxu0 %vm1490_vm8, %v12608_v27 }
 0x6fd   : > { %7127 = vmatprep.subr.bf16.mxu1 %v7126_v12  ;;  %5813 = vmatprep.mubr.f32.mxu0 %v14445_v30 }
 0x6fe   : > { %7129 = vmatpush1.bf16.msra.mxu1 %v7128_v25  ;;  %v12778_v25 = vpop.permute.xlu1 %5540 }
 0x700   : > { %6945 = vmatmul.mubr.msk.f32.gmra.mrb[90].mxu0 %vm1490_vm8, %v12649_v18 }
 0x701   : > { %6948 = vmatmul.mubr.msk.f32.vlgmr.msra.gmra.mrb[88].mxu1 %vm1490_vm8, %v12608_v27  ;;  %5819 = vmatprep.mubr.f32.mxu0 %v14445_v30 }
 0x702   : > { %5902 = vmatprep.mubr.f32.mxu1 %v14445_v30  ;;  %v12817_v38 = vpop.permute.xlu1 %5550 }
 0x704   : > { %6946 = vmatmul.mubr.msk.f32.gmra.mrb[92].mxu0 %vm1490_vm8, %v12678_v13 }
 0x705   : > { %6949 = vmatmul.mubr.msk.f32.gmra.mrb[90].mxu1 %vm1490_vm8, %v12649_v18  ;;  %5825 = vmatprep.mubr.f32.mxu0 %v14445_v30 }
 0x706   : > { %5908 = vmatprep.mubr.f32.mxu1 %v14445_v30 }
 0x708   : > { %6947 = vmatmul.mubr.msk.f32.gmra.mrb[94].mxu0 %vm1490_vm8, %v12701_v31 }
 0x709   : > { %6950 = vmatmul.mubr.msk.f32.gmra.mrb[92].mxu1 %vm1490_vm8, %v12678_v13  ;;  %6507 = vmatprep.mubr.f32.mxu0 %v14445_v30 }
 0x70a   : > { %5914 = vmatprep.mubr.f32.mxu1 %v14445_v30 }
 0x70d   : > { %6951 = vmatmul.mubr.msk.f32.gmra.mrb[94].mxu1 %vm1490_vm8, %v12701_v31 }
 0x70e   : > { %6578 = vmatprep.mubr.f32.mxu1 %v14445_v30 }
 0x7b8   : > { %v5631_v39 = vpop.f32.mrb[80].mxu0 }
 0x7b9   : > { %v12773_v62 = vadd.f32 %v5631_v39, %v12770_v19  ;;  %v5633_v59 = vpop.f32.mrb[81].mxu0 }
 0x7ba   : > { %v12791_v2 = vadd.f32 %v5633_v59, %v12770_v19 }
 0x7bb   : > { %v12776_v21 = vmul.f32 100.0, %v12773_v62 }
 0x7bc   : > { %v5637_v27 = vpop.f32.mrb[82].mxu0  ;;  %14468 = vst [vmem:[#allocation22_spill] sm:$0xff] %v12791_v2  ;;  %v12807_v17 = vmul.f32 100.0, %v12791_v2 }
 0x7bd   : > { %v5953_v18 = vmin.f32 %v12776_v21, 20.0  ;;  %v12782_v13 = vadd.f32 %v5637_v27, %v12778_v25  ;;  %v5639_v28 = vpop.f32.mrb[83].mxu0  ;;  %vm5985_vm6 = vcmp.gt.f32.partialorder %v12776_v21, 20.0 }
 0x7be   : > { %v12820_v0 = vadd.f32 %v5639_v28, %v12778_v25  ;;  %v5954_v42 = vmin.f32 %v12807_v17, 20.0 }
 0x7bf   : > { %v6017_v44 = vmul.f32 1.442695, %v5953_v18  ;;  %v5720_v9 = vpop.f32.mrb[80].mxu1  ;;  %v12785_v48 = vmul.f32 100.0, %v12782_v13 }
 0x7c0   : > { %v12788_v20 = vadd.f32 %v5720_v9, %v12770_v19  ;;  %v5722_v40 = vpop.f32.mrb[81].mxu1  ;;  %v5643_v31 = vpop.f32.mrb[84].mxu0  ;;  %14469 = vst [vmem:[#allocation35_spill] sm:$0xff] %v12820_v0  ;;  %v12837_v50 = vmul.f32 100.0, %v12820_v0  ;;  %v6019_v45 = vmul.f32 1.442695, %v5954_v42 }
 0x7c1   : > { %7882 = vpow2.f32 %v6017_v44  ;;  %v5961_v14 = vmin.f32 %v12785_v48, 20.0  ;;  %v5645_v15 = vpop.f32.mrb[85].mxu0  ;;  %v12800_v47 = vadd.f32 %v5643_v31, %v12794_v8  ;;  %v12834_v22 = vadd.f32 %v5722_v40, %v12770_v19 }
 0x7c2   : > { %v12797_v32 = vmul.f32 100.0, %v12788_v20  ;;  %v12858_v33 = vadd.f32 %v5645_v15, %v12794_v8  ;;  %v5962_v60 = vmin.f32 %v12837_v50, 20.0  ;;  %vm5993_vm9 = vcmp.gt.f32.partialorder %v12785_v48, 20.0 }
 0x7c3   : > { %v6033_v1 = vmul.f32 1.442695, %v5961_v14  ;;  %v5726_v54 = vpop.f32.mrb[82].mxu1  ;;  %v12815_v10 = vmul.f32 100.0, %v12800_v47  ;;  %14470 = vst [vmem:[#allocation40_spill] sm:$0xff] %v12834_v22  ;;  %v12854_v26 = vmul.f32 100.0, %v12834_v22 }
 0x7c4   : > { %v5955_v3 = vmin.f32 %v12797_v32, 20.0  ;;  %v12804_v57 = vadd.f32 %v5726_v54, %v12778_v25  ;;  %v5728_v29 = vpop.f32.mrb[83].mxu1  ;;  %v5649_v46 = vpop.f32.mrb[86].mxu0  ;;  %14472 = vst [vmem:[#allocation36_spill] sm:$0xff] %v12858_v33  ;;  %v12876_v9 = vmul.f32 100.0, %v12858_v33  ;;  %vm5987_vm1 = vcmp.gt.f32.partialorder %v12797_v32, 20.0 }
 0x7c5   : > { %7884 = vpow2.f32 %v6033_v1  ;;  %v12809_v36 = vpop.f32.mrb[87].mxu0  ;;  %v5969_v43 = vmin.f32 %v12815_v10, 20.0  ;;  %v12825_v4 = vadd.f32 %v5649_v46, %v12817_v38  ;;  %v12841_v52 = vadd.f32 %v5728_v29, %v12778_v25 }
 0x7c6   : > { %v6021_v35 = vmul.f32 1.442695, %v5955_v3  ;;  %v12812_v61 = vmul.f32 100.0, %v12804_v57  ;;  %v5956_v44 = vmin.f32 %v12854_v26, 20.0  ;;  %14474 = vst [vmem:[#allocation28_spill] sm:$0xff] %v12876_v9  ;;  %vm6001_vm13 = vcmp.gt.f32.partialorder %v12815_v10, 20.0 }
 0x7c7   : > { %v5732_v37 = vpop.f32.mrb[84].mxu1  ;;  %v6049_v11 = vmul.f32 1.442695, %v5969_v43  ;;  %14471 = vst [vmem:[#allocation27_spill] sm:$0xff] %v12841_v52  ;;  %v12844_v51 = vmul.f32 100.0, %v12825_v4  ;;  %v12863_v6 = vmul.f32 100.0, %v12841_v52 }
 0x7c8   : > { %7886 = vpow2.f32 %v6021_v35  ;;  %v5963_v5 = vmin.f32 %v12812_v61, 20.0  ;;  %v5734_v16 = vpop.f32.mrb[85].mxu1  ;;  %v12829_v24 = vadd.f32 %v5732_v37, %v12794_v8  ;;  %v6035_v40 = vmul.f32 1.442695, %v5962_v60 }
 0x7c9   : > { %14473 = vst [vmem:[#allocation11_spill] sm:$0xff] %v12863_v6  ;;  %v5977_v53 = vmin.f32 %v12844_v51, 20.0  ;;  %v5964_v31 = vmin.f32 %v12863_v6, 20.0  ;;  %vm5995_vm10 = vcmp.gt.f32.partialorder %v12812_v61, 20.0  ;;  %vm6009_vm15 = vcmp.gt.f32.partialorder %v12844_v51, 20.0 }
 0x7ca   : > { %v6037_v63 = vmul.f32 1.442695, %v5963_v5  ;;  %v12849_v58 = vmul.f32 100.0, %v12829_v24  ;;  %v12893_v5 = vadd.f32 %v5734_v16, %v12794_v8 }
 0x7cb   : > { %v12831_v56 = vpop.eup %7882  ;;  %v5738_v55 = vpop.f32.mrb[86].mxu1  ;;  %v6065_v14 = vmul.f32 1.442695, %v5977_v53 }
 0x7cc   : > { %v6081_v49 = vadd.f32 1.0, %v12831_v56  ;;  %7888 = vpow2.f32 %v6037_v63  ;;  %v12846_v23 = vpop.f32.mrb[87].mxu1  ;;  %v5971_v41 = vmin.f32 %v12849_v58, 20.0  ;;  %v6084_v39 = vmul.f32 -0.5, %v12831_v56  ;;  %14475 = vst [vmem:[#allocation13_spill] sm:$0xff] %v12893_v5 }
 0x7cd   : > { %v12880_v15 = vadd.f32 %v5738_v55, %v12817_v38  ;;  %v6087_v37 = vand.u32 2147483647, %v12831_v56  ;;  %vm6003_vm5 = vcmp.gt.f32.partialorder %v12849_v58, 20.0 }
 0x7ce   : > { %7890 = vlog2.f32 %v6081_v49  ;;  %v6053_v59 = vmul.f32 1.442695, %v5971_v41  ;;  %v6085_v54 = vadd.f32 1.0, %v6084_v39  ;;  %v5970_v49 = vmin.f32 %v12876_v9, 20.0 }
 0x7cf   : > { %v12851_v34 = vpop.eup %7884  ;;  %7892 = vpow2.f32 %v6049_v11  ;;  %v12866_v12 = vpop.f32.mrb[88].mxu0  ;;  %v12896_v43 = vmul.f32 100.0, %v12880_v15  ;;  %v6023_v11 = vmul.f32 1.442695, %v5956_v44  ;;  %vm12913_vm7 = vcmp.lt.f32.partialorder %v6087_v37, 0.0004427343 }
 0x7d0   : > { %v6153_v7 = vadd.f32 1.0, %v12851_v34  ;;  %7894 = vpow2.f32 %v6019_v45  ;;  %v12869_v27 = vpop.f32.mrb[89].mxu0  ;;  %v6156_v3 = vmul.f32 -0.5, %v12851_v34  ;;  %v6159_v41 = vand.u32 2147483647, %v12851_v34 }
 0x7d1   : > { %v5979_v16 = vmin.f32 %v12896_v43, 20.0 }
 0x7d2   : > { %v12871_v18 = vpop.eup %7886  ;;  %7896 = vlog2.f32 %v6153_v7  ;;  %v6039_v7 = vmul.f32 1.442695, %v5964_v31  ;;  %v12919_v31 = vmul.f32 100.0, %v12893_v5  ;;  %vm12930_vm0 = vcmp.lt.f32.partialorder %v6159_v41, 0.0004427343 }
 0x7d3   : > { %v6099_v28 = vadd.f32 1.0, %v12871_v18  ;;  %7898 = vpow2.f32 %v6053_v59  ;;  %v12882_v1 = vpop.f32.mrb[90].mxu0  ;;  %v6102_v63 = vmul.f32 -0.5, %v12871_v18  ;;  %v6086_v59 = vmul.f32 %v12831_v56, %v6085_v54 }
 0x7d4   : > { %v12885_v29 = vpop.f32.mrb[88].mxu1  ;;  %v12887_v46 = vpop.f32.mrb[91].mxu0  ;;  %14478 = vst [vmem:[#allocation43_spill] sm:$0xff] %v12919_v31  ;;  %v6069_v30 = vmul.f32 1.442695, %v5979_v16  ;;  %v5972_v9 = vmin.f32 %v12919_v31, 20.0 }
 0x7d5   : > { %7900 = vlog2.f32 %v6099_v28  ;;  %v12898_v42 = vpop.f32.mrb[89].mxu1  ;;  %v6157_v28 = vadd.f32 1.0, %v6156_v3  ;;  %v6103_v56 = vadd.f32 1.0, %v6102_v63  ;;  %v6051_v5 = vmul.f32 1.442695, %v5970_v49 }
 0x7d6   : > { %v12889_v35 = vpop.eup %7888  ;;  %7902 = vpow2.f32 %v6065_v14  ;;  %v6105_v63 = vand.u32 2147483647, %v12871_v18  ;;  %v12989_v31 = vmul.f32 1.442695, %v5972_v9 }
 0x7d7   : > { %v6171_v55 = vadd.f32 1.0, %v12889_v35  ;;  %7904 = vpow2.f32 %v6035_v40  ;;  %v12905_v60 = vpop.f32.mrb[92].mxu0  ;;  %v6174_v16 = vmul.f32 -0.5, %v12889_v35  ;;  %v6104_v2 = vmul.f32 %v12871_v18, %v6103_v56 }
 0x7d8   : > { %v7891_v45 = vpop.eup %7890  ;;  %v12911_v44 = vpop.f32.mrb[90].mxu1  ;;  %vm12965_vm11 = vcmp.lt.f32.partialorder %v6105_v63, 0.0004427343 }
 0x7d9   : > { %v12907_v53 = vpop.eup %7892  ;;  %v6083_v39 = vmul.f32 0.6931472, %v7891_v45  ;;  %7906 = vlog2.f32 %v6171_v55  ;;  %v12926_v54 = vpop.f32.mrb[91].mxu1  ;;  %v6175_v18 = vadd.f32 1.0, %v6174_v16 }
 0x7da   : > { %v6225_v40 = vadd.f32 1.0, %v12907_v53  ;;  %v12921_v33 = vpop.eup %7894  ;;  %7908 = vpow2.f32 %v6023_v11  ;;  %v12928_v3 = vpop.f32.mrb[93].mxu0  ;;  %v6228_v56 = vmul.f32 -0.5, %v12907_v53 }
 0x7db   : > { %v6089_v45 = vsel %vm12913_vm7, %v6086_v59, %v6083_v39  ;;  %v12935_v52 = vpop.f32.mrb[94].mxu0  ;;  %v6158_v59 = vmul.f32 %v12851_v34, %v6157_v28  ;;  %v12958_v34 = vadd.f32 %v12866_v12, %v12770_v19  ;;  %v6176_v48 = vmul.f32 %v12889_v35, %v6175_v18 }
 0x7dc   : > { %v7897_v37 = vpop.eup %7896  ;;  %7910 = vlog2.f32 %v6225_v40  ;;  %v12941_v14 = vpop.f32.mrb[92].mxu1  ;;  %v6369_v41 = vmul.f32 0.01, %v6089_v45 }
 0x7dd   : > { %v12937_v39 = vpop.eup %7898  ;;  %v6155_v11 = vmul.f32 0.6931472, %v7897_v37  ;;  %7912 = vpow2.f32 %v6069_v30  ;;  %v12945_v40 = vpop.f32.mrb[93].mxu1  ;;  %v12954_v30 = vadd.f32 %v12809_v36, %v12817_v38  ;;  %v6177_v36 = vand.u32 2147483647, %v12889_v35 }
 0x7de   : > { %7914 = vpow2.f32 %v6039_v7  ;;  %v6243_v22 = vadd.f32 1.0, %v12937_v39  ;;  %v12947_v49 = vpop.f32.mrb[95].mxu0  ;;  %v6246_v35 = vmul.f32 -0.5, %v12937_v39 }
 0x7df   : > { %v7901_v0 = vpop.eup %7900  ;;  %v6161_v37 = vsel %vm12930_vm0, %v6158_v59, %v6155_v11  ;;  %14481 = vst [vmem:[#allocation24_spill] sm:$0xff] %v12954_v30  ;;  %vm6178_vm12 = vcmp.lt.f32.partialorder %v6177_v36, 0.0004427343  ;;  %v13012_v36 = vadd.f32 %v12846_v23, %v12817_v38 }
 0x7e0   : > { %v12960_v7 = vpop.eup %7902  ;;  %v6101_v28 = vmul.f32 0.6931472, %v7901_v0  ;;  %v6377_v45 = vmul.f32 0.01, %v6161_v37  ;;  %7916 = vlog2.f32 %v6243_v22  ;;  %v12976_v0 = vsel %vm5985_vm6, %v12773_v62, %v6369_v41  ;;  %v12985_v59 = vpop.f32.mrb[94].mxu1 }
 0x7e1   : > { %v6297_v12 = vadd.f32 1.0, %v12960_v7  ;;  %v12971_v11 = vpop.eup %7904  ;;  %14484 = vst [vmem:[#allocation39_spill] sm:$0xff] %v12976_v0  ;;  %7918 = vpow2.f32 %v6051_v5  ;;  %v12992_v62 = vmul.f32 100.0, %v12954_v30  ;;  %v12994_v21 = vpop.f32.mrb[95].mxu1  ;;  %v12998_v5 = vmul.f32 100.0, %v12958_v34  ;;  %14486 = vst [vmem:[#allocation33_spill] sm:$0xff] %v13012_v36 }
 0x7e2   : > { %v6107_v16 = vsel %vm12965_vm11, %v6104_v2, %v6101_v28  ;;  %v12983_v63 = vsel %vm5993_vm9, %v12782_v13, %v6377_v45  ;;  %v6229_v13 = vadd.f32 1.0, %v6228_v56  ;;  %v6300_v9 = vmul.f32 -0.5, %v12960_v7 }
 0x7e3   : > { %14485 = vst [vmem:[#allocation15_spill] sm:$0xff] %v12983_v63  ;;  %v7907_v22 = vpop.eup %7906  ;;  %7920 = vlog2.f32 %v6297_v12  ;;  %v6371_v28 = vmul.f32 0.01, %v6107_v16  ;;  %v13005_v45 = vadd.f32 %v12885_v29, %v12770_v19  ;;  %v5957_v18 = vmin.f32 %v12998_v5, 20.0 }
 0x7e4   : > { %v6173_v2 = vmul.f32 0.6931472, %v7907_v22  ;;  %v13000_v41 = vpop.eup %7908  ;;  %v6231_v22 = vand.u32 2147483647, %v12907_v53  ;;  %v5978_v0 = vmin.f32 %v12992_v62, 20.0  ;;  %v6247_v32 = vadd.f32 1.0, %v6246_v35 }
 0x7e5   : > { %v13015_v16 = vmul.f32 100.0, %v13005_v45  ;;  %v6025_v63 = vmul.f32 1.442695, %v5957_v18  ;;  %v6303_v61 = vand.u32 2147483647, %v12960_v7  ;;  %vm6011_vm6 = vcmp.gt.f32.partialorder %v12896_v43, 20.0 }
 0x7e6   : > { %v7911_v55 = vpop.eup %7910  ;;  %v6179_v12 = vsel %vm6178_vm12, %v6176_v48, %v6173_v2  ;;  %v6230_v2 = vmul.f32 %v12907_v53, %v6229_v13  ;;  %vm13035_vm14 = vcmp.lt.f32.partialorder %v6231_v22, 0.0004427343  ;;  %v6067_v18 = vmul.f32 1.442695, %v5978_v0 }
 0x7e7   : > { %v7913_v56 = vpop.eup %7912  ;;  %v6379_v37 = vmul.f32 0.01, %v6179_v12  ;;  %v6227_v30 = vmul.f32 0.6931472, %v7911_v55  ;;  %v13024_v12 = vsel %vm5987_vm1, %v12788_v20, %v6371_v28  ;;  %v6301_v55 = vadd.f32 1.0, %v6300_v9 }
 0x7e8   : > { %v13017_v29 = vpop.eup %7914  ;;  %v6315_v48 = vadd.f32 1.0, %v7913_v56  ;;  %v5959_v6 = vmin.f32 %v13015_v16, 20.0  ;;  %v6249_v9 = vand.u32 2147483647, %v12937_v39  ;;  %v6318_v22 = vmul.f32 -0.5, %v7913_v56 }
 0x7e9   : > { %v13029_v23 = vsel %vm5995_vm10, %v12804_v57, %v6379_v37  ;;  %v6233_v57 = vsel %vm13035_vm14, %v6230_v2, %v6227_v30  ;;  %v13047_v53 = vmul.f32 100.0, %v13012_v36  ;;  %v13052_v30 = vadd.f32 %v12869_v27, %v12770_v19 }
 0x7ea   : > { %7922 = vlog2.f32 %v6315_v48  ;;  %v7917_v20 = vpop.eup %7916  ;;  %v6029_v37 = vmul.f32 1.442695, %v5959_v6  ;;  %v6302_v48 = vmul.f32 %v12960_v7, %v6301_v55  ;;  %v13056_v6 = vadd.f32 %v12882_v1, %v12778_v25 }
 0x7eb   : > { %7924 = vpow2.f32 %v6025_v63  ;;  %v13043_v28 = vpop.eup %7918  ;;  %14489 = vst [vmem:[#allocation42_spill] sm:$0xff] %v13047_v53  ;;  %14490 = vst [vmem:[#allocation14_spill] sm:$0xff] %v13052_v30  ;;  %v6385_v63 = vmul.f32 0.01, %v6233_v57  ;;  %v6245_v2 = vmul.f32 0.6931472, %v7917_v20  ;;  %v13060_v0 = vadd.f32 %v12911_v44, %v12778_v25 }
 0x7ec   : > { %7926 = vpow2.f32 %v6029_v37  ;;  %v6248_v36 = vmul.f32 %v12937_v39, %v6247_v32  ;;  %vm6304_vm2 = vcmp.lt.f32.partialorder %v6303_v61, 0.0004427343  ;;  %v13065_v7 = vadd.f32 %v12898_v42, %v12770_v19 }
 0x7ed   : > { %v7921_v35 = vpop.eup %7920  ;;  %v13068_v27 = vmul.f32 100.0, %v13056_v6  ;;  %v6319_v1 = vadd.f32 1.0, %v6318_v22  ;;  %v6321_v37 = vand.u32 2147483647, %v7913_v56  ;;  %v13071_v20 = vmul.f32 100.0, %v13060_v0 }
 0x7ee   : > { %v6299_v13 = vmul.f32 0.6931472, %v7921_v35  ;;  %14491 = vst [vmem:[#allocation26_spill] sm:$0xff] %v13065_v7  ;;  %vm13073_vm3 = vcmp.lt.f32.partialorder %v6249_v9, 0.0004427343  ;;  %v13078_v39 = vmul.f32 100.0, %v13052_v30  ;;  %v13084_v42 = vsel %vm6001_vm13, %v12800_v47, %v6385_v63 }
 0x7ef   : > { %v5965_v19 = vmin.f32 %v13068_v27, 20.0  ;;  %14495 = vst [vmem:[#allocation12_spill] sm:$0xff] %v13084_v42  ;;  %v6251_v32 = vsel %vm13073_vm3, %v6248_v36, %v6245_v2  ;;  %v5980_v61 = vmin.f32 %v13047_v53, 20.0  ;;  %v5967_v9 = vmin.f32 %v13071_v20, 20.0 }
 0x7f0   : > { %v6305_v55 = vsel %vm6304_vm2, %v6302_v48, %v6299_v13  ;;  %14494 = vst [vmem:[#allocation34_spill] sm:$0xff] %v13078_v39  ;;  %v13096_v35 = vmul.f32 100.0, %v13065_v7  ;;  %v13100_v47 = vadd.f32 %v12905_v60, %v12794_v8  ;;  %v6320_v63 = vmul.f32 %v7913_v56, %v6319_v1 }
 0x7f1   : > { %v6393_v44 = vmul.f32 0.01, %v6305_v55  ;;  %v6041_v48 = vmul.f32 1.442695, %v5965_v19  ;;  %vm13104_vm4 = vcmp.lt.f32.partialorder %v6321_v37, 0.0004427343  ;;  %v13113_v60 = vadd.f32 %v12887_v46, %v12778_v25 }
 0x7f2   : > { %14497 = vst [vmem:[#allocation45_spill] sm:$0xff] %v13096_v35  ;;  %v6045_v51 = vmul.f32 1.442695, %v5967_v9  ;;  %v5958_v55 = vmin.f32 %v13078_v39, 20.0  ;;  %v6387_v57 = vmul.f32 0.01, %v6251_v32  ;;  %v13129_v9 = vadd.f32 %v12926_v54, %v12778_v25 }
 0x7f3   : > { %v13093_v22 = vsel %vm6009_vm15, %v12825_v4, %v6393_v44  ;;  %7928 = vpow2.f32 %v6041_v48  ;;  %14500 = vst [vmem:[#allocation20_spill] sm:$0xff] %v13113_v60  ;;  %v13117_v56 = vmul.f32 100.0, %v13100_v47  ;;  %v5960_v19 = vmin.f32 %v13096_v35, 20.0 }
 0x7f4   : > { %14496 = vst [vmem:[#allocation29_spill] sm:$0xff] %v13093_v22  ;;  %v7923_v10 = vpop.eup %7922  ;;  %7930 = vpow2.f32 %v6045_v51  ;;  %v6071_v32 = vmul.f32 1.442695, %v5980_v61  ;;  %14501 = vst [vmem:[#allocation19_spill] sm:$0xff] %v13129_v9  ;;  %v13133_v58 = vmul.f32 100.0, %v13113_v60  ;;  %v13155_v51 = vadd.f32 %v12928_v3, %v12794_v8 }
 0x7f5   : > { %v13108_v4 = vpop.eup %7924  ;;  %v6317_v13 = vmul.f32 0.6931472, %v7923_v10  ;;  %7932 = vpow2.f32 %v12989_v31  ;;  %v6027_v10 = vmul.f32 1.442695, %v5958_v55  ;;  %v13136_v31 = vsel %vm6003_vm5, %v12829_v24, %v6387_v57 }
 0x7f6   : > { %v6117_v44 = vadd.f32 1.0, %v13108_v4  ;;  %v13119_v1 = vpop.eup %7926  ;;  %7934 = vpow2.f32 %v6067_v18  ;;  %14502 = vst [vmem:[#allocation17_spill] sm:$0xff] %v13133_v58  ;;  %14503 = vst [vmem:[#allocation37_spill] sm:$0xff] %v13136_v31  ;;  %v5973_v43 = vmin.f32 %v13117_v56, 20.0  ;;  %v6031_v54 = vmul.f32 1.442695, %v5960_v19 }
 0x7f7   : > { %v6323_v37 = vsel %vm13104_vm4, %v6320_v63, %v6317_v13  ;;  %v6135_v48 = vadd.f32 1.0, %v13119_v1  ;;  %v13145_v18 = vmul.f32 100.0, %v13129_v9  ;;  %v13149_v24 = vadd.f32 %v12941_v14, %v12794_v8  ;;  %14506 = vst [vmem:[#allocation41_spill] sm:$0xff] %v13155_v51 }
 0x7f8   : > { %v6395_v46 = vmul.f32 0.01, %v6323_v37  ;;  %7936 = vlog2.f32 %v6117_v44  ;;  %v6057_v61 = vmul.f32 1.442695, %v5973_v43  ;;  %v5966_v2 = vmin.f32 %v13133_v58, 20.0 }
 0x7f9   : > { %7938 = vlog2.f32 %v6135_v48  ;;  %14505 = vst [vmem:[#allocation32_spill] sm:$0xff] %v13145_v18  ;;  %v6123_v13 = vand.u32 2147483647, %v13108_v4  ;;  %v13159_v55 = vmul.f32 100.0, %v13149_v24  ;;  %v13165_v14 = vadd.f32 %v12945_v40, %v12794_v8 }
 0x7fa   : > { %v13139_v63 = vsel %vm6011_vm6, %v12880_v15, %v6395_v46  ;;  %7940 = vpow2.f32 %v6071_v32  ;;  %v6120_v15 = vmul.f32 -0.5, %v13108_v4  ;;  %v13169_v44 = vadd.f32 %v12935_v52, %v12817_v38 }
 0x7fb   : > { %14504 = vst [vmem:[#allocation16_spill] sm:$0xff] %v13139_v63  ;;  %7942 = vpow2.f32 %v6027_v10  ;;  %14507 = vst [vmem:[#allocation21_spill] sm:$0xff] %v13165_v14  ;;  %v6138_v3 = vmul.f32 -0.5, %v13119_v1  ;;  %v5968_v46 = vmin.f32 %v13145_v18, 20.0  ;;  %v5975_v32 = vmin.f32 %v13159_v55, 20.0 }
 0x7fc   : > { %7944 = vpow2.f32 %v6057_v61  ;;  %v6121_v10 = vadd.f32 1.0, %v6120_v15  ;;  %v6043_v40 = vmul.f32 1.442695, %v5966_v2  ;;  %v13181_v43 = vmul.f32 100.0, %v13155_v51 }
 0x7fd   : > { %v13161_v57 = vpop.eup %7928  ;;  %7946 = vpow2.f32 %v6031_v54  ;;  %vm13183_vm7 = vcmp.lt.f32.partialorder %v6123_v13, 0.0004427343  ;;  %v6141_v54 = vand.u32 2147483647, %v13119_v1  ;;  %v6061_v25 = vmul.f32 1.442695, %v5975_v32 }
 0x7fe   : > { %v13171_v37 = vpop.eup %7930  ;;  %v6189_v19 = vadd.f32 1.0, %v13161_v57  ;;  %14508 = vst [vmem:[#allocation25_spill] sm:$0xff] %v13181_v43  ;;  %v6192_v61 = vmul.f32 -0.5, %v13161_v57  ;;  %v13192_v15 = vmul.f32 100.0, %v13165_v14  ;;  %v13195_v2 = vmul.f32 100.0, %v13169_v44 }
 0x7ff   : > { %v13177_v48 = vpop.eup %7932  ;;  %v6207_v8 = vadd.f32 1.0, %v13171_v37  ;;  %v13199_v13 = vadd.f32 %v12985_v59, %v12817_v38  ;;  %v6139_v9 = vadd.f32 1.0, %v6138_v3  ;;  %v6047_v7 = vmul.f32 1.442695, %v5968_v46 }
 0x800   : > { %7948 = vlog2.f32 %v6189_v19  ;;  %v13189_v36 = vpop.eup %7934  ;;  %14511 = vst [vmem:[#allocation44_spill] sm:$0xff] %v13192_v15  ;;  %v6195_v19 = vand.u32 2147483647, %v13161_v57  ;;  %v6210_v18 = vmul.f32 -0.5, %v13171_v37  ;;  %v13206_v14 = vadd.f32 %v12947_v49, %v12817_v38 }
 0x801   : > { %7950 = vlog2.f32 %v6207_v8  ;;  %v5974_v8 = vmin.f32 %v13181_v43, 20.0  ;;  %v6122_v59 = vmul.f32 %v13108_v4, %v6121_v10  ;;  %vm13211_vm9 = vcmp.lt.f32.partialorder %v6141_v54, 0.0004427343 }
 0x802   : > { %v7937_v51 = vpop.eup %7936  ;;  %7952 = vpow2.f32 %v6061_v25  ;;  %14512 = vst [vmem:[#allocation23_spill] sm:$0xff] %v13206_v14  ;;  %v6193_v46 = vadd.f32 1.0, %v6192_v61  ;;  %v6213_v25 = vand.u32 2147483647, %v13171_v37  ;;  %v5976_v43 = vmin.f32 %v13192_v15, 20.0 }
 0x803   : > { %v7939_v32 = vpop.eup %7938  ;;  %7954 = vpow2.f32 %v6043_v40  ;;  %v6119_v40 = vmul.f32 0.6931472, %v7937_v51  ;;  %v5981_v30 = vmin.f32 %v13195_v2, 20.0  ;;  %v13221_v49 = vmul.f32 100.0, %v13199_v13 }
 0x804   : > { %v13208_v35 = vpop.eup %7940  ;;  %v6137_v63 = vmul.f32 0.6931472, %v7939_v32  ;;  %v6140_v4 = vmul.f32 %v13119_v1, %v6139_v9  ;;  %vm13224_vm0 = vcmp.lt.f32.partialorder %v6195_v19, 0.0004427343  ;;  %7956 = vpow2.f32 %v6047_v7 }
 0x805   : > { %v13216_v60 = vpop.eup %7942  ;;  %vm5989_vm1 = vcmp.gt.f32.partialorder %v12998_v5, 20.0  ;;  %vm5997_vm10 = vcmp.gt.f32.partialorder %v13068_v27, 20.0  ;;  %v6211_v51 = vadd.f32 1.0, %v6210_v18  ;;  %v6059_v15 = vmul.f32 1.442695, %v5974_v8 }
 0x806   : > { %v7945_v31 = vpop.eup %7944  ;;  %v13233_v42 = vmul.f32 100.0, %v13206_v14  ;;  %vm5991_vm11 = vcmp.gt.f32.partialorder %v13015_v16, 20.0  ;;  %vm5999_vm12 = vcmp.gt.f32.partialorder %v13071_v20, 20.0  ;;  %vm13237_vm13 = vcmp.lt.f32.partialorder %v6213_v25, 0.0004427343 }
 0x807   : > { %v13228_v54 = vpop.eup %7946  ;;  %v6261_v61 = vadd.f32 1.0, %v7945_v31  ;;  %v6073_v7 = vmul.f32 1.442695, %v5981_v30  ;;  %v5983_v9 = vmin.f32 %v13221_v49, 20.0  ;;  %v13244_v19 = vadd.f32 %v12994_v21, %v12817_v38 }
 0x808   : > { %v6125_v18 = vsel %vm13183_vm7, %v6122_v59, %v6119_v40  ;;  %v6194_v32 = vmul.f32 %v13161_v57, %v6193_v46  ;;  %v6063_v8 = vmul.f32 1.442695, %v5976_v43  ;;  %v6143_v25 = vsel %vm13211_vm9, %v6140_v4, %v6137_v63 }
 0x809   : > { %7958 = vlog2.f32 %v6261_v61  ;;  %v6264_v22 = vmul.f32 -0.5, %v7945_v31  ;;  %v6077_v30 = vmul.f32 1.442695, %v5983_v9  ;;  %v6212_v53 = vmul.f32 %v13171_v37, %v6211_v51 }
 0x80a   : > { %v7949_v14 = vpop.eup %7948  ;;  %7960 = vpow2.f32 %v6073_v7  ;;  %v5982_v38 = vmin.f32 %v13233_v42, 20.0  ;;  %v6373_v52 = vmul.f32 0.01, %v6125_v18  ;;  %v6090_v57 = vadd.f32 1.0, %v12921_v33 }
 0x80b   : > { %v7951_v58 = vpop.eup %7950  ;;  %v6191_v39 = vmul.f32 0.6931472, %v7949_v14  ;;  %7962 = vpow2.f32 %v6059_v15  ;;  %v6375_v3 = vmul.f32 0.01, %v6143_v25  ;;  %v6267_v46 = vand.u32 2147483647, %v7945_v31 }
 0x80c   : > { %v7953_v21 = vpop.eup %7952  ;;  %v6209_v59 = vmul.f32 0.6931472, %v7951_v58  ;;  %7964 = vpow2.f32 %v6077_v30  ;;  %v6265_v15 = vadd.f32 1.0, %v6264_v22  ;;  %v6075_v58 = vmul.f32 1.442695, %v5982_v38 }
 0x80d   : > { %v13254_v43 = vpop.eup %7954  ;;  %v6197_v63 = vsel %vm13224_vm0, %v6194_v32, %v6191_v39  ;;  %v6279_v40 = vadd.f32 1.0, %v7953_v21  ;;  %7966 = vpow2.f32 %v6063_v8  ;;  %v13261_v51 = vmul.f32 100.0, %v13244_v19 }
 0x80e   : > { %v6381_v14 = vmul.f32 0.01, %v6197_v63  ;;  %v6215_v37 = vsel %vm13237_vm13, %v6212_v53, %v6209_v59  ;;  %v13263_v61 = vpop.eup %7956  ;;  %v13268_v39 = vsel %vm5989_vm1, %v12958_v34, %v6373_v52  ;;  %v6282_v53 = vmul.f32 -0.5, %v7953_v21 }
 0x80f   : > { %v6383_v4 = vmul.f32 0.01, %v6215_v37  ;;  %7968 = vlog2.f32 %v6279_v40  ;;  %v13278_v22 = vsel %vm5991_vm11, %v13005_v45, %v6375_v3  ;;  %v6093_v5 = vmul.f32 -0.5, %v12921_v33 }
 0x810   : > { %v13273_v10 = vsel %vm5997_vm10, %v13056_v6, %v6381_v14  ;;  %7970 = vlog2.f32 %v6090_v57  ;;  %v6266_v27 = vmul.f32 %v7945_v31, %v6265_v15  ;;  %vm13290_vm14 = vcmp.lt.f32.partialorder %v6267_v46, 0.0004427343 }
 0x811   : > { %v7148_v1 = vpack.c.bf16 %v13273_v10, %v13268_v39  ;;  %v13285_v34 = vsel %vm5999_vm12, %v13060_v0, %v6383_v4  ;;  %v6162_v45 = vadd.f32 1.0, %v12971_v11  ;;  %v6285_v9 = vand.u32 2147483647, %v7953_v21 }
 0x812   : > { %v7156_v6 = vpack.c.bf16 %v13285_v34, %v13278_v22  ;;  %7972 = vpow2.f32 %v6075_v58  ;;  %v5984_v18 = vmin.f32 %v13261_v51, 20.0  ;;  %v6108_v0 = vadd.f32 1.0, %v13000_v41  ;;  %v14580_v34 = vld [vmem:[#allocation23_spill] sm:$0xff] }
 0x813   : > { %v7959_v16 = vpop.eup %7958  ;;  %v6283_v8 = vadd.f32 1.0, %v6282_v53  ;;  %7974 = vlog2.f32 %v6162_v45  ;;  %v6165_v25 = vmul.f32 -0.5, %v12971_v11  ;;  %v6094_v38 = vadd.f32 1.0, %v6093_v5 }
 0x814   : > { %v7961_v20 = vpop.eup %7960  ;;  %v6263_v32 = vmul.f32 0.6931472, %v7959_v16  ;;  %v6096_v52 = vand.u32 2147483647, %v12921_v33  ;;  %v6168_v59 = vand.u32 2147483647, %v12971_v11  ;;  %7976 = vlog2.f32 %v6108_v0 }
 0x815   : > { %v13298_v31 = vpop.eup %7962  ;;  %v6333_v30 = vadd.f32 1.0, %v7961_v20  ;;  %vm6005_vm15 = vcmp.gt.f32.partialorder %v13117_v56, 20.0  ;;  %v6336_v63 = vmul.f32 -0.5, %v7961_v20  ;;  %vm13307_vm2 = vcmp.lt.f32.partialorder %v6285_v9, 0.0004427343 }
 0x816   : > { %v13302_v57 = vpop.eup %7964  ;;  %v6269_v3 = vsel %vm13290_vm14, %v6266_v27, %v6263_v32  ;;  %v13311_v40 = vmul.f32 1.442695, %v5984_v18  ;;  %v6111_v14 = vmul.f32 -0.5, %v13000_v41  ;;  %v6284_v15 = vmul.f32 %v7953_v21, %v6283_v8 }
 0x817   : > { %7978 = vlog2.f32 %v6333_v30  ;;  %v13314_v37 = vpop.eup %7966  ;;  %v6339_v4 = vand.u32 2147483647, %v7961_v20  ;;  %v6351_v58 = vadd.f32 1.0, %v13302_v57  ;;  %v6166_v53 = vadd.f32 1.0, %v6165_v25 }
 0x818   : > { %v6389_v27 = vmul.f32 0.01, %v6269_v3  ;;  %v6095_v7 = vmul.f32 %v12921_v33, %v6094_v38  ;;  %vm13318_vm3 = vcmp.lt.f32.partialorder %v6096_v52, 0.0004427343  ;;  %vm13322_vm4 = vcmp.lt.f32.partialorder %v6168_v59, 0.0004427343 }
 0x819   : > { %v7969_v5 = vpop.eup %7968  ;;  %v6337_v0 = vadd.f32 1.0, %v6336_v63  ;;  %7980 = vlog2.f32 %v6351_v58  ;;  %v6354_v21 = vmul.f32 -0.5, %v13302_v57  ;;  %vm5986_vm5 = vcmp.gt.f32.partialorder %v12807_v17, 20.0 }
 0x81a   : > { %v7971_v9 = vpop.eup %7970  ;;  %v6281_v18 = vmul.f32 0.6931472, %v7969_v5  ;;  %vm5994_vm6 = vcmp.gt.f32.partialorder %v12837_v50, 20.0  ;;  %v6357_v33 = vand.u32 2147483647, %v13302_v57  ;;  %v6112_v8 = vadd.f32 1.0, %v6111_v14 }
 0x81b   : > { %v6092_v32 = vmul.f32 0.6931472, %v7971_v9  ;;  %v6180_v25 = vadd.f32 1.0, %v13017_v29  ;;  %vm13331_vm7 = vcmp.lt.f32.partialorder %v6339_v4, 0.0004427343  ;;  %v6167_v38 = vmul.f32 %v12971_v11, %v6166_v53 }
 0x81c   : > { %v6114_v52 = vand.u32 2147483647, %v13000_v41  ;;  %v6234_v59 = vadd.f32 1.0, %v13043_v28  ;;  %v13338_v3 = vpop.eup %7972  ;;  %v13343_v63 = vsel %vm6005_vm15, %v13100_v47, %v6389_v27  ;;  %vm6007_vm9 = vcmp.gt.f32.partialorder %v13159_v55, 20.0 }
 0x81d   : > { %v6098_v14 = vsel %vm13318_vm3, %v6095_v7, %v6092_v32  ;;  %7982 = vlog2.f32 %v6180_v25  ;;  %v6183_v4 = vmul.f32 -0.5, %v13017_v29  ;;  %v7975_v11 = vpop.eup %7974  ;;  %v6287_v58 = vsel %vm13307_vm2, %v6284_v15, %v6281_v18 }
 0x81e   : > { %vm6013_vm0 = vcmp.gt.f32.partialorder %v13195_v2, 20.0  ;;  %v6338_v53 = vmul.f32 %v7961_v20, %v6337_v0  ;;  %v6355_v5 = vadd.f32 1.0, %v6354_v21  ;;  %7984 = vlog2.f32 %v6234_v59  ;;  %v7977_v45 = vpop.eup %7976 }
 0x81f   : > { %vm13352_vm1 = vcmp.lt.f32.partialorder %v6357_v33, 0.0004427343  ;;  %v6164_v56 = vmul.f32 0.6931472, %v7975_v11  ;;  %v6113_v27 = vmul.f32 %v13000_v41, %v6112_v8  ;;  %v6186_v7 = vand.u32 2147483647, %v13017_v29 }
 0x820   : > { %v6370_v9 = vmul.f32 0.01, %v6098_v14  ;;  %vm13358_vm10 = vcmp.lt.f32.partialorder %v6114_v52, 0.0004427343  ;;  %v6237_v46 = vmul.f32 -0.5, %v13043_v28  ;;  %v6306_v20 = vadd.f32 1.0, %v13189_v36 }
 0x821   : > { %v7979_v15 = vpop.eup %7978  ;;  %v6391_v18 = vmul.f32 0.01, %v6287_v58  ;;  %vm6015_vm11 = vcmp.gt.f32.partialorder %v13221_v49, 20.0  ;;  %v6170_v0 = vsel %vm13322_vm4, %v6167_v38, %v6164_v56  ;;  %v6110_v41 = vmul.f32 0.6931472, %v7977_v45  ;;  %v14535_v11 = vld [vmem:[#allocation11_spill] sm:$0xff] }
 0x822   : > { %v6184_v21 = vadd.f32 1.0, %v6183_v4  ;;  %v6335_v33 = vmul.f32 0.6931472, %v7979_v15  ;;  %v6378_v8 = vmul.f32 0.01, %v6170_v0  ;;  %7986 = vlog2.f32 %v6306_v20  ;;  %v14536_v58 = vld [vmem:[#allocation22_spill] sm:$0xff] }
 0x823   : > { %v6240_v25 = vand.u32 2147483647, %v13043_v28  ;;  %vm5988_vm12 = vcmp.gt.f32.partialorder %v12854_v26, 20.0  ;;  %v6356_v52 = vmul.f32 %v13302_v57, %v6355_v5  ;;  %vm13370_vm13 = vcmp.lt.f32.partialorder %v6186_v7, 0.0004427343  ;;  %v7981_v38 = vpop.eup %7980  ;;  %v14537_v45 = vld [vmem:[#allocation35_spill] sm:$0xff] }
 0x824   : > { %v6309_v14 = vmul.f32 -0.5, %v13189_v36  ;;  %v6252_v16 = vadd.f32 1.0, %v13177_v48  ;;  %vm5996_vm14 = vcmp.gt.f32.partialorder %v14535_v11, 20.0  ;;  %v6341_v4 = vsel %vm13331_vm7, %v6338_v53, %v6335_v33  ;;  %v14541_v33 = vld [vmem:[#allocation39_spill] sm:$0xff]  ;;  %v14544_v49 = vld [vmem:[#allocation40_spill] sm:$0xff] }
 0x825   : > { %v6402_v56 = vsel %vm5986_vm5, %v14536_v58, %v6370_v9  ;;  %v6410_v57 = vsel %vm5994_vm6, %v14537_v45, %v6378_v8  ;;  %v6238_v5 = vadd.f32 1.0, %v6237_v46  ;;  %v6397_v7 = vmul.f32 0.01, %v6341_v4  ;;  %v14548_v11 = vld [vmem:[#allocation43_spill] sm:$0xff] }
 0x826   : > { %v6353_v20 = vmul.f32 0.6931472, %v7981_v38  ;;  %v7130_v15 = vpack.c.bf16 %v6410_v57, %v6402_v56  ;;  %v6116_v0 = vsel %vm13358_vm10, %v6113_v27, %v6110_v41  ;;  %v13390_v30 = vsel %vm6007_vm9, %v13149_v24, %v6391_v18 }
 0x827   : > { %v6185_v53 = vmul.f32 %v13017_v29, %v6184_v21  ;;  %vm13393_vm15 = vcmp.lt.f32.partialorder %v6240_v25, 0.0004427343  ;;  %7988 = vlog2.f32 %v6252_v16  ;;  %v7983_v50 = vpop.eup %7982  ;;  %v13400_v9 = vsel %vm6013_vm0, %v13169_v44, %v6397_v7  ;;  %v14540_v21 = vld [vmem:[#allocation15_spill] sm:$0xff]  ;;  %v14543_v44 = vld [vmem:[#allocation28_spill] sm:$0xff] }
 0x828   : > { %v6359_v27 = vsel %vm13352_vm1, %v6356_v52, %v6353_v20  ;;  %7131 = vmatprep.subr.bf16.mxu0 %v7130_v15  ;;  %v6310_v55 = vadd.f32 1.0, %v6309_v14  ;;  %v6324_v24 = vadd.f32 1.0, %v13208_v35  ;;  %v7985_v32 = vpop.eup %7984  ;;  %v7152_v29 = vpack.c.bf16 %v13400_v9, %v13343_v63 }
 0x829   : > { %v6399_v46 = vmul.f32 0.01, %v6359_v27  ;;  %v6182_v18 = vmul.f32 0.6931472, %v7983_v50  ;;  %v6372_v41 = vmul.f32 0.01, %v6116_v0  ;;  %v14542_v8 = vpack.c.bf16 %v14540_v21, %v14541_v33 }
 0x82a   : > { %vm6002_vm2 = vcmp.gt.f32.partialorder %v14543_v44, 20.0  ;;  %vm6010_vm3 = vcmp.gt.f32.partialorder %v12992_v62, 20.0  ;;  %v6236_v2 = vmul.f32 0.6931472, %v7985_v32  ;;  %v6239_v47 = vmul.f32 %v13043_v28, %v6238_v5  ;;  %v14545_v5 = vld [vmem:[#allocation27_spill] sm:$0xff] }
 0x82b   : > { %7133 = vmatpush1.bf16.msra.mxu0 %v14542_v8  ;;  %v6255_v25 = vmul.f32 -0.5, %v13177_v48  ;;  %7990 = vlog2.f32 %v6324_v24  ;;  %v13417_v52 = vsel %vm6015_vm11, %v13199_v13, %v6399_v46  ;;  %v6188_v14 = vsel %vm13370_vm13, %v6185_v53, %v6182_v18  ;;  %v14550_v8 = vld [vmem:[#allocation36_spill] sm:$0xff] }
 0x82c   : > { %v6312_v16 = vand.u32 2147483647, %v13189_v36  ;;  %v6126_v38 = vadd.f32 1.0, %v13216_v60  ;;  %v7160_v4 = vpack.c.bf16 %v13417_v52, %v13390_v30  ;;  %v6380_v58 = vmul.f32 0.01, %v6188_v14  ;;  %v7987_v45 = vpop.eup %7986 }
 0x82d   : > { %v6242_v28 = vsel %vm13393_vm15, %v6239_v47, %v6236_v2  ;;  %v6258_v56 = vand.u32 2147483647, %v13177_v48  ;;  %v6404_v13 = vsel %vm5988_vm12, %v14544_v49, %v6372_v41  ;;  %v6311_v59 = vmul.f32 %v13189_v36, %v6310_v55  ;;  %v14551_v47 = vld [vmem:[#allocation24_spill] sm:$0xff] }
 0x82e   : > { %v6327_v57 = vmul.f32 -0.5, %v13208_v35  ;;  %7992 = vlog2.f32 %v6126_v38  ;;  %v6412_v7 = vsel %vm5996_vm14, %v14545_v5, %v6380_v58  ;;  %v6308_v20 = vmul.f32 0.6931472, %v7987_v45  ;;  %v14559_v5 = vld [vmem:[#allocation29_spill] sm:$0xff] }
 0x82f   : > { %v6256_v15 = vadd.f32 1.0, %v6255_v25  ;;  %v6198_v0 = vadd.f32 1.0, %v13254_v43  ;;  %7994 = vpow2.f32 %v13311_v40  ;;  %v7138_v53 = vpack.c.bf16 %v6412_v7, %v6404_v13  ;;  %v14560_v7 = vld [vmem:[#allocation12_spill] sm:$0xff] }
 0x830   : > { %vm6313_vm4 = vcmp.lt.f32.partialorder %v6312_v16, 0.0004427343  ;;  %v6386_v17 = vmul.f32 0.01, %v6242_v28  ;;  %vm13438_vm5 = vcmp.lt.f32.partialorder %v6258_v56, 0.0004427343  ;;  %v14549_v46 = vpack.c.bf16 %v13029_v23, %v13024_v12 }
 0x831   : > { %v6314_v26 = vsel %vm6313_vm4, %v6311_v59, %v6308_v20  ;;  %v6129_v36 = vmul.f32 -0.5, %v13216_v60  ;;  %7996 = vlog2.f32 %v6198_v0  ;;  %v7989_v27 = vpop.eup %7988  ;;  %vm6004_vm6 = vcmp.gt.f32.partialorder %v14548_v11, 20.0  ;;  %7139 = vmatprep.subr.bf16.mxu1 %v7138_v53  ;;  %v14554_v28 = vld [vmem:[#allocation42_spill] sm:$0xff] }
 0x832   : > { %v6394_v55 = vmul.f32 0.01, %v6314_v26  ;;  %v6328_v24 = vadd.f32 1.0, %v6327_v57  ;;  %v6330_v32 = vand.u32 2147483647, %v13208_v35  ;;  %v6144_v40 = vadd.f32 1.0, %v13228_v54  ;;  %7141 = vmatpush1.bf16.msra.mxu1 %v14549_v46 }
 0x833   : > { %v6254_v18 = vmul.f32 0.6931472, %v7989_v27  ;;  %v6257_v41 = vmul.f32 %v13177_v48, %v6256_v15  ;;  %v6132_v21 = vand.u32 2147483647, %v13216_v60  ;;  %v6216_v33 = vadd.f32 1.0, %v13263_v61  ;;  %v14557_v59 = vld [vmem:[#allocation34_spill] sm:$0xff] }
 0x834   : > { %v6418_v2 = vsel %vm6002_vm2, %v14550_v8, %v6386_v17  ;;  %v6426_v25 = vsel %vm6010_vm3, %v14551_v47, %v6394_v55  ;;  %v6201_v14 = vmul.f32 -0.5, %v13254_v43  ;;  %7998 = vlog2.f32 %v6144_v40  ;;  %v13483_v15 = vld [vmem:[%s13638_s14] sm:$0x1f] }
 0x835   : > { %v7991_v12 = vpop.eup %7990  ;;  %v7134_v23 = vpack.c.bf16 %v6426_v25, %v6418_v2  ;;  %v6260_v48 = vsel %vm13438_vm5, %v6257_v41, %v6254_v18  ;;  %v6130_v16 = vadd.f32 1.0, %v6129_v36  ;;  %8000 = vlog2.f32 %v6216_v33  ;;  %v14562_v18 = vld [vmem:[#allocation13_spill] sm:$0xff] }
 0x836   : > { %v6326_v38 = vmul.f32 0.6931472, %v7991_v12  ;;  %v6329_v58 = vmul.f32 %v13208_v35, %v6328_v24  ;;  %vm13462_vm7 = vcmp.lt.f32.partialorder %v6330_v32, 0.0004427343  ;;  %v6147_v62 = vmul.f32 -0.5, %v13228_v54  ;;  %v14558_v35 = vld [vmem:[#allocation17_spill] sm:$0xff] }
 0x837   : > { %vm6012_vm9 = vcmp.gt.f32.partialorder %v14554_v28, 20.0  ;;  %7135 = vmatprep.subr.bf16.mxu0 %v7134_v23  ;;  %v6388_v56 = vmul.f32 0.01, %v6260_v48  ;;  %vm13468_vm0 = vcmp.lt.f32.partialorder %v6132_v21, 0.0004427343  ;;  %v6270_v49 = vadd.f32 1.0, %v13298_v31 }
 0x838   : > { %v7993_v13 = vpop.eup %7992  ;;  %vm5990_vm1 = vcmp.gt.f32.partialorder %v14557_v59, 20.0  ;;  %vm5998_vm10 = vcmp.gt.f32.partialorder %v14558_v35, 20.0  ;;  %v6332_v57 = vsel %vm13462_vm7, %v6329_v58, %v6326_v38  ;;  %v14561_v20 = vpack.c.bf16 %v14559_v5, %v14560_v7  ;;  %v14563_v21 = vld [vmem:[#allocation33_spill] sm:$0xff] }
 0x839   : > { %v6202_v0 = vadd.f32 1.0, %v6201_v14  ;;  %v6204_v53 = vand.u32 2147483647, %v13254_v43  ;;  %v6219_v17 = vmul.f32 -0.5, %v13263_v61  ;;  %v6396_v26 = vmul.f32 0.01, %v6332_v57  ;;  %v13488_v27 = vpop.eup %7994 }
 0x83a   : > { %7137 = vmatpush1.bf16.msra.mxu0 %v14561_v20  ;;  %v6128_v50 = vmul.f32 0.6931472, %v7993_v13  ;;  %v6131_v36 = vmul.f32 %v13216_v60, %v6130_v16  ;;  %8002 = vlog2.f32 %v6270_v49  ;;  %v6148_v55 = vadd.f32 1.0, %v6147_v62  ;;  %v14569_v62 = vld [vmem:[#allocation16_spill] sm:$0xff]  ;;  %v14570_v28 = vld [vmem:[#allocation37_spill] sm:$0xff] }
 0x83b   : > { %v6150_v24 = vand.u32 2147483647, %v13228_v54  ;;  %v6222_v32 = vand.u32 2147483647, %v13263_v61  ;;  %v6342_v40 = vadd.f32 1.0, %v13338_v3  ;;  %v7997_v46 = vpop.eup %7996  ;;  %v6420_v41 = vsel %vm6004_vm6, %v14562_v18, %v6388_v56  ;;  %v14574_v59 = vld [vmem:[#allocation45_spill] sm:$0xff] }
 0x83c   : > { %v6428_v33 = vsel %vm6012_vm9, %v14563_v21, %v6396_v26  ;;  %v6134_v60 = vsel %vm13468_vm0, %v6131_v36, %v6128_v50  ;;  %v6273_v8 = vmul.f32 -0.5, %v13298_v31  ;;  %v6200_v47 = vmul.f32 0.6931472, %v7997_v46  ;;  %v14576_v21 = vld [vmem:[#allocation26_spill] sm:$0xff] }
 0x83d   : > { %6952 = vmatmul.mubr.msk.f32.vlgmr.msra.gmra.mrb[96].mxu0 %vm1490_vm8, %v13483_v15  ;;  %v7142_v2 = vpack.c.bf16 %v6428_v33, %v6420_v41  ;;  %v6203_v25 = vmul.f32 %v13254_v43, %v6202_v0  ;;  %v6220_v14 = vadd.f32 1.0, %v6219_v17  ;;  %v14564_v12 = vmov 0.0   ;;  %v14572_v0 = vld [vmem:[#allocation14_spill] sm:$0xff]  ;;  %v14573_v17 = vld [vmem:[#allocation20_spill] sm:$0xff] }
 0x83e   : > { %6649 = vmatprep.mubr.f32.mxu0 %v14564_v12  ;;  %vm6205_vm11 = vcmp.lt.f32.partialorder %v6204_v53, 0.0004427343  ;;  %v6374_v11 = vmul.f32 0.01, %v6134_v60  ;;  %8004 = vlog2.f32 %v6342_v40  ;;  %v6288_v23 = vadd.f32 1.0, %v13314_v37  ;;  %v7999_v48 = vpop.eup %7998  ;;  %v14575_v40 = vld [vmem:[#allocation32_spill] sm:$0xff] }
 0x83f   : > { %7143 = vmatprep.subr.bf16.mxu1 %v7142_v2  ;;  %v6206_v16 = vsel %vm6205_vm11, %v6203_v25, %v6200_v47  ;;  %vm13507_vm12 = vcmp.lt.f32.partialorder %v6150_v24, 0.0004427343  ;;  %vm13511_vm13 = vcmp.lt.f32.partialorder %v6222_v32, 0.0004427343  ;;  %v6276_v43 = vand.u32 2147483647, %v13298_v31  ;;  %v8001_v44 = vpop.eup %8000 }
 0x840   : > { %v14571_v56 = vpack.c.bf16 %v14569_v62, %v14570_v28  ;;  %v6382_v45 = vmul.f32 0.01, %v6206_v16  ;;  %v6146_v49 = vmul.f32 0.6931472, %v7999_v48  ;;  %v6149_v13 = vmul.f32 %v13228_v54, %v6148_v55  ;;  %v14577_v60 = vld [vmem:[#allocation19_spill] sm:$0xff]  ;;  %v14578_v62 = vld [vmem:[#allocation25_spill] sm:$0xff] }
 0x841   : > { %v6274_v57 = vadd.f32 1.0, %v6273_v8  ;;  %v6218_v5 = vmul.f32 0.6931472, %v8001_v44  ;;  %v6221_v7 = vmul.f32 %v13263_v61, %v6220_v14  ;;  %v6345_v20 = vmul.f32 -0.5, %v13338_v3  ;;  %v14579_v28 = vld [vmem:[#allocation41_spill] sm:$0xff] }
 0x842   : > { %7145 = vmatpush1.bf16.msra.mxu1 %v14571_v56  ;;  %8006 = vlog2.f32 %v6288_v23  ;;  %v6406_v53 = vsel %vm5990_vm1, %v14572_v0, %v6374_v11  ;;  %v6414_v26 = vsel %vm5998_vm10, %v14573_v17, %v6382_v45  ;;  %v6152_v50 = vsel %vm13507_vm12, %v6149_v13, %v6146_v49 }
 0x843   : > { %v6360_v54 = vadd.f32 1.0, %v13488_v27  ;;  %v7146_v61 = vpack.c.bf16 %v6414_v26, %v6406_v53  ;;  %v6224_v36 = vsel %vm13511_vm13, %v6221_v7, %v6218_v5  ;;  %v6376_v55 = vmul.f32 0.01, %v6152_v50  ;;  %v14582_v7 = vld [vmem:[#allocation21_spill] sm:$0xff] }
 0x844   : > { %v8003_v24 = vpop.eup %8002  ;;  %vm5992_vm14 = vcmp.gt.f32.partialorder %v14574_v59, 20.0  ;;  %v6384_v32 = vmul.f32 0.01, %v6224_v36  ;;  %v6291_v35 = vmul.f32 -0.5, %v13314_v37  ;;  %vm6000_vm15 = vcmp.gt.f32.partialorder %v14575_v40, 20.0 }
 0x845   : > { %6953 = vmatmul.mubr.msk.f32.vlgmr.msra.gmra.mrb[96].mxu1 %vm1490_vm8, %v13483_v15  ;;  %8008 = vlog2.f32 %v6360_v54  ;;  %7147 = vmatprep.subr.bf16.mxu0 %v7146_v61  ;;  %v6272_v46 = vmul.f32 0.6931472, %v8003_v24  ;;  %v6275_v18 = vmul.f32 %v13298_v31, %v6274_v57  ;;  %v6346_v41 = vadd.f32 1.0, %v6345_v20 }
 0x846   : > { %6720 = vmatprep.mubr.f32.mxu1 %v14564_v12  ;;  %v6408_v33 = vsel %vm5992_vm14, %v14576_v21, %v6376_v55  ;;  %v6416_v8 = vsel %vm6000_vm15, %v14577_v60, %v6384_v32  ;;  %7149 = vmatpush1.bf16.msra.mxu0 %v7148_v1  ;;  %vm6277_vm2 = vcmp.lt.f32.partialorder %v6276_v43, 0.0004427343  ;;  %v6348_v2 = vand.u32 2147483647, %v13338_v3 }
 0x847   : > { %v7154_v47 = vpack.c.bf16 %v6416_v8, %v6408_v33  ;;  %v6278_v25 = vsel %vm6277_vm2, %v6275_v18, %v6272_v46  ;;  %v6363_v14 = vmul.f32 -0.5, %v13488_v27  ;;  %v6292_v11 = vadd.f32 1.0, %v6291_v35 }
 0x848   : > { %v8005_v12 = vpop.eup %8004  ;;  %v6347_v23 = vmul.f32 %v13338_v3, %v6346_v41  ;;  %v6294_v48 = vand.u32 2147483647, %v13314_v37  ;;  %vm6349_vm3 = vcmp.lt.f32.partialorder %v6348_v2, 0.0004427343  ;;  %v6390_v39 = vmul.f32 0.01, %v6278_v25 }
 0x849   : > { %7155 = vmatprep.subr.bf16.mxu1 %v7154_v47  ;;  %v6344_v31 = vmul.f32 0.6931472, %v8005_v12  ;;  %v6364_v16 = vadd.f32 1.0, %v6363_v14  ;;  %v6293_v43 = vmul.f32 %v13314_v37, %v6292_v11  ;;  %v6366_v44 = vand.u32 2147483647, %v13488_v27 }
 0x84a   : > { %7157 = vmatpush1.bf16.msra.mxu1 %v7156_v6  ;;  %vm6006_vm4 = vcmp.gt.f32.partialorder %v14578_v62, 20.0  ;;  %vm6014_vm5 = vcmp.gt.f32.partialorder %v13233_v42, 20.0  ;;  %vm6295_vm6 = vcmp.lt.f32.partialorder %v6294_v48, 0.0004427343  ;;  %v14581_v42 = vld [vmem:[#allocation44_spill] sm:$0xff]  ;;  %vm6016_vm0 = vcmp.gt.f32.partialorder %v13261_v51, 20.0  ;;  %v6438_v51 = vpop.permute.xlu0 %6437 }
 0x84b   : > { %v6350_v1 = vsel %vm6349_vm3, %v6347_v23, %v6344_v31  ;;  %v6422_v22 = vsel %vm6006_vm4, %v14579_v28, %v6390_v39  ;;  %v6365_v13 = vmul.f32 %v13488_v27, %v6364_v16  ;;  %vm6367_vm7 = vcmp.lt.f32.partialorder %v6366_v44, 0.0004427343 }
 0x84c   : > { %v8007_v10 = vpop.eup %8006  ;;  %v6398_v38 = vmul.f32 0.01, %v6350_v1  ;;  %vm6008_vm9 = vcmp.gt.f32.partialorder %v14581_v42, 20.0 }
 0x84d   : > { %v6290_v58 = vmul.f32 0.6931472, %v8007_v10 }
 0x84e   : > { %v6430_v6 = vsel %vm6014_vm5, %v14580_v34, %v6398_v38 }
 0x84f   : > { %v8009_v3 = vpop.eup %8008  ;;  %v6296_v56 = vsel %vm6295_vm6, %v6293_v43, %v6290_v58  ;;  %v7150_v45 = vpack.c.bf16 %v6430_v6, %v6422_v22 }
 0x850   : > { %v6362_v49 = vmul.f32 0.6931472, %v8009_v3  ;;  %v6392_v37 = vmul.f32 0.01, %v6296_v56 }
 0x851   : > { %7151 = vmatprep.subr.bf16.mxu0 %v7150_v45 }
 0x852   : > { %v6368_v57 = vsel %vm6367_vm7, %v6365_v13, %v6362_v49  ;;  %7153 = vmatpush1.bf16.msra.mxu0 %v7152_v29  ;;  %v6424_v20 = vsel %vm6008_vm9, %v14582_v7, %v6392_v37 }
 0x853   : > { %v6400_v5 = vmul.f32 0.01, %v6368_v57 }
 0x855   : > { %v6432_v0 = vsel %vm6016_vm0, %v13244_v19, %v6400_v5  ;;  %6954 = vmatmul.mubr.msk.f32.vlgmr.msra.gmra.mrb[98].mxu0 %vm1490_vm8, %v13483_v15 }
 0x856   : > { %v7158_v27 = vpack.c.bf16 %v6432_v0, %v6424_v20 }
 0x858   : > { %7159 = vmatprep.subr.bf16.mxu1 %v7158_v27 }
 0x859   : > { %7161 = vmatpush1.bf16.msra.mxu1 %v7160_v4 }
 0x85c   : > { %6955 = vmatmul.mubr.msk.f32.vlgmr.msra.gmra.mrb[98].mxu1 %vm1490_vm8, %v13483_v15 }
 0x910   : > { %v6509_v63 = vpop.f32.mrb[96].mxu0 }
 0x911   : > { %v6510_v9 = vadd.f32 %v6509_v63, %v6438_v51  ;;  %v6511_v29 = vpop.f32.mrb[97].mxu0 }
 0x912   : > { %v6512_v19 = vadd.f32 %v6511_v29, %v6438_v51 }
 0x913   : > { %6727 = vst [vmem:[%s515_s27] sm:$0x1f] %v6510_v9 }
 0x914   : > { %6728 = vst [vmem:[%s515_s27 + $0x8] sm:$0x1f] %v6512_v19 }
 0x918   : > { %v6580_v53 = vpop.f32.mrb[96].mxu1 }
 0x919   : > { %v6581_v17 = vadd.f32 %v6580_v53, %v6438_v51  ;;  %v6582_v26 = vpop.f32.mrb[97].mxu1 }
 0x91a   : > { %v6583_v30 = vadd.f32 %v6582_v26, %v6438_v51 }
 0x91b   : > { %6729 = vst [vmem:[%s515_s27 + $0x10] sm:$0x1f] %v6581_v17 }
 0x91c   : > { %6730 = vst [vmem:[%s515_s27 + $0x18] sm:$0x1f] %v6583_v30 }
 0x928   : > { %v6651_v52 = vpop.f32.mrb[98].mxu0 }
 0x929   : > { %v6652_v4 = vadd.f32 %v6651_v52, %v6438_v51  ;;  %v6653_v15 = vpop.f32.mrb[99].mxu0 }
 0x92a   : > { %v6654_v50 = vadd.f32 %v6653_v15, %v6438_v51 }
 0x92b   : > { %6731 = vst [vmem:[%s515_s27 + $0x20] sm:$0x1f] %v6652_v4 }
 0x92c   : > { %6732 = vst [vmem:[%s515_s27 + $0x28] sm:$0x1f] %v6654_v50 }
 0x92f   : > { %v6722_v54 = vpop.f32.mrb[98].mxu1 }
 0x930   : > { %v6723_v61 = vadd.f32 %v6722_v54, %v6438_v51  ;;  %v6724_v36 = vpop.f32.mrb[99].mxu1 }
 0x931   : > { %v6725_v55 = vadd.f32 %v6724_v36, %v6438_v51 }
 0x932   : > { %6733 = vst [vmem:[%s515_s27 + $0x30] sm:$0x1f] %v6723_v61 }
 0x933   : > { %6734 = vst [vmem:[%s515_s27 + $0x38] sm:$0x1f] %v6725_v55 }
 0x934   : > { %8027 = shalt.err (!%p8024_p3)
}
 0x935   : > { %s8028_s20 = scalar_lea.hbm %s13580_s18, 1024  ;;  %s8032_s21 = scalar_lea.hbm %s13640_s16, 2048 }
 0x936   : > { %p8029_p4 = scmp.ne.s32.totalorder %s13580_s18, %s8028_s20  ;;  %p8033_p9 = scmp.lt.u32.totalorder %s13580_s18, %s13640_s16 }
 0x937   : > { %p8034_p10 = scmp.lt.u32.totalorder %s8032_s21, %s8028_s20  ;;  %p8036_p12 = scmp.lt.u32.totalorder %s8028_s20, %s13580_s18 }
 0x938   : > { %p8030_p7 = pnand %p8029_p4, %p8205_p5 }
 0x939   : > { %p8035_p11 = por %p8034_p10, %p8033_p9 }
 0x93a   : > { %p8031_p8 = pneg %p8030_p7 }
 0x93b   : > { %p8037_p13 = por %p8036_p12, %p8035_p11 }
 0x93d   : > { %p8038_p0 = pnand %p8037_p13, %p8031_p8 }
 0x93f   : > { %8041 = shalt.err (!%p8038_p0)
}
 0x940   : > { %7194 = dma.vmem_to_hbm [thread:$0]  (%p8205_p5), %s13582_s24, 1024, %s13580_s18, %s6736_s26  }
 0x941 PF: > { %s14583_s25 = sld [smem:[#allocation7_spill]]  ;;  %s14584_s28 = sld [smem:[#allocation5_spill]] }
 0x947   : > { %p7200_p1 = scmp.ge.s32.totalorder %s14583_s25, 2  ;;  %s6762_s19 = sand.u32 1, %s14584_s28  }
 0x948   : > { %s6763_s23 = scalar_lea.sflag [#allocation3], %s6762_s19 }
 0x949   : > { %p7197_p2 = pnand %p7200_p1, %p8209_p6 }
 0x94b   : > { %8059 = dma.done.wait (!%p7197_p2), %s6763_s23, 1024  }
 0x94c   : > { %8061 = vsyncadd (!%p7197_p2), %s6763_s23, 4294966272  ;;  %s14586_s24 = sld [smem:[#allocation8_spill]]  ;;  %s14587_s20 = sld [smem:[#allocation6_spill]] }
 0x94d   : > { %s14588_s23 = sld [smem:[#allocation9_spill]]  ;;  %s14589_s21 = smov %s8068_s22 }
 0x952   : > { %p26_p3 = scmp.ge.s32.totalorder %s14586_s24, 4   ;;  %s14590_s22 = smov %s14587_s20 }
 0x954   :  { %28 = sbr.rel (!%p26_p3) target bundleno = 5 (0x5), region = 119 }
 0x95b   :  { %6768 = vsyncpa [#allocation3], 1 }
 0x95c   :  { %6770 = vsyncpa [#allocation3 + $0x1], 1 }

</bundles_post_ra>
